<compile_context>
chip_gen: v7x
topology: tpu7x:2x2x1
jax: 0.10.0
libtpu: 0.0.40
codegen_flags: <defaults>
</compile_context>

<pallas_src>
import jax
import jax.numpy as jnp
from jax.experimental import pallas as pl
from jax.experimental.pallas import tpu as pltpu


# ---------------------------------------------------------------------------
# Small helpers
# ---------------------------------------------------------------------------
def live_taps(h, w, d):
    """(ky, kx) taps of a 3x3 dilation-d conv that can touch the HxW extent.
    A non-center tap is pure zero padding (contributes nothing) iff d >= H/W."""
    out = []
    for ky in range(3):
        if ky != 1 and d >= h:
            continue
        for kx in range(3):
            if kx != 1 and d >= w:
                continue
            out.append((ky, kx))
    return out


def bn_fold(conv_bias, gamma, beta, mean, var, eps=1e-5):
    """Fold eval-mode BatchNorm (running stats) + conv bias into scale/bias."""
    scale = gamma / jnp.sqrt(var + eps)
    bias = (conv_bias - mean) * scale + beta
    return scale, bias


def make_conv_bn_params(key, taps, cin, cout):
    k1, k2, k3, k4, k5, k6 = jax.random.split(key, 6)
    w = jax.random.normal(k1, (taps, cin, cout), jnp.float32) * 0.02
    b = jax.random.normal(k2, (cout,), jnp.float32) * 0.02
    gamma = 1.0 + 0.1 * jax.random.normal(k3, (cout,), jnp.float32)
    beta = 0.1 * jax.random.normal(k4, (cout,), jnp.float32)
    mean = 0.1 * jax.random.normal(k5, (cout,), jnp.float32)
    var = jax.random.uniform(k6, (cout,), jnp.float32, minval=0.5, maxval=1.5)
    scale, bias = bn_fold(b, gamma, beta, mean, var)
    return w, scale, bias


def make_conv_params(key, taps, cin, cout):
    k1, k2 = jax.random.split(key, 2)
    w = jax.random.normal(k1, (taps, cin, cout), jnp.float32) * 0.02
    b = jax.random.normal(k2, (cout,), jnp.float32) * 0.02
    return w, b


# ---------------------------------------------------------------------------
# Fully fused ASPP kernel: one grid step == one (padded) image
# ---------------------------------------------------------------------------
def _make_aspp_kernel(H, W, P, Cin, Cb, branch_specs):
    """branch_specs: static list of (dilation, [(ky, kx), ...]) per branch, in
    the PyTorch concat order (1x1, 3x3 d=6, 3x3 d=12, 3x3 d=18)."""
    HW = H * W

    def kernel(x_ref, w_ref, s_ref, b_ref, wcat_ref,
               wimg_ref, simg_ref, bimg_ref, wcimg_ref,
               scat_ref, bcat_ref, wfin_ref, bfin_ref,
               o_ref, acc_ref, cat_ref):
        # Shared center window (the 1x1 branch and every dilated branch's
        # center tap read exactly this slice) -- loaded from VMEM once.
        xc = x_ref[0, P:P + H, P:P + W, :].reshape(HW, Cin)

        # ---- image-pool branch: AdaptiveAvgPool2d(1) + 1x1 conv + BN + ReLU,
        # projected through the image slice of the concat conv.  Bilinear
        # upsample of a 1x1 map == broadcast, so it collapses to a per-image
        # bias that seeds the concat accumulator.
        pooled = jnp.mean(xc.astype(jnp.float32), axis=0, keepdims=True)   # (1, Cin)
        yi = jnp.dot(pooled.astype(wimg_ref.dtype), wimg_ref[...],
                     preferred_element_type=jnp.float32)                   # (1, Cb)
        yi = jnp.maximum(yi * simg_ref[...] + bimg_ref[...], 0.0)
        img = jnp.dot(yi.astype(wcimg_ref.dtype), wcimg_ref[...],
                      preferred_element_type=jnp.float32)                  # (1, Cb)
        cat_ref[...] = jnp.broadcast_to(img, (HW, Cb))

        # ---- spatial branches: each tap is a static window into the padded
        # block; BN + ReLU fused in the per-branch epilogue, which is folded
        # straight through the branch's slice of the 1280->256 concat conv.
        t = 0
        for bi, (d, taps) in enumerate(branch_specs):
            acc_ref[...] = jnp.zeros_like(acc_ref)
            for (ky, kx) in taps:
                if (ky, kx) == (1, 1):
                    xs = xc
                else:
                    y0 = P + (ky - 1) * d
                    x0 = P + (kx - 1) * d
                    xs = x_ref[0, y0:y0 + H, x0:x0 + W, :].reshape(HW, Cin)
                acc_ref[...] += jnp.dot(xs, w_ref[t],
                                        preferred_element_type=jnp.float32)
                t += 1
            y = jnp.maximum(acc_ref[...] * s_ref[bi] + b_ref[bi], 0.0)      # BN+ReLU
            cat_ref[...] += jnp.dot(y.astype(wcat_ref.dtype), wcat_ref[bi],
                                    preferred_element_type=jnp.float32)

        # ---- concat-conv BN + ReLU + final 1x1 conv (lane-dense: classes
        # padded up to 128 output lanes; wrapper slices back to num_classes).
        yc = jnp.maximum(cat_ref[...] * scat_ref[...] + bcat_ref[...], 0.0)
        o_ref[0] = (jnp.dot(yc.astype(wfin_ref.dtype), wfin_ref[...],
                            preferred_element_type=jnp.float32)
                    + bfin_ref[...]).astype(o_ref.dtype)

    return kernel


# ---------------------------------------------------------------------------
# ASPP forward
# ---------------------------------------------------------------------------
def aspp_forward(x_nchw, params, *, dilations=(6, 12, 18)):
    B, Cin, H, W = x_nchw.shape
    HW = H * W
    Cb = params["c1"][0].shape[-1]                      # 256
    NC = params["c_final"][0].shape[-1]                 # num_classes
    NCP = max(128, ((NC + 127) // 128) * 128)           # lane-dense class dim

    x = jnp.transpose(x_nchw, (0, 2, 3, 1)).astype(jnp.bfloat16)     # NHWC bf16

    # Static per-branch tap lists; taps entirely inside zero padding dropped.
    branch_specs = [(0, [(1, 1)])]                      # branch 0: 1x1 conv
    for d in dilations:
        branch_specs.append((d, live_taps(H, W, d)))
    NB = len(branch_specs)                              # 4

    # ONE shared padded tensor (pad = largest dilation with off-center taps).
    P = max([d for d, taps in branch_specs if taps != [(1, 1)]] + [0])
    xp = jnp.pad(x, ((0, 0), (P, P), (P, P), (0, 0)))
    Hp, Wp = H + 2 * P, W + 2 * P

    # Stack per-tap weights in kernel traversal order; fold BN per branch.
    key_by_branch = ("c1", "c3_1", "c3_2", "c3_3")
    w_list, scales, biases = [], [], []
    for bi, (d, taps) in enumerate(branch_specs):
        w_all, s, b = params[key_by_branch[bi]]
        for (ky, kx) in taps:
            w_list.append(w_all[0] if bi == 0 else w_all[ky * 3 + kx])
        scales.append(s)
        biases.append(b)
    w_taps = jnp.stack(w_list, 0).astype(jnp.bfloat16)                # (T, Cin, Cb)
    T = w_taps.shape[0]
    scale_arr = jnp.stack(scales, 0).reshape(NB, 1, Cb).astype(jnp.float32)
    bias_arr = jnp.stack(biases, 0).reshape(NB, 1, Cb).astype(jnp.float32)

    # Concat conv 1280->256: 4 spatial slices + the image slice.
    wcat_full, s_cat, b_cat = params["c_cat"]
    wcat_full = wcat_full[0]                                          # (5*Cb, Cb)
    w_cat_sp = wcat_full[:NB * Cb].reshape(NB, Cb, Cb).astype(jnp.bfloat16)
    w_cat_img = wcat_full[NB * Cb:].astype(jnp.bfloat16)              # (Cb, Cb)

    w_img, s_img, b_img = params["c_img"]
    w_img = w_img[0].astype(jnp.bfloat16)                             # (Cin, Cb)

    w_fin, b_fin = params["c_final"]
    w_fin_p = jnp.zeros((Cb, NCP), jnp.float32).at[:, :NC].set(w_fin[0])
    w_fin_p = w_fin_p.astype(jnp.bfloat16)
    b_fin_p = jnp.zeros((1, NCP), jnp.float32).at[:, :NC].set(b_fin)

    # Shape-adaptive scoped-VMEM limit (raised on big shapes, capped at 100 MiB).
    resident_w = (T * Cin * Cb + NB * Cb * Cb + Cin * Cb + Cb * Cb + Cb * NCP) * 2
    est = (2 * Hp * Wp * Cin * 2        # double-buffered padded input block
           + 2 * HW * NCP * 4           # double-buffered output block
           + 2 * resident_w             # resident weights (2 pipeline buffers)
           + 2 * HW * Cb * 4            # f32 accumulator scratch
           + (8 << 20))                 # headroom for relayout temporaries
    vmem_limit = int(min(max(est, 32 << 20), 100 << 20))

    kernel = _make_aspp_kernel(H, W, P, Cin, Cb, branch_specs)

    out = pl.pallas_call(
        kernel,
        out_shape=jax.ShapeDtypeStruct((B, HW, NCP), jnp.float32),
        grid=(B,),
        in_specs=[
            pl.BlockSpec((1, Hp, Wp, Cin), lambda b: (b, 0, 0, 0)),   # padded x
            pl.BlockSpec((T, Cin, Cb),     lambda b: (0, 0, 0)),      # tap weights
            pl.BlockSpec((NB, 1, Cb),      lambda b: (0, 0, 0)),      # branch BN scale
            pl.BlockSpec((NB, 1, Cb),      lambda b: (0, 0, 0)),      # branch BN bias
            pl.BlockSpec((NB, Cb, Cb),     lambda b: (0, 0, 0)),      # concat W (spatial)
            pl.BlockSpec((Cin, Cb),        lambda b: (0, 0)),         # image 1x1 W
            pl.BlockSpec((1, Cb),          lambda b: (0, 0)),         # image BN scale
            pl.BlockSpec((1, Cb),          lambda b: (0, 0)),         # image BN bias
            pl.BlockSpec((Cb, Cb),         lambda b: (0, 0)),         # concat W (image)
            pl.BlockSpec((1, Cb),          lambda b: (0, 0)),         # concat BN scale
            pl.BlockSpec((1, Cb),          lambda b: (0, 0)),         # concat BN bias
            pl.BlockSpec((Cb, NCP),        lambda b: (0, 0)),         # final W (padded)
            pl.BlockSpec((1, NCP),         lambda b: (0, 0)),         # final bias (padded)
        ],
        out_specs=pl.BlockSpec((1, HW, NCP), lambda b: (b, 0, 0)),
        scratch_shapes=[pltpu.VMEM((HW, Cb), jnp.float32),            # branch accumulator
                        pltpu.VMEM((HW, Cb), jnp.float32)],           # concat accumulator
        compiler_params=pltpu.CompilerParams(
            dimension_semantics=("parallel",),
            vmem_limit_bytes=vmem_limit),
    )(xp, w_taps, scale_arr, bias_arr, w_cat_sp,
      w_img,
      s_img.reshape(1, Cb).astype(jnp.float32),
      b_img.reshape(1, Cb).astype(jnp.float32),
      w_cat_img,
      s_cat.reshape(1, Cb).astype(jnp.float32),
      b_cat.reshape(1, Cb).astype(jnp.float32),
      w_fin_p, b_fin_p)

    out = out[:, :, :NC].reshape(B, H, W, NC)
    return jnp.transpose(out, (0, 3, 1, 2))                           # NCHW


# ---------------------------------------------------------------------------
if __name__ == "__main__":
    key = jax.random.PRNGKey(0)
    B, Cin, H, W = 2, 512, 8, 8          # 512 in-channels fixed by the module
    Cb = 256
    num_classes = 4

    kx_, k1, k2, k3, k4, k5, k6, k7 = jax.random.split(key, 8)
    x = jax.random.normal(kx_, (B, Cin, H, W), jnp.float32)

    params = {
        "c1":      make_conv_bn_params(k1, 1, Cin, Cb),        # conv_1x1_1 + bn
        "c3_1":    make_conv_bn_params(k2, 9, Cin, Cb),        # conv_3x3_1 + bn (d=6)
        "c3_2":    make_conv_bn_params(k3, 9, Cin, Cb),        # conv_3x3_2 + bn (d=12)
        "c3_3":    make_conv_bn_params(k4, 9, Cin, Cb),        # conv_3x3_3 + bn (d=18)
        "c_img":   make_conv_bn_params(k5, 1, Cin, Cb),        # conv_1x1_2 + bn
        "c_cat":   make_conv_bn_params(k6, 1, 5 * Cb, Cb),     # conv_1x1_3 + bn
        "c_final": make_conv_params(k7, 1, Cb, num_classes),   # conv_1x1_4
    }

    out = jax.jit(aspp_forward)(x, params)
    out = jax.block_until_ready(out)

    assert out.shape == (B, num_classes, H, W), out.shape
    assert bool(jnp.all(jnp.isfinite(out)))
    print("KERNEL_OK")
</pallas_src>

<mosaic_0001>
module attributes {stable_mosaic.version = 11 : i64} {
  func.func @kernel(%arg0: i32, %arg1: memref<1x20x20x512xbf16, #tpu.memory_space<vmem>>, %arg2: memref<12x512x256xbf16, #tpu.memory_space<vmem>>, %arg3: memref<4x1x256xf32, #tpu.memory_space<vmem>>, %arg4: memref<4x1x256xf32, #tpu.memory_space<vmem>>, %arg5: memref<4x256x256xbf16, #tpu.memory_space<vmem>>, %arg6: memref<512x256xbf16, #tpu.memory_space<vmem>>, %arg7: memref<1x256xf32, #tpu.memory_space<vmem>>, %arg8: memref<1x256xf32, #tpu.memory_space<vmem>>, %arg9: memref<256x256xbf16, #tpu.memory_space<vmem>>, %arg10: memref<1x256xf32, #tpu.memory_space<vmem>>, %arg11: memref<1x256xf32, #tpu.memory_space<vmem>>, %arg12: memref<256x128xbf16, #tpu.memory_space<vmem>>, %arg13: memref<1x128xf32, #tpu.memory_space<vmem>>, %arg14: memref<1x64x128xf32, #tpu.memory_space<vmem>>, %arg15: memref<64x256xf32, #tpu.memory_space<vmem>>, %arg16: memref<64x256xf32, #tpu.memory_space<vmem>>) attributes {dimension_semantics = [#tpu.dimension_semantics<parallel>], iteration_bounds = array<i64: 2>, scalar_prefetch = 0 : i64, scratch_operands = 2 : i64, tpu.core_type = #tpu.core_type<tc>, window_params = [{transform_indices = @transform_0, window_bounds = array<i64: 1, 20, 20, 512>}, {pipeline_mode = #tpu.pipeline_mode<synchronous>, transform_indices = @transform_1, window_bounds = array<i64: 12, 512, 256>}, {pipeline_mode = #tpu.pipeline_mode<synchronous>, transform_indices = @transform_2, window_bounds = array<i64: 4, 1, 256>}, {pipeline_mode = #tpu.pipeline_mode<synchronous>, transform_indices = @transform_3, window_bounds = array<i64: 4, 1, 256>}, {pipeline_mode = #tpu.pipeline_mode<synchronous>, transform_indices = @transform_4, window_bounds = array<i64: 4, 256, 256>}, {pipeline_mode = #tpu.pipeline_mode<synchronous>, transform_indices = @transform_5, window_bounds = array<i64: 512, 256>}, {pipeline_mode = #tpu.pipeline_mode<synchronous>, transform_indices = @transform_6, window_bounds = array<i64: 1, 256>}, {pipeline_mode = #tpu.pipeline_mode<synchronous>, transform_indices = @transform_7, window_bounds = array<i64: 1, 256>}, {pipeline_mode = #tpu.pipeline_mode<synchronous>, transform_indices = @transform_8, window_bounds = array<i64: 256, 256>}, {pipeline_mode = #tpu.pipeline_mode<synchronous>, transform_indices = @transform_9, window_bounds = array<i64: 1, 256>}, {pipeline_mode = #tpu.pipeline_mode<synchronous>, transform_indices = @transform_10, window_bounds = array<i64: 1, 256>}, {pipeline_mode = #tpu.pipeline_mode<synchronous>, transform_indices = @transform_11, window_bounds = array<i64: 256, 128>}, {pipeline_mode = #tpu.pipeline_mode<synchronous>, transform_indices = @transform_12, window_bounds = array<i64: 1, 128>}, {transform_indices = @transform_13, window_bounds = array<i64: 1, 64, 128>}]} {
    %c0 = arith.constant 0 : index
    %c6 = arith.constant 6 : index
    %c6_0 = arith.constant 6 : index
    %c0_1 = arith.constant 0 : index
    %0 = vector.load %arg1[%c0, %c6, %c6_0, %c0_1] : memref<1x20x20x512xbf16, #tpu.memory_space<vmem>>, vector<1x8x8x512xbf16>
    %1 = vector.shape_cast %0 : vector<1x8x8x512xbf16> to vector<8x8x512xbf16>
    %2 = vector.shape_cast %1 : vector<8x8x512xbf16> to vector<64x512xbf16>
    %3 = arith.extf %2 : vector<64x512xbf16> to vector<64x512xf32>
    %cst = arith.constant dense<0.000000e+00> : vector<512xf32>
    %4 = vector.multi_reduction <add>, %3, %cst [0] : vector<64x512xf32> to vector<512xf32>
    %5 = vector.shape_cast %4 : vector<512xf32> to vector<1x512xf32>
    %cst_2 = arith.constant 6.400000e+01 : f32
    %6 = vector.broadcast %cst_2 : f32 to vector<1x512xf32>
    %7 = arith.divf %5, %6 : vector<1x512xf32>
    %8 = arith.truncf %7 : vector<1x512xf32> to vector<1x512xbf16>
    %c0_3 = arith.constant 0 : index
    %c0_4 = arith.constant 0 : index
    %9 = vector.load %arg6[%c0_3, %c0_4] : memref<512x256xbf16, #tpu.memory_space<vmem>>, vector<512x256xbf16>
    %cst_5 = arith.constant dense<0.000000e+00> : vector<1x256xf32>
    %10 = tpu.matmul %8, %9, %cst_5 {dimension_numbers = #tpu.dot_dimension_numbers<[1], [0], [0], [1], [0, 0, 1, 1], [], []>} : vector<1x512xbf16>, vector<512x256xbf16>, vector<1x256xf32> -> vector<1x256xf32>
    %c0_6 = arith.constant 0 : index
    %c0_7 = arith.constant 0 : index
    %11 = vector.load %arg7[%c0_6, %c0_7] : memref<1x256xf32, #tpu.memory_space<vmem>>, vector<1x256xf32>
    %12 = arith.mulf %10, %11 : vector<1x256xf32>
    %c0_8 = arith.constant 0 : index
    %c0_9 = arith.constant 0 : index
    %13 = vector.load %arg8[%c0_8, %c0_9] : memref<1x256xf32, #tpu.memory_space<vmem>>, vector<1x256xf32>
    %14 = arith.addf %12, %13 : vector<1x256xf32>
    %cst_10 = arith.constant 0.000000e+00 : f32
    %15 = vector.broadcast %cst_10 : f32 to vector<1x256xf32>
    %16 = arith.maximumf %14, %15 : vector<1x256xf32>
    %17 = arith.truncf %16 : vector<1x256xf32> to vector<1x256xbf16>
    %c0_11 = arith.constant 0 : index
    %c0_12 = arith.constant 0 : index
    %18 = vector.load %arg9[%c0_11, %c0_12] : memref<256x256xbf16, #tpu.memory_space<vmem>>, vector<256x256xbf16>
    %cst_13 = arith.constant dense<0.000000e+00> : vector<1x256xf32>
    %19 = tpu.matmul %17, %18, %cst_13 {dimension_numbers = #tpu.dot_dimension_numbers<[1], [0], [0], [1], [0, 0, 1, 1], [], []>} : vector<1x256xbf16>, vector<256x256xbf16>, vector<1x256xf32> -> vector<1x256xf32>
    %20 = vector.shape_cast %19 : vector<1x256xf32> to vector<1x256xf32>
    %21 = vector.broadcast %20 : vector<1x256xf32> to vector<64x256xf32>
    %c0_14 = arith.constant 0 : index
    %c0_15 = arith.constant 0 : index
    %22 = vector.load %arg16[%c0_14, %c0_15] : memref<64x256xf32, #tpu.memory_space<vmem>>, vector<64x256xf32>
    tpu.vector_store %arg16[%c0_14, %c0_15], %21 {strides = array<i32>} : memref<64x256xf32, #tpu.memory_space<vmem>>, vector<64x256xf32>,
    %cst_16 = arith.constant 0.000000e+00 : f32
    %23 = vector.broadcast %cst_16 : f32 to vector<64x256xf32>
    %c0_17 = arith.constant 0 : index
    %c0_18 = arith.constant 0 : index
    %24 = vector.load %arg15[%c0_17, %c0_18] : memref<64x256xf32, #tpu.memory_space<vmem>>, vector<64x256xf32>
    tpu.vector_store %arg15[%c0_17, %c0_18], %23 {strides = array<i32>} : memref<64x256xf32, #tpu.memory_space<vmem>>, vector<64x256xf32>,
    %c0_19 = arith.constant 0 : index
    %c0_20 = arith.constant 0 : index
    %25 = vector.load %arg15[%c0_19, %c0_20] : memref<64x256xf32, #tpu.memory_space<vmem>>, vector<64x256xf32>
    %c0_21 = arith.constant 0 : index
    %c0_22 = arith.constant 0 : index
    %c0_23 = arith.constant 0 : index
    %26 = vector.load %arg2[%c0_21, %c0_22, %c0_23] : memref<12x512x256xbf16, #tpu.memory_space<vmem>>, vector<1x512x256xbf16>
    %27 = vector.shape_cast %26 : vector<1x512x256xbf16> to vector<512x256xbf16>
    %cst_24 = arith.constant dense<0.000000e+00> : vector<64x256xf32>
    %28 = tpu.matmul %2, %27, %cst_24 {dimension_numbers = #tpu.dot_dimension_numbers<[1], [0], [0], [1], [0, 0, 1, 1], [], []>} : vector<64x512xbf16>, vector<512x256xbf16>, vector<64x256xf32> -> vector<64x256xf32>
    %29 = arith.addf %25, %28 : vector<64x256xf32>
    %c0_25 = arith.constant 0 : index
    %c0_26 = arith.constant 0 : index
    %30 = vector.load %arg15[%c0_25, %c0_26] : memref<64x256xf32, #tpu.memory_space<vmem>>, vector<64x256xf32>
    tpu.vector_store %arg15[%c0_25, %c0_26], %29 {strides = array<i32>} : memref<64x256xf32, #tpu.memory_space<vmem>>, vector<64x256xf32>,
    %c0_27 = arith.constant 0 : index
    %c0_28 = arith.constant 0 : index
    %31 = vector.load %arg15[%c0_27, %c0_28] : memref<64x256xf32, #tpu.memory_space<vmem>>, vector<64x256xf32>
    %c0_29 = arith.constant 0 : index
    %c0_30 = arith.constant 0 : index
    %c0_31 = arith.constant 0 : index
    %32 = vector.load %arg3[%c0_29, %c0_30, %c0_31] : memref<4x1x256xf32, #tpu.memory_space<vmem>>, vector<1x1x256xf32>
    %33 = vector.shape_cast %32 : vector<1x1x256xf32> to vector<1x256xf32>
    %34 = vector.broadcast %33 : vector<1x256xf32> to vector<64x256xf32>
    %35 = arith.mulf %31, %34 : vector<64x256xf32>
    %c0_32 = arith.constant 0 : index
    %c0_33 = arith.constant 0 : index
    %c0_34 = arith.constant 0 : index
    %36 = vector.load %arg4[%c0_32, %c0_33, %c0_34] : memref<4x1x256xf32, #tpu.memory_space<vmem>>, vector<1x1x256xf32>
    %37 = vector.shape_cast %36 : vector<1x1x256xf32> to vector<1x256xf32>
    %38 = vector.broadcast %37 : vector<1x256xf32> to vector<64x256xf32>
    %39 = arith.addf %35, %38 : vector<64x256xf32>
    %cst_35 = arith.constant 0.000000e+00 : f32
    %40 = vector.broadcast %cst_35 : f32 to vector<64x256xf32>
    %41 = arith.maximumf %39, %40 : vector<64x256xf32>
    %c0_36 = arith.constant 0 : index
    %c0_37 = arith.constant 0 : index
    %42 = vector.load %arg16[%c0_36, %c0_37] : memref<64x256xf32, #tpu.memory_space<vmem>>, vector<64x256xf32>
    %43 = arith.truncf %41 : vector<64x256xf32> to vector<64x256xbf16>
    %c0_38 = arith.constant 0 : index
    %c0_39 = arith.constant 0 : index
    %c0_40 = arith.constant 0 : index
    %44 = vector.load %arg5[%c0_38, %c0_39, %c0_40] : memref<4x256x256xbf16, #tpu.memory_space<vmem>>, vector<1x256x256xbf16>
    %45 = vector.shape_cast %44 : vector<1x256x256xbf16> to vector<256x256xbf16>
    %cst_41 = arith.constant dense<0.000000e+00> : vector<64x256xf32>
    %46 = tpu.matmul %43, %45, %cst_41 {dimension_numbers = #tpu.dot_dimension_numbers<[1], [0], [0], [1], [0, 0, 1, 1], [], []>} : vector<64x256xbf16>, vector<256x256xbf16>, vector<64x256xf32> -> vector<64x256xf32>
    %47 = arith.addf %42, %46 : vector<64x256xf32>
    %c0_42 = arith.constant 0 : index
    %c0_43 = arith.constant 0 : index
    %48 = vector.load %arg16[%c0_42, %c0_43] : memref<64x256xf32, #tpu.memory_space<vmem>>, vector<64x256xf32>
    tpu.vector_store %arg16[%c0_42, %c0_43], %47 {strides = array<i32>} : memref<64x256xf32, #tpu.memory_space<vmem>>, vector<64x256xf32>,
    %cst_44 = arith.constant 0.000000e+00 : f32
    %49 = vector.broadcast %cst_44 : f32 to vector<64x256xf32>
    %c0_45 = arith.constant 0 : index
    %c0_46 = arith.constant 0 : index
    %50 = vector.load %arg15[%c0_45, %c0_46] : memref<64x256xf32, #tpu.memory_space<vmem>>, vector<64x256xf32>
    tpu.vector_store %arg15[%c0_45, %c0_46], %49 {strides = array<i32>} : memref<64x256xf32, #tpu.memory_space<vmem>>, vector<64x256xf32>,
    %c0_47 = arith.constant 0 : index
    %c0_48 = arith.constant 0 : index
    %c0_49 = arith.constant 0 : index
    %c0_50 = arith.constant 0 : index
    %51 = vector.load %arg1[%c0_47, %c0_48, %c0_49, %c0_50] : memref<1x20x20x512xbf16, #tpu.memory_space<vmem>>, vector<1x8x8x512xbf16>
    %52 = vector.shape_cast %51 : vector<1x8x8x512xbf16> to vector<8x8x512xbf16>
    %53 = vector.shape_cast %52 : vector<8x8x512xbf16> to vector<64x512xbf16>
    %c0_51 = arith.constant 0 : index
    %c0_52 = arith.constant 0 : index
    %54 = vector.load %arg15[%c0_51, %c0_52] : memref<64x256xf32, #tpu.memory_space<vmem>>, vector<64x256xf32>
    %c1 = arith.constant 1 : index
    %c0_53 = arith.constant 0 : index
    %c0_54 = arith.constant 0 : index
    %55 = vector.load %arg2[%c1, %c0_53, %c0_54] : memref<12x512x256xbf16, #tpu.memory_space<vmem>>, vector<1x512x256xbf16>
    %56 = vector.shape_cast %55 : vector<1x512x256xbf16> to vector<512x256xbf16>
    %cst_55 = arith.constant dense<0.000000e+00> : vector<64x256xf32>
    %57 = tpu.matmul %53, %56, %cst_55 {dimension_numbers = #tpu.dot_dimension_numbers<[1], [0], [0], [1], [0, 0, 1, 1], [], []>} : vector<64x512xbf16>, vector<512x256xbf16>, vector<64x256xf32> -> vector<64x256xf32>
    %58 = arith.addf %54, %57 : vector<64x256xf32>
    %c0_56 = arith.constant 0 : index
    %c0_57 = arith.constant 0 : index
    %59 = vector.load %arg15[%c0_56, %c0_57] : memref<64x256xf32, #tpu.memory_space<vmem>>, vector<64x256xf32>
    tpu.vector_store %arg15[%c0_56, %c0_57], %58 {strides = array<i32>} : memref<64x256xf32, #tpu.memory_space<vmem>>, vector<64x256xf32>,
    %c0_58 = arith.constant 0 : index
    %c0_59 = arith.constant 0 : index
    %c6_60 = arith.constant 6 : index
    %c0_61 = arith.constant 0 : index
    %60 = vector.load %arg1[%c0_58, %c0_59, %c6_60, %c0_61] : memref<1x20x20x512xbf16, #tpu.memory_space<vmem>>, vector<1x8x8x512xbf16>
    %61 = vector.shape_cast %60 : vector<1x8x8x512xbf16> to vector<8x8x512xbf16>
    %62 = vector.shape_cast %61 : vector<8x8x512xbf16> to vector<64x512xbf16>
    %c0_62 = arith.constant 0 : index
    %c0_63 = arith.constant 0 : index
    %63 = vector.load %arg15[%c0_62, %c0_63] : memref<64x256xf32, #tpu.memory_space<vmem>>, vector<64x256xf32>
    %c2 = arith.constant 2 : index
    %c0_64 = arith.constant 0 : index
    %c0_65 = arith.constant 0 : index
    %64 = vector.load %arg2[%c2, %c0_64, %c0_65] : memref<12x512x256xbf16, #tpu.memory_space<vmem>>, vector<1x512x256xbf16>
    %65 = vector.shape_cast %64 : vector<1x512x256xbf16> to vector<512x256xbf16>
    %cst_66 = arith.constant dense<0.000000e+00> : vector<64x256xf32>
    %66 = tpu.matmul %62, %65, %cst_66 {dimension_numbers = #tpu.dot_dimension_numbers<[1], [0], [0], [1], [0, 0, 1, 1], [], []>} : vector<64x512xbf16>, vector<512x256xbf16>, vector<64x256xf32> -> vector<64x256xf32>
    %67 = arith.addf %63, %66 : vector<64x256xf32>
    %c0_67 = arith.constant 0 : index
    %c0_68 = arith.constant 0 : index
    %68 = vector.load %arg15[%c0_67, %c0_68] : memref<64x256xf32, #tpu.memory_space<vmem>>, vector<64x256xf32>
    tpu.vector_store %arg15[%c0_67, %c0_68], %67 {strides = array<i32>} : memref<64x256xf32, #tpu.memory_space<vmem>>, vector<64x256xf32>,
    %c0_69 = arith.constant 0 : index
    %c0_70 = arith.constant 0 : index
    %c12 = arith.constant 12 : index
    %c0_71 = arith.constant 0 : index
    %69 = vector.load %arg1[%c0_69, %c0_70, %c12, %c0_71] : memref<1x20x20x512xbf16, #tpu.memory_space<vmem>>, vector<1x8x8x512xbf16>
    %70 = vector.shape_cast %69 : vector<1x8x8x512xbf16> to vector<8x8x512xbf16>
    %71 = vector.shape_cast %70 : vector<8x8x512xbf16> to vector<64x512xbf16>
    %c0_72 = arith.constant 0 : index
    %c0_73 = arith.constant 0 : index
    %72 = vector.load %arg15[%c0_72, %c0_73] : memref<64x256xf32, #tpu.memory_space<vmem>>, vector<64x256xf32>
    %c3 = arith.constant 3 : index
    %c0_74 = arith.constant 0 : index
    %c0_75 = arith.constant 0 : index
    %73 = vector.load %arg2[%c3, %c0_74, %c0_75] : memref<12x512x256xbf16, #tpu.memory_space<vmem>>, vector<1x512x256xbf16>
    %74 = vector.shape_cast %73 : vector<1x512x256xbf16> to vector<512x256xbf16>
    %cst_76 = arith.constant dense<0.000000e+00> : vector<64x256xf32>
    %75 = tpu.matmul %71, %74, %cst_76 {dimension_numbers = #tpu.dot_dimension_numbers<[1], [0], [0], [1], [0, 0, 1, 1], [], []>} : vector<64x512xbf16>, vector<512x256xbf16>, vector<64x256xf32> -> vector<64x256xf32>
    %76 = arith.addf %72, %75 : vector<64x256xf32>
    %c0_77 = arith.constant 0 : index
    %c0_78 = arith.constant 0 : index
    %77 = vector.load %arg15[%c0_77, %c0_78] : memref<64x256xf32, #tpu.memory_space<vmem>>, vector<64x256xf32>
    tpu.vector_store %arg15[%c0_77, %c0_78], %76 {strides = array<i32>} : memref<64x256xf32, #tpu.memory_space<vmem>>, vector<64x256xf32>,
    %c0_79 = arith.constant 0 : index
    %c6_80 = arith.constant 6 : index
    %c0_81 = arith.constant 0 : index
    %c0_82 = arith.constant 0 : index
    %78 = vector.load %arg1[%c0_79, %c6_80, %c0_81, %c0_82] : memref<1x20x20x512xbf16, #tpu.memory_space<vmem>>, vector<1x8x8x512xbf16>
    %79 = vector.shape_cast %78 : vector<1x8x8x512xbf16> to vector<8x8x512xbf16>
    %80 = vector.shape_cast %79 : vector<8x8x512xbf16> to vector<64x512xbf16>
    %c0_83 = arith.constant 0 : index
    %c0_84 = arith.constant 0 : index
    %81 = vector.load %arg15[%c0_83, %c0_84] : memref<64x256xf32, #tpu.memory_space<vmem>>, vector<64x256xf32>
    %c4 = arith.constant 4 : index
    %c0_85 = arith.constant 0 : index
    %c0_86 = arith.constant 0 : index
    %82 = vector.load %arg2[%c4, %c0_85, %c0_86] : memref<12x512x256xbf16, #tpu.memory_space<vmem>>, vector<1x512x256xbf16>
    %83 = vector.shape_cast %82 : vector<1x512x256xbf16> to vector<512x256xbf16>
    %cst_87 = arith.constant dense<0.000000e+00> : vector<64x256xf32>
    %84 = tpu.matmul %80, %83, %cst_87 {dimension_numbers = #tpu.dot_dimension_numbers<[1], [0], [0], [1], [0, 0, 1, 1], [], []>} : vector<64x512xbf16>, vector<512x256xbf16>, vector<64x256xf32> -> vector<64x256xf32>
    %85 = arith.addf %81, %84 : vector<64x256xf32>
    %c0_88 = arith.constant 0 : index
    %c0_89 = arith.constant 0 : index
    %86 = vector.load %arg15[%c0_88, %c0_89] : memref<64x256xf32, #tpu.memory_space<vmem>>, vector<64x256xf32>
    tpu.vector_store %arg15[%c0_88, %c0_89], %85 {strides = array<i32>} : memref<64x256xf32, #tpu.memory_space<vmem>>, vector<64x256xf32>,
    %c0_90 = arith.constant 0 : index
    %c0_91 = arith.constant 0 : index
    %87 = vector.load %arg15[%c0_90, %c0_91] : memref<64x256xf32, #tpu.memory_space<vmem>>, vector<64x256xf32>
    %c5 = arith.constant 5 : index
    %c0_92 = arith.constant 0 : index
    %c0_93 = arith.constant 0 : index
    %88 = vector.load %arg2[%c5, %c0_92, %c0_93] : memref<12x512x256xbf16, #tpu.memory_space<vmem>>, vector<1x512x256xbf16>
    %89 = vector.shape_cast %88 : vector<1x512x256xbf16> to vector<512x256xbf16>
    %cst_94 = arith.constant dense<0.000000e+00> : vector<64x256xf32>
    %90 = tpu.matmul %2, %89, %cst_94 {dimension_numbers = #tpu.dot_dimension_numbers<[1], [0], [0], [1], [0, 0, 1, 1], [], []>} : vector<64x512xbf16>, vector<512x256xbf16>, vector<64x256xf32> -> vector<64x256xf32>
    %91 = arith.addf %87, %90 : vector<64x256xf32>
    %c0_95 = arith.constant 0 : index
    %c0_96 = arith.constant 0 : index
    %92 = vector.load %arg15[%c0_95, %c0_96] : memref<64x256xf32, #tpu.memory_space<vmem>>, vector<64x256xf32>
    tpu.vector_store %arg15[%c0_95, %c0_96], %91 {strides = array<i32>} : memref<64x256xf32, #tpu.memory_space<vmem>>, vector<64x256xf32>,
    %c0_97 = arith.constant 0 : index
    %c6_98 = arith.constant 6 : index
    %c12_99 = arith.constant 12 : index
    %c0_100 = arith.constant 0 : index
    %93 = vector.load %arg1[%c0_97, %c6_98, %c12_99, %c0_100] : memref<1x20x20x512xbf16, #tpu.memory_space<vmem>>, vector<1x8x8x512xbf16>
    %94 = vector.shape_cast %93 : vector<1x8x8x512xbf16> to vector<8x8x512xbf16>
    %95 = vector.shape_cast %94 : vector<8x8x512xbf16> to vector<64x512xbf16>
    %c0_101 = arith.constant 0 : index
    %c0_102 = arith.constant 0 : index
    %96 = vector.load %arg15[%c0_101, %c0_102] : memref<64x256xf32, #tpu.memory_space<vmem>>, vector<64x256xf32>
    %c6_103 = arith.constant 6 : index
    %c0_104 = arith.constant 0 : index
    %c0_105 = arith.constant 0 : index
    %97 = vector.load %arg2[%c6_103, %c0_104, %c0_105] : memref<12x512x256xbf16, #tpu.memory_space<vmem>>, vector<1x512x256xbf16>
    %98 = vector.shape_cast %97 : vector<1x512x256xbf16> to vector<512x256xbf16>
    %cst_106 = arith.constant dense<0.000000e+00> : vector<64x256xf32>
    %99 = tpu.matmul %95, %98, %cst_106 {dimension_numbers = #tpu.dot_dimension_numbers<[1], [0], [0], [1], [0, 0, 1, 1], [], []>} : vector<64x512xbf16>, vector<512x256xbf16>, vector<64x256xf32> -> vector<64x256xf32>
    %100 = arith.addf %96, %99 : vector<64x256xf32>
    %c0_107 = arith.constant 0 : index
    %c0_108 = arith.constant 0 : index
    %101 = vector.load %arg15[%c0_107, %c0_108] : memref<64x256xf32, #tpu.memory_space<vmem>>, vector<64x256xf32>
    tpu.vector_store %arg15[%c0_107, %c0_108], %100 {strides = array<i32>} : memref<64x256xf32, #tpu.memory_space<vmem>>, vector<64x256xf32>,
    %c0_109 = arith.constant 0 : index
    %c12_110 = arith.constant 12 : index
    %c0_111 = arith.constant 0 : index
    %c0_112 = arith.constant 0 : index
    %102 = vector.load %arg1[%c0_109, %c12_110, %c0_111, %c0_112] : memref<1x20x20x512xbf16, #tpu.memory_space<vmem>>, vector<1x8x8x512xbf16>
    %103 = vector.shape_cast %102 : vector<1x8x8x512xbf16> to vector<8x8x512xbf16>
    %104 = vector.shape_cast %103 : vector<8x8x512xbf16> to vector<64x512xbf16>
    %c0_113 = arith.constant 0 : index
    %c0_114 = arith.constant 0 : index
    %105 = vector.load %arg15[%c0_113, %c0_114] : memref<64x256xf32, #tpu.memory_space<vmem>>, vector<64x256xf32>
    %c7 = arith.constant 7 : index
    %c0_115 = arith.constant 0 : index
    %c0_116 = arith.constant 0 : index
    %106 = vector.load %arg2[%c7, %c0_115, %c0_116] : memref<12x512x256xbf16, #tpu.memory_space<vmem>>, vector<1x512x256xbf16>
    %107 = vector.shape_cast %106 : vector<1x512x256xbf16> to vector<512x256xbf16>
    %cst_117 = arith.constant dense<0.000000e+00> : vector<64x256xf32>
    %108 = tpu.matmul %104, %107, %cst_117 {dimension_numbers = #tpu.dot_dimension_numbers<[1], [0], [0], [1], [0, 0, 1, 1], [], []>} : vector<64x512xbf16>, vector<512x256xbf16>, vector<64x256xf32> -> vector<64x256xf32>
    %109 = arith.addf %105, %108 : vector<64x256xf32>
    %c0_118 = arith.constant 0 : index
    %c0_119 = arith.constant 0 : index
    %110 = vector.load %arg15[%c0_118, %c0_119] : memref<64x256xf32, #tpu.memory_space<vmem>>, vector<64x256xf32>
    tpu.vector_store %arg15[%c0_118, %c0_119], %109 {strides = array<i32>} : memref<64x256xf32, #tpu.memory_space<vmem>>, vector<64x256xf32>,
    %c0_120 = arith.constant 0 : index
    %c12_121 = arith.constant 12 : index
    %c6_122 = arith.constant 6 : index
    %c0_123 = arith.constant 0 : index
    %111 = vector.load %arg1[%c0_120, %c12_121, %c6_122, %c0_123] : memref<1x20x20x512xbf16, #tpu.memory_space<vmem>>, vector<1x8x8x512xbf16>
    %112 = vector.shape_cast %111 : vector<1x8x8x512xbf16> to vector<8x8x512xbf16>
    %113 = vector.shape_cast %112 : vector<8x8x512xbf16> to vector<64x512xbf16>
    %c0_124 = arith.constant 0 : index
    %c0_125 = arith.constant 0 : index
    %114 = vector.load %arg15[%c0_124, %c0_125] : memref<64x256xf32, #tpu.memory_space<vmem>>, vector<64x256xf32>
    %c8 = arith.constant 8 : index
    %c0_126 = arith.constant 0 : index
    %c0_127 = arith.constant 0 : index
    %115 = vector.load %arg2[%c8, %c0_126, %c0_127] : memref<12x512x256xbf16, #tpu.memory_space<vmem>>, vector<1x512x256xbf16>
    %116 = vector.shape_cast %115 : vector<1x512x256xbf16> to vector<512x256xbf16>
    %cst_128 = arith.constant dense<0.000000e+00> : vector<64x256xf32>
    %117 = tpu.matmul %113, %116, %cst_128 {dimension_numbers = #tpu.dot_dimension_numbers<[1], [0], [0], [1], [0, 0, 1, 1], [], []>} : vector<64x512xbf16>, vector<512x256xbf16>, vector<64x256xf32> -> vector<64x256xf32>
    %118 = arith.addf %114, %117 : vector<64x256xf32>
    %c0_129 = arith.constant 0 : index
    %c0_130 = arith.constant 0 : index
    %119 = vector.load %arg15[%c0_129, %c0_130] : memref<64x256xf32, #tpu.memory_space<vmem>>, vector<64x256xf32>
    tpu.vector_store %arg15[%c0_129, %c0_130], %118 {strides = array<i32>} : memref<64x256xf32, #tpu.memory_space<vmem>>, vector<64x256xf32>,
    %c0_131 = arith.constant 0 : index
    %c12_132 = arith.constant 12 : index
    %c12_133 = arith.constant 12 : index
    %c0_134 = arith.constant 0 : index
    %120 = vector.load %arg1[%c0_131, %c12_132, %c12_133, %c0_134] : memref<1x20x20x512xbf16, #tpu.memory_space<vmem>>, vector<1x8x8x512xbf16>
    %121 = vector.shape_cast %120 : vector<1x8x8x512xbf16> to vector<8x8x512xbf16>
    %122 = vector.shape_cast %121 : vector<8x8x512xbf16> to vector<64x512xbf16>
    %c0_135 = arith.constant 0 : index
    %c0_136 = arith.constant 0 : index
    %123 = vector.load %arg15[%c0_135, %c0_136] : memref<64x256xf32, #tpu.memory_space<vmem>>, vector<64x256xf32>
    %c9 = arith.constant 9 : index
    %c0_137 = arith.constant 0 : index
    %c0_138 = arith.constant 0 : index
    %124 = vector.load %arg2[%c9, %c0_137, %c0_138] : memref<12x512x256xbf16, #tpu.memory_space<vmem>>, vector<1x512x256xbf16>
    %125 = vector.shape_cast %124 : vector<1x512x256xbf16> to vector<512x256xbf16>
    %cst_139 = arith.constant dense<0.000000e+00> : vector<64x256xf32>
    %126 = tpu.matmul %122, %125, %cst_139 {dimension_numbers = #tpu.dot_dimension_numbers<[1], [0], [0], [1], [0, 0, 1, 1], [], []>} : vector<64x512xbf16>, vector<512x256xbf16>, vector<64x256xf32> -> vector<64x256xf32>
    %127 = arith.addf %123, %126 : vector<64x256xf32>
    %c0_140 = arith.constant 0 : index
    %c0_141 = arith.constant 0 : index
    %128 = vector.load %arg15[%c0_140, %c0_141] : memref<64x256xf32, #tpu.memory_space<vmem>>, vector<64x256xf32>
    tpu.vector_store %arg15[%c0_140, %c0_141], %127 {strides = array<i32>} : memref<64x256xf32, #tpu.memory_space<vmem>>, vector<64x256xf32>,
    %c0_142 = arith.constant 0 : index
    %c0_143 = arith.constant 0 : index
    %129 = vector.load %arg15[%c0_142, %c0_143] : memref<64x256xf32, #tpu.memory_space<vmem>>, vector<64x256xf32>
    %c1_144 = arith.constant 1 : index
    %c0_145 = arith.constant 0 : index
    %c0_146 = arith.constant 0 : index
    %130 = vector.load %arg3[%c1_144, %c0_145, %c0_146] : memref<4x1x256xf32, #tpu.memory_space<vmem>>, vector<1x1x256xf32>
    %131 = vector.shape_cast %130 : vector<1x1x256xf32> to vector<1x256xf32>
    %132 = vector.broadcast %131 : vector<1x256xf32> to vector<64x256xf32>
    %133 = arith.mulf %129, %132 : vector<64x256xf32>
    %c1_147 = arith.constant 1 : index
    %c0_148 = arith.constant 0 : index
    %c0_149 = arith.constant 0 : index
    %134 = vector.load %arg4[%c1_147, %c0_148, %c0_149] : memref<4x1x256xf32, #tpu.memory_space<vmem>>, vector<1x1x256xf32>
    %135 = vector.shape_cast %134 : vector<1x1x256xf32> to vector<1x256xf32>
    %136 = vector.broadcast %135 : vector<1x256xf32> to vector<64x256xf32>
    %137 = arith.addf %133, %136 : vector<64x256xf32>
    %cst_150 = arith.constant 0.000000e+00 : f32
    %138 = vector.broadcast %cst_150 : f32 to vector<64x256xf32>
    %139 = arith.maximumf %137, %138 : vector<64x256xf32>
    %c0_151 = arith.constant 0 : index
    %c0_152 = arith.constant 0 : index
    %140 = vector.load %arg16[%c0_151, %c0_152] : memref<64x256xf32, #tpu.memory_space<vmem>>, vector<64x256xf32>
    %141 = arith.truncf %139 : vector<64x256xf32> to vector<64x256xbf16>
    %c1_153 = arith.constant 1 : index
    %c0_154 = arith.constant 0 : index
    %c0_155 = arith.constant 0 : index
    %142 = vector.load %arg5[%c1_153, %c0_154, %c0_155] : memref<4x256x256xbf16, #tpu.memory_space<vmem>>, vector<1x256x256xbf16>
    %143 = vector.shape_cast %142 : vector<1x256x256xbf16> to vector<256x256xbf16>
    %cst_156 = arith.constant dense<0.000000e+00> : vector<64x256xf32>
    %144 = tpu.matmul %141, %143, %cst_156 {dimension_numbers = #tpu.dot_dimension_numbers<[1], [0], [0], [1], [0, 0, 1, 1], [], []>} : vector<64x256xbf16>, vector<256x256xbf16>, vector<64x256xf32> -> vector<64x256xf32>
    %145 = arith.addf %140, %144 : vector<64x256xf32>
    %c0_157 = arith.constant 0 : index
    %c0_158 = arith.constant 0 : index
    %146 = vector.load %arg16[%c0_157, %c0_158] : memref<64x256xf32, #tpu.memory_space<vmem>>, vector<64x256xf32>
    tpu.vector_store %arg16[%c0_157, %c0_158], %145 {strides = array<i32>} : memref<64x256xf32, #tpu.memory_space<vmem>>, vector<64x256xf32>,
    %cst_159 = arith.constant 0.000000e+00 : f32
    %147 = vector.broadcast %cst_159 : f32 to vector<64x256xf32>
    %c0_160 = arith.constant 0 : index
    %c0_161 = arith.constant 0 : index
    %148 = vector.load %arg15[%c0_160, %c0_161] : memref<64x256xf32, #tpu.memory_space<vmem>>, vector<64x256xf32>
    tpu.vector_store %arg15[%c0_160, %c0_161], %147 {strides = array<i32>} : memref<64x256xf32, #tpu.memory_space<vmem>>, vector<64x256xf32>,
    %c0_162 = arith.constant 0 : index
    %c0_163 = arith.constant 0 : index
    %149 = vector.load %arg15[%c0_162, %c0_163] : memref<64x256xf32, #tpu.memory_space<vmem>>, vector<64x256xf32>
    %c10 = arith.constant 10 : index
    %c0_164 = arith.constant 0 : index
    %c0_165 = arith.constant 0 : index
    %150 = vector.load %arg2[%c10, %c0_164, %c0_165] : memref<12x512x256xbf16, #tpu.memory_space<vmem>>, vector<1x512x256xbf16>
    %151 = vector.shape_cast %150 : vector<1x512x256xbf16> to vector<512x256xbf16>
    %cst_166 = arith.constant dense<0.000000e+00> : vector<64x256xf32>
    %152 = tpu.matmul %2, %151, %cst_166 {dimension_numbers = #tpu.dot_dimension_numbers<[1], [0], [0], [1], [0, 0, 1, 1], [], []>} : vector<64x512xbf16>, vector<512x256xbf16>, vector<64x256xf32> -> vector<64x256xf32>
    %153 = arith.addf %149, %152 : vector<64x256xf32>
    %c0_167 = arith.constant 0 : index
    %c0_168 = arith.constant 0 : index
    %154 = vector.load %arg15[%c0_167, %c0_168] : memref<64x256xf32, #tpu.memory_space<vmem>>, vector<64x256xf32>
    tpu.vector_store %arg15[%c0_167, %c0_168], %153 {strides = array<i32>} : memref<64x256xf32, #tpu.memory_space<vmem>>, vector<64x256xf32>,
    %c0_169 = arith.constant 0 : index
    %c0_170 = arith.constant 0 : index
    %155 = vector.load %arg15[%c0_169, %c0_170] : memref<64x256xf32, #tpu.memory_space<vmem>>, vector<64x256xf32>
    %c2_171 = arith.constant 2 : index
    %c0_172 = arith.constant 0 : index
    %c0_173 = arith.constant 0 : index
    %156 = vector.load %arg3[%c2_171, %c0_172, %c0_173] : memref<4x1x256xf32, #tpu.memory_space<vmem>>, vector<1x1x256xf32>
    %157 = vector.shape_cast %156 : vector<1x1x256xf32> to vector<1x256xf32>
    %158 = vector.broadcast %157 : vector<1x256xf32> to vector<64x256xf32>
    %159 = arith.mulf %155, %158 : vector<64x256xf32>
    %c2_174 = arith.constant 2 : index
    %c0_175 = arith.constant 0 : index
    %c0_176 = arith.constant 0 : index
    %160 = vector.load %arg4[%c2_174, %c0_175, %c0_176] : memref<4x1x256xf32, #tpu.memory_space<vmem>>, vector<1x1x256xf32>
    %161 = vector.shape_cast %160 : vector<1x1x256xf32> to vector<1x256xf32>
    %162 = vector.broadcast %161 : vector<1x256xf32> to vector<64x256xf32>
    %163 = arith.addf %159, %162 : vector<64x256xf32>
    %cst_177 = arith.constant 0.000000e+00 : f32
    %164 = vector.broadcast %cst_177 : f32 to vector<64x256xf32>
    %165 = arith.maximumf %163, %164 : vector<64x256xf32>
    %c0_178 = arith.constant 0 : index
    %c0_179 = arith.constant 0 : index
    %166 = vector.load %arg16[%c0_178, %c0_179] : memref<64x256xf32, #tpu.memory_space<vmem>>, vector<64x256xf32>
    %167 = arith.truncf %165 : vector<64x256xf32> to vector<64x256xbf16>
    %c2_180 = arith.constant 2 : index
    %c0_181 = arith.constant 0 : index
    %c0_182 = arith.constant 0 : index
    %168 = vector.load %arg5[%c2_180, %c0_181, %c0_182] : memref<4x256x256xbf16, #tpu.memory_space<vmem>>, vector<1x256x256xbf16>
    %169 = vector.shape_cast %168 : vector<1x256x256xbf16> to vector<256x256xbf16>
    %cst_183 = arith.constant dense<0.000000e+00> : vector<64x256xf32>
    %170 = tpu.matmul %167, %169, %cst_183 {dimension_numbers = #tpu.dot_dimension_numbers<[1], [0], [0], [1], [0, 0, 1, 1], [], []>} : vector<64x256xbf16>, vector<256x256xbf16>, vector<64x256xf32> -> vector<64x256xf32>
    %171 = arith.addf %166, %170 : vector<64x256xf32>
    %c0_184 = arith.constant 0 : index
    %c0_185 = arith.constant 0 : index
    %172 = vector.load %arg16[%c0_184, %c0_185] : memref<64x256xf32, #tpu.memory_space<vmem>>, vector<64x256xf32>
    tpu.vector_store %arg16[%c0_184, %c0_185], %171 {strides = array<i32>} : memref<64x256xf32, #tpu.memory_space<vmem>>, vector<64x256xf32>,
    %cst_186 = arith.constant 0.000000e+00 : f32
    %173 = vector.broadcast %cst_186 : f32 to vector<64x256xf32>
    %c0_187 = arith.constant 0 : index
    %c0_188 = arith.constant 0 : index
    %174 = vector.load %arg15[%c0_187, %c0_188] : memref<64x256xf32, #tpu.memory_space<vmem>>, vector<64x256xf32>
    tpu.vector_store %arg15[%c0_187, %c0_188], %173 {strides = array<i32>} : memref<64x256xf32, #tpu.memory_space<vmem>>, vector<64x256xf32>,
    %c0_189 = arith.constant 0 : index
    %c0_190 = arith.constant 0 : index
    %175 = vector.load %arg15[%c0_189, %c0_190] : memref<64x256xf32, #tpu.memory_space<vmem>>, vector<64x256xf32>
    %c11 = arith.constant 11 : index
    %c0_191 = arith.constant 0 : index
    %c0_192 = arith.constant 0 : index
    %176 = vector.load %arg2[%c11, %c0_191, %c0_192] : memref<12x512x256xbf16, #tpu.memory_space<vmem>>, vector<1x512x256xbf16>
    %177 = vector.shape_cast %176 : vector<1x512x256xbf16> to vector<512x256xbf16>
    %cst_193 = arith.constant dense<0.000000e+00> : vector<64x256xf32>
    %178 = tpu.matmul %2, %177, %cst_193 {dimension_numbers = #tpu.dot_dimension_numbers<[1], [0], [0], [1], [0, 0, 1, 1], [], []>} : vector<64x512xbf16>, vector<512x256xbf16>, vector<64x256xf32> -> vector<64x256xf32>
    %179 = arith.addf %175, %178 : vector<64x256xf32>
    %c0_194 = arith.constant 0 : index
    %c0_195 = arith.constant 0 : index
    %180 = vector.load %arg15[%c0_194, %c0_195] : memref<64x256xf32, #tpu.memory_space<vmem>>, vector<64x256xf32>
    tpu.vector_store %arg15[%c0_194, %c0_195], %179 {strides = array<i32>} : memref<64x256xf32, #tpu.memory_space<vmem>>, vector<64x256xf32>,
    %c0_196 = arith.constant 0 : index
    %c0_197 = arith.constant 0 : index
    %181 = vector.load %arg15[%c0_196, %c0_197] : memref<64x256xf32, #tpu.memory_space<vmem>>, vector<64x256xf32>
    %c3_198 = arith.constant 3 : index
    %c0_199 = arith.constant 0 : index
    %c0_200 = arith.constant 0 : index
    %182 = vector.load %arg3[%c3_198, %c0_199, %c0_200] : memref<4x1x256xf32, #tpu.memory_space<vmem>>, vector<1x1x256xf32>
    %183 = vector.shape_cast %182 : vector<1x1x256xf32> to vector<1x256xf32>
    %184 = vector.broadcast %183 : vector<1x256xf32> to vector<64x256xf32>
    %185 = arith.mulf %181, %184 : vector<64x256xf32>
    %c3_201 = arith.constant 3 : index
    %c0_202 = arith.constant 0 : index
    %c0_203 = arith.constant 0 : index
    %186 = vector.load %arg4[%c3_201, %c0_202, %c0_203] : memref<4x1x256xf32, #tpu.memory_space<vmem>>, vector<1x1x256xf32>
    %187 = vector.shape_cast %186 : vector<1x1x256xf32> to vector<1x256xf32>
    %188 = vector.broadcast %187 : vector<1x256xf32> to vector<64x256xf32>
    %189 = arith.addf %185, %188 : vector<64x256xf32>
    %cst_204 = arith.constant 0.000000e+00 : f32
    %190 = vector.broadcast %cst_204 : f32 to vector<64x256xf32>
    %191 = arith.maximumf %189, %190 : vector<64x256xf32>
    %c0_205 = arith.constant 0 : index
    %c0_206 = arith.constant 0 : index
    %192 = vector.load %arg16[%c0_205, %c0_206] : memref<64x256xf32, #tpu.memory_space<vmem>>, vector<64x256xf32>
    %193 = arith.truncf %191 : vector<64x256xf32> to vector<64x256xbf16>
    %c3_207 = arith.constant 3 : index
    %c0_208 = arith.constant 0 : index
    %c0_209 = arith.constant 0 : index
    %194 = vector.load %arg5[%c3_207, %c0_208, %c0_209] : memref<4x256x256xbf16, #tpu.memory_space<vmem>>, vector<1x256x256xbf16>
    %195 = vector.shape_cast %194 : vector<1x256x256xbf16> to vector<256x256xbf16>
    %cst_210 = arith.constant dense<0.000000e+00> : vector<64x256xf32>
    %196 = tpu.matmul %193, %195, %cst_210 {dimension_numbers = #tpu.dot_dimension_numbers<[1], [0], [0], [1], [0, 0, 1, 1], [], []>} : vector<64x256xbf16>, vector<256x256xbf16>, vector<64x256xf32> -> vector<64x256xf32>
    %197 = arith.addf %192, %196 : vector<64x256xf32>
    %c0_211 = arith.constant 0 : index
    %c0_212 = arith.constant 0 : index
    %198 = vector.load %arg16[%c0_211, %c0_212] : memref<64x256xf32, #tpu.memory_space<vmem>>, vector<64x256xf32>
    tpu.vector_store %arg16[%c0_211, %c0_212], %197 {strides = array<i32>} : memref<64x256xf32, #tpu.memory_space<vmem>>, vector<64x256xf32>,
    %c0_213 = arith.constant 0 : index
    %c0_214 = arith.constant 0 : index
    %199 = vector.load %arg16[%c0_213, %c0_214] : memref<64x256xf32, #tpu.memory_space<vmem>>, vector<64x256xf32>
    %c0_215 = arith.constant 0 : index
    %c0_216 = arith.constant 0 : index
    %200 = vector.load %arg10[%c0_215, %c0_216] : memref<1x256xf32, #tpu.memory_space<vmem>>, vector<1x256xf32>
    %201 = vector.broadcast %200 : vector<1x256xf32> to vector<64x256xf32>
    %202 = arith.mulf %199, %201 : vector<64x256xf32>
    %c0_217 = arith.constant 0 : index
    %c0_218 = arith.constant 0 : index
    %203 = vector.load %arg11[%c0_217, %c0_218] : memref<1x256xf32, #tpu.memory_space<vmem>>, vector<1x256xf32>
    %204 = vector.broadcast %203 : vector<1x256xf32> to vector<64x256xf32>
    %205 = arith.addf %202, %204 : vector<64x256xf32>
    %cst_219 = arith.constant 0.000000e+00 : f32
    %206 = vector.broadcast %cst_219 : f32 to vector<64x256xf32>
    %207 = arith.maximumf %205, %206 : vector<64x256xf32>
    %208 = arith.truncf %207 : vector<64x256xf32> to vector<64x256xbf16>
    %c0_220 = arith.constant 0 : index
    %c0_221 = arith.constant 0 : index
    %209 = vector.load %arg12[%c0_220, %c0_221] : memref<256x128xbf16, #tpu.memory_space<vmem>>, vector<256x128xbf16>
    %cst_222 = arith.constant dense<0.000000e+00> : vector<64x128xf32>
    %210 = tpu.matmul %208, %209, %cst_222 {dimension_numbers = #tpu.dot_dimension_numbers<[1], [0], [0], [1], [0, 0, 1, 1], [], []>} : vector<64x256xbf16>, vector<256x128xbf16>, vector<64x128xf32> -> vector<64x128xf32>
    %c0_223 = arith.constant 0 : index
    %c0_224 = arith.constant 0 : index
    %211 = vector.load %arg13[%c0_223, %c0_224] : memref<1x128xf32, #tpu.memory_space<vmem>>, vector<1x128xf32>
    %212 = vector.broadcast %211 : vector<1x128xf32> to vector<64x128xf32>
    %213 = arith.addf %210, %212 : vector<64x128xf32>
    %c0_225 = arith.constant 0 : index
    %c0_226 = arith.constant 0 : index
    %c0_227 = arith.constant 0 : index
    %214 = vector.load %arg14[%c0_225, %c0_226, %c0_227] : memref<1x64x128xf32, #tpu.memory_space<vmem>>, vector<1x64x128xf32>
    %215 = vector.shape_cast %214 : vector<1x64x128xf32> to vector<64x128xf32>
    %216 = vector.shape_cast %213 : vector<64x128xf32> to vector<1x64x128xf32>
    tpu.vector_store %arg14[%c0_225, %c0_226, %c0_227], %216 {strides = array<i32>} : memref<1x64x128xf32, #tpu.memory_space<vmem>>, vector<1x64x128xf32>,
    return
  }
  func.func @transform_0(%arg0: i32) -> (i32, i32, i32, i32) {
    %c0_i32 = arith.constant 0 : i32
    %c0_i32_0 = arith.constant 0 : i32
    %c0_i32_1 = arith.constant 0 : i32
    %c0_i32_2 = arith.constant 0 : i32
    return %arg0, %c0_i32, %c0_i32_0, %c0_i32_1 : i32, i32, i32, i32
  }
  func.func @transform_1(%arg0: i32) -> (i32, i32, i32) {
    %c0_i32 = arith.constant 0 : i32
    %c0_i32_0 = arith.constant 0 : i32
    %c0_i32_1 = arith.constant 0 : i32
    %c0_i32_2 = arith.constant 0 : i32
    return %c0_i32, %c0_i32_0, %c0_i32_1 : i32, i32, i32
  }
  func.func @transform_2(%arg0: i32) -> (i32, i32, i32) {
    %c0_i32 = arith.constant 0 : i32
    %c0_i32_0 = arith.constant 0 : i32
    %c0_i32_1 = arith.constant 0 : i32
    %c0_i32_2 = arith.constant 0 : i32
    return %c0_i32, %c0_i32_0, %c0_i32_1 : i32, i32, i32
  }
  func.func @transform_3(%arg0: i32) -> (i32, i32, i32) {
    %c0_i32 = arith.constant 0 : i32
    %c0_i32_0 = arith.constant 0 : i32
    %c0_i32_1 = arith.constant 0 : i32
    %c0_i32_2 = arith.constant 0 : i32
    return %c0_i32, %c0_i32_0, %c0_i32_1 : i32, i32, i32
  }
  func.func @transform_4(%arg0: i32) -> (i32, i32, i32) {
    %c0_i32 = arith.constant 0 : i32
    %c0_i32_0 = arith.constant 0 : i32
    %c0_i32_1 = arith.constant 0 : i32
    %c0_i32_2 = arith.constant 0 : i32
    return %c0_i32, %c0_i32_0, %c0_i32_1 : i32, i32, i32
  }
  func.func @transform_5(%arg0: i32) -> (i32, i32) {
    %c0_i32 = arith.constant 0 : i32
    %c0_i32_0 = arith.constant 0 : i32
    %c0_i32_1 = arith.constant 0 : i32
    return %c0_i32, %c0_i32_0 : i32, i32
  }
  func.func @transform_6(%arg0: i32) -> (i32, i32) {
    %c0_i32 = arith.constant 0 : i32
    %c0_i32_0 = arith.constant 0 : i32
    %c0_i32_1 = arith.constant 0 : i32
    return %c0_i32, %c0_i32_0 : i32, i32
  }
  func.func @transform_7(%arg0: i32) -> (i32, i32) {
    %c0_i32 = arith.constant 0 : i32
    %c0_i32_0 = arith.constant 0 : i32
    %c0_i32_1 = arith.constant 0 : i32
    return %c0_i32, %c0_i32_0 : i32, i32
  }
  func.func @transform_8(%arg0: i32) -> (i32, i32) {
    %c0_i32 = arith.constant 0 : i32
    %c0_i32_0 = arith.constant 0 : i32
    %c0_i32_1 = arith.constant 0 : i32
    return %c0_i32, %c0_i32_0 : i32, i32
  }
  func.func @transform_9(%arg0: i32) -> (i32, i32) {
    %c0_i32 = arith.constant 0 : i32
    %c0_i32_0 = arith.constant 0 : i32
    %c0_i32_1 = arith.constant 0 : i32
    return %c0_i32, %c0_i32_0 : i32, i32
  }
  func.func @transform_10(%arg0: i32) -> (i32, i32) {
    %c0_i32 = arith.constant 0 : i32
    %c0_i32_0 = arith.constant 0 : i32
    %c0_i32_1 = arith.constant 0 : i32
    return %c0_i32, %c0_i32_0 : i32, i32
  }
  func.func @transform_11(%arg0: i32) -> (i32, i32) {
    %c0_i32 = arith.constant 0 : i32
    %c0_i32_0 = arith.constant 0 : i32
    %c0_i32_1 = arith.constant 0 : i32
    return %c0_i32, %c0_i32_0 : i32, i32
  }
  func.func @transform_12(%arg0: i32) -> (i32, i32) {
    %c0_i32 = arith.constant 0 : i32
    %c0_i32_0 = arith.constant 0 : i32
    %c0_i32_1 = arith.constant 0 : i32
    return %c0_i32, %c0_i32_0 : i32, i32
  }
  func.func @transform_13(%arg0: i32) -> (i32, i32, i32) {
    %c0_i32 = arith.constant 0 : i32
    %c0_i32_0 = arith.constant 0 : i32
    %c0_i32_1 = arith.constant 0 : i32
    return %arg0, %c0_i32, %c0_i32_0 : i32, i32, i32
  }
}

</mosaic_0001>

<bundles_post_ra>
// kernel: aspp_forward.1
= control target key start
LH: loop header
LB: loop body
LE: loop exit
PB: predicated region body
PF: predicated region fallthrough
CT: control target
= control target key end

     0   :  { %s16086_s25 = smov 0   ;;  %s20254_s0 = inlined_call_operand.vmem [shape: bf16[2,20,20,512], index: 0, kind: input, shape index: {}]   ;;  %s20255_s1 = inlined_call_operand.vmem [shape: bf16[12,512,256], index: 1, kind: input, shape index: {}]   ;;  %s20256_s2 = inlined_call_operand.vmem [shape: f32[4,1,256], index: 2, kind: input, shape index: {}]   ;;  %s20257_s3 = inlined_call_operand.vmem [shape: f32[4,1,256], index: 3, kind: input, shape index: {}]   ;;  %s20258_s4 = inlined_call_operand.vmem [shape: bf16[4,256,256], index: 4, kind: input, shape index: {}]   ;;  %s20259_s5 = inlined_call_operand.vmem [shape: bf16[512,256], index: 5, kind: input, shape index: {}]   ;;  %s20260_s6 = inlined_call_operand.vmem [shape: f32[1,256], index: 6, kind: input, shape index: {}]   ;;  %s20261_s7 = inlined_call_operand.vmem [shape: f32[1,256], index: 7, kind: input, shape index: {}]   ;;  %s20262_s8 = inlined_call_operand.vmem [shape: bf16[256,256], index: 8, kind: input, shape index: {}]   ;;  %s20263_s9 = inlined_call_operand.vmem [shape: f32[1,256], index: 9, kind: input, shape index: {}]   ;;  %s20264_s10 = inlined_call_operand.vmem [shape: f32[1,256], index: 10, kind: input, shape index: {}]   ;;  %s20265_s11 = inlined_call_operand.vmem [shape: bf16[256,128], index: 11, kind: input, shape index: {}]   ;;  %s20266_s12 = inlined_call_operand.vmem [shape: f32[1,128], index: 12, kind: input, shape index: {}]   ;;  %s20267_s13 = inlined_call_operand.vmem [shape: f32[2,64,128], index: 13, kind: output, shape index: {}]  }
   0x1 LB: > { %s11769_s26 = sadd.s32 4294967295, %s16014_s25   ;;  %p11773_p0 = scmp.ge.s32.totalorder %s16014_s25, 1  ;;  %s16014_s25 = sphi %s16086_s25, %s23_s25  }
   0x2   : > { %p387_p1 = scmp.lt.s32.totalorder %s16014_s25, 3 }
   0x4   : > { %p388_p2 = pnand %p11773_p0, %p387_p1 }
   0x5   : > { %v14432_v0 = vld [vmem:[%s20259_s5 + $0x4] ss:$8 sps:$4 sm:$0xff] (!%p388_p2)   ;;  %v14436_v2 = vld [vmem:[%s20259_s5] ss:$8 sps:$4 sm:$0xff] (!%p388_p2)   ;;  %v14438_v4 = vld [vmem:[%s20259_s5 + $0x14] ss:$8 sps:$4 sm:$0xff] (!%p388_p2)  }
   0x6   : > { %391 = sbr.rel (%p388_p2) target bundleno = 1996 (0x7cc), region = 72  ;;  %v14434_v1 = vld [vmem:[%s20255_s1 + $0x704] ss:$8 sps:$4 sm:$0xff] (!%p388_p2)   ;;  %1067 = vmatprep.subr.bf16.mxu1 (!%p388_p2), %v14432_v0  ;;  %v14437_v3 = vld [vmem:[%s20255_s1 + $0x700] ss:$8 sps:$4 sm:$0xff] (!%p388_p2)   ;;  %p431_p3 = scmp.lt.s32.totalorder (!%p388_p2), %s11769_s26, 1 }
   0x7   : > { %4636 = vmatprep.subr.bf16.mxu0 (!%p388_p2), %v14434_v1  ;;  %1068 = vmatpush1.bf16.msra.mxu1 (!%p388_p2), %v14436_v2  ;;  %v14440_v5 = vld [vmem:[%s20255_s1 + $0x714] ss:$8 sps:$4 sm:$0xff] (!%p388_p2)   ;;  %v14442_v6 = vld [vmem:[%s20259_s5 + $0x10] ss:$8 sps:$4 sm:$0xff] (!%p388_p2)   ;;  %v14444_v8 = vld [vmem:[%s20259_s5 + $0x24] ss:$8 sps:$4 sm:$0xff] (!%p388_p2)  }
   0x8   : > { %4637 = vmatpush1.bf16.msra.mxu0 (!%p388_p2), %v14437_v3  ;;  %1069 = vmatprep.subr.bf16.mxu1 (!%p388_p2), %v14438_v4  ;;  %v14443_v7 = vld [vmem:[%s20255_s1 + $0x710] ss:$8 sps:$4 sm:$0xff] (!%p388_p2)   ;;  %v14446_v9 = vld [vmem:[%s20255_s1 + $0x724] ss:$8 sps:$4 sm:$0xff] (!%p388_p2)   ;;  %v14448_v10 = vld [vmem:[%s20259_s5 + $0x20] ss:$8 sps:$4 sm:$0xff] (!%p388_p2)  }
   0x9   : > { %4638 = vmatprep.subr.bf16.mxu0 (!%p388_p2), %v14440_v5  ;;  %v14449_v11 = vld [vmem:[%s20255_s1 + $0x720] ss:$8 sps:$4 sm:$0xff] (!%p388_p2)   ;;  %v14450_v12 = vld [vmem:[%s20259_s5 + $0x34] ss:$8 sps:$4 sm:$0xff] (!%p388_p2)   ;;  %v14454_v14 = vld [vmem:[%s20259_s5 + $0x30] ss:$8 sps:$4 sm:$0xff] (!%p388_p2)  }
   0xa   : > { %v14452_v13 = vld [vmem:[%s20255_s1 + $0x734] ss:$8 sps:$4 sm:$0xff] (!%p388_p2)   ;;  %v14455_v15 = vld [vmem:[%s20255_s1 + $0x730] ss:$8 sps:$4 sm:$0xff] (!%p388_p2)   ;;  %v14456_v16 = vld [vmem:[%s20259_s5 + $0x44] ss:$8 sps:$4 sm:$0xff] (!%p388_p2)  }
   0xb   : > { %1070 = vmatpush1.bf16.msra.mxu1 (!%p388_p2), %v14442_v6  ;;  %v14458_v17 = vld [vmem:[%s20255_s1 + $0x744] ss:$8 sps:$4 sm:$0xff] (!%p388_p2)   ;;  %v14460_v18 = vld [vmem:[%s20259_s5 + $0x40] ss:$8 sps:$4 sm:$0xff] (!%p388_p2)   ;;  %v14462_v20 = vld [vmem:[%s20259_s5 + $0x54] ss:$8 sps:$4 sm:$0xff] (!%p388_p2)  }
   0xc   : > { %4639 = vmatpush1.bf16.msra.mxu0 (!%p388_p2), %v14443_v7  ;;  %1071 = vmatprep.subr.bf16.mxu1 (!%p388_p2), %v14444_v8  ;;  %v14461_v19 = vld [vmem:[%s20255_s1 + $0x740] ss:$8 sps:$4 sm:$0xff] (!%p388_p2)   ;;  %v14464_v21 = vld [vmem:[%s20255_s1 + $0x754] ss:$8 sps:$4 sm:$0xff] (!%p388_p2)   ;;  %v14466_v22 = vld [vmem:[%s20259_s5 + $0x50] ss:$8 sps:$4 sm:$0xff] (!%p388_p2)  }
   0xd   : > { %4640 = vmatprep.subr.bf16.mxu0 %v14446_v9  ;;  %v14467_v23 = vld [vmem:[%s20255_s1 + $0x750] ss:$8 sps:$4 sm:$0xff]   ;;  %v14468_v24 = vld [vmem:[%s20259_s5 + $0x64] ss:$8 sps:$4 sm:$0xff]   ;;  %v14472_v26 = vld [vmem:[%s20259_s5 + $0x60] ss:$8 sps:$4 sm:$0xff]  }
   0xe   : > { %v14470_v25 = vld [vmem:[%s20255_s1 + $0x764] ss:$8 sps:$4 sm:$0xff]   ;;  %v14473_v27 = vld [vmem:[%s20255_s1 + $0x760] ss:$8 sps:$4 sm:$0xff]   ;;  %v14474_v28 = vld [vmem:[%s20259_s5 + $0x74] ss:$8 sps:$4 sm:$0xff]  }
   0xf   : > { %1072 = vmatpush1.bf16.msra.mxu1 %v14448_v10  ;;  %v14476_v29 = vld [vmem:[%s20255_s1 + $0x774] ss:$8 sps:$4 sm:$0xff]   ;;  %v14478_v30 = vld [vmem:[%s20259_s5 + $0x70] ss:$8 sps:$4 sm:$0xff]   ;;  %v14480_v32 = vld [vmem:[%s20259_s5 + $0x84] ss:$8 sps:$4 sm:$0xff]  }
  0x10   : > { %4641 = vmatpush1.bf16.msra.mxu0 %v14449_v11  ;;  %1073 = vmatprep.subr.bf16.mxu1 %v14450_v12  ;;  %v14479_v31 = vld [vmem:[%s20255_s1 + $0x770] ss:$8 sps:$4 sm:$0xff]   ;;  %v14482_v33 = vld [vmem:[%s20255_s1 + $0x784] ss:$8 sps:$4 sm:$0xff]   ;;  %v14484_v34 = vld [vmem:[%s20259_s5 + $0x80] ss:$8 sps:$4 sm:$0xff]  }
  0x11   : > { %4642 = vmatprep.subr.bf16.mxu0 %v14452_v13  ;;  %v14485_v35 = vld [vmem:[%s20255_s1 + $0x780] ss:$8 sps:$4 sm:$0xff]   ;;  %v14486_v36 = vld [vmem:[%s20259_s5 + $0x94] ss:$8 sps:$4 sm:$0xff]   ;;  %s20273_s26 = smov (!%p431_p3, %s11769_s26), 1  ;;  %vm507_vm0 = vcmask 1040384  }
  0x12   : > { %v14488_v37 = vld [vmem:[%s20255_s1 + $0x794] ss:$8 sps:$4 sm:$0xff]   ;;  %v14490_v38 = vld [vmem:[%s20259_s5 + $0x90] ss:$8 sps:$4 sm:$0xff]   ;;  %v14492_v40 = vld [vmem:[%s20259_s5 + $0xa4] ss:$8 sps:$4 sm:$0xff]  }
  0x13   : > { %1074 = vmatpush1.bf16.msra.mxu1 %v14454_v14  ;;  %v14491_v39 = vld [vmem:[%s20255_s1 + $0x790] ss:$8 sps:$4 sm:$0xff]   ;;  %v14494_v41 = vld [vmem:[%s20255_s1 + $0x7a4] ss:$8 sps:$4 sm:$0xff]   ;;  %s14423_s19 = smul.u32 960, %s20273_s26  ;;  %vm508_vm1 = vcmask 1044484  }
  0x14   : > { %4643 = vmatpush1.bf16.msra.mxu0 %v14455_v15  ;;  %1075 = vmatprep.subr.bf16.mxu1 %v14456_v16  ;;  %v14496_v42 = vld [vmem:[%s20259_s5 + $0xa0] ss:$8 sps:$4 sm:$0xff]   ;;  %v14498_v44 = vld [vmem:[%s20259_s5 + $0xb4] ss:$8 sps:$4 sm:$0xff]   ;;  %v14502_v46 = vld [vmem:[%s20259_s5 + $0xb0] ss:$8 sps:$4 sm:$0xff]  }
  0x15   : > { %4644 = vmatprep.subr.bf16.mxu0 %v14458_v17  ;;  %v14497_v43 = vld [vmem:[%s20255_s1 + $0x7a0] ss:$8 sps:$4 sm:$0xff]   ;;  %v14500_v45 = vld [vmem:[%s20255_s1 + $0x7b4] ss:$8 sps:$4 sm:$0xff]   ;;  %s16242_s15 = scalar_lea.vmem %s20254_s0, %s14423_s19  ;;  %v14503_v47 = vld [vmem:[%s20255_s1 + $0x7b0] ss:$8 sps:$4 sm:$0xff]  }
  0x16   : > { %v14504_v48 = vld [vmem:[%s20259_s5 + $0xc4] ss:$8 sps:$4 sm:$0xff]   ;;  %v11779_v51 = vld [vmem:[%s16242_s15 + $0x130] sm:$0x77]  ;;  %v11781_v52 = vld [vmem:[%s16242_s15 + $0x150] sm:$0x88] }
  0x17   : > { %1076 = vmatpush1.bf16.msra.mxu1 %v14460_v18  ;;  %v14506_v49 = vld [vmem:[%s20255_s1 + $0x7c4] ss:$8 sps:$4 sm:$0xff]   ;;  %vm4031_vm2 = vcmask 1041408   ;;  %v11787_v55 = vld [vmem:[%s16242_s15 + $0x190] sm:$0x77]  ;;  %vm16279_vm3 = vmor %vm507_vm0, %vm508_vm1  ;;  %v512_v3 = vrot.slane %v11779_v51, 7 }
  0x18   : > { %4645 = vmatpush1.bf16.msra.mxu0 %v14461_v19  ;;  %1077 = vmatprep.subr.bf16.mxu1 %v14462_v20  ;;  %v11777_v50 = vld [vmem:[%s16242_s15 + $0x120] sm:$0x88]  ;;  %v11783_v53 = vld [vmem:[%s16242_s15 + $0x160] sm:$0x77]  ;;  %v11789_v58 = vld [vmem:[%s16242_s15 + $0x1b0] sm:$0x88] }
  0x19   : > { %4646 = vmatprep.subr.bf16.mxu0 %v14464_v21  ;;  %v11785_v54 = vld [vmem:[%s16242_s15 + $0x180] sm:$0x88]  ;;  %v11791_v59 = vld [vmem:[%s16242_s15 + $0x1c0] sm:$0x77]  ;;  %v14510_v61 = vld [vmem:[%s20259_s5 + $0xd4] ss:$8 sps:$4 sm:$0xff]  }
  0x1a   : > { %v14508_v56 = vld [vmem:[%s20259_s5 + $0xc0] ss:$8 sps:$4 sm:$0xff]   ;;  %v11795_v62 = vld [vmem:[%s16242_s15 + $0x1f0] sm:$0x77]  ;;  %v11797_v63 = vld [vmem:[%s16242_s15 + $0x210] sm:$0x88] }
  0x1b   : > { %1078 = vmatpush1.bf16.msra.mxu1 %v14466_v22  ;;  %v14509_v57 = vld [vmem:[%s20255_s1 + $0x7c0] ss:$8 sps:$4 sm:$0xff]   ;;  %v11809_v2 = vrot.slane %v11777_v50, 11  ;;  %v11811_v4 = vrot.slane %v11781_v52, 11  ;;  %v520_v5 = vrot.slane %v11783_v53, 7  ;;  %v11813_v7 = vrot.slane %v11785_v54, 11 }
  0x1c   : > { %4647 = vmatpush1.bf16.msra.mxu0 %v14467_v23  ;;  %1079 = vmatprep.subr.bf16.mxu1 %v14468_v24  ;;  %v11793_v60 = vld [vmem:[%s16242_s15 + $0x1e0] sm:$0x88]  ;;  %v11799_v0 = vld [vmem:[%s16242_s15 + $0x220] sm:$0x77]  ;;  %v14512_v6 = vld [vmem:[%s20255_s1 + $0x7d4] ss:$8 sps:$4 sm:$0xff]  }
  0x1d   : > { %4648 = vmatprep.subr.bf16.mxu0 %v14470_v25  ;;  %v528_v8 = vrot.slane %v11787_v55, 7  ;;  %v11815_v9 = vrot.slane %v11789_v58, 11  ;;  %v536_v10 = vrot.slane %v11791_v59, 7  ;;  %v14514_v11 = vld [vmem:[%s20259_s5 + $0xd0] ss:$8 sps:$4 sm:$0xff]   ;;  %v16295_v14 = vsel %vm16279_vm3, %v11809_v2, %v512_v3  ;;  %s13994_s29 = sshll.u32 %s20273_s26, 6 }
  0x1e   : > { %v14515_v12 = vld [vmem:[%s20255_s1 + $0x7d0] ss:$8 sps:$4 sm:$0xff]   ;;  %v11801_v13 = vld [vmem:[%s16242_s15 + $0x240] sm:$0x88]  ;;  %v16299_v15 = vsel %vm16279_vm3, %v11811_v4, %v520_v5  ;;  %v11817_v16 = vrot.slane %v11793_v60, 11  ;;  %v544_v17 = vrot.slane %v11795_v62, 7  ;;  %v590_v53 = vunpack.c.l.bf16 %v16295_v14  ;;  %s20241_s18 = scalar_lea.vmem %s20267_s13, %s13994_s29 }
  0x1f   : > { %1080 = vmatpush1.bf16.msra.mxu1 %v14472_v26  ;;  %v14516_v18 = vld [vmem:[%s20259_s5 + $0xe4] ss:$8 sps:$4 sm:$0xff]   ;;  %v11803_v20 = vld [vmem:[%s16242_s15 + $0x250] sm:$0x77]  ;;  %v11805_v21 = vld [vmem:[%s16242_s15 + $0x270] sm:$0x88]  ;;  %v16311_v22 = vsel %vm16279_vm3, %v11813_v7, %v528_v8  ;;  %v16316_v26 = vsel %vm16279_vm3, %v11815_v9, %v536_v10  ;;  %v594_v54 = vunpack.c.l.bf16 %v16299_v15 }
  0x20   : > { %4649 = vmatpush1.bf16.msra.mxu0 %v14473_v27  ;;  %1081 = vmatprep.subr.bf16.mxu1 %v14474_v28  ;;  %v14518_v19 = vld [vmem:[%s20255_s1 + $0x7e4] ss:$8 sps:$4 sm:$0xff]   ;;  %v11819_v23 = vrot.slane %v11797_v63, 11  ;;  %v552_v24 = vrot.slane %v11799_v0, 7  ;;  %v3968_v27 = vld [vmem:[%s16242_s15 + $0x18] sm:$0xcc]  ;;  %v16321_v28 = vsel %vm16279_vm3, %v11817_v16, %v544_v17  ;;  %v602_v3 = vunpack.c.l.bf16 %v16316_v26 }
  0x21   : > { %4650 = vmatprep.subr.bf16.mxu0 %v14476_v29  ;;  %v11807_v25 = vld [vmem:[%s16242_s15 + $0x280] sm:$0x77]  ;;  %vm4032_vm4 = vcmask 1045508   ;;  %v11821_v29 = vrot.slane %v11801_v13, 11  ;;  %v14524_v50 = vld [vmem:[%s20255_s1 + $0x7f4] ss:$8 sps:$4 sm:$0xff]   ;;  %v622_v4 = vadd.f32 %v594_v54, %v590_v53  ;;  %v606_v8 = vunpack.c.l.bf16 %v16321_v28 }
  0x22   : > { %vm16339_vm5 = vmor %vm4031_vm2, %vm4032_vm4  ;;  %v14526_v58 = vld [vmem:[%s20259_s5 + $0xf0] ss:$8 sps:$4 sm:$0xff]   ;;  %v14530_v0 = vld [vmem:[%s20259_s5 + $0x104] ss:$8 sps:$4 sm:$0xff]  }
  0x23   : > { %1082 = vmatpush1.bf16.msra.mxu1 %v14478_v30  ;;  %v591_v30 = vunpack.c.h.bf16 %v16295_v14  ;;  %v14527_v62 = vld [vmem:[%s20255_s1 + $0x7f0] ss:$8 sps:$4 sm:$0xff]   ;;  %v14533_v7 = vld [vmem:[%s20255_s1 + $0x804] ss:$8 sps:$4 sm:$0xff]   ;;  %v14531_v13 = vld [vmem:[%s20255_s1 + $0x800] ss:$8 sps:$4 sm:$0xff]  }
  0x24   : > { %4651 = vmatpush1.bf16.msra.mxu0 %v14479_v31  ;;  %1083 = vmatprep.subr.bf16.mxu1 %v14480_v32  ;;  %v595_v31 = vunpack.c.h.bf16 %v16299_v15  ;;  %v3970_v32 = vld [vmem:[%s16242_s15 + $0x28] sm:$0x33]  ;;  %v3982_v53 = vld [vmem:[%s16242_s15 + $0xb8] sm:$0x33] }
  0x25   : > { %4652 = vmatprep.subr.bf16.mxu0 %v14482_v33  ;;  %v3972_v33 = vld [vmem:[%s16242_s15 + $0x48] sm:$0xcc] }
  0x27   : > { %1084 = vmatpush1.bf16.msra.mxu1 %v14484_v34  ;;  %v14520_v34 = vld [vmem:[%s20259_s5 + $0xe0] ss:$8 sps:$4 sm:$0xff]  }
  0x28   : > { %4653 = vmatpush1.bf16.msra.mxu0 %v14485_v35  ;;  %1085 = vmatprep.subr.bf16.mxu1 %v14486_v36  ;;  %v560_v35 = vrot.slane %v11803_v20, 7  ;;  %v11823_v36 = vrot.slane %v11805_v21, 11 }
  0x29   : > { %4654 = vmatprep.subr.bf16.mxu0 %v14488_v37  ;;  %v599_v37 = vunpack.c.h.bf16 %v16311_v22 }
  0x2a   : > { %v16357_v55 = vsel %vm16279_vm3, %v11821_v29, %v560_v35 }
  0x2b   : > { %1086 = vmatpush1.bf16.msra.mxu1 %v14490_v38  ;;  %v3974_v38 = vld [vmem:[%s16242_s15 + $0x58] sm:$0x33]  ;;  %v615_v5 = vunpack.c.h.bf16 %v16357_v55  ;;  %v614_v20 = vunpack.c.l.bf16 %v16357_v55 }
  0x2c   : > { %4655 = vmatpush1.bf16.msra.mxu0 %v14491_v39  ;;  %1087 = vmatprep.subr.bf16.mxu1 %v14492_v40  ;;  %v16334_v39 = vsel %vm16279_vm3, %v11819_v23, %v552_v24  ;;  %v568_v40 = vrot.slane %v11807_v25, 7  ;;  %v4048_v52 = vrot.slane %v3974_v38, 6 }
  0x2d   : > { %4656 = vmatprep.subr.bf16.mxu0 %v14494_v41  ;;  %v603_v41 = vunpack.c.h.bf16 %v16316_v26  ;;  %v611_v59 = vunpack.c.h.bf16 %v16334_v39  ;;  %v610_v16 = vunpack.c.l.bf16 %v16334_v39 }
  0x2e   : > { %v16373_v63 = vsel %vm16279_vm3, %v11823_v36, %v568_v40  ;;  %v14551_v36 = vld [vmem:[%s20255_s1 + $0x834] ss:$8 sps:$4 sm:$0xff]  }
  0x2f   : > { %1088 = vmatpush1.bf16.msra.mxu1 %v14496_v42  ;;  %v635_v42 = vadd.f32 %v595_v31, %v591_v30  ;;  %v619_v10 = vunpack.c.h.bf16 %v16373_v63  ;;  %v618_v24 = vunpack.c.l.bf16 %v16373_v63  ;;  %v14545_v30 = vld [vmem:[%s20255_s1 + $0x824] ss:$8 sps:$4 sm:$0xff]  }
  0x30   : > { %4657 = vmatpush1.bf16.msra.mxu0 %v14497_v43  ;;  %1089 = vmatprep.subr.bf16.mxu1 %v14498_v44  ;;  %v14521_v44 = vld [vmem:[%s20255_s1 + $0x7e0] ss:$8 sps:$4 sm:$0xff]   ;;  %v15671_v43 = vld [vmem:[%s20255_s1 + $0x1450] ss:$8 sps:$4 sm:$0xff]  }
  0x31   : > { %4658 = vmatprep.subr.bf16.mxu0 %v14500_v45  ;;  %v607_v45 = vunpack.c.h.bf16 %v16321_v28  ;;  %v636_v51 = vadd.f32 %v635_v42, %v599_v37 }
  0x33   : > { %1090 = vmatpush1.bf16.msra.mxu1 %v14502_v46  ;;  %v12338_v46 = vrot.slane %v3968_v27, 10  ;;  %v637_v60 = vadd.f32 %v636_v51, %v603_v41  ;;  %v14537_v27 = vld [vmem:[%s20255_s1 + $0x810] ss:$8 sps:$4 sm:$0xff]   ;;  %v3978_v51 = vld [vmem:[%s16242_s15 + $0x88] sm:$0x33] }
  0x34   : > { %4659 = vmatpush1.bf16.msra.mxu0 %v14503_v47  ;;  %1091 = vmatprep.subr.bf16.mxu1 %v14504_v48  ;;  %v4040_v47 = vrot.slane %v3970_v32, 6  ;;  %v12340_v48 = vrot.slane %v3972_v33, 10  ;;  %v14549_v41 = vld [vmem:[%s20255_s1 + $0x830] ss:$8 sps:$4 sm:$0xff]  }
  0x35   : > { %4660 = vmatprep.subr.bf16.mxu0 %v14506_v49  ;;  %v14522_v49 = vld [vmem:[%s20259_s5 + $0xf4] ss:$8 sps:$4 sm:$0xff]  }
  0x37   : > { %1092 = vmatpush1.bf16.msra.mxu1 %v14508_v56  ;;  %v4041_v56 = vsel %vm16339_vm5, %v12338_v46, %v4040_v47  ;;  %v14555_v47 = vld [vmem:[%s20255_s1 + $0x840] ss:$8 sps:$4 sm:$0xff]  }
  0x38   : > { %4661 = vmatpush1.bf16.msra.mxu0 %v14509_v57  ;;  %1093 = vmatprep.subr.bf16.mxu1 %v14510_v61  ;;  %v598_v57 = vunpack.c.l.bf16 %v16311_v22  ;;  %v4049_v61 = vsel %vm16339_vm5, %v12340_v48, %v4048_v52  ;;  %v14563_v48 = vld [vmem:[%s20255_s1 + $0x854] ss:$8 sps:$4 sm:$0xff]   ;;  %v3980_v52 = vld [vmem:[%s16242_s15 + $0xa8] sm:$0xcc] }
  0x39   : > { %4662 = vmatprep.subr.bf16.mxu0 %v14512_v6  ;;  %v12420_v2 = vcombine.high %v4041_v56, %v4049_v61  ;;  %v638_v6 = vadd.f32 %v637_v60, %v607_v45  ;;  %v4064_v60 = vrot.slane %v3982_v53, 6  ;;  %v14585_v53 = vld [vmem:[%s20255_s1 + $0x890] ss:$8 sps:$4 sm:$0xff]  }
  0x3a   : > { %v623_v9 = vadd.f32 %v622_v4, %v598_v57  ;;  %v4056_v57 = vrot.slane %v3978_v51, 6  ;;  %v14528_v4 = vld [vmem:[%s20259_s5 + $0x100] ss:$8 sps:$4 sm:$0xff]  }
  0x3b   : > { %1094 = vmatpush1.bf16.msra.mxu1 %v14514_v11  ;;  %4668 = vmatprep.mubr.bf16.mxu0 %v12420_v2  ;;  %v639_v11 = vadd.f32 %v638_v6, %v611_v59  ;;  %v14561_v2 = vld [vmem:[%s20255_s1 + $0x850] ss:$8 sps:$4 sm:$0xff]  }
  0x3c   : > { %4663 = vmatpush1.bf16.msra.mxu0 %v14515_v12  ;;  %1095 = vmatprep.subr.bf16.mxu1 %v14516_v18  ;;  %v12419_v12 = vcombine.low %v4041_v56, %v4049_v61  ;;  %v624_v17 = vadd.f32 %v623_v9, %v602_v3  ;;  %v14536_v9 = vld [vmem:[%s20259_s5 + $0x114] ss:$8 sps:$4 sm:$0xff]  }
  0x3d   : > { %4664 = vmatprep.subr.bf16.mxu0 %v14518_v19  ;;  %v640_v18 = vadd.f32 %v639_v11, %v615_v5  ;;  %v14539_v19 = vld [vmem:[%s20255_s1 + $0x814] ss:$8 sps:$4 sm:$0xff]   ;;  %v14569_v5 = vld [vmem:[%s20255_s1 + $0x864] ss:$8 sps:$4 sm:$0xff]  }
  0x3e   : > { %v625_v21 = vadd.f32 %v624_v17, %v606_v8  ;;  %v3984_v11 = vld [vmem:[%s16242_s15 + $0xd8] sm:$0xcc]  ;;  %v3990_v17 = vld [vmem:[%s16242_s15 + $0x118] sm:$0x33] }
  0x3f   : > { %1096 = vmatpush1.bf16.msra.mxu1 %v14520_v34  ;;  %v641_v23 = vadd.f32 %v640_v18, %v619_v10  ;;  %v14543_v34 = vld [vmem:[%s20255_s1 + $0x820] ss:$8 sps:$4 sm:$0xff]   ;;  %v12346_v18 = vrot.slane %v3984_v11, 10  ;;  %v14558_v11 = vld [vmem:[%s20259_s5 + $0x150] ss:$8 sps:$4 sm:$0xff]  }
  0x40   : > { %4665 = vmatpush1.bf16.msra.mxu0 %v14521_v44  ;;  %1097 = vmatprep.subr.bf16.mxu1 %v14522_v49  ;;  %v626_v25 = vadd.f32 %v625_v21, %v610_v16  ;;  %v14557_v44 = vld [vmem:[%s20255_s1 + $0x844] ss:$8 sps:$4 sm:$0xff]   ;;  %v3976_v49 = vld [vmem:[%s16242_s15 + $0x78] sm:$0xcc]  ;;  %v14567_v10 = vld [vmem:[%s20255_s1 + $0x860] ss:$8 sps:$4 sm:$0xff]  }
  0x41   : > { %4666 = vmatprep.subr.bf16.mxu0 %v14524_v50  ;;  %v642_v29 = vrot.slane %v641_v23, 4  ;;  %v12342_v56 = vrot.slane %v3976_v49, 10  ;;  %v14575_v21 = vld [vmem:[%s20255_s1 + $0x874] ss:$8 sps:$4 sm:$0xff]  }
  0x42   : > { %v627_v31 = vadd.f32 %v626_v25, %v614_v20  ;;  %v14534_v25 = vld [vmem:[%s20259_s5 + $0x110] ss:$8 sps:$4 sm:$0xff]  }
  0x43   : > { %1098 = vmatpush1.bf16.msra.mxu1 %v14526_v58  ;;  %v643_v32 = vadd.f32 %v642_v29, %v641_v23  ;;  %v12344_v58 = vrot.slane %v3980_v52, 10  ;;  %v4080_v23 = vrot.slane %v3990_v17, 6  ;;  %v14542_v29 = vld [vmem:[%s20259_s5 + $0x124] ss:$8 sps:$4 sm:$0xff]  }
  0x44   : > { %4667 = vmatpush1.bf16.msra.mxu0 %v14527_v62  ;;  %1108 = vmatprep.subr.bf16.mxu1 %v14530_v0  ;;  %v628_v33 = vadd.f32 %v627_v31, %v618_v24  ;;  %v4057_v62 = vsel %vm16339_vm5, %v12342_v56, %v4056_v57  ;;  %v14554_v52 = vld [vmem:[%s20259_s5 + $0x144] ss:$8 sps:$4 sm:$0xff]   ;;  %v14552_v56 = vld [vmem:[%s20259_s5 + $0x140] ss:$8 sps:$4 sm:$0xff]  }
  0x45   : > { %5238 = vmatprep.subr.bf16.mxu0 %v14533_v7  ;;  %v644_v35 = vrot.slane %v643_v32, 2  ;;  %v4065_v3 = vsel %vm16339_vm5, %v12344_v58, %v4064_v60  ;;  %v11778_v58 = vld [vmem:[%s16242_s15 + $0x128] sm:$0x88]  ;;  %v11782_v60 = vld [vmem:[%s16242_s15 + $0x158] sm:$0x88] }
  0x46   : > { %v629_v37 = vrot.slane %v628_v33, 4  ;;  %v12424_v6 = vcombine.high %v4057_v62, %v4065_v3  ;;  %v12423_v7 = vcombine.low %v4057_v62, %v4065_v3  ;;  %v14591_v62 = vld [vmem:[%s20255_s1 + $0x8a0] ss:$8 sps:$4 sm:$0xff]   ;;  %v11788_v3 = vld [vmem:[%s16242_s15 + $0x198] sm:$0x77] }
  0x47   : > { %4669 = vmatmul.mubr.bf16.vlgmr.msra.gmra.mrb[0].mxu0 %v12419_v12  ;;  %v645_v38 = vadd.f32 %v644_v35, %v643_v32  ;;  %v3986_v12 = vld [vmem:[%s16242_s15 + $0xe8] sm:$0x33]  ;;  %v3992_v35 = vld [vmem:[%s16242_s15 + $0x138] sm:$0xcc] }
  0x48   : > { %5239 = vmatpush1.bf16.msra.mxu0 %v14531_v13  ;;  %v630_v40 = vadd.f32 %v629_v37, %v628_v33  ;;  %4678 = vmatprep.mubr.bf16.mxu0 %v12424_v6  ;;  %v3988_v13 = vld [vmem:[%s16242_s15 + $0x108] sm:$0xcc] }
  0x49   : > { %5240 = vmatprep.subr.bf16.mxu0 %v14539_v19  ;;  %v646_v42 = vrot.slane %v645_v38, 1  ;;  %v4072_v19 = vrot.slane %v3986_v12, 6  ;;  %v12348_v20 = vrot.slane %v3988_v13, 10  ;;  %v14540_v32 = vld [vmem:[%s20259_s5 + $0x120] ss:$8 sps:$4 sm:$0xff]   ;;  %v11810_v12 = vrot.slane %v11778_v58, 11 }
  0x4a   : > { %v631_v45 = vrot.slane %v630_v40, 2  ;;  %v14581_v33 = vld [vmem:[%s20255_s1 + $0x884] ss:$8 sps:$4 sm:$0xff]  }
  0x4b   : > { %v647_v46 = vadd.f32 %v646_v42, %v645_v38  ;;  %v4073_v24 = vsel %vm16339_vm5, %v12346_v18, %v4072_v19  ;;  %v3996_v37 = vld [vmem:[%s16242_s15 + $0x168] sm:$0xcc]  ;;  %v3998_v38 = vld [vmem:[%s16242_s15 + $0x178] sm:$0x33] }
  0x4c   : > { %5241 = vmatpush1.bf16.msra.mxu0 %v14537_v27  ;;  %v632_v50 = vadd.f32 %v631_v45, %v630_v40  ;;  %v4081_v27 = vsel %vm16339_vm5, %v12348_v20, %v4080_v23  ;;  %v12350_v40 = vrot.slane %v3992_v35, 10  ;;  %v12352_v42 = vrot.slane %v3996_v37, 10  ;;  %v14579_v45 = vld [vmem:[%s20255_s1 + $0x880] ss:$8 sps:$4 sm:$0xff]   ;;  %v14566_v18 = vld [vmem:[%s20259_s5 + $0x164] ss:$8 sps:$4 sm:$0xff]  }
  0x4d   : > { %5242 = vmatprep.subr.bf16.mxu0 %v14545_v30  ;;  %v676_v54 = vmul.f32 0.015625, %v647_v46  ;;  %v14573_v30 = vld [vmem:[%s20255_s1 + $0x870] ss:$8 sps:$4 sm:$0xff]   ;;  %v12428_v31 = vcombine.high %v4073_v24, %v4081_v27  ;;  %v4096_v46 = vrot.slane %v3998_v38, 6  ;;  %v11792_v6 = vld [vmem:[%s16242_s15 + $0x1c8] sm:$0x77] }
  0x4e   : > { %v633_v59 = vrot.slane %v632_v50, 1  ;;  %v14597_v19 = vld [vmem:[%s20255_s1 + $0x8b0] ss:$8 sps:$4 sm:$0xff]   ;;  %v11802_v20 = vld [vmem:[%s16242_s15 + $0x248] sm:$0x88]  ;;  %v532_v23 = vrot.slane %v11788_v3, 7 }
  0x4f   : > { %v680_v61 = vpack.c.bf16 %v676_v54, %v676_v54  ;;  %4679 = vmatmul.mubr.bf16.gmra.mrb[4].mxu0 %v12423_v7  ;;  %v4097_v49 = vsel %vm16339_vm5, %v12352_v42, %v4096_v46  ;;  %v14593_v54 = vld [vmem:[%s20255_s1 + $0x8a4] ss:$8 sps:$4 sm:$0xff]   ;;  %v11806_v35 = vld [vmem:[%s16242_s15 + $0x278] sm:$0x88] }
  0x50   : > { %5243 = vmatpush1.bf16.msra.mxu0 %v14543_v34  ;;  %v634_v0 = vadd.f32 %v633_v59, %v632_v50  ;;  %v12427_v34 = vcombine.low %v4073_v24, %v4081_v27  ;;  %4688 = vmatprep.mubr.bf16.mxu0 %v12428_v31  ;;  %v14546_v50 = vld [vmem:[%s20259_s5 + $0x130] ss:$8 sps:$4 sm:$0xff]   ;;  %v11794_v7 = vld [vmem:[%s16242_s15 + $0x1e8] sm:$0x88] }
  0x51   : > { %5244 = vmatprep.subr.bf16.mxu0 %v14551_v36  ;;  %1099 = vmatprep.mubr.bf16.mxu1 %v680_v61  ;;  %v3994_v36 = vld [vmem:[%s16242_s15 + $0x148] sm:$0x33]  ;;  %v11780_v59 = vld [vmem:[%s16242_s15 + $0x138] sm:$0x77]  ;;  %v11818_v31 = vrot.slane %v11794_v7, 11 }
  0x52   : > { %v675_v8 = vmul.f32 0.015625, %v634_v0  ;;  %v14560_v61 = vld [vmem:[%s20259_s5 + $0x154] ss:$8 sps:$4 sm:$0xff]   ;;  %v11784_v0 = vld [vmem:[%s16242_s15 + $0x168] sm:$0x77]  ;;  %v516_v13 = vrot.slane %v11780_v59, 7 }
  0x53   : > { %v524_v17 = vrot.slane %v11784_v0, 7  ;;  %v14605_v27 = vld [vmem:[%s20255_s1 + $0x8c4] ss:$8 sps:$4 sm:$0xff]   ;;  %v14609_v7 = vld [vmem:[%s20255_s1 + $0x8d0] ss:$8 sps:$4 sm:$0xff]  }
  0x54   : > { %5245 = vmatpush1.bf16.msra.mxu0 %v14549_v41  ;;  %v679_v16 = vpack.c.bf16 %v675_v8, %v675_v8  ;;  %v4088_v41 = vrot.slane %v3994_v36, 6  ;;  %v11796_v8 = vld [vmem:[%s16242_s15 + $0x1f8] sm:$0x77] }
  0x55   : > { %5246 = vmatprep.subr.bf16.mxu0 %v14557_v44  ;;  %v14548_v44 = vld [vmem:[%s20259_s5 + $0x134] ss:$8 sps:$4 sm:$0xff]  }
  0x56   : > { %1100 = vmatmul.mubr.bf16.vlgmr.msra.gmra.mrb[0].mxu1 %v679_v16  ;;  %v11812_v16 = vrot.slane %v11782_v60, 11 }
  0x57   : > { %1109 = vmatpush1.bf16.msra.mxu1 %v14528_v4  ;;  %4689 = vmatmul.mubr.bf16.gmra.mrb[8].mxu0 %v12427_v34  ;;  %v14599_v4 = vld [vmem:[%s20255_s1 + $0x8b4] ss:$8 sps:$4 sm:$0xff]  }
  0x58   : > { %5247 = vmatpush1.bf16.msra.mxu0 %v14555_v47  ;;  %1110 = vmatprep.subr.bf16.mxu1 %v14536_v9  ;;  %v14587_v47 = vld [vmem:[%s20255_s1 + $0x894] ss:$8 sps:$4 sm:$0xff]  }
  0x59   : > { %5248 = vmatprep.subr.bf16.mxu0 %v14563_v48  ;;  %v4089_v48 = vsel %vm16339_vm5, %v12350_v40, %v4088_v41  ;;  %v11798_v9 = vld [vmem:[%s16242_s15 + $0x218] sm:$0x88]  ;;  %v11804_v34 = vld [vmem:[%s16242_s15 + $0x258] sm:$0x77]  ;;  %v11808_v41 = vld [vmem:[%s16242_s15 + $0x288] sm:$0x77] }
  0x5a   : > { %v12432_v51 = vcombine.high %v4089_v48, %v4097_v49  ;;  %v12431_v57 = vcombine.low %v4089_v48, %v4097_v49  ;;  %v11820_v37 = vrot.slane %v11798_v9, 11  ;;  %v564_v48 = vrot.slane %v11804_v34, 7  ;;  %v14582_v34 = vld [vmem:[%s20259_s5 + $0x190] ss:$8 sps:$4 sm:$0xff]  }
  0x5b   : > { %1111 = vmatpush1.bf16.msra.mxu1 %v14534_v25  ;;  %v540_v25 = vrot.slane %v11792_v6, 7  ;;  %v572_v58 = vrot.slane %v11808_v41, 7  ;;  %v14578_v6 = vld [vmem:[%s20259_s5 + $0x184] ss:$8 sps:$4 sm:$0xff]   ;;  %v14621_v41 = vld [vmem:[%s20255_s1 + $0x8f0] ss:$8 sps:$4 sm:$0xff]  }
  0x5c   : > { %5249 = vmatpush1.bf16.msra.mxu0 %v14561_v2  ;;  %1112 = vmatprep.subr.bf16.mxu1 %v14542_v29  ;;  %v11786_v2 = vld [vmem:[%s16242_s15 + $0x188] sm:$0x88]  ;;  %v16535_v29 = vsel %vm16279_vm3, %v11810_v12, %v516_v13 }
  0x5d   : > { %5250 = vmatprep.subr.bf16.mxu0 %v14569_v5  ;;  %4698 = vmatprep.mubr.bf16.mxu0 %v12432_v51  ;;  %v11790_v5 = vld [vmem:[%s16242_s15 + $0x1b8] sm:$0x88]  ;;  %v593_v42 = vunpack.c.h.bf16 %v16535_v29  ;;  %v14603_v51 = vld [vmem:[%s20255_s1 + $0x8c0] ss:$8 sps:$4 sm:$0xff]   ;;  %v592_v59 = vunpack.c.l.bf16 %v16535_v29 }
  0x5e   : > { %v11816_v24 = vrot.slane %v11790_v5, 11 }
  0x5f   : > { %1113 = vmatpush1.bf16.msra.mxu1 %v14540_v32  ;;  %4699 = vmatmul.mubr.bf16.gmra.mrb[12].mxu0 %v12431_v57  ;;  %v548_v32 = vrot.slane %v11796_v8, 7  ;;  %v14611_v57 = vld [vmem:[%s20255_s1 + $0x8d4] ss:$8 sps:$4 sm:$0xff]  }
  0x60   : > { %5251 = vmatpush1.bf16.msra.mxu0 %v14567_v10  ;;  %1114 = vmatprep.subr.bf16.mxu1 %v14548_v44  ;;  %v11800_v10 = vld [vmem:[%s16242_s15 + $0x228] sm:$0x77]  ;;  %v16550_v40 = vsel %vm16279_vm3, %v11816_v24, %v540_v25 }
  0x61   : > { %5252 = vmatprep.subr.bf16.mxu0 %v14575_v21  ;;  %v11814_v21 = vrot.slane %v11786_v2, 11  ;;  %v556_v38 = vrot.slane %v11800_v10, 7  ;;  %v16560_v46 = vsel %vm16279_vm3, %v11818_v31, %v548_v32  ;;  %v14570_v2 = vld [vmem:[%s20259_s5 + $0x170] ss:$8 sps:$4 sm:$0xff]   ;;  %v14617_v10 = vld [vmem:[%s20255_s1 + $0x8e4] ss:$8 sps:$4 sm:$0xff]  }
  0x62   : > { %v608_v12 = vunpack.c.l.bf16 %v16560_v46 }
  0x63   : > { %1115 = vmatpush1.bf16.msra.mxu1 %v14546_v50  ;;  %v16546_v36 = vsel %vm16279_vm3, %v11814_v21, %v532_v23  ;;  %v14572_v50 = vld [vmem:[%s20259_s5 + $0x174] ss:$8 sps:$4 sm:$0xff]   ;;  %v14615_v23 = vld [vmem:[%s20255_s1 + $0x8e0] ss:$8 sps:$4 sm:$0xff]  }
  0x64   : > { %5253 = vmatpush1.bf16.msra.mxu0 %v14573_v30  ;;  %1116 = vmatprep.subr.bf16.mxu1 %v14554_v52  ;;  %v16539_v30 = vsel %vm16279_vm3, %v11812_v16, %v524_v17  ;;  %v601_v49 = vunpack.c.h.bf16 %v16546_v36  ;;  %v16571_v52 = vsel %vm16279_vm3, %v11820_v37, %v556_v38  ;;  %v14584_v21 = vld [vmem:[%s20259_s5 + $0x194] ss:$8 sps:$4 sm:$0xff]   ;;  %v14590_v38 = vld [vmem:[%s20259_s5 + $0x1a4] ss:$8 sps:$4 sm:$0xff]  }
  0x65   : > { %5254 = vmatprep.subr.bf16.mxu0 %v14581_v33  ;;  %v14626_v33 = vld [vmem:[%s16242_s15 + $0x124] ss:$48 sps:$4 sm:$0xff]   ;;  %v597_v44 = vunpack.c.h.bf16 %v16539_v30  ;;  %v596_v60 = vunpack.c.l.bf16 %v16539_v30  ;;  %v613_v8 = vunpack.c.h.bf16 %v16571_v52 }
  0x66   : > { %5270 = vmatprep.mubr.bf16.mxu0 %v14626_v33 }
  0x67   : > { %1117 = vmatpush1.bf16.msra.mxu1 %v14552_v56  ;;  %v661_v56 = vadd.f32 %v597_v44, %v593_v42  ;;  %v648_v5 = vadd.f32 %v596_v60, %v592_v59  ;;  %v14594_v60 = vld [vmem:[%s20259_s5 + $0x1b0] ss:$8 sps:$4 sm:$0xff]  }
  0x68   : > { %5255 = vmatpush1.bf16.msra.mxu0 %v14579_v45  ;;  %1118 = vmatprep.subr.bf16.mxu1 %v14560_v61  ;;  %v14564_v45 = vld [vmem:[%s20259_s5 + $0x160] ss:$8 sps:$4 sm:$0xff]   ;;  %v600_v61 = vunpack.c.l.bf16 %v16546_v36 }
  0x69   : > { %5256 = vmatprep.subr.bf16.mxu0 %v14587_v47  ;;  %v11822_v47 = vrot.slane %v11802_v20, 11  ;;  %v662_v0 = vadd.f32 %v661_v56, %v601_v49  ;;  %v14596_v49 = vld [vmem:[%s20259_s5 + $0x1b4] ss:$8 sps:$4 sm:$0xff]  }
  0x6a   : > { %v649_v13 = vadd.f32 %v648_v5, %v600_v61  ;;  %v14632_v56 = vld [vmem:[%s20255_s1 + $0x914] ss:$8 sps:$4 sm:$0xff]   ;;  %v14635_v5 = vld [vmem:[%s20255_s1 + $0x924] ss:$8 sps:$4 sm:$0xff]  }
  0x6b   : > { %1119 = vmatpush1.bf16.msra.mxu1 %v14558_v11  ;;  %v16586_v3 = vsel %vm16279_vm3, %v11822_v47, %v564_v48  ;;  %v14588_v47 = vld [vmem:[%s20259_s5 + $0x1a0] ss:$8 sps:$4 sm:$0xff]  }
  0x6c   : > { %5257 = vmatpush1.bf16.msra.mxu0 %v14585_v53  ;;  %1120 = vmatprep.subr.bf16.mxu1 %v14566_v18  ;;  %v11824_v53 = vrot.slane %v11806_v35, 11  ;;  %v617_v16 = vunpack.c.h.bf16 %v16586_v3  ;;  %v14576_v18 = vld [vmem:[%s20259_s5 + $0x180] ss:$8 sps:$4 sm:$0xff]   ;;  %v616_v31 = vunpack.c.l.bf16 %v16586_v3 }
  0x6d   : > { %5258 = vmatprep.subr.bf16.mxu0 %v14593_v54  ;;  %v605_v54 = vunpack.c.h.bf16 %v16550_v40 }
  0x6e   : > { %v16601_v11 = vsel %vm16279_vm3, %v11824_v53, %v572_v58  ;;  %v14657_v58 = vld [vmem:[%s16242_s15 + $0x184] ss:$48 sps:$4 sm:$0xff]  }
  0x6f   : > { %1121 = vmatpush1.bf16.msra.mxu1 %v14564_v45  ;;  %v663_v9 = vadd.f32 %v662_v0, %v605_v54  ;;  %v621_v24 = vunpack.c.h.bf16 %v16601_v11  ;;  %v620_v35 = vunpack.c.l.bf16 %v16601_v11  ;;  %v14629_v45 = vld [vmem:[%s20255_s1 + $0x904] ss:$8 sps:$4 sm:$0xff]   ;;  %v14627_v54 = vld [vmem:[%s20255_s1 + $0x900] ss:$8 sps:$4 sm:$0xff]  }
  0x70   : > { %5259 = vmatpush1.bf16.msra.mxu0 %v14591_v62  ;;  %v609_v62 = vunpack.c.h.bf16 %v16560_v46  ;;  %1122 = vmatprep.subr.bf16.mxu1 %v14572_v50 }
  0x71   : > { %5260 = vmatprep.subr.bf16.mxu0 %v14599_v4  ;;  %v604_v4 = vunpack.c.l.bf16 %v16550_v40 }
  0x72   : > { %v664_v17 = vadd.f32 %v663_v9, %v609_v62  ;;  %v14602_v62 = vld [vmem:[%s20259_s5 + $0x1c4] ss:$8 sps:$4 sm:$0xff]  }
  0x73   : > { %1123 = vmatpush1.bf16.msra.mxu1 %v14570_v2  ;;  %v650_v20 = vadd.f32 %v649_v13, %v604_v4  ;;  %v14630_v2 = vld [vmem:[%s20255_s1 + $0x910] ss:$8 sps:$4 sm:$0xff]   ;;  %v14633_v13 = vld [vmem:[%s20255_s1 + $0x920] ss:$8 sps:$4 sm:$0xff]  }
  0x74   : > { %5261 = vmatpush1.bf16.msra.mxu0 %v14597_v19  ;;  %v612_v19 = vunpack.c.l.bf16 %v16571_v52  ;;  %1124 = vmatprep.subr.bf16.mxu1 %v14578_v6  ;;  %v665_v25 = vadd.f32 %v664_v17, %v613_v8  ;;  %v14600_v6 = vld [vmem:[%s20259_s5 + $0x1c0] ss:$8 sps:$4 sm:$0xff]   ;;  %v14608_v8 = vld [vmem:[%s20259_s5 + $0x1d4] ss:$8 sps:$4 sm:$0xff]  }
  0x75   : > { %5262 = vmatprep.subr.bf16.mxu0 %v14605_v27  ;;  %v14623_v27 = vld [vmem:[%s20255_s1 + $0x8f4] ss:$8 sps:$4 sm:$0xff]   ;;  %v651_v32 = vadd.f32 %v650_v20, %v608_v12  ;;  %v14606_v20 = vld [vmem:[%s20259_s5 + $0x1d0] ss:$8 sps:$4 sm:$0xff]  }
  0x76   : > { %v666_v33 = vadd.f32 %v665_v25, %v617_v16  ;;  %v14638_v16 = vld [vmem:[%s20255_s1 + $0x934] ss:$8 sps:$4 sm:$0xff]   ;;  %v14641_v25 = vld [vmem:[%s20255_s1 + $0x944] ss:$8 sps:$4 sm:$0xff]  }
  0x77   : > { %1125 = vmatpush1.bf16.msra.mxu1 %v14576_v18  ;;  %v652_v37 = vadd.f32 %v651_v32, %v612_v19  ;;  %v14666_v17 = vld [vmem:[%s16242_s15 + $0x1e4] ss:$48 sps:$4 sm:$0xff]  }
  0x78   : > { %5263 = vmatpush1.bf16.msra.mxu0 %v14603_v51  ;;  %1126 = vmatprep.subr.bf16.mxu1 %v14584_v21  ;;  %v667_v42 = vadd.f32 %v666_v33, %v621_v24  ;;  %v14624_v51 = vld [vmem:[%s16242_s15 + $0x120] ss:$48 sps:$4 sm:$0xff]   ;;  %v14614_v21 = vld [vmem:[%s20259_s5 + $0x1e4] ss:$8 sps:$4 sm:$0xff]   ;;  %v14620_v32 = vld [vmem:[%s20259_s5 + $0x1f4] ss:$8 sps:$4 sm:$0xff]  }
  0x79   : > { %5264 = vmatprep.subr.bf16.mxu0 %v14611_v57  ;;  %v653_v44 = vadd.f32 %v652_v37, %v616_v31  ;;  %v14636_v24 = vld [vmem:[%s20255_s1 + $0x930] ss:$8 sps:$4 sm:$0xff]   ;;  %v14675_v37 = vld [vmem:[%s16242_s15 + $0x244] ss:$48 sps:$4 sm:$0xff]  }
  0x7a   : > { %v668_v48 = vrot.slane %v667_v42, 4  ;;  %v14671_v33 = vld [vmem:[%s16242_s15 + $0x1e0] ss:$48 sps:$4 sm:$0xff]  }
  0x7b   : > { %1127 = vmatpush1.bf16.msra.mxu1 %v14582_v34  ;;  %v654_v50 = vadd.f32 %v653_v44, %v620_v35  ;;  %v14639_v34 = vld [vmem:[%s20255_s1 + $0x940] ss:$8 sps:$4 sm:$0xff]   ;;  %v14644_v35 = vld [vmem:[%s20255_s1 + $0x954] ss:$8 sps:$4 sm:$0xff]   ;;  %v14647_v44 = vld [vmem:[%s20255_s1 + $0x964] ss:$8 sps:$4 sm:$0xff]  }
  0x7c   : > { %5265 = vmatpush1.bf16.msra.mxu0 %v14609_v7  ;;  %1128 = vmatprep.subr.bf16.mxu1 %v14590_v38  ;;  %v669_v53 = vadd.f32 %v668_v48, %v667_v42  ;;  %v14642_v42 = vld [vmem:[%s20255_s1 + $0x950] ss:$8 sps:$4 sm:$0xff]  }
  0x7d   : > { %5266 = vmatprep.subr.bf16.mxu0 %v14617_v10  ;;  %v655_v57 = vrot.slane %v654_v50, 4  ;;  %v14662_v10 = vld [vmem:[%s16242_s15 + $0x180] ss:$48 sps:$4 sm:$0xff]  }
  0x7e   : > { %v670_v59 = vrot.slane %v669_v53, 2  ;;  %v14680_v48 = vld [vmem:[%s16242_s15 + $0x240] ss:$48 sps:$4 sm:$0xff]  }
  0x7f   : > { %1129 = vmatpush1.bf16.msra.mxu1 %v14588_v47  ;;  %v656_v61 = vadd.f32 %v655_v57, %v654_v50  ;;  %v14645_v47 = vld [vmem:[%s20255_s1 + $0x960] ss:$8 sps:$4 sm:$0xff]   ;;  %v14650_v50 = vld [vmem:[%s20255_s1 + $0x974] ss:$8 sps:$4 sm:$0xff]   ;;  %v14654_v57 = vld [vmem:[%s20255_s1 + $0x990] ss:$8 sps:$4 sm:$0xff]  }
  0x80   : > { %5267 = vmatpush1.bf16.msra.mxu0 %v14615_v23  ;;  %1130 = vmatprep.subr.bf16.mxu1 %v14596_v49  ;;  %v671_v0 = vadd.f32 %v670_v59, %v669_v53  ;;  %v14686_v49 = vld [vmem:[%s16242_s15 + $0x12c] ss:$48 sps:$4 sm:$0xff]   ;;  %v14659_v59 = vld [vmem:[%s20255_s1 + $0x9a0] ss:$8 sps:$4 sm:$0xff]  }
  0x81   : > { %5268 = vmatprep.subr.bf16.mxu0 %v14623_v27  ;;  %v657_v4 = vrot.slane %v656_v61, 2  ;;  %v14612_v27 = vld [vmem:[%s20259_s5 + $0x1e0] ss:$8 sps:$4 sm:$0xff]   ;;  %v14653_v53 = vld [vmem:[%s20255_s1 + $0x984] ss:$8 sps:$4 sm:$0xff]  }
  0x82   : > { %v672_v7 = vrot.slane %v671_v0, 1 }
  0x83   : > { %1131 = vmatpush1.bf16.msra.mxu1 %v14594_v60  ;;  %v658_v9 = vadd.f32 %v657_v4, %v656_v61  ;;  %v14665_v60 = vld [vmem:[%s20255_s1 + $0x9b4] ss:$8 sps:$4 sm:$0xff]   ;;  %v14768_v61 = vld [vmem:[%s20262_s8] ss:$8 sps:$4 sm:$0xff]   ;;  %v14774_v4 = vld [vmem:[%s20262_s8 + $0x10] ss:$8 sps:$4 sm:$0xff]  }
  0x84   : > { %5269 = vmatpush1.bf16.msra.mxu0 %v14621_v41  ;;  %1132 = vmatprep.subr.bf16.mxu1 %v14602_v62  ;;  %v673_v12 = vadd.f32 %v672_v7, %v671_v0  ;;  %v14618_v41 = vld [vmem:[%s20259_s5 + $0x1f0] ss:$8 sps:$4 sm:$0xff]   ;;  %v14770_v62 = vld [vmem:[%s20262_s8 + $0x4] ss:$8 sps:$4 sm:$0xff]  }
  0x85   : > { %5311 = vmatprep.subr.bf16.mxu0 %v14629_v45  ;;  %v659_v19 = vrot.slane %v658_v9, 1  ;;  %v14663_v0 = vld [vmem:[%s20255_s1 + $0x9b0] ss:$8 sps:$4 sm:$0xff]   ;;  %v14782_v7 = vld [vmem:[%s20262_s8 + $0x24] ss:$8 sps:$4 sm:$0xff]  }
  0x86   : > { %v678_v18 = vmul.f32 0.015625, %v673_v12  ;;  %v14672_v12 = vld [vmem:[%s20255_s1 + $0x9d0] ss:$8 sps:$4 sm:$0xff]  }
  0x87   : > { %5271 = vmatmul.mubr.bf16.vlgmr.msra.gmra.mrb[0].mxu0 %v14624_v51  ;;  %1133 = vmatpush1.bf16.msra.mxu1 %v14600_v6  ;;  %v660_v31 = vadd.f32 %v659_v19, %v658_v9  ;;  %v14648_v51 = vld [vmem:[%s20255_s1 + $0x970] ss:$8 sps:$4 sm:$0xff]   ;;  %v14668_v6 = vld [vmem:[%s20255_s1 + $0x9c0] ss:$8 sps:$4 sm:$0xff]   ;;  %v14683_v19 = vld [vmem:[%s20255_s1 + $0x9f4] ss:$8 sps:$4 sm:$0xff]  }
  0x88   : > { %5312 = vmatpush1.bf16.msra.mxu0 %v14627_v54  ;;  %5280 = vmatprep.mubr.bf16.mxu0 %v14657_v58  ;;  %v682_v23 = vpack.c.bf16 %v678_v18, %v678_v18  ;;  %v14651_v54 = vld [vmem:[%s20255_s1 + $0x980] ss:$8 sps:$4 sm:$0xff]   ;;  %v14661_v58 = vld [vmem:[%s20255_s1 + $0x9a4] ss:$8 sps:$4 sm:$0xff]  }
  0x89   : > { %5313 = vmatprep.subr.bf16.mxu0 %v14632_v56  ;;  %1134 = vmatprep.subr.bf16.mxu1 %v14608_v8  ;;  %v677_v38 = vmul.f32 0.015625, %v660_v31  ;;  %v14656_v56 = vld [vmem:[%s20255_s1 + $0x994] ss:$8 sps:$4 sm:$0xff]   ;;  %v14780_v9 = vld [vmem:[%s20262_s8 + $0x20] ss:$8 sps:$4 sm:$0xff]  }
  0x8a   : > { %1140 = vmatprep.mubr.bf16.mxu1 %v682_v23  ;;  %v14674_v8 = vld [vmem:[%s20255_s1 + $0x9d4] ss:$8 sps:$4 sm:$0xff]   ;;  %v14677_v18 = vld [vmem:[%s20255_s1 + $0x9e0] ss:$8 sps:$4 sm:$0xff]   ;;  %v14681_v23 = vld [vmem:[%s20255_s1 + $0x9f0] ss:$8 sps:$4 sm:$0xff]  }
  0x8b   : > { %1135 = vmatpush1.bf16.msra.mxu1 %v14606_v20  ;;  %v681_v45 = vpack.c.bf16 %v677_v38, %v677_v38  ;;  %v14792_v20 = vld [vmem:[%s20262_s8 + $0x40] ss:$8 sps:$4 sm:$0xff]   ;;  %v14806_v31 = vld [vmem:[%s20262_s8 + $0x64] ss:$8 sps:$4 sm:$0xff]   ;;  %v14690_v38 = vld [vmem:[%s20255_s1 + $0xa10] ss:$8 sps:$4 sm:$0xff]  }
  0x8c   : > { %5314 = vmatpush1.bf16.msra.mxu0 %v14630_v2  ;;  %1136 = vmatprep.subr.bf16.mxu1 %v14614_v21  ;;  %v14670_v2 = vld [vmem:[%s20255_s1 + $0x9c4] ss:$8 sps:$4 sm:$0xff]   ;;  %v14800_v21 = vld [vmem:[%s20262_s8 + $0x54] ss:$8 sps:$4 sm:$0xff]  }
  0x8d   : > { %5315 = vmatprep.subr.bf16.mxu0 %v14635_v5  ;;  %v14776_v5 = vld [vmem:[%s20262_s8 + $0x14] ss:$8 sps:$4 sm:$0xff]  }
  0x8f   : > { %5281 = vmatmul.mubr.bf16.gmra.mrb[4].mxu0 %v14662_v10  ;;  %1137 = vmatpush1.bf16.msra.mxu1 %v14612_v27  ;;  %v14788_v10 = vld [vmem:[%s20262_s8 + $0x34] ss:$8 sps:$4 sm:$0xff]   ;;  %v14684_v27 = vld [vmem:[%s16242_s15 + $0x128] ss:$48 sps:$4 sm:$0xff]  }
  0x90   : > { %5316 = vmatpush1.bf16.msra.mxu0 %v14633_v13  ;;  %5290 = vmatprep.mubr.bf16.mxu0 %v14666_v17  ;;  %v14679_v13 = vld [vmem:[%s20255_s1 + $0x9e4] ss:$8 sps:$4 sm:$0xff]  }
  0x91   : > { %5317 = vmatprep.subr.bf16.mxu0 %v14638_v16  ;;  %1138 = vmatprep.subr.bf16.mxu1 %v14620_v32  ;;  %v14786_v16 = vld [vmem:[%s20262_s8 + $0x30] ss:$8 sps:$4 sm:$0xff]   ;;  %v14794_v17 = vld [vmem:[%s20262_s8 + $0x44] ss:$8 sps:$4 sm:$0xff]   ;;  %v14687_v32 = vld [vmem:[%s20255_s1 + $0xa00] ss:$8 sps:$4 sm:$0xff]  }
  0x93   : > { %1139 = vmatpush1.bf16.msra.mxu1 %v14618_v41  ;;  %v14695_v41 = vld [vmem:[%s20255_s1 + $0xa24] ss:$8 sps:$4 sm:$0xff]  }
  0x94   : > { %5318 = vmatpush1.bf16.msra.mxu0 %v14636_v24  ;;  %1373 = vmatprep.subr.bf16.mxu1 %v14770_v62  ;;  %v14689_v24 = vld [vmem:[%s20255_s1 + $0xa04] ss:$8 sps:$4 sm:$0xff]   ;;  %v14828_v62 = vld [vmem:[%s20262_s8 + $0xa0] ss:$8 sps:$4 sm:$0xff]  }
  0x95   : > { %5319 = vmatprep.subr.bf16.mxu0 %v14641_v25  ;;  %v14798_v25 = vld [vmem:[%s20262_s8 + $0x50] ss:$8 sps:$4 sm:$0xff]  }
  0x96   : > { %1141 = vmatmul.mubr.bf16.vlgmr.msra.gmra.mrb[0].mxu1 %v681_v45  ;;  %v14693_v45 = vld [vmem:[%s20255_s1 + $0xa20] ss:$8 sps:$4 sm:$0xff]  }
  0x97   : > { %5291 = vmatmul.mubr.bf16.gmra.mrb[8].mxu0 %v14671_v33  ;;  %1374 = vmatpush1.bf16.msra.mxu1 %v14768_v61  ;;  %v14717_v33 = vld [vmem:[%s16242_s15 + $0x18c] ss:$48 sps:$4 sm:$0xff]  }
  0x98   : > { %5320 = vmatpush1.bf16.msra.mxu0 %v14639_v34  ;;  %5300 = vmatprep.mubr.bf16.mxu0 %v14675_v37  ;;  %v14692_v34 = vld [vmem:[%s20255_s1 + $0xa14] ss:$8 sps:$4 sm:$0xff]  }
  0x99   : > { %5321 = vmatprep.subr.bf16.mxu0 %v14644_v35  ;;  %1375 = vmatprep.subr.bf16.mxu1 %v14776_v5  ;;  %v14804_v35 = vld [vmem:[%s20262_s8 + $0x60] ss:$8 sps:$4 sm:$0xff]   ;;  %v14812_v37 = vld [vmem:[%s20262_s8 + $0x74] ss:$8 sps:$4 sm:$0xff]   ;;  %v14834_v5 = vld [vmem:[%s20262_s8 + $0xb0] ss:$8 sps:$4 sm:$0xff]  }
  0x9a   : > { %v14735_v61 = vld [vmem:[%s16242_s15 + $0x24c] ss:$48 sps:$4 sm:$0xff]  }
  0x9b   : > { %1376 = vmatpush1.bf16.msra.mxu1 %v14774_v4  ;;  %v14707_v4 = vld [vmem:[%s20255_s1 + $0xa64] ss:$8 sps:$4 sm:$0xff]  }
  0x9c   : > { %5322 = vmatpush1.bf16.msra.mxu0 %v14642_v42  ;;  %1377 = vmatprep.subr.bf16.mxu1 %v14782_v7  ;;  %v14722_v42 = vld [vmem:[%s16242_s15 + $0x188] ss:$48 sps:$4 sm:$0xff]   ;;  %v14842_v7 = vld [vmem:[%s20262_s8 + $0xc4] ss:$8 sps:$4 sm:$0xff]  }
  0x9d   : > { %5323 = vmatprep.subr.bf16.mxu0 %v14647_v44  ;;  %v14810_v44 = vld [vmem:[%s20262_s8 + $0x70] ss:$8 sps:$4 sm:$0xff]  }
  0x9f   : > { %5301 = vmatmul.mubr.bf16.gmra.mrb[12].mxu0 %v14680_v48  ;;  %1378 = vmatpush1.bf16.msra.mxu1 %v14780_v9  ;;  %v14698_v48 = vld [vmem:[%s20255_s1 + $0xa34] ss:$8 sps:$4 sm:$0xff]  }
  0xa0   : > { %5324 = vmatpush1.bf16.msra.mxu0 %v14645_v47  ;;  %5343 = vmatprep.mubr.bf16.mxu0 %v14686_v49  ;;  %v14818_v47 = vld [vmem:[%s20262_s8 + $0x84] ss:$8 sps:$4 sm:$0xff]   ;;  %v14710_v9 = vld [vmem:[%s20255_s1 + $0xa74] ss:$8 sps:$4 sm:$0xff]  }
  0xa1   : > { %5325 = vmatprep.subr.bf16.mxu0 %v14650_v50  ;;  %1379 = vmatprep.subr.bf16.mxu1 %v14788_v10  ;;  %v14726_v49 = vld [vmem:[%s16242_s15 + $0x1ec] ss:$48 sps:$4 sm:$0xff]   ;;  %v14816_v50 = vld [vmem:[%s20262_s8 + $0x80] ss:$8 sps:$4 sm:$0xff]   ;;  %v16896_v10 = vcombine.high %v16295_v14, %v16299_v15 }
  0xa3   : > { %1380 = vmatpush1.bf16.msra.mxu1 %v14786_v16  ;;  %v14708_v16 = vld [vmem:[%s20255_s1 + $0xa70] ss:$8 sps:$4 sm:$0xff]  }
  0xa4   : > { %5326 = vmatpush1.bf16.msra.mxu0 %v14648_v51  ;;  %1381 = vmatprep.subr.bf16.mxu1 %v14794_v17  ;;  %v14824_v51 = vld [vmem:[%s20262_s8 + $0x94] ss:$8 sps:$4 sm:$0xff]   ;;  %v14713_v17 = vld [vmem:[%s20255_s1 + $0xa84] ss:$8 sps:$4 sm:$0xff]  }
  0xa5   : > { %5327 = vmatprep.subr.bf16.mxu0 %v14653_v53  ;;  %v14696_v53 = vld [vmem:[%s20255_s1 + $0xa30] ss:$8 sps:$4 sm:$0xff]  }
  0xa7   : > { %1382 = vmatpush1.bf16.msra.mxu1 %v14792_v20  ;;  %v14716_v20 = vld [vmem:[%s20255_s1 + $0xa94] ss:$8 sps:$4 sm:$0xff]  }
  0xa8   : > { %5328 = vmatpush1.bf16.msra.mxu0 %v14651_v54  ;;  %1383 = vmatprep.subr.bf16.mxu1 %v14800_v21  ;;  %v14701_v54 = vld [vmem:[%s20255_s1 + $0xa44] ss:$8 sps:$4 sm:$0xff]   ;;  %v14714_v21 = vld [vmem:[%s20255_s1 + $0xa90] ss:$8 sps:$4 sm:$0xff]  }
  0xa9   : > { %5329 = vmatprep.subr.bf16.mxu0 %v14656_v56  ;;  %v14731_v56 = vld [vmem:[%s16242_s15 + $0x1e8] ss:$48 sps:$4 sm:$0xff]  }
  0xab   : > { %1384 = vmatpush1.bf16.msra.mxu1 %v14798_v25  ;;  %v14725_v25 = vld [vmem:[%s20255_s1 + $0xab4] ss:$8 sps:$4 sm:$0xff]  }
  0xac   : > { %5330 = vmatpush1.bf16.msra.mxu0 %v14654_v57  ;;  %1385 = vmatprep.subr.bf16.mxu1 %v14806_v31  ;;  %v14822_v57 = vld [vmem:[%s20262_s8 + $0x90] ss:$8 sps:$4 sm:$0xff]   ;;  %v14730_v31 = vld [vmem:[%s20255_s1 + $0xac4] ss:$8 sps:$4 sm:$0xff]  }
  0xad   : > { %5331 = vmatprep.subr.bf16.mxu0 %v14661_v58  ;;  %v14830_v58 = vld [vmem:[%s20262_s8 + $0xa4] ss:$8 sps:$4 sm:$0xff]  }
  0xaf   : > { %1386 = vmatpush1.bf16.msra.mxu1 %v14804_v35  ;;  %v14734_v35 = vld [vmem:[%s20255_s1 + $0xad4] ss:$8 sps:$4 sm:$0xff]  }
  0xb0   : > { %5332 = vmatpush1.bf16.msra.mxu0 %v14659_v59  ;;  %1387 = vmatprep.subr.bf16.mxu1 %v14812_v37  ;;  %v14699_v59 = vld [vmem:[%s20255_s1 + $0xa40] ss:$8 sps:$4 sm:$0xff]   ;;  %v14860_v37 = vld [vmem:[%s20262_s8 + $0xf4] ss:$8 sps:$4 sm:$0xff]  }
  0xb1   : > { %5333 = vmatprep.subr.bf16.mxu0 %v14665_v60  ;;  %v14704_v60 = vld [vmem:[%s20255_s1 + $0xa54] ss:$8 sps:$4 sm:$0xff]  }
  0xb3   : > { %1388 = vmatpush1.bf16.msra.mxu1 %v14810_v44  ;;  %v14866_v44 = vld [vmem:[%s20255_s1 + $0x4] ss:$8 sps:$4 sm:$0xff]  }
  0xb4   : > { %5334 = vmatpush1.bf16.msra.mxu0 %v14663_v0  ;;  %1389 = vmatprep.subr.bf16.mxu1 %v14818_v47  ;;  %v14836_v0 = vld [vmem:[%s20262_s8 + $0xb4] ss:$8 sps:$4 sm:$0xff]  }
  0xb5   : > { %5335 = vmatprep.subr.bf16.mxu0 %v14670_v2  ;;  %v14702_v2 = vld [vmem:[%s20255_s1 + $0xa50] ss:$8 sps:$4 sm:$0xff]   ;;  %v14743_v47 = vld [vmem:[%s20255_s1 + $0xaf4] ss:$8 sps:$4 sm:$0xff]  }
  0xb7   : > { %1390 = vmatpush1.bf16.msra.mxu1 %v14816_v50  ;;  %v14744_v50 = vld [vmem:[%s20255_s1 + $0xb00] ss:$8 sps:$4 sm:$0xff]  }
  0xb8   : > { %5336 = vmatpush1.bf16.msra.mxu0 %v14668_v6  ;;  %1391 = vmatprep.subr.bf16.mxu1 %v14824_v51  ;;  %v14740_v6 = vld [vmem:[%s16242_s15 + $0x248] ss:$48 sps:$4 sm:$0xff]   ;;  %v16982_v51 = vcombine.low %v16295_v14, %v16299_v15  ;;  %v14752_v14 = vld [vmem:[%s20255_s1 + $0xb24] ss:$8 sps:$4 sm:$0xff]  }
  0xb9   : > { %5337 = vmatprep.subr.bf16.mxu0 %v14674_v8  ;;  %v14705_v8 = vld [vmem:[%s20255_s1 + $0xa60] ss:$8 sps:$4 sm:$0xff]  }
  0xba   : > { %v14750_v15 = vld [vmem:[%s20255_s1 + $0xb20] ss:$8 sps:$4 sm:$0xff]  }
  0xbb   : > { %1392 = vmatpush1.bf16.msra.mxu1 %v14822_v57  ;;  %v17004_v57 = vcombine.low %v16311_v22, %v16316_v26 }
  0xbc   : > { %5338 = vmatpush1.bf16.msra.mxu0 %v14672_v12  ;;  %1393 = vmatprep.subr.bf16.mxu1 %v14830_v58  ;;  %v14840_v12 = vld [vmem:[%s20262_s8 + $0xc0] ss:$8 sps:$4 sm:$0xff]   ;;  %v17008_v58 = vcombine.high %v16321_v28, %v16334_v39 }
  0xbd   : > { %5339 = vmatprep.subr.bf16.mxu0 %v14679_v13  ;;  %v14848_v13 = vld [vmem:[%s20262_s8 + $0xd4] ss:$8 sps:$4 sm:$0xff]  }
  0xbf   : > { %1394 = vmatpush1.bf16.msra.mxu1 %v14828_v62  ;;  %v17030_v62 = vcombine.high %v16357_v55, %v16373_v63 }
  0xc0   : > { %5340 = vmatpush1.bf16.msra.mxu0 %v14677_v18  ;;  %1395 = vmatprep.subr.bf16.mxu1 %v14836_v0  ;;  %v14846_v18 = vld [vmem:[%s20262_s8 + $0xd0] ss:$8 sps:$4 sm:$0xff]   ;;  %v14761_v0 = vld [vmem:[%s20255_s1 + $0xb54] ss:$8 sps:$4 sm:$0xff]  }
  0xc1   : > { %5341 = vmatprep.subr.bf16.mxu0 %v14683_v19  ;;  %v14711_v19 = vld [vmem:[%s20255_s1 + $0xa80] ss:$8 sps:$4 sm:$0xff]  }
  0xc3   : > { %1396 = vmatpush1.bf16.msra.mxu1 %v14834_v5  ;;  %v17052_v5 = vcombine.high %v16535_v29, %v16539_v30 }
  0xc4   : > { %5342 = vmatpush1.bf16.msra.mxu0 %v14681_v23  ;;  %1397 = vmatprep.subr.bf16.mxu1 %v14842_v7  ;;  %v14721_v23 = vld [vmem:[%s20255_s1 + $0xaa4] ss:$8 sps:$4 sm:$0xff]   ;;  %v14765_v7 = vld [vmem:[%s20255_s1 + $0xb70] ss:$8 sps:$4 sm:$0xff]  }
  0xc5   : > { %5817 = vmatprep.subr.bf16.mxu0 %v14689_v24  ;;  %v14719_v24 = vld [vmem:[%s20255_s1 + $0xaa0] ss:$8 sps:$4 sm:$0xff]  }
  0xc7   : > { %5344 = vmatmul.mubr.bf16.vlgmr.msra.gmra.mrb[0].mxu0 %v14684_v27  ;;  %1398 = vmatpush1.bf16.msra.mxu1 %v14840_v12  ;;  %v14723_v27 = vld [vmem:[%s20255_s1 + $0xab0] ss:$8 sps:$4 sm:$0xff]   ;;  %v14785_v12 = vld [vmem:[%s20255_s1 + $0xba4] ss:$8 sps:$4 sm:$0xff]  }
  0xc8   : > { %5818 = vmatpush1.bf16.msra.mxu0 %v14687_v32  ;;  %5353 = vmatprep.mubr.bf16.mxu0 %v14717_v33  ;;  %v14854_v32 = vld [vmem:[%s20262_s8 + $0xe4] ss:$8 sps:$4 sm:$0xff]   ;;  %v14852_v33 = vld [vmem:[%s20262_s8 + $0xe0] ss:$8 sps:$4 sm:$0xff]  }
  0xc9   : > { %5819 = vmatprep.subr.bf16.mxu0 %v14692_v34  ;;  %1399 = vmatprep.subr.bf16.mxu1 %v14848_v13  ;;  %v14728_v34 = vld [vmem:[%s20255_s1 + $0xac0] ss:$8 sps:$4 sm:$0xff]  }
  0xca   : > { %v14783_v13 = vld [vmem:[%s20255_s1 + $0xba0] ss:$8 sps:$4 sm:$0xff]  }
  0xcb   : > { %1400 = vmatpush1.bf16.msra.mxu1 %v14846_v18  ;;  %v14797_v18 = vld [vmem:[%s20255_s1 + $0xbc4] ss:$8 sps:$4 sm:$0xff]  }
  0xcc   : > { %5820 = vmatpush1.bf16.msra.mxu0 %v14690_v38  ;;  %1401 = vmatprep.subr.bf16.mxu1 %v14854_v32  ;;  %v14858_v38 = vld [vmem:[%s20262_s8 + $0xf0] ss:$8 sps:$4 sm:$0xff]   ;;  %v14819_v32 = vld [vmem:[%s20255_s1 + $0xc00] ss:$8 sps:$4 sm:$0xff]  }
  0xcd   : > { %5821 = vmatprep.subr.bf16.mxu0 %v14695_v41  ;;  %v14732_v41 = vld [vmem:[%s20255_s1 + $0xad0] ss:$8 sps:$4 sm:$0xff]  }
  0xcf   : > { %5354 = vmatmul.mubr.bf16.gmra.mrb[4].mxu0 %v14722_v42  ;;  %1402 = vmatpush1.bf16.msra.mxu1 %v14852_v33  ;;  %v14739_v42 = vld [vmem:[%s20255_s1 + $0xae4] ss:$8 sps:$4 sm:$0xff]   ;;  %v17118_v33 = vcombine.low %v16535_v29, %v16539_v30  ;;  %v14831_v30 = vld [vmem:[%s20255_s1 + $0xc20] ss:$8 sps:$4 sm:$0xff]  }
  0xd0   : > { %5822 = vmatpush1.bf16.msra.mxu0 %v14693_v45  ;;  %5363 = vmatprep.mubr.bf16.mxu0 %v14726_v49  ;;  %v14737_v45 = vld [vmem:[%s20255_s1 + $0xae0] ss:$8 sps:$4 sm:$0xff]   ;;  %v14746_v49 = vld [vmem:[%s20255_s1 + $0xb04] ss:$8 sps:$4 sm:$0xff]  }
  0xd1   : > { %5823 = vmatprep.subr.bf16.mxu0 %v14698_v48  ;;  %1403 = vmatprep.subr.bf16.mxu1 %v14860_v37  ;;  %v14741_v48 = vld [vmem:[%s20255_s1 + $0xaf0] ss:$8 sps:$4 sm:$0xff]   ;;  %v14833_v29 = vld [vmem:[%s20255_s1 + $0xc24] ss:$8 sps:$4 sm:$0xff]  }
  0xd2   : > { %v14825_v37 = vld [vmem:[%s20255_s1 + $0xc10] ss:$8 sps:$4 sm:$0xff]  }
  0xd3   : > { %1404 = vmatpush1.bf16.msra.mxu1 %v14858_v38  ;;  %v17140_v38 = vcombine.low %v16546_v36, %v16550_v40 }
  0xd4   : > { %5824 = vmatpush1.bf16.msra.mxu0 %v14696_v53  ;;  %1918 = vmatprep.subr.bf16.mxu1 %v14866_v44  ;;  %v16986_v53 = vcombine.high %v16311_v22, %v16316_v26  ;;  %v14758_v22 = vld [vmem:[%s20255_s1 + $0xb44] ss:$8 sps:$4 sm:$0xff]   ;;  %v14756_v26 = vld [vmem:[%s20255_s1 + $0xb40] ss:$8 sps:$4 sm:$0xff]   ;;  %v14837_v44 = vld [vmem:[%s20255_s1 + $0xc30] ss:$8 sps:$4 sm:$0xff]  }
  0xd5   : > { %5825 = vmatprep.subr.bf16.mxu0 %v14701_v54  ;;  %v14749_v54 = vld [vmem:[%s20255_s1 + $0xb14] ss:$8 sps:$4 sm:$0xff]  }
  0xd7   : > { %5364 = vmatmul.mubr.bf16.gmra.mrb[8].mxu0 %v14731_v56  ;;  %v14747_v56 = vld [vmem:[%s20255_s1 + $0xb10] ss:$8 sps:$4 sm:$0xff]  }
  0xd8   : > { %5826 = vmatpush1.bf16.msra.mxu0 %v14699_v59  ;;  %5373 = vmatprep.mubr.bf16.mxu0 %v14735_v61  ;;  %v14755_v59 = vld [vmem:[%s20255_s1 + $0xb34] ss:$8 sps:$4 sm:$0xff]   ;;  %v17026_v61 = vcombine.low %v16321_v28, %v16334_v39  ;;  %v14764_v28 = vld [vmem:[%s20255_s1 + $0xb64] ss:$8 sps:$4 sm:$0xff]   ;;  %v14762_v39 = vld [vmem:[%s20255_s1 + $0xb60] ss:$8 sps:$4 sm:$0xff]  }
  0xd9   : > { %5827 = vmatprep.subr.bf16.mxu0 %v14704_v60  ;;  %v14753_v60 = vld [vmem:[%s20255_s1 + $0xb30] ss:$8 sps:$4 sm:$0xff]  }
  0xdc   : > { %5828 = vmatpush1.bf16.msra.mxu0 %v14702_v2  ;;  %v14759_v2 = vld [vmem:[%s20255_s1 + $0xb50] ss:$8 sps:$4 sm:$0xff]  }
  0xdd   : > { %5829 = vmatprep.subr.bf16.mxu0 %v14707_v4  ;;  %v17048_v4 = vcombine.low %v16357_v55, %v16373_v63  ;;  %v14773_v55 = vld [vmem:[%s20255_s1 + $0xb84] ss:$8 sps:$4 sm:$0xff]   ;;  %v14771_v63 = vld [vmem:[%s20255_s1 + $0xb80] ss:$8 sps:$4 sm:$0xff]  }
  0xdf   : > { %5374 = vmatmul.mubr.bf16.gmra.mrb[12].mxu0 %v14740_v6  ;;  %v14767_v6 = vld [vmem:[%s20255_s1 + $0xb74] ss:$8 sps:$4 sm:$0xff]  }
  0xe0   : > { %5830 = vmatpush1.bf16.msra.mxu0 %v14705_v8  ;;  %5849 = vmatprep.mubr.bf16.mxu0 %v16896_v10  ;;  %v14779_v8 = vld [vmem:[%s20255_s1 + $0xb94] ss:$8 sps:$4 sm:$0xff]  }
  0xe1   : > { %5831 = vmatprep.subr.bf16.mxu0 %v14710_v9  ;;  %v14777_v9 = vld [vmem:[%s20255_s1 + $0xb90] ss:$8 sps:$4 sm:$0xff]  }
  0xe4   : > { %5832 = vmatpush1.bf16.msra.mxu0 %v14708_v16  ;;  %v14791_v16 = vld [vmem:[%s20255_s1 + $0xbb4] ss:$8 sps:$4 sm:$0xff]  }
  0xe5   : > { %5833 = vmatprep.subr.bf16.mxu0 %v14713_v17  ;;  %v14789_v17 = vld [vmem:[%s20255_s1 + $0xbb0] ss:$8 sps:$4 sm:$0xff]  }
  0xe8   : > { %5834 = vmatpush1.bf16.msra.mxu0 %v14711_v19  ;;  %v14795_v19 = vld [vmem:[%s20255_s1 + $0xbc0] ss:$8 sps:$4 sm:$0xff]  }
  0xe9   : > { %5835 = vmatprep.subr.bf16.mxu0 %v14716_v20  ;;  %v14803_v20 = vld [vmem:[%s20255_s1 + $0xbd4] ss:$8 sps:$4 sm:$0xff]  }
  0xec   : > { %5836 = vmatpush1.bf16.msra.mxu0 %v14714_v21  ;;  %v14801_v21 = vld [vmem:[%s20255_s1 + $0xbd0] ss:$8 sps:$4 sm:$0xff]  }
  0xed   : > { %5837 = vmatprep.subr.bf16.mxu0 %v14721_v23  ;;  %v14809_v23 = vld [vmem:[%s20255_s1 + $0xbe4] ss:$8 sps:$4 sm:$0xff]  }
  0xf0   : > { %5838 = vmatpush1.bf16.msra.mxu0 %v14719_v24  ;;  %v14807_v24 = vld [vmem:[%s20255_s1 + $0xbe0] ss:$8 sps:$4 sm:$0xff]  }
  0xf1   : > { %5839 = vmatprep.subr.bf16.mxu0 %v14725_v25  ;;  %v14815_v25 = vld [vmem:[%s20255_s1 + $0xbf4] ss:$8 sps:$4 sm:$0xff]  }
  0xf4   : > { %5840 = vmatpush1.bf16.msra.mxu0 %v14723_v27  ;;  %v14813_v27 = vld [vmem:[%s20255_s1 + $0xbf0] ss:$8 sps:$4 sm:$0xff]  }
  0xf5   : > { %5841 = vmatprep.subr.bf16.mxu0 %v14730_v31  ;;  %v14821_v31 = vld [vmem:[%s20255_s1 + $0xc04] ss:$8 sps:$4 sm:$0xff]  }
  0xf8   : > { %5842 = vmatpush1.bf16.msra.mxu0 %v14728_v34  ;;  %v17122_v34 = vcombine.high %v16546_v36, %v16550_v40  ;;  %v14845_v36 = vld [vmem:[%s20255_s1 + $0xc44] ss:$8 sps:$4 sm:$0xff]   ;;  %v12785_v40 = vld [vmem:[%s16242_s15 + $0x130] sm:$0xcc] }
  0xf9   : > { %5843 = vmatprep.subr.bf16.mxu0 %v14734_v35  ;;  %v14827_v35 = vld [vmem:[%s20255_s1 + $0xc14] ss:$8 sps:$4 sm:$0xff]  }
  0xfc   : > { %5844 = vmatpush1.bf16.msra.mxu0 %v14732_v41  ;;  %v17144_v41 = vcombine.high %v16560_v46, %v16571_v52 }
  0xfd   : > { %5845 = vmatprep.subr.bf16.mxu0 %v14739_v42  ;;  %v14839_v42 = vld [vmem:[%s20255_s1 + $0xc34] ss:$8 sps:$4 sm:$0xff]  }
 0x100   : > { %5846 = vmatpush1.bf16.msra.mxu0 %v14737_v45  ;;  %v12787_v45 = vld [vmem:[%s16242_s15 + $0x140] sm:$0x33] }
 0x101   : > { %5847 = vmatprep.subr.bf16.mxu0 %v14743_v47  ;;  %v12789_v47 = vld [vmem:[%s16242_s15 + $0x160] sm:$0xcc] }
 0x104   : > { %5848 = vmatpush1.bf16.msra.mxu0 %v14741_v48  ;;  %v12791_v48 = vld [vmem:[%s16242_s15 + $0x170] sm:$0x33] }
 0x105   : > { %5890 = vmatprep.subr.bf16.mxu0 %v14746_v49  ;;  %v14843_v49 = vld [vmem:[%s20255_s1 + $0xc40] ss:$8 sps:$4 sm:$0xff]  }
 0x107   : > { %5850 = vmatmul.mubr.bf16.vlgmr.msra.gmra.mrb[0].mxu0 %v16982_v51 }
 0x108   : > { %5891 = vmatpush1.bf16.msra.mxu0 %v14744_v50  ;;  %5859 = vmatprep.mubr.bf16.mxu0 %v16986_v53  ;;  %v17166_v50 = vcombine.low %v16560_v46, %v16571_v52  ;;  %v14857_v46 = vld [vmem:[%s20255_s1 + $0xc64] ss:$8 sps:$4 sm:$0xff]  }
 0x109   : > { %5892 = vmatprep.subr.bf16.mxu0 %v14749_v54  ;;  %v17170_v54 = vcombine.high %v16586_v3, %v16601_v11 }
 0x10c   : > { %5893 = vmatpush1.bf16.msra.mxu0 %v14747_v56  ;;  %v14851_v56 = vld [vmem:[%s20255_s1 + $0xc54] ss:$8 sps:$4 sm:$0xff]  }
 0x10d   : > { %5894 = vmatprep.subr.bf16.mxu0 %v14752_v14  ;;  %v12817_v14 = vrot.slane %v12785_v40, 10  ;;  %v14899_v40 = vld [vmem:[%s20255_s1 + $0xcd4] ss:$8 sps:$4 sm:$0xff]  }
 0x10f   : > { %5860 = vmatmul.mubr.bf16.gmra.mrb[4].mxu0 %v17004_v57 }
 0x110   : > { %5895 = vmatpush1.bf16.msra.mxu0 %v14750_v15  ;;  %5869 = vmatprep.mubr.bf16.mxu0 %v17008_v58  ;;  %v6061_v15 = vrot.slane %v12787_v45, 6 }
 0x111   : > { %5896 = vmatprep.subr.bf16.mxu0 %v14755_v59  ;;  %v12819_v59 = vrot.slane %v12789_v47, 10  ;;  %v14897_v47 = vld [vmem:[%s20255_s1 + $0xcd0] ss:$8 sps:$4 sm:$0xff]  }
 0x112   : > { %v17185_v52 = vsel %vm16339_vm5, %v12817_v14, %v6061_v15  ;;  %v14872_v14 = vld [vmem:[%s20255_s1 + $0x14] ss:$8 sps:$4 sm:$0xff]  }
 0x113   : > { %v12793_v15 = vld [vmem:[%s16242_s15 + $0x190] sm:$0xcc] }
 0x114   : > { %5897 = vmatpush1.bf16.msra.mxu0 %v14753_v60  ;;  %v6069_v60 = vrot.slane %v12791_v48, 6 }
 0x115   : > { %5898 = vmatprep.subr.bf16.mxu0 %v14758_v22  ;;  %v14849_v22 = vld [vmem:[%s20255_s1 + $0xc50] ss:$8 sps:$4 sm:$0xff]  }
 0x117   : > { %5870 = vmatmul.mubr.bf16.gmra.mrb[8].mxu0 %v17026_v61 }
 0x118   : > { %5899 = vmatpush1.bf16.msra.mxu0 %v14756_v26  ;;  %5879 = vmatprep.mubr.bf16.mxu0 %v17030_v62  ;;  %v17189_v26 = vsel %vm16339_vm5, %v12819_v59, %v6069_v60  ;;  %v12795_v59 = vld [vmem:[%s16242_s15 + $0x1a0] sm:$0x33] }
 0x119   : > { %5900 = vmatprep.subr.bf16.mxu0 %v14761_v0  ;;  %v14855_v0 = vld [vmem:[%s20255_s1 + $0xc60] ss:$8 sps:$4 sm:$0xff]  }
 0x11c   : > { %5901 = vmatpush1.bf16.msra.mxu0 %v14759_v2  ;;  %v17196_v2 = vcombine.low %v16586_v3, %v16601_v11  ;;  %v14869_v3 = vld [vmem:[%s20255_s1 + $0xc84] ss:$8 sps:$4 sm:$0xff]   ;;  %v1151_v11 = vlaneseq }
 0x11d   : > { %5902 = vmatprep.subr.bf16.mxu0 %v14764_v28  ;;  %v12898_v28 = vcombine.high %v17185_v52, %v17189_v26 }
 0x11f   : > { %5880 = vmatmul.mubr.bf16.gmra.mrb[12].mxu0 %v17048_v4 }
 0x120   : > { %5903 = vmatpush1.bf16.msra.mxu0 %v14762_v39  ;;  %5922 = vmatprep.mubr.bf16.mxu0 %v17052_v5  ;;  %v14863_v39 = vld [vmem:[%s20255_s1 + $0xc74] ss:$8 sps:$4 sm:$0xff]  }
 0x121   : > { %5904 = vmatprep.subr.bf16.mxu0 %v14767_v6  ;;  %v14861_v6 = vld [vmem:[%s20255_s1 + $0xc70] ss:$8 sps:$4 sm:$0xff]  }
 0x124   : > { %5905 = vmatpush1.bf16.msra.mxu0 %v14765_v7  ;;  %v14867_v7 = vld [vmem:[%s20255_s1 + $0xc80] ss:$8 sps:$4 sm:$0xff]  }
 0x125   : > { %5906 = vmatprep.subr.bf16.mxu0 %v14773_v55  ;;  %v14875_v55 = vld [vmem:[%s20255_s1 + $0xc94] ss:$8 sps:$4 sm:$0xff]  }
 0x128   : > { %5907 = vmatpush1.bf16.msra.mxu0 %v14771_v63  ;;  %v1152_v63 = vshrl.u32 %v1151_v11, 7  ;;  %v12821_v11 = vrot.slane %v12793_v15, 10  ;;  %v14894_v15 = vld [vmem:[%s20255_s1 + $0x50] ss:$8 sps:$4 sm:$0xff]  }
 0x129   : > { %5908 = vmatprep.subr.bf16.mxu0 %v14779_v8  ;;  %v14873_v8 = vld [vmem:[%s20255_s1 + $0xc90] ss:$8 sps:$4 sm:$0xff]  }
 0x12c   : > { %5909 = vmatpush1.bf16.msra.mxu0 %v14777_v9  ;;  %v1149_v9 = vld [vmem:[%s20260_s6] sm:$0x3] }
 0x12d   : > { %5910 = vmatprep.subr.bf16.mxu0 %v14785_v12  ;;  %v14881_v12 = vld [vmem:[%s20255_s1 + $0xca4] ss:$8 sps:$4 sm:$0xff]  }
 0x130   : > { %5911 = vmatpush1.bf16.msra.mxu0 %v14783_v13  ;;  %v17225_v13 = vsub.s32 0, %v1152_v63 }
 0x131   : > { %5912 = vmatprep.subr.bf16.mxu0 %v14791_v16  ;;  %v14879_v16 = vld [vmem:[%s20255_s1 + $0xca0] ss:$8 sps:$4 sm:$0xff]  }
 0x134   : > { %5913 = vmatpush1.bf16.msra.mxu0 %v14789_v17  ;;  %v17230_v17 = vsub.s32 1, %v1152_v63 }
 0x135   : > { %5914 = vmatprep.subr.bf16.mxu0 %v14797_v18  ;;  %v1163_v18 = vld [vmem:[%s20261_s7] sm:$0x3] }
 0x138   : > { %5915 = vmatpush1.bf16.msra.mxu0 %v14795_v19  ;;  %v14887_v19 = vld [vmem:[%s20255_s1 + $0xcb4] ss:$8 sps:$4 sm:$0xff]  }
 0x139   : > { %5916 = vmatprep.subr.bf16.mxu0 %v14803_v20  ;;  %v1154_v20 = vrot.slane %v1149_v9, %v17225_v13 }
 0x13c   : > { %5917 = vmatpush1.bf16.msra.mxu0 %v14801_v21  ;;  %v14885_v21 = vld [vmem:[%s20255_s1 + $0xcb0] ss:$8 sps:$4 sm:$0xff]  }
 0x13d   : > { %5918 = vmatprep.subr.bf16.mxu0 %v14809_v23  ;;  %v1158_v23 = vrot.slane %v1149_v9, %v17230_v17  ;;  %v14876_v9 = vld [vmem:[%s20255_s1 + $0x20] ss:$8 sps:$4 sm:$0xff]  }
 0x140   : > { %5919 = vmatpush1.bf16.msra.mxu0 %v14807_v24  ;;  %v1168_v24 = vrot.slane %v1163_v18, %v17225_v13 }
 0x141   : > { %5920 = vmatprep.subr.bf16.mxu0 %v14815_v25 }
 0x144   : > { %5921 = vmatpush1.bf16.msra.mxu0 %v14813_v27  ;;  %v1172_v27 = vrot.slane %v1163_v18, %v17230_v17 }
 0x145   : > { %6588 = vmatprep.subr.bf16.mxu0 %v14821_v31  ;;  %v14893_v31 = vld [vmem:[%s20255_s1 + $0xcc4] ss:$8 sps:$4 sm:$0xff]  }
 0x147   : > { %5923 = vmatmul.mubr.bf16.vlgmr.msra.gmra.mrb[0].mxu0 %v17118_v33 }
 0x148   : > { %6589 = vmatpush1.bf16.msra.mxu0 %v14819_v32  ;;  %5932 = vmatprep.mubr.bf16.mxu0 %v17122_v34 }
 0x149   : > { %6590 = vmatprep.subr.bf16.mxu0 %v14827_v35 }
 0x14c   : > { %6591 = vmatpush1.bf16.msra.mxu0 %v14825_v37  ;;  %v14891_v37 = vld [vmem:[%s20255_s1 + $0xcc0] ss:$8 sps:$4 sm:$0xff]  }
 0x14d   : > { %6592 = vmatprep.subr.bf16.mxu0 %v14833_v29 }
 0x14f   : > { %5933 = vmatmul.mubr.bf16.gmra.mrb[4].mxu0 %v17140_v38 }
 0x150   : > { %6593 = vmatpush1.bf16.msra.mxu0 %v14831_v30  ;;  %5942 = vmatprep.mubr.bf16.mxu0 %v17144_v41 }
 0x151   : > { %6594 = vmatprep.subr.bf16.mxu0 %v14839_v42 }
 0x154   : > { %6595 = vmatpush1.bf16.msra.mxu0 %v14837_v44 }
 0x155   : > { %6596 = vmatprep.subr.bf16.mxu0 %v14845_v36 }
 0x157   : > { %5943 = vmatmul.mubr.bf16.gmra.mrb[8].mxu0 %v17166_v50 }
 0x158   : > { %6597 = vmatpush1.bf16.msra.mxu0 %v14843_v49  ;;  %5952 = vmatprep.mubr.bf16.mxu0 %v17170_v54  ;;  %v14864_v49 = vld [vmem:[%s20255_s1] ss:$8 sps:$4 sm:$0xff]  }
 0x159   : > { %6598 = vmatprep.subr.bf16.mxu0 %v14851_v56  ;;  %v14905_v56 = vld [vmem:[%s20255_s1 + $0xce4] ss:$8 sps:$4 sm:$0xff]  }
 0x15c   : > { %6599 = vmatpush1.bf16.msra.mxu0 %v14849_v22  ;;  %v12797_v22 = vld [vmem:[%s16242_s15 + $0x1c0] sm:$0xcc] }
 0x15d   : > { %6600 = vmatprep.subr.bf16.mxu0 %v14857_v46  ;;  %v12799_v46 = vld [vmem:[%s16242_s15 + $0x1d0] sm:$0x33] }
 0x15e   : > { %v6085_v63 = vrot.slane %v12799_v46, 6  ;;  %v14935_v46 = vld [vmem:[%s20255_s1 + $0xd34] ss:$8 sps:$4 sm:$0xff]  }
 0x15f   : > { %5953 = vmatmul.mubr.bf16.gmra.mrb[12].mxu0 %v17196_v2 }
 0x160   : > { %6601 = vmatpush1.bf16.msra.mxu0 %v14855_v0  ;;  %6620 = vmatprep.mubr.bf16.mxu0 %v12898_v28  ;;  %v14870_v28 = vld [vmem:[%s20255_s1 + $0x10] ss:$8 sps:$4 sm:$0xff]  }
 0x161   : > { %6602 = vmatprep.subr.bf16.mxu0 %v14863_v39  ;;  %v14878_v39 = vld [vmem:[%s20255_s1 + $0x24] ss:$8 sps:$4 sm:$0xff]  }
 0x164   : > { %6603 = vmatpush1.bf16.msra.mxu0 %v14861_v6  ;;  %v14903_v6 = vld [vmem:[%s20255_s1 + $0xce0] ss:$8 sps:$4 sm:$0xff]  }
 0x165   : > { %6604 = vmatprep.subr.bf16.mxu0 %v14869_v3  ;;  %v14911_v3 = vld [vmem:[%s20255_s1 + $0xcf4] ss:$8 sps:$4 sm:$0xff]  }
 0x168   : > { %6605 = vmatpush1.bf16.msra.mxu0 %v14867_v7  ;;  %v6077_v7 = vrot.slane %v12795_v59, 6 }
 0x169   : > { %6606 = vmatprep.subr.bf16.mxu0 %v14875_v55  ;;  %v1142_v25 = vpop.f32.mrb[0].mxu1  ;;  %v12823_v55 = vrot.slane %v12797_v22, 10  ;;  %v14927_v22 = vld [vmem:[%s20255_s1 + $0xd20] ss:$8 sps:$4 sm:$0xff]  }
 0x16a   : > { %v1161_v32 = vmul.f32 %v1154_v20, %v1142_v25  ;;  %v1144_v35 = vpop.f32.mrb[1].mxu1  ;;  %v6078_v18 = vsel %vm16339_vm5, %v12821_v11, %v6077_v7  ;;  %v12801_v20 = vld [vmem:[%s16242_s15 + $0x1f0] sm:$0xcc]  ;;  %v14900_v7 = vld [vmem:[%s20255_s1 + $0x60] ss:$8 sps:$4 sm:$0xff]  }
 0x16b   : > { %v1162_v29 = vmul.f32 %v1158_v23, %v1144_v35  ;;  %v1146_v30 = vpop.f32.mrb[2].mxu1  ;;  %v12805_v23 = vld [vmem:[%s16242_s15 + $0x220] sm:$0xcc]  ;;  %v14882_v25 = vld [vmem:[%s20255_s1 + $0x30] ss:$8 sps:$4 sm:$0xff]  }
 0x16c   : > { %6607 = vmatpush1.bf16.msra.mxu0 %v14873_v8  ;;  %v1175_v42 = vadd.f32 %v1168_v24, %v1161_v32  ;;  %v1147_v44 = vpop.f32.mrb[3].mxu1  ;;  %v14909_v8 = vld [vmem:[%s20255_s1 + $0xcf0] ss:$8 sps:$4 sm:$0xff]   ;;  %v14915_v32 = vld [vmem:[%s20255_s1 + $0xd00] ss:$8 sps:$4 sm:$0xff]  }
 0x16d   : > { %6608 = vmatprep.subr.bf16.mxu0 %v14881_v12  ;;  %v1176_v36 = vadd.f32 %v1172_v27, %v1162_v29  ;;  %v14884_v12 = vld [vmem:[%s20255_s1 + $0x34] ss:$8 sps:$4 sm:$0xff]   ;;  %v12897_v27 = vcombine.low %v17185_v52, %v17189_v26  ;;  %v12825_v29 = vrot.slane %v12801_v20, 10  ;;  %v12827_v52 = vrot.slane %v12805_v23, 10  ;;  %v14888_v44 = vld [vmem:[%s20255_s1 + $0x40] ss:$8 sps:$4 sm:$0xff]  }
 0x16e   : > { %v1177_v45 = vmax.f32 %v1175_v42, 0.0  ;;  %v12807_v24 = vld [vmem:[%s16242_s15 + $0x230] sm:$0x33]  ;;  %v14939_v23 = vld [vmem:[%s20255_s1 + $0xd40] ss:$8 sps:$4 sm:$0xff]  }
 0x16f   : > { %v1178_v48 = vmax.f32 %v1176_v36, 0.0  ;;  %v14923_v35 = vld [vmem:[%s20255_s1 + $0xd14] ss:$8 sps:$4 sm:$0xff]   ;;  %v6101_v26 = vrot.slane %v12807_v24, 6  ;;  %v14921_v42 = vld [vmem:[%s20255_s1 + $0xd10] ss:$8 sps:$4 sm:$0xff]  }
 0x170   : > { %6609 = vmatpush1.bf16.msra.mxu0 %v14879_v16  ;;  %v1179_v0 = vpack.c.bf16 %v1177_v45, %v1177_v45  ;;  %v14917_v16 = vld [vmem:[%s20255_s1 + $0xd04] ss:$8 sps:$4 sm:$0xff]   ;;  %v14896_v36 = vld [vmem:[%s20255_s1 + $0x54] ss:$8 sps:$4 sm:$0xff]   ;;  %v14933_v11 = vld [vmem:[%s20255_s1 + $0xd30] ss:$8 sps:$4 sm:$0xff]  }
 0x171   : > { %6610 = vmatprep.subr.bf16.mxu0 %v14887_v19  ;;  %v1180_v60 = vpack.c.bf16 %v1178_v48, %v1178_v48  ;;  %v6086_v19 = vsel %vm16339_vm5, %v12823_v55, %v6085_v63  ;;  %v12809_v48 = vld [vmem:[%s16242_s15 + $0x250] sm:$0xcc]  ;;  %v14941_v63 = vld [vmem:[%s20255_s1 + $0xd44] ss:$8 sps:$4 sm:$0xff]  }
 0x172   : > { %v12901_v59 = vcombine.low %v6078_v18, %v6086_v19  ;;  %v14908_v55 = vld [vmem:[%s20255_s1 + $0x74] ss:$8 sps:$4 sm:$0xff]  }
 0x173   : > { %1405 = vmatprep.mubr.bf16.mxu1 %v1180_v60  ;;  %v14902_v60 = vld [vmem:[%s20255_s1 + $0x64] ss:$8 sps:$4 sm:$0xff]  }
 0x174   : > { %6611 = vmatpush1.bf16.msra.mxu0 %v14885_v21  ;;  %1406 = vmatmul.mubr.bf16.vlgmr.msra.gmra.mrb[4].mxu1 %v1179_v0  ;;  %v12803_v21 = vld [vmem:[%s16242_s15 + $0x200] sm:$0x33] }
 0x175   : > { %6612 = vmatprep.subr.bf16.mxu0 %v14893_v31  ;;  %1919 = vmatpush1.bf16.msra.mxu1 %v14864_v49  ;;  %v14890_v31 = vld [vmem:[%s20255_s1 + $0x44] ss:$8 sps:$4 sm:$0xff]   ;;  %v6093_v30 = vrot.slane %v12803_v21, 6  ;;  %v14906_v21 = vld [vmem:[%s20255_s1 + $0x70] ss:$8 sps:$4 sm:$0xff]  }
 0x176   : > { %1920 = vmatprep.subr.bf16.mxu1 %v14872_v14  ;;  %1950 = vmatprep.mubr.bf16.mxu1 %v16896_v10  ;;  %v12811_v49 = vld [vmem:[%s16242_s15 + $0x260] sm:$0x33]  ;;  %v12815_v14 = vld [vmem:[%s16242_s15 + $0x290] sm:$0x33] }
 0x177   : > { %v6094_v45 = vsel %vm16339_vm5, %v12825_v29, %v6093_v30  ;;  %v14945_v29 = vld [vmem:[%s20255_s1 + $0xd50] ss:$8 sps:$4 sm:$0xff]   ;;  %v14912_v30 = vld [vmem:[%s20255_s1 + $0x80] ss:$8 sps:$4 sm:$0xff]  }
 0x178   : > { %6613 = vmatpush1.bf16.msra.mxu0 %v14891_v37  ;;  %v12902_v37 = vcombine.high %v6078_v18, %v6086_v19  ;;  %v12790_v18 = vld [vmem:[%s16242_s15 + $0x168] sm:$0xcc]  ;;  %v12792_v19 = vld [vmem:[%s16242_s15 + $0x178] sm:$0x33] }
 0x179   : > { %6614 = vmatprep.subr.bf16.mxu0 %v14899_v40  ;;  %1921 = vmatpush1.bf16.msra.mxu1 %v14870_v28  ;;  %v14929_v40 = vld [vmem:[%s20255_s1 + $0xd24] ss:$8 sps:$4 sm:$0xff]   ;;  %v12829_v28 = vrot.slane %v12809_v48, 10  ;;  %v14959_v48 = vld [vmem:[%s20255_s1 + $0xd74] ss:$8 sps:$4 sm:$0xff]  }
 0x17a   : > { %1922 = vmatprep.subr.bf16.mxu1 %v14878_v39  ;;  %v6109_v39 = vrot.slane %v12811_v49, 6 }
 0x17c   : > { %6615 = vmatpush1.bf16.msra.mxu0 %v14897_v47  ;;  %v6102_v47 = vsel %vm16339_vm5, %v12827_v52, %v6101_v26  ;;  %v14920_v52 = vld [vmem:[%s20255_s1 + $0x94] ss:$8 sps:$4 sm:$0xff]   ;;  %v14953_v26 = vld [vmem:[%s20255_s1 + $0xd64] ss:$8 sps:$4 sm:$0xff]  }
 0x17d   : > { %6616 = vmatprep.subr.bf16.mxu0 %v14905_v56  ;;  %1923 = vmatpush1.bf16.msra.mxu1 %v14876_v9  ;;  %v12813_v56 = vld [vmem:[%s16242_s15 + $0x280] sm:$0xcc]  ;;  %v12906_v0 = vcombine.high %v6094_v45, %v6102_v47  ;;  %v12905_v20 = vcombine.low %v6094_v45, %v6102_v47 }
 0x17e   : > { %1924 = vmatprep.subr.bf16.mxu1 %v14884_v12  ;;  %v12786_v12 = vld [vmem:[%s16242_s15 + $0x138] sm:$0xcc]  ;;  %v14926_v45 = vld [vmem:[%s20255_s1 + $0xa4] ss:$8 sps:$4 sm:$0xff]   ;;  %v14951_v47 = vld [vmem:[%s20255_s1 + $0xd60] ss:$8 sps:$4 sm:$0xff]  }
 0x180   : > { %6617 = vmatpush1.bf16.msra.mxu0 %v14903_v6  ;;  %v12831_v6 = vrot.slane %v12813_v56, 10  ;;  %v14924_v56 = vld [vmem:[%s20255_s1 + $0xa0] ss:$8 sps:$4 sm:$0xff]  }
 0x181   : > { %6618 = vmatprep.subr.bf16.mxu0 %v14911_v3  ;;  %1925 = vmatpush1.bf16.msra.mxu1 %v14882_v25  ;;  %v6117_v3 = vrot.slane %v12815_v14, 6  ;;  %v14947_v25 = vld [vmem:[%s20255_s1 + $0xd54] ss:$8 sps:$4 sm:$0xff]  }
 0x182   : > { %1926 = vmatprep.subr.bf16.mxu1 %v14890_v31  ;;  %v14932_v14 = vld [vmem:[%s20255_s1 + $0xb4] ss:$8 sps:$4 sm:$0xff]  }
 0x183   : > { %v6118_v9 = vsel %vm16339_vm5, %v12831_v6, %v6117_v3  ;;  %v14969_v6 = vld [vmem:[%s20255_s1 + $0xd90] ss:$8 sps:$4 sm:$0xff]   ;;  %v14977_v3 = vld [vmem:[%s20255_s1 + $0xda4] ss:$8 sps:$4 sm:$0xff]  }
 0x184   : > { %6619 = vmatpush1.bf16.msra.mxu0 %v14909_v8  ;;  %v6110_v8 = vsel %vm16339_vm5, %v12829_v28, %v6109_v39  ;;  %v14936_v28 = vld [vmem:[%s20255_s1 + $0xc0] ss:$8 sps:$4 sm:$0xff]   ;;  %v14944_v39 = vld [vmem:[%s20255_s1 + $0xd4] ss:$8 sps:$4 sm:$0xff]  }
 0x185   : > { %6661 = vmatprep.subr.bf16.mxu0 %v14917_v16  ;;  %1927 = vmatpush1.bf16.msra.mxu1 %v14888_v44  ;;  %v12788_v16 = vld [vmem:[%s16242_s15 + $0x148] sm:$0x33]  ;;  %v12910_v24 = vcombine.high %v6110_v8, %v6118_v9 }
 0x186   : > { %1928 = vmatprep.subr.bf16.mxu1 %v14896_v36  ;;  %v6065_v31 = vrot.slane %v12788_v16, 6  ;;  %v14918_v36 = vld [vmem:[%s20255_s1 + $0x90] ss:$8 sps:$4 sm:$0xff]   ;;  %v14989_v16 = vld [vmem:[%s20255_s1 + $0xdc4] ss:$8 sps:$4 sm:$0xff]  }
 0x187   : > { %6621 = vmatmul.mubr.bf16.vlgmr.msra.gmra.mrb[0].mxu0 %v12897_v27  ;;  %v12818_v27 = vrot.slane %v12786_v12, 10  ;;  %v14981_v12 = vld [vmem:[%s20255_s1 + $0xdb0] ss:$8 sps:$4 sm:$0xff]  }
 0x188   : > { %6662 = vmatpush1.bf16.msra.mxu0 %v14915_v32  ;;  %6630 = vmatprep.mubr.bf16.mxu0 %v12902_v37  ;;  %v12820_v32 = vrot.slane %v12790_v18, 10  ;;  %v14914_v37 = vld [vmem:[%s20255_s1 + $0x84] ss:$8 sps:$4 sm:$0xff]   ;;  %v14954_v18 = vld [vmem:[%s20255_s1 + $0xf0] ss:$8 sps:$4 sm:$0xff]  }
 0x189   : > { %6663 = vmatprep.subr.bf16.mxu0 %v14923_v35  ;;  %1929 = vmatpush1.bf16.msra.mxu1 %v14894_v15  ;;  %v6073_v35 = vrot.slane %v12792_v19, 6  ;;  %v14957_v15 = vld [vmem:[%s20255_s1 + $0xd70] ss:$8 sps:$4 sm:$0xff]   ;;  %v14962_v19 = vld [vmem:[%s20255_s1 + $0x104] ss:$8 sps:$4 sm:$0xff]  }
 0x18a   : > { %1930 = vmatprep.subr.bf16.mxu1 %v14902_v60  ;;  %v14930_v60 = vld [vmem:[%s20255_s1 + $0xb0] ss:$8 sps:$4 sm:$0xff]  }
 0x18b   : > { %v17399_v44 = vsel %vm16339_vm5, %v12820_v32, %v6073_v35  ;;  %v12796_v32 = vld [vmem:[%s16242_s15 + $0x1a8] sm:$0x33]  ;;  %v12798_v35 = vld [vmem:[%s16242_s15 + $0x1c8] sm:$0xcc] }
 0x18c   : > { %6664 = vmatpush1.bf16.msra.mxu0 %v14921_v42  ;;  %v17395_v42 = vsel %vm16339_vm5, %v12818_v27, %v6065_v31  ;;  %v12794_v27 = vld [vmem:[%s16242_s15 + $0x198] sm:$0xcc] }
 0x18d   : > { %6665 = vmatprep.subr.bf16.mxu0 %v14929_v40  ;;  %1931 = vmatpush1.bf16.msra.mxu1 %v14900_v7  ;;  %v12909_v40 = vcombine.low %v6110_v8, %v6118_v9  ;;  %v12900_v49 = vcombine.high %v17395_v42, %v17399_v44  ;;  %v14950_v7 = vld [vmem:[%s20255_s1 + $0xe4] ss:$8 sps:$4 sm:$0xff]   ;;  %v14948_v8 = vld [vmem:[%s20255_s1 + $0xe0] ss:$8 sps:$4 sm:$0xff]   ;;  %v14956_v9 = vld [vmem:[%s20255_s1 + $0xf4] ss:$8 sps:$4 sm:$0xff]  }
 0x18e   : > { %1932 = vmatprep.subr.bf16.mxu1 %v14908_v55  ;;  %v14975_v55 = vld [vmem:[%s20255_s1 + $0xda0] ss:$8 sps:$4 sm:$0xff]   ;;  %v14968_v31 = vld [vmem:[%s20255_s1 + $0x114] ss:$8 sps:$4 sm:$0xff]  }
 0x18f   : > { %6631 = vmatmul.mubr.bf16.gmra.mrb[4].mxu0 %v12901_v59  ;;  %v14965_v59 = vld [vmem:[%s20255_s1 + $0xd84] ss:$8 sps:$4 sm:$0xff]  }
 0x190   : > { %6666 = vmatpush1.bf16.msra.mxu0 %v14927_v22  ;;  %6640 = vmatprep.mubr.bf16.mxu0 %v12906_v0  ;;  %v14938_v22 = vld [vmem:[%s20255_s1 + $0xc4] ss:$8 sps:$4 sm:$0xff]   ;;  %v14971_v0 = vld [vmem:[%s20255_s1 + $0xd94] ss:$8 sps:$4 sm:$0xff]  }
 0x191   : > { %6667 = vmatprep.subr.bf16.mxu0 %v14935_v46  ;;  %1933 = vmatpush1.bf16.msra.mxu1 %v14906_v21  ;;  %v14963_v46 = vld [vmem:[%s20255_s1 + $0xd80] ss:$8 sps:$4 sm:$0xff]   ;;  %v14995_v21 = vld [vmem:[%s20255_s1 + $0xdd4] ss:$8 sps:$4 sm:$0xff]  }
 0x192   : > { %1934 = vmatprep.subr.bf16.mxu1 %v14914_v37  ;;  %v12800_v37 = vld [vmem:[%s16242_s15 + $0x1d8] sm:$0x33] }
 0x194   : > { %6668 = vmatpush1.bf16.msra.mxu0 %v14933_v11  ;;  %v14942_v11 = vld [vmem:[%s20255_s1 + $0xd0] ss:$8 sps:$4 sm:$0xff]  }
 0x195   : > { %6669 = vmatprep.subr.bf16.mxu0 %v14941_v63  ;;  %1935 = vmatpush1.bf16.msra.mxu1 %v14912_v30  ;;  %v14983_v63 = vld [vmem:[%s20255_s1 + $0xdb4] ss:$8 sps:$4 sm:$0xff]   ;;  %v14966_v30 = vld [vmem:[%s20255_s1 + $0x110] ss:$8 sps:$4 sm:$0xff]  }
 0x196   : > { %1936 = vmatprep.subr.bf16.mxu1 %v14920_v52  ;;  %v15007_v52 = vld [vmem:[%s20255_s1 + $0xdf4] ss:$8 sps:$4 sm:$0xff]  }
 0x197   : > { %6641 = vmatmul.mubr.bf16.gmra.mrb[8].mxu0 %v12905_v20  ;;  %v14987_v20 = vld [vmem:[%s20255_s1 + $0xdc0] ss:$8 sps:$4 sm:$0xff]  }
 0x198   : > { %6670 = vmatpush1.bf16.msra.mxu0 %v14939_v23  ;;  %6650 = vmatprep.mubr.bf16.mxu0 %v12910_v24  ;;  %v14993_v23 = vld [vmem:[%s20255_s1 + $0xdd0] ss:$8 sps:$4 sm:$0xff]   ;;  %v14960_v24 = vld [vmem:[%s20255_s1 + $0x100] ss:$8 sps:$4 sm:$0xff]  }
 0x199   : > { %6671 = vmatprep.subr.bf16.mxu0 %v14947_v25  ;;  %1937 = vmatpush1.bf16.msra.mxu1 %v14918_v36  ;;  %v15001_v25 = vld [vmem:[%s20255_s1 + $0xde4] ss:$8 sps:$4 sm:$0xff]   ;;  %v12822_v36 = vrot.slane %v12794_v27, 10  ;;  %v14990_v27 = vld [vmem:[%s20255_s1 + $0x150] ss:$8 sps:$4 sm:$0xff]  }
 0x19a   : > { %1938 = vmatprep.subr.bf16.mxu1 %v14926_v45  ;;  %v12824_v45 = vrot.slane %v12798_v35, 10  ;;  %v14998_v35 = vld [vmem:[%s20255_s1 + $0x164] ss:$8 sps:$4 sm:$0xff]  }
 0x19c   : > { %6672 = vmatpush1.bf16.msra.mxu0 %v14945_v29  ;;  %v14999_v29 = vld [vmem:[%s20255_s1 + $0xde0] ss:$8 sps:$4 sm:$0xff]  }
 0x19d   : > { %6673 = vmatprep.subr.bf16.mxu0 %v14953_v26  ;;  %1939 = vmatpush1.bf16.msra.mxu1 %v14924_v56  ;;  %v14974_v26 = vld [vmem:[%s20255_s1 + $0x124] ss:$8 sps:$4 sm:$0xff]  }
 0x19e   : > { %1940 = vmatprep.subr.bf16.mxu1 %v14932_v14  ;;  %v15013_v56 = vld [vmem:[%s20255_s1 + $0xe04] ss:$8 sps:$4 sm:$0xff]   ;;  %v12802_v14 = vld [vmem:[%s16242_s15 + $0x1f8] sm:$0xcc] }
 0x19f   : > { %6651 = vmatmul.mubr.bf16.gmra.mrb[12].mxu0 %v12909_v40  ;;  %v6081_v40 = vrot.slane %v12796_v32, 6 }
 0x1a0   : > { %6674 = vmatpush1.bf16.msra.mxu0 %v14951_v47  ;;  %6693 = vmatprep.mubr.bf16.mxu0 %v12900_v49  ;;  %v6089_v47 = vrot.slane %v12800_v37, 6  ;;  %v14972_v49 = vld [vmem:[%s20255_s1 + $0x120] ss:$8 sps:$4 sm:$0xff]  }
 0x1a1   : > { %6675 = vmatprep.subr.bf16.mxu0 %v14959_v48  ;;  %1941 = vmatpush1.bf16.msra.mxu1 %v14930_v60  ;;  %v15005_v48 = vld [vmem:[%s20255_s1 + $0xdf0] ss:$8 sps:$4 sm:$0xff]   ;;  %v12806_v60 = vld [vmem:[%s16242_s15 + $0x228] sm:$0xcc] }
 0x1a2   : > { %1942 = vmatprep.subr.bf16.mxu1 %v14938_v22  ;;  %v12808_v22 = vld [vmem:[%s16242_s15 + $0x238] sm:$0x33] }
 0x1a4   : > { %6676 = vmatpush1.bf16.msra.mxu0 %v14957_v15  ;;  %v14980_v15 = vld [vmem:[%s20255_s1 + $0x134] ss:$8 sps:$4 sm:$0xff]  }
 0x1a5   : > { %6677 = vmatprep.subr.bf16.mxu0 %v14965_v59  ;;  %1943 = vmatpush1.bf16.msra.mxu1 %v14936_v28  ;;  %v12804_v59 = vld [vmem:[%s16242_s15 + $0x208] sm:$0x33] }
 0x1a6   : > { %1944 = vmatprep.subr.bf16.mxu1 %v14944_v39  ;;  %v15011_v28 = vld [vmem:[%s20255_s1 + $0xe00] ss:$8 sps:$4 sm:$0xff]   ;;  %v14978_v39 = vld [vmem:[%s20255_s1 + $0x130] ss:$8 sps:$4 sm:$0xff]  }
 0x1a8   : > { %6678 = vmatpush1.bf16.msra.mxu0 %v14963_v46  ;;  %v6082_v46 = vsel %vm16339_vm5, %v12822_v36, %v6081_v40  ;;  %v15029_v36 = vld [vmem:[%s20255_s1 + $0xe30] ss:$8 sps:$4 sm:$0xff]   ;;  %v14996_v40 = vld [vmem:[%s20255_s1 + $0x160] ss:$8 sps:$4 sm:$0xff]  }
 0x1a9   : > { %6679 = vmatprep.subr.bf16.mxu0 %v14971_v0  ;;  %1945 = vmatpush1.bf16.msra.mxu1 %v14942_v11  ;;  %v6090_v0 = vsel %vm16339_vm5, %v12824_v45, %v6089_v47  ;;  %v14986_v11 = vld [vmem:[%s20255_s1 + $0x144] ss:$8 sps:$4 sm:$0xff]  }
 0x1aa   : > { %1946 = vmatprep.subr.bf16.mxu1 %v14950_v7  ;;  %v12904_v7 = vcombine.high %v6082_v46, %v6090_v0  ;;  %v12903_v32 = vcombine.low %v6082_v46, %v6090_v0  ;;  %v15037_v45 = vld [vmem:[%s20255_s1 + $0xe44] ss:$8 sps:$4 sm:$0xff]   ;;  %v15008_v46 = vld [vmem:[%s20255_s1 + $0x180] ss:$8 sps:$4 sm:$0xff]   ;;  %v15016_v0 = vld [vmem:[%s20255_s1 + $0x194] ss:$8 sps:$4 sm:$0xff]  }
 0x1ac   : > { %6680 = vmatpush1.bf16.msra.mxu0 %v14969_v6  ;;  %v12899_v6 = vcombine.low %v17395_v42, %v17399_v44  ;;  %v6097_v42 = vrot.slane %v12804_v59, 6  ;;  %v12828_v44 = vrot.slane %v12806_v60, 10  ;;  %v15002_v59 = vld [vmem:[%s20255_s1 + $0x170] ss:$8 sps:$4 sm:$0xff]   ;;  %v15043_v60 = vld [vmem:[%s20255_s1 + $0xe54] ss:$8 sps:$4 sm:$0xff]  }
 0x1ad   : > { %6681 = vmatprep.subr.bf16.mxu0 %v14977_v3  ;;  %1947 = vmatpush1.bf16.msra.mxu1 %v14948_v8  ;;  %v15019_v3 = vld [vmem:[%s20255_s1 + $0xe14] ss:$8 sps:$4 sm:$0xff]   ;;  %v15017_v8 = vld [vmem:[%s20255_s1 + $0xe10] ss:$8 sps:$4 sm:$0xff]  }
 0x1ae   : > { %1948 = vmatprep.subr.bf16.mxu1 %v14956_v9  ;;  %v14984_v9 = vld [vmem:[%s20255_s1 + $0x140] ss:$8 sps:$4 sm:$0xff]  }
 0x1b0   : > { %6682 = vmatpush1.bf16.msra.mxu0 %v14975_v55  ;;  %v12826_v55 = vrot.slane %v12802_v14, 10  ;;  %v15035_v14 = vld [vmem:[%s20255_s1 + $0xe40] ss:$8 sps:$4 sm:$0xff]  }
 0x1b1   : > { %6683 = vmatprep.subr.bf16.mxu0 %v14983_v63  ;;  %1949 = vmatpush1.bf16.msra.mxu1 %v14954_v18  ;;  %v6105_v63 = vrot.slane %v12808_v22, 6  ;;  %v14992_v18 = vld [vmem:[%s20255_s1 + $0x154] ss:$8 sps:$4 sm:$0xff]   ;;  %v15010_v22 = vld [vmem:[%s20255_s1 + $0x184] ss:$8 sps:$4 sm:$0xff]  }
 0x1b2   : > { %1991 = vmatprep.subr.bf16.mxu1 %v14962_v19  ;;  %v12812_v19 = vld [vmem:[%s16242_s15 + $0x268] sm:$0x33] }
 0x1b4   : > { %6684 = vmatpush1.bf16.msra.mxu0 %v14981_v12  ;;  %1951 = vmatmul.mubr.bf16.vlgmr.msra.gmra.mrb[8].mxu1 %v16982_v51  ;;  %v15025_v12 = vld [vmem:[%s20255_s1 + $0xe24] ss:$8 sps:$4 sm:$0xff]  }
 0x1b5   : > { %6685 = vmatprep.subr.bf16.mxu0 %v14989_v16  ;;  %1992 = vmatpush1.bf16.msra.mxu1 %v14960_v24  ;;  %v12810_v16 = vld [vmem:[%s16242_s15 + $0x258] sm:$0xcc]  ;;  %v6106_v24 = vsel %vm16339_vm5, %v12828_v44, %v6105_v63  ;;  %v15020_v44 = vld [vmem:[%s20255_s1 + $0x1a0] ss:$8 sps:$4 sm:$0xff]  }
 0x1b6   : > { %1993 = vmatprep.subr.bf16.mxu1 %v14968_v31  ;;  %1960 = vmatprep.mubr.bf16.mxu1 %v16986_v53  ;;  %v15031_v31 = vld [vmem:[%s20255_s1 + $0xe34] ss:$8 sps:$4 sm:$0xff]  }
 0x1b7   : > { %v15028_v63 = vld [vmem:[%s20255_s1 + $0x1b4] ss:$8 sps:$4 sm:$0xff]  }
 0x1b8   : > { %6686 = vmatpush1.bf16.msra.mxu0 %v14987_v20  ;;  %v12814_v20 = vld [vmem:[%s16242_s15 + $0x288] sm:$0xcc] }
 0x1b9   : > { %6687 = vmatprep.subr.bf16.mxu0 %v14995_v21  ;;  %1994 = vmatpush1.bf16.msra.mxu1 %v14966_v30  ;;  %v12816_v21 = vld [vmem:[%s16242_s15 + $0x298] sm:$0x33]  ;;  %v6113_v30 = vrot.slane %v12812_v19, 6 }
 0x1ba   : > { %1995 = vmatprep.subr.bf16.mxu1 %v14974_v26  ;;  %v6121_v26 = vrot.slane %v12816_v21, 6  ;;  %v15061_v19 = vld [vmem:[%s20255_s1 + $0xe94] ss:$8 sps:$4 sm:$0xff]  }
 0x1bb   : > { %v15040_v21 = vld [vmem:[%s20255_s1 + $0x1d4] ss:$8 sps:$4 sm:$0xff]  }
 0x1bc   : > { %6688 = vmatpush1.bf16.msra.mxu0 %v14993_v23  ;;  %1961 = vmatmul.mubr.bf16.gmra.mrb[12].mxu1 %v17004_v57  ;;  %v6098_v23 = vsel %vm16339_vm5, %v12826_v55, %v6097_v42  ;;  %v15055_v55 = vld [vmem:[%s20255_s1 + $0xe74] ss:$8 sps:$4 sm:$0xff]  }
 0x1bd   : > { %6689 = vmatprep.subr.bf16.mxu0 %v15001_v25  ;;  %1996 = vmatpush1.bf16.msra.mxu1 %v14972_v49  ;;  %v15023_v25 = vld [vmem:[%s20255_s1 + $0xe20] ss:$8 sps:$4 sm:$0xff]   ;;  %v12908_v37 = vcombine.high %v6098_v23, %v6106_v24  ;;  %v15004_v49 = vld [vmem:[%s20255_s1 + $0x174] ss:$8 sps:$4 sm:$0xff]  }
 0x1be   : > { %1997 = vmatprep.subr.bf16.mxu1 %v14980_v15  ;;  %1970 = vmatprep.mubr.bf16.mxu1 %v17008_v58  ;;  %v15082_v42 = vld [vmem:[%s16242_s15 + $0x244] ss:$48 sps:$4 sm:$0xff]  }
 0x1c0   : > { %6690 = vmatpush1.bf16.msra.mxu0 %v14999_v29  ;;  %v12830_v29 = vrot.slane %v12810_v16, 10  ;;  %v15034_v16 = vld [vmem:[%s20255_s1 + $0x1c4] ss:$8 sps:$4 sm:$0xff]  }
 0x1c1   : > { %6691 = vmatprep.subr.bf16.mxu0 %v15007_v52  ;;  %1998 = vmatpush1.bf16.msra.mxu1 %v14978_v39  ;;  %v12832_v52 = vrot.slane %v12814_v20, 10  ;;  %v15049_v39 = vld [vmem:[%s20255_s1 + $0xe64] ss:$8 sps:$4 sm:$0xff]   ;;  %v15032_v20 = vld [vmem:[%s20255_s1 + $0x1c0] ss:$8 sps:$4 sm:$0xff]  }
 0x1c2   : > { %1999 = vmatprep.subr.bf16.mxu1 %v14986_v11  ;;  %v6114_v47 = vsel %vm16339_vm5, %v12830_v29, %v6113_v30  ;;  %v15065_v29 = vld [vmem:[%s20255_s1 + $0xeb0] ss:$8 sps:$4 sm:$0xff]   ;;  %v15070_v30 = vld [vmem:[%s20255_s1 + $0xec4] ss:$8 sps:$4 sm:$0xff]  }
 0x1c4   : > { %6692 = vmatpush1.bf16.msra.mxu0 %v15005_v48  ;;  %1971 = vmatmul.mubr.bf16.gmra.mrb[16].mxu1 %v17026_v61  ;;  %v6122_v48 = vsel %vm16339_vm5, %v12832_v52, %v6121_v26  ;;  %v15050_v52 = vld [vmem:[%s20255_s1 + $0x1f0] ss:$8 sps:$4 sm:$0xff]   ;;  %v15068_v26 = vld [vmem:[%s20255_s1 + $0xec0] ss:$8 sps:$4 sm:$0xff]  }
 0x1c5   : > { %7264 = vmatprep.subr.bf16.mxu0 %v15013_v56  ;;  %2000 = vmatpush1.bf16.msra.mxu1 %v14984_v9  ;;  %v12907_v56 = vcombine.low %v6098_v23, %v6106_v24  ;;  %v12912_v15 = vcombine.high %v6114_v47, %v6122_v48  ;;  %v12911_v11 = vcombine.low %v6114_v47, %v6122_v48  ;;  %v15058_v9 = vld [vmem:[%s20255_s1 + $0xe84] ss:$8 sps:$4 sm:$0xff]   ;;  %v15059_v23 = vld [vmem:[%s20255_s1 + $0xe90] ss:$8 sps:$4 sm:$0xff]   ;;  %v15074_v47 = vld [vmem:[%s20255_s1 + $0xee0] ss:$8 sps:$4 sm:$0xff]  }
 0x1c6   : > { %2001 = vmatprep.subr.bf16.mxu1 %v14992_v18  ;;  %1980 = vmatprep.mubr.bf16.mxu1 %v17030_v62  ;;  %v15056_v18 = vld [vmem:[%s20255_s1 + $0xe80] ss:$8 sps:$4 sm:$0xff]   ;;  %v15064_v24 = vld [vmem:[%s20255_s1 + $0xea4] ss:$8 sps:$4 sm:$0xff]   ;;  %v15079_v48 = vld [vmem:[%s20255_s1 + $0xef4] ss:$8 sps:$4 sm:$0xff]  }
 0x1c7   : > { %6694 = vmatmul.mubr.bf16.vlgmr.msra.gmra.mrb[0].mxu0 %v12899_v6  ;;  %v15047_v6 = vld [vmem:[%s20255_s1 + $0xe60] ss:$8 sps:$4 sm:$0xff]  }
 0x1c8   : > { %7265 = vmatpush1.bf16.msra.mxu0 %v15011_v28  ;;  %6703 = vmatprep.mubr.bf16.mxu0 %v12904_v7  ;;  %v15041_v28 = vld [vmem:[%s20255_s1 + $0xe50] ss:$8 sps:$4 sm:$0xff]   ;;  %v15022_v7 = vld [vmem:[%s20255_s1 + $0x1a4] ss:$8 sps:$4 sm:$0xff]  }
 0x1c9   : > { %7266 = vmatprep.subr.bf16.mxu0 %v15019_v3  ;;  %2002 = vmatpush1.bf16.msra.mxu1 %v14990_v27  ;;  %v15014_v3 = vld [vmem:[%s20255_s1 + $0x190] ss:$8 sps:$4 sm:$0xff]   ;;  %v15046_v27 = vld [vmem:[%s20255_s1 + $0x1e4] ss:$8 sps:$4 sm:$0xff]  }
 0x1ca   : > { %2003 = vmatprep.subr.bf16.mxu1 %v14998_v35  ;;  %v15044_v35 = vld [vmem:[%s20255_s1 + $0x1e0] ss:$8 sps:$4 sm:$0xff]  }
 0x1cc   : > { %7267 = vmatpush1.bf16.msra.mxu0 %v15017_v8  ;;  %1981 = vmatmul.mubr.bf16.gmra.mrb[20].mxu1 %v17048_v4  ;;  %v15053_v8 = vld [vmem:[%s20255_s1 + $0xe70] ss:$8 sps:$4 sm:$0xff]  }
 0x1cd   : > { %7268 = vmatprep.subr.bf16.mxu0 %v15025_v12  ;;  %2004 = vmatpush1.bf16.msra.mxu1 %v14996_v40  ;;  %v15026_v12 = vld [vmem:[%s20255_s1 + $0x1b0] ss:$8 sps:$4 sm:$0xff]  }
 0x1ce   : > { %2005 = vmatprep.subr.bf16.mxu1 %v15004_v49  ;;  %2023 = vmatprep.mubr.bf16.mxu1 %v17052_v5  ;;  %v15071_v40 = vld [vmem:[%s20255_s1 + $0xed0] ss:$8 sps:$4 sm:$0xff]  }
 0x1cf   : > { %6704 = vmatmul.mubr.bf16.gmra.mrb[4].mxu0 %v12903_v32  ;;  %v15067_v32 = vld [vmem:[%s20255_s1 + $0xeb4] ss:$8 sps:$4 sm:$0xff]   ;;  %v15077_v49 = vld [vmem:[%s20255_s1 + $0xef0] ss:$8 sps:$4 sm:$0xff]  }
 0x1d0   : > { %7269 = vmatpush1.bf16.msra.mxu0 %v15023_v25  ;;  %6713 = vmatprep.mubr.bf16.mxu0 %v12908_v37  ;;  %v15038_v25 = vld [vmem:[%s20255_s1 + $0x1d0] ss:$8 sps:$4 sm:$0xff]   ;;  %v15052_v37 = vld [vmem:[%s20255_s1 + $0x1f4] ss:$8 sps:$4 sm:$0xff]  }
 0x1d1   : > { %7270 = vmatprep.subr.bf16.mxu0 %v15031_v31  ;;  %2006 = vmatpush1.bf16.msra.mxu1 %v15002_v59  ;;  %v15062_v31 = vld [vmem:[%s20255_s1 + $0xea0] ss:$8 sps:$4 sm:$0xff]   ;;  %v15085_v59 = vld [vmem:[%s20255_s1 + $0xf04] ss:$8 sps:$4 sm:$0xff]  }
 0x1d2   : > { %2007 = vmatprep.subr.bf16.mxu1 %v15010_v22  ;;  %v15113_v22 = vld [vmem:[%s16242_s15 + $0x2a4] ss:$48 sps:$4 sm:$0xff]  }
 0x1d4   : > { %7271 = vmatpush1.bf16.msra.mxu0 %v15029_v36  ;;  %v15073_v36 = vld [vmem:[%s20255_s1 + $0xed4] ss:$8 sps:$4 sm:$0xff]  }
 0x1d5   : > { %7272 = vmatprep.subr.bf16.mxu0 %v15037_v45  ;;  %2008 = vmatpush1.bf16.msra.mxu1 %v15008_v46  ;;  %v15076_v45 = vld [vmem:[%s20255_s1 + $0xee4] ss:$8 sps:$4 sm:$0xff]   ;;  %v15203_v46 = vld [vmem:[%s20258_s4 + $0x10] ss:$8 sps:$4 sm:$0xff]  }
 0x1d6   : > { %2009 = vmatprep.subr.bf16.mxu1 %v15016_v0  ;;  %v15205_v0 = vld [vmem:[%s20258_s4 + $0x14] ss:$8 sps:$4 sm:$0xff]  }
 0x1d7   : > { %6714 = vmatmul.mubr.bf16.gmra.mrb[8].mxu0 %v12907_v56  ;;  %v15197_v56 = vld [vmem:[%s20258_s4] ss:$8 sps:$4 sm:$0xff]  }
 0x1d8   : > { %7273 = vmatpush1.bf16.msra.mxu0 %v15035_v14  ;;  %6723 = vmatprep.mubr.bf16.mxu0 %v12912_v15  ;;  %v15199_v14 = vld [vmem:[%s20258_s4 + $0x4] ss:$8 sps:$4 sm:$0xff]   ;;  %v15080_v15 = vld [vmem:[%s16242_s15 + $0x240] ss:$48 sps:$4 sm:$0xff]  }
 0x1d9   : > { %7274 = vmatprep.subr.bf16.mxu0 %v15043_v60  ;;  %2010 = vmatpush1.bf16.msra.mxu1 %v15014_v3  ;;  %v15083_v60 = vld [vmem:[%s20255_s1 + $0xf00] ss:$8 sps:$4 sm:$0xff]  }
 0x1da   : > { %2011 = vmatprep.subr.bf16.mxu1 %v15022_v7  ;;  %v15209_v3 = vld [vmem:[%s20258_s4 + $0x20] ss:$8 sps:$4 sm:$0xff]  }
 0x1db   : > { %v15118_v7 = vld [vmem:[%s16242_s15 + $0x2a0] ss:$48 sps:$4 sm:$0xff]  }
 0x1dc   : > { %7275 = vmatpush1.bf16.msra.mxu0 %v15041_v28  ;;  %v15088_v28 = vld [vmem:[%s20255_s1 + $0xf14] ss:$8 sps:$4 sm:$0xff]  }
 0x1dd   : > { %7276 = vmatprep.subr.bf16.mxu0 %v15049_v39  ;;  %2012 = vmatpush1.bf16.msra.mxu1 %v15020_v44  ;;  %v15086_v39 = vld [vmem:[%s20255_s1 + $0xf10] ss:$8 sps:$4 sm:$0xff]  }
 0x1de   : > { %2013 = vmatprep.subr.bf16.mxu1 %v15028_v63  ;;  %v15215_v44 = vld [vmem:[%s20258_s4 + $0x30] ss:$8 sps:$4 sm:$0xff]   ;;  %v15217_v63 = vld [vmem:[%s20258_s4 + $0x34] ss:$8 sps:$4 sm:$0xff]  }
 0x1df   : > { %6724 = vmatmul.mubr.bf16.gmra.mrb[12].mxu0 %v12911_v11  ;;  %v15211_v11 = vld [vmem:[%s20258_s4 + $0x24] ss:$8 sps:$4 sm:$0xff]  }
 0x1e0   : > { %7277 = vmatpush1.bf16.msra.mxu0 %v15047_v6  ;;  %7296 = vmatprep.mubr.bf16.mxu0 %v15082_v42  ;;  %v15091_v6 = vld [vmem:[%s20255_s1 + $0xf24] ss:$8 sps:$4 sm:$0xff]  }
 0x1e1   : > { %7278 = vmatprep.subr.bf16.mxu0 %v15055_v55  ;;  %2014 = vmatpush1.bf16.msra.mxu1 %v15026_v12  ;;  %v15089_v55 = vld [vmem:[%s20255_s1 + $0xf20] ss:$8 sps:$4 sm:$0xff]   ;;  %v15122_v42 = vld [vmem:[%s16242_s15 + $0x304] ss:$48 sps:$4 sm:$0xff]  }
 0x1e2   : > { %2015 = vmatprep.subr.bf16.mxu1 %v15034_v16  ;;  %v15097_v12 = vld [vmem:[%s20255_s1 + $0xf44] ss:$8 sps:$4 sm:$0xff]   ;;  %v15221_v16 = vld [vmem:[%s20258_s4 + $0x40] ss:$8 sps:$4 sm:$0xff]  }
 0x1e4   : > { %7279 = vmatpush1.bf16.msra.mxu0 %v15053_v8  ;;  %v15094_v8 = vld [vmem:[%s20255_s1 + $0xf34] ss:$8 sps:$4 sm:$0xff]  }
 0x1e5   : > { %7280 = vmatprep.subr.bf16.mxu0 %v15058_v9  ;;  %2016 = vmatpush1.bf16.msra.mxu1 %v15032_v20  ;;  %v15092_v9 = vld [vmem:[%s20255_s1 + $0xf30] ss:$8 sps:$4 sm:$0xff]   ;;  %v15095_v20 = vld [vmem:[%s20255_s1 + $0xf40] ss:$8 sps:$4 sm:$0xff]  }
 0x1e6   : > { %2017 = vmatprep.subr.bf16.mxu1 %v15040_v21  ;;  %v15131_v21 = vld [vmem:[%s16242_s15 + $0x364] ss:$48 sps:$4 sm:$0xff]  }
 0x1e8   : > { %7281 = vmatpush1.bf16.msra.mxu0 %v15056_v18  ;;  %v15223_v18 = vld [vmem:[%s20258_s4 + $0x44] ss:$8 sps:$4 sm:$0xff]  }
 0x1e9   : > { %7282 = vmatprep.subr.bf16.mxu0 %v15061_v19  ;;  %2018 = vmatpush1.bf16.msra.mxu1 %v15038_v25  ;;  %v15127_v19 = vld [vmem:[%s16242_s15 + $0x300] ss:$48 sps:$4 sm:$0xff]   ;;  %v15100_v25 = vld [vmem:[%s20255_s1 + $0xf54] ss:$8 sps:$4 sm:$0xff]  }
 0x1ea   : > { %2019 = vmatprep.subr.bf16.mxu1 %v15046_v27  ;;  %v15098_v27 = vld [vmem:[%s20255_s1 + $0xf50] ss:$8 sps:$4 sm:$0xff]  }
 0x1ec   : > { %7283 = vmatpush1.bf16.msra.mxu0 %v15059_v23  ;;  %v15227_v23 = vld [vmem:[%s20258_s4 + $0x50] ss:$8 sps:$4 sm:$0xff]  }
 0x1ed   : > { %7284 = vmatprep.subr.bf16.mxu0 %v15064_v24  ;;  %2020 = vmatpush1.bf16.msra.mxu1 %v15044_v35  ;;  %v15229_v24 = vld [vmem:[%s20258_s4 + $0x54] ss:$8 sps:$4 sm:$0xff]   ;;  %v15235_v35 = vld [vmem:[%s20258_s4 + $0x64] ss:$8 sps:$4 sm:$0xff]  }
 0x1ee   : > { %2021 = vmatprep.subr.bf16.mxu1 %v15052_v37  ;;  %v15136_v37 = vld [vmem:[%s16242_s15 + $0x360] ss:$48 sps:$4 sm:$0xff]  }
 0x1f0   : > { %7285 = vmatpush1.bf16.msra.mxu0 %v15062_v31  ;;  %v15103_v31 = vld [vmem:[%s20255_s1 + $0xf64] ss:$8 sps:$4 sm:$0xff]  }
 0x1f1   : > { %7286 = vmatprep.subr.bf16.mxu0 %v15067_v32  ;;  %2022 = vmatpush1.bf16.msra.mxu1 %v15050_v52  ;;  %v15233_v32 = vld [vmem:[%s20258_s4 + $0x60] ss:$8 sps:$4 sm:$0xff]   ;;  %v15239_v52 = vld [vmem:[%s20258_s4 + $0x70] ss:$8 sps:$4 sm:$0xff]  }
 0x1f2   : > { %2400 = vmatprep.subr.bf16.mxu1 %v15199_v14  ;;  %v15253_v14 = vld [vmem:[%s20258_s4 + $0x94] ss:$8 sps:$4 sm:$0xff]  }
 0x1f4   : > { %7287 = vmatpush1.bf16.msra.mxu0 %v15065_v29  ;;  %2024 = vmatmul.mubr.bf16.vlgmr.msra.gmra.mrb[8].mxu1 %v17118_v33  ;;  %v15101_v29 = vld [vmem:[%s20255_s1 + $0xf60] ss:$8 sps:$4 sm:$0xff]  }
 0x1f5   : > { %7288 = vmatprep.subr.bf16.mxu0 %v15070_v30  ;;  %2033 = vmatprep.mubr.bf16.mxu1 %v17122_v34  ;;  %v15142_v30 = vld [vmem:[%s16242_s15 + $0x24c] ss:$48 sps:$4 sm:$0xff]  }
 0x1f6   : > { %2401 = vmatpush1.bf16.msra.mxu1 %v15197_v56  ;;  %v15251_v56 = vld [vmem:[%s20258_s4 + $0x90] ss:$8 sps:$4 sm:$0xff]  }
 0x1f7   : > { %2402 = vmatprep.subr.bf16.mxu1 %v15205_v0  ;;  %v15115_v0 = vld [vmem:[%s20255_s1 + $0xfa0] ss:$8 sps:$4 sm:$0xff]  }
 0x1f8   : > { %7289 = vmatpush1.bf16.msra.mxu0 %v15068_v26  ;;  %v15241_v26 = vld [vmem:[%s20258_s4 + $0x74] ss:$8 sps:$4 sm:$0xff]  }
 0x1f9   : > { %7290 = vmatprep.subr.bf16.mxu0 %v15073_v36  ;;  %v15106_v36 = vld [vmem:[%s20255_s1 + $0xf74] ss:$8 sps:$4 sm:$0xff]  }
 0x1fa   : > { %2403 = vmatpush1.bf16.msra.mxu1 %v15203_v46  ;;  %v15117_v46 = vld [vmem:[%s20255_s1 + $0xfa4] ss:$8 sps:$4 sm:$0xff]  }
 0x1fb   : > { %2404 = vmatprep.subr.bf16.mxu1 %v15211_v11  ;;  %v15269_v11 = vld [vmem:[%s20258_s4 + $0xc0] ss:$8 sps:$4 sm:$0xff]  }
 0x1fc   : > { %7291 = vmatpush1.bf16.msra.mxu0 %v15071_v40  ;;  %2034 = vmatmul.mubr.bf16.gmra.mrb[12].mxu1 %v17140_v38  ;;  %v15104_v40 = vld [vmem:[%s20255_s1 + $0xf70] ss:$8 sps:$4 sm:$0xff]  }
 0x1fd   : > { %7292 = vmatprep.subr.bf16.mxu0 %v15076_v45  ;;  %2043 = vmatprep.mubr.bf16.mxu1 %v17144_v41  ;;  %v15245_v45 = vld [vmem:[%s20258_s4 + $0x80] ss:$8 sps:$4 sm:$0xff]  }
 0x1fe   : > { %2405 = vmatpush1.bf16.msra.mxu1 %v15209_v3  ;;  %v15119_v3 = vld [vmem:[%s20255_s1 + $0xfb0] ss:$8 sps:$4 sm:$0xff]  }
 0x1ff   : > { %2406 = vmatprep.subr.bf16.mxu1 %v15217_v63  ;;  %v15128_v63 = vld [vmem:[%s20255_s1 + $0xfd0] ss:$8 sps:$4 sm:$0xff]  }
 0x200   : > { %7293 = vmatpush1.bf16.msra.mxu0 %v15074_v47  ;;  %v15247_v47 = vld [vmem:[%s20258_s4 + $0x84] ss:$8 sps:$4 sm:$0xff]  }
 0x201   : > { %7294 = vmatprep.subr.bf16.mxu0 %v15079_v48  ;;  %v15109_v48 = vld [vmem:[%s20255_s1 + $0xf84] ss:$8 sps:$4 sm:$0xff]  }
 0x202   : > { %2407 = vmatpush1.bf16.msra.mxu1 %v15215_v44  ;;  %v15130_v44 = vld [vmem:[%s20255_s1 + $0xfd4] ss:$8 sps:$4 sm:$0xff]  }
 0x203   : > { %2408 = vmatprep.subr.bf16.mxu1 %v15223_v18  ;;  %v15145_v18 = vld [vmem:[%s20255_s1 + $0x1004] ss:$8 sps:$4 sm:$0xff]  }
 0x204   : > { %7295 = vmatpush1.bf16.msra.mxu0 %v15077_v49  ;;  %2044 = vmatmul.mubr.bf16.gmra.mrb[16].mxu1 %v17166_v50  ;;  %v15107_v49 = vld [vmem:[%s20255_s1 + $0xf80] ss:$8 sps:$4 sm:$0xff]  }
 0x205   : > { %7337 = vmatprep.subr.bf16.mxu0 %v15085_v59  ;;  %2053 = vmatprep.mubr.bf16.mxu1 %v17170_v54  ;;  %v15110_v59 = vld [vmem:[%s20255_s1 + $0xf90] ss:$8 sps:$4 sm:$0xff]  }
 0x206   : > { %2409 = vmatpush1.bf16.msra.mxu1 %v15221_v16  ;;  %v15137_v16 = vld [vmem:[%s20255_s1 + $0xff0] ss:$8 sps:$4 sm:$0xff]  }
 0x207   : > { %7297 = vmatmul.mubr.bf16.vlgmr.msra.gmra.mrb[0].mxu0 %v15080_v15  ;;  %2410 = vmatprep.subr.bf16.mxu1 %v15229_v24  ;;  %v15112_v15 = vld [vmem:[%s20255_s1 + $0xf94] ss:$8 sps:$4 sm:$0xff]   ;;  %v15146_v24 = vld [vmem:[%s20255_s1 + $0x1010] ss:$8 sps:$4 sm:$0xff]  }
 0x208   : > { %7338 = vmatpush1.bf16.msra.mxu0 %v15083_v60  ;;  %7306 = vmatprep.mubr.bf16.mxu0 %v15113_v22  ;;  %v15257_v60 = vld [vmem:[%s20258_s4 + $0xa0] ss:$8 sps:$4 sm:$0xff]   ;;  %v15259_v22 = vld [vmem:[%s20258_s4 + $0xa4] ss:$8 sps:$4 sm:$0xff]  }
 0x209   : > { %7339 = vmatprep.subr.bf16.mxu0 %v15088_v28  ;;  %v15263_v28 = vld [vmem:[%s20258_s4 + $0xb0] ss:$8 sps:$4 sm:$0xff]  }
 0x20a   : > { %2411 = vmatpush1.bf16.msra.mxu1 %v15227_v23  ;;  %v15148_v23 = vld [vmem:[%s20255_s1 + $0x1014] ss:$8 sps:$4 sm:$0xff]  }
 0x20b   : > { %2412 = vmatprep.subr.bf16.mxu1 %v15235_v35  ;;  %v15154_v35 = vld [vmem:[%s20255_s1 + $0x1034] ss:$8 sps:$4 sm:$0xff]  }
 0x20c   : > { %7340 = vmatpush1.bf16.msra.mxu0 %v15086_v39  ;;  %2054 = vmatmul.mubr.bf16.gmra.mrb[20].mxu1 %v17196_v2  ;;  %v15265_v39 = vld [vmem:[%s20258_s4 + $0xb4] ss:$8 sps:$4 sm:$0xff]  }
 0x20d   : > { %7341 = vmatprep.subr.bf16.mxu0 %v15091_v6  ;;  %v15121_v6 = vld [vmem:[%s20255_s1 + $0xfb4] ss:$8 sps:$4 sm:$0xff]  }
 0x20e   : > { %2413 = vmatpush1.bf16.msra.mxu1 %v15233_v32  ;;  %v15182_v32 = vld [vmem:[%s16242_s15 + $0x30c] ss:$48 sps:$4 sm:$0xff]  }
 0x20f   : > { %7307 = vmatmul.mubr.bf16.gmra.mrb[4].mxu0 %v15118_v7  ;;  %2414 = vmatprep.subr.bf16.mxu1 %v15241_v26  ;;  %v15271_v7 = vld [vmem:[%s20258_s4 + $0xc4] ss:$8 sps:$4 sm:$0xff]  }
 0x210   : > { %7342 = vmatpush1.bf16.msra.mxu0 %v15089_v55  ;;  %7316 = vmatprep.mubr.bf16.mxu0 %v15122_v42  ;;  %v15126_v55 = vld [vmem:[%s20255_s1 + $0xfc4] ss:$8 sps:$4 sm:$0xff]   ;;  %v15124_v42 = vld [vmem:[%s20255_s1 + $0xfc0] ss:$8 sps:$4 sm:$0xff]  }
 0x211   : > { %7343 = vmatprep.subr.bf16.mxu0 %v15094_v8  ;;  %v15135_v8 = vld [vmem:[%s20255_s1 + $0xfe4] ss:$8 sps:$4 sm:$0xff]  }
 0x212   : > { %2415 = vmatpush1.bf16.msra.mxu1 %v15239_v52  ;;  %v15157_v26 = vld [vmem:[%s20255_s1 + $0x1044] ss:$8 sps:$4 sm:$0xff]  }
 0x213   : > { %2416 = vmatprep.subr.bf16.mxu1 %v15247_v47 }
 0x214   : > { %7344 = vmatpush1.bf16.msra.mxu0 %v15092_v9  ;;  %v15133_v9 = vld [vmem:[%s20255_s1 + $0xfe0] ss:$8 sps:$4 sm:$0xff]  }
 0x215   : > { %7345 = vmatprep.subr.bf16.mxu0 %v15097_v12  ;;  %v15139_v12 = vld [vmem:[%s20255_s1 + $0xff4] ss:$8 sps:$4 sm:$0xff]  }
 0x216   : > { %2417 = vmatpush1.bf16.msra.mxu1 %v15245_v45  ;;  %v13139_v45 = vld [vmem:[%s16242_s15 + $0x250] sm:$0x77] }
 0x217   : > { %7317 = vmatmul.mubr.bf16.gmra.mrb[8].mxu0 %v15127_v19  ;;  %2418 = vmatprep.subr.bf16.mxu1 %v15253_v14  ;;  %v15140_v19 = vld [vmem:[%s16242_s15 + $0x248] ss:$48 sps:$4 sm:$0xff]   ;;  %v13143_v14 = vld [vmem:[%s16242_s15 + $0x280] sm:$0x77] }
 0x218   : > { %7346 = vmatpush1.bf16.msra.mxu0 %v15095_v20  ;;  %7326 = vmatprep.mubr.bf16.mxu0 %v15131_v21  ;;  %v15143_v20 = vld [vmem:[%s20255_s1 + $0x1000] ss:$8 sps:$4 sm:$0xff]   ;;  %v15173_v21 = vld [vmem:[%s16242_s15 + $0x2ac] ss:$48 sps:$4 sm:$0xff]  }
 0x219   : > { %7347 = vmatprep.subr.bf16.mxu0 %v15100_v25  ;;  %v15151_v25 = vld [vmem:[%s20255_s1 + $0x1024] ss:$8 sps:$4 sm:$0xff]  }
 0x21a   : > { %2419 = vmatpush1.bf16.msra.mxu1 %v15251_v56 }
 0x21b   : > { %2420 = vmatprep.subr.bf16.mxu1 %v15259_v22  ;;  %v15160_v22 = vld [vmem:[%s20255_s1 + $0x1054] ss:$8 sps:$4 sm:$0xff]  }
 0x21c   : > { %7348 = vmatpush1.bf16.msra.mxu0 %v15098_v27  ;;  %v15149_v27 = vld [vmem:[%s20255_s1 + $0x1020] ss:$8 sps:$4 sm:$0xff]  }
 0x21d   : > { %7349 = vmatprep.subr.bf16.mxu0 %v15103_v31  ;;  %v15178_v31 = vld [vmem:[%s16242_s15 + $0x2a8] ss:$48 sps:$4 sm:$0xff]  }
 0x21e   : > { %2421 = vmatpush1.bf16.msra.mxu1 %v15257_v60  ;;  %v15155_v60 = vld [vmem:[%s20255_s1 + $0x1040] ss:$8 sps:$4 sm:$0xff]  }
 0x21f   : > { %7327 = vmatmul.mubr.bf16.gmra.mrb[12].mxu0 %v15136_v37  ;;  %2422 = vmatprep.subr.bf16.mxu1 %v15265_v39  ;;  %v15277_v37 = vld [vmem:[%s20258_s4 + $0xd4] ss:$8 sps:$4 sm:$0xff]  }
 0x220   : > { %7350 = vmatpush1.bf16.msra.mxu0 %v15101_v29  ;;  %7369 = vmatprep.mubr.bf16.mxu0 %v15142_v30  ;;  %v15152_v29 = vld [vmem:[%s20255_s1 + $0x1030] ss:$8 sps:$4 sm:$0xff]  }
 0x221   : > { %7351 = vmatprep.subr.bf16.mxu0 %v15106_v36  ;;  %v15275_v30 = vld [vmem:[%s20258_s4 + $0xd0] ss:$8 sps:$4 sm:$0xff]  }
 0x222   : > { %2423 = vmatpush1.bf16.msra.mxu1 %v15263_v28  ;;  %v7508_v28 = vrot.slane %v13139_v45, 7  ;;  %v13149_v45 = vld [vmem:[%s16242_s15 + $0x2d0] sm:$0x88] }
 0x223   : > { %2424 = vmatprep.subr.bf16.mxu1 %v15271_v7  ;;  %v15158_v7 = vld [vmem:[%s20255_s1 + $0x1050] ss:$8 sps:$4 sm:$0xff]  }
 0x224   : > { %7352 = vmatpush1.bf16.msra.mxu0 %v15104_v40  ;;  %v13137_v40 = vld [vmem:[%s16242_s15 + $0x240] sm:$0x88] }
 0x225   : > { %7353 = vmatprep.subr.bf16.mxu0 %v15109_v48  ;;  %v13141_v48 = vld [vmem:[%s16242_s15 + $0x270] sm:$0x88] }
 0x226   : > { %2425 = vmatpush1.bf16.msra.mxu1 %v15269_v11  ;;  %v13171_v39 = vrot.slane %v13141_v48, 11  ;;  %v15287_v11 = vld [vmem:[%s20258_s4 + $0xf0] ss:$8 sps:$4 sm:$0xff]   ;;  %v15193_v48 = vld [vmem:[%s20255_s1 + $0x10e0] ss:$8 sps:$4 sm:$0xff]  }
 0x227   : > { %2426 = vmatprep.subr.bf16.mxu1 %v15277_v37  ;;  %v15190_v37 = vld [vmem:[%s20255_s1 + $0x10d4] ss:$8 sps:$4 sm:$0xff]  }
 0x228   : > { %7354 = vmatpush1.bf16.msra.mxu0 %v15107_v49  ;;  %v15283_v49 = vld [vmem:[%s20258_s4 + $0xe4] ss:$8 sps:$4 sm:$0xff]  }
 0x229   : > { %7355 = vmatprep.subr.bf16.mxu0 %v15112_v15  ;;  %v15281_v15 = vld [vmem:[%s20258_s4 + $0xe0] ss:$8 sps:$4 sm:$0xff]  }
 0x22a   : > { %2427 = vmatpush1.bf16.msra.mxu1 %v15275_v30  ;;  %v15195_v30 = vld [vmem:[%s20255_s1 + $0x10e4] ss:$8 sps:$4 sm:$0xff]  }
 0x22b   : > { %2428 = vmatprep.subr.bf16.mxu1 %v15283_v49  ;;  %v15202_v49 = vld [vmem:[%s20255_s1 + $0x10f4] ss:$8 sps:$4 sm:$0xff]  }
 0x22c   : > { %7356 = vmatpush1.bf16.msra.mxu0 %v15110_v59  ;;  %v15187_v59 = vld [vmem:[%s16242_s15 + $0x308] ss:$48 sps:$4 sm:$0xff]  }
 0x22d   : > { %7357 = vmatprep.subr.bf16.mxu0 %v15117_v46  ;;  %v15191_v46 = vld [vmem:[%s16242_s15 + $0x36c] ss:$48 sps:$4 sm:$0xff]  }
 0x22e   : > { %2429 = vmatpush1.bf16.msra.mxu1 %v15281_v15  ;;  %v13175_v15 = vrot.slane %v13149_v45, 11 }
 0x230   : > { %7358 = vmatpush1.bf16.msra.mxu0 %v15115_v0  ;;  %v13169_v0 = vrot.slane %v13137_v40, 11  ;;  %v13147_v40 = vld [vmem:[%s16242_s15 + $0x2b0] sm:$0x77] }
 0x231   : > { %7359 = vmatprep.subr.bf16.mxu0 %v15121_v6  ;;  %v7516_v6 = vrot.slane %v13143_v14, 7  ;;  %v7524_v14 = vrot.slane %v13147_v40, 7  ;;  %v15232_v40 = vld [vmem:[%s20255_s1 + $0x1144] ss:$8 sps:$4 sm:$0xff]  }
 0x234   : > { %7360 = vmatpush1.bf16.msra.mxu0 %v15119_v3  ;;  %v15289_v3 = vld [vmem:[%s20258_s4 + $0xf4] ss:$8 sps:$4 sm:$0xff]  }
 0x235   : > { %7361 = vmatprep.subr.bf16.mxu0 %v15126_v55  ;;  %2430 = vmatprep.subr.bf16.mxu1 %v15289_v3  ;;  %v15163_v55 = vld [vmem:[%s20255_s1 + $0x1064] ss:$8 sps:$4 sm:$0xff]  }
 0x236   : > { %2431 = vmatpush1.bf16.msra.mxu1 %v15287_v11  ;;  %v13159_v3 = vld [vmem:[%s16242_s15 + $0x340] sm:$0x77] }
 0x238   : > { %7362 = vmatpush1.bf16.msra.mxu0 %v15124_v42  ;;  %v17988_v42 = vsel %vm16279_vm3, %v13169_v0, %v7508_v28  ;;  %v13153_v28 = vld [vmem:[%s16242_s15 + $0x300] sm:$0x88] }
 0x239   : > { %7363 = vmatprep.subr.bf16.mxu0 %v15130_v44  ;;  %v17992_v44 = vsel %vm16279_vm3, %v13171_v39, %v7516_v6  ;;  %v13155_v39 = vld [vmem:[%s16242_s15 + $0x310] sm:$0x77]  ;;  %v13157_v6 = vld [vmem:[%s16242_s15 + $0x330] sm:$0x88] }
 0x23a   : > { %v13249_v11 = vcombine.low %v17988_v42, %v17992_v44 }
 0x23c   : > { %7364 = vmatpush1.bf16.msra.mxu0 %v15128_v63  ;;  %v15295_v63 = vld [vmem:[%s20255_s1 + $0x204] ss:$8 sps:$4 sm:$0xff]  }
 0x23d   : > { %7365 = vmatprep.subr.bf16.mxu0 %v15135_v8  ;;  %v15196_v8 = vld [vmem:[%s16242_s15 + $0x368] ss:$48 sps:$4 sm:$0xff]   ;;  %3018 = vmatprep.subr.bf16.mxu1 %v15295_v63  ;;  %v15214_v63 = vld [vmem:[%s20255_s1 + $0x1114] ss:$8 sps:$4 sm:$0xff]  }
 0x240   : > { %7366 = vmatpush1.bf16.msra.mxu0 %v15133_v9  ;;  %v15161_v9 = vld [vmem:[%s20255_s1 + $0x1060] ss:$8 sps:$4 sm:$0xff]  }
 0x241   : > { %7367 = vmatprep.subr.bf16.mxu0 %v15139_v12  ;;  %v13250_v12 = vcombine.high %v17988_v42, %v17992_v44  ;;  %v15212_v42 = vld [vmem:[%s20255_s1 + $0x1110] ss:$8 sps:$4 sm:$0xff]   ;;  %v15220_v44 = vld [vmem:[%s20255_s1 + $0x1124] ss:$8 sps:$4 sm:$0xff]  }
 0x244   : > { %7368 = vmatpush1.bf16.msra.mxu0 %v15137_v16  ;;  %v15166_v16 = vld [vmem:[%s20255_s1 + $0x1074] ss:$8 sps:$4 sm:$0xff]  }
 0x245   : > { %8035 = vmatprep.subr.bf16.mxu0 %v15145_v18  ;;  %v15164_v18 = vld [vmem:[%s20255_s1 + $0x1070] ss:$8 sps:$4 sm:$0xff]  }
 0x247   : > { %7370 = vmatmul.mubr.bf16.vlgmr.msra.gmra.mrb[0].mxu0 %v15140_v19  ;;  %v17949_v52 = vpop.f32.mrb[4].mxu1  ;;  %v15169_v19 = vld [vmem:[%s20255_s1 + $0x1084] ss:$8 sps:$4 sm:$0xff]  }
 0x248   : > { %8036 = vmatpush1.bf16.msra.mxu0 %v15143_v20  ;;  %7379 = vmatprep.mubr.bf16.mxu0 %v15173_v21  ;;  %v17954_v36 = vpop.f32.mrb[5].mxu1  ;;  %v15167_v20 = vld [vmem:[%s20255_s1 + $0x1080] ss:$8 sps:$4 sm:$0xff]   ;;  %v15172_v21 = vld [vmem:[%s20255_s1 + $0x1094] ss:$8 sps:$4 sm:$0xff]  }
 0x249   : > { %8037 = vmatprep.subr.bf16.mxu0 %v15148_v23  ;;  %v1411_v47 = vpop.f32.mrb[6].mxu1  ;;  %v15170_v23 = vld [vmem:[%s20255_s1 + $0x1090] ss:$8 sps:$4 sm:$0xff]  }
 0x24a   : > { %v1412_v56 = vpop.f32.mrb[7].mxu1  ;;  %v13151_v47 = vld [vmem:[%s16242_s15 + $0x2e0] sm:$0x77] }
 0x24c   : > { %8038 = vmatpush1.bf16.msra.mxu0 %v15146_v24  ;;  %v15177_v24 = vld [vmem:[%s20255_s1 + $0x10a4] ss:$8 sps:$4 sm:$0xff]  }
 0x24d   : > { %8039 = vmatprep.subr.bf16.mxu0 %v15151_v25  ;;  %v15175_v25 = vld [vmem:[%s20255_s1 + $0x10a0] ss:$8 sps:$4 sm:$0xff]  }
 0x24f   : > { %7380 = vmatmul.mubr.bf16.gmra.mrb[4].mxu0 %v15178_v31  ;;  %v15179_v31 = vld [vmem:[%s20255_s1 + $0x10b0] ss:$8 sps:$4 sm:$0xff]  }
 0x250   : > { %8040 = vmatpush1.bf16.msra.mxu0 %v15149_v27  ;;  %7389 = vmatprep.mubr.bf16.mxu0 %v15182_v32  ;;  %v15181_v27 = vld [vmem:[%s20255_s1 + $0x10b4] ss:$8 sps:$4 sm:$0xff]   ;;  %v15186_v32 = vld [vmem:[%s20255_s1 + $0x10c4] ss:$8 sps:$4 sm:$0xff]  }
 0x251   : > { %8041 = vmatprep.subr.bf16.mxu0 %v15154_v35  ;;  %v15184_v35 = vld [vmem:[%s20255_s1 + $0x10c0] ss:$8 sps:$4 sm:$0xff]  }
 0x254   : > { %8042 = vmatpush1.bf16.msra.mxu0 %v15152_v29  ;;  %v15188_v29 = vld [vmem:[%s20255_s1 + $0x10d0] ss:$8 sps:$4 sm:$0xff]  }
 0x255   : > { %8043 = vmatprep.subr.bf16.mxu0 %v15157_v26  ;;  %v13145_v26 = vld [vmem:[%s16242_s15 + $0x2a0] sm:$0x88] }
 0x256   : > { %v13173_v56 = vrot.slane %v13145_v26, 11  ;;  %v15224_v26 = vld [vmem:[%s20255_s1 + $0x1130] ss:$8 sps:$4 sm:$0xff]  }
 0x257   : > { %7390 = vmatmul.mubr.bf16.gmra.mrb[8].mxu0 %v15187_v59  ;;  %v7532_v59 = vrot.slane %v13151_v47, 7 }
 0x258   : > { %8044 = vmatpush1.bf16.msra.mxu0 %v15155_v60  ;;  %7399 = vmatprep.mubr.bf16.mxu0 %v15191_v46  ;;  %v15200_v60 = vld [vmem:[%s20255_s1 + $0x10f0] ss:$8 sps:$4 sm:$0xff]   ;;  %v7525_v46 = vsel %vm16279_vm3, %v13173_v56, %v7524_v14  ;;  %v13144_v14 = vld [vmem:[%s16242_s15 + $0x288] sm:$0x77] }
 0x259   : > { %8045 = vmatprep.subr.bf16.mxu0 %v15160_v22  ;;  %v15208_v22 = vld [vmem:[%s20255_s1 + $0x1104] ss:$8 sps:$4 sm:$0xff]   ;;  %v7533_v0 = vsel %vm16279_vm3, %v13175_v15, %v7532_v59  ;;  %v13142_v56 = vld [vmem:[%s16242_s15 + $0x278] sm:$0x88]  ;;  %v15230_v59 = vld [vmem:[%s20255_s1 + $0x1140] ss:$8 sps:$4 sm:$0xff]  }
 0x25c   : > { %8046 = vmatpush1.bf16.msra.mxu0 %v15158_v7  ;;  %v15206_v7 = vld [vmem:[%s20255_s1 + $0x1100] ss:$8 sps:$4 sm:$0xff]  }
 0x25d   : > { %8047 = vmatprep.subr.bf16.mxu0 %v15163_v55  ;;  %v13254_v55 = vcombine.high %v7525_v46, %v7533_v0 }
 0x25f   : > { %7400 = vmatmul.mubr.bf16.gmra.mrb[12].mxu0 %v15196_v8  ;;  %v13177_v8 = vrot.slane %v13153_v28, 11  ;;  %v13172_v28 = vrot.slane %v13142_v56, 11  ;;  %v15296_v56 = vld [vmem:[%s20255_s1 + $0x11f0] ss:$8 sps:$4 sm:$0xff]  }
 0x260   : > { %8048 = vmatpush1.bf16.msra.mxu0 %v15161_v9  ;;  %8067 = vmatprep.mubr.bf16.mxu0 %v13250_v12  ;;  %v7540_v9 = vrot.slane %v13155_v39, 7  ;;  %v13179_v12 = vrot.slane %v13157_v6, 11  ;;  %v7520_v39 = vrot.slane %v13144_v14, 7  ;;  %v15236_v6 = vld [vmem:[%s20255_s1 + $0x1150] ss:$8 sps:$4 sm:$0xff]  }
 0x261   : > { %8049 = vmatprep.subr.bf16.mxu0 %v15166_v16  ;;  %v7548_v16 = vrot.slane %v13159_v3, 7  ;;  %v15244_v3 = vld [vmem:[%s20255_s1 + $0x1164] ss:$8 sps:$4 sm:$0xff]  }
 0x262   : > { %v15304_v14 = vld [vmem:[%s20255_s1 + $0x1204] ss:$8 sps:$4 sm:$0xff]  }
 0x264   : > { %8050 = vmatpush1.bf16.msra.mxu0 %v15164_v18  ;;  %v7541_v18 = vsel %vm16279_vm3, %v13177_v8, %v7540_v9  ;;  %v15250_v9 = vld [vmem:[%s20255_s1 + $0x1174] ss:$8 sps:$4 sm:$0xff]  }
 0x265   : > { %8051 = vmatprep.subr.bf16.mxu0 %v15169_v19  ;;  %v7549_v19 = vsel %vm16279_vm3, %v13179_v12, %v7548_v16  ;;  %v15248_v12 = vld [vmem:[%s20255_s1 + $0x1170] ss:$8 sps:$4 sm:$0xff]   ;;  %v15256_v16 = vld [vmem:[%s20255_s1 + $0x1184] ss:$8 sps:$4 sm:$0xff]  }
 0x266   : > { %v13257_v15 = vcombine.low %v7541_v18, %v7549_v19 }
 0x268   : > { %8052 = vmatpush1.bf16.msra.mxu0 %v15167_v20  ;;  %v13161_v20 = vld [vmem:[%s16242_s15 + $0x360] sm:$0x88] }
 0x269   : > { %8053 = vmatprep.subr.bf16.mxu0 %v15172_v21  ;;  %v13163_v21 = vld [vmem:[%s16242_s15 + $0x370] sm:$0x77] }
 0x26c   : > { %8054 = vmatpush1.bf16.msra.mxu0 %v15170_v23  ;;  %v13165_v23 = vld [vmem:[%s16242_s15 + $0x390] sm:$0x88] }
 0x26d   : > { %8055 = vmatprep.subr.bf16.mxu0 %v15177_v24  ;;  %v13167_v24 = vld [vmem:[%s16242_s15 + $0x3a0] sm:$0x77] }
 0x270   : > { %8056 = vmatpush1.bf16.msra.mxu0 %v15175_v25  ;;  %v13253_v25 = vcombine.low %v7525_v46, %v7533_v0 }
 0x271   : > { %8057 = vmatprep.subr.bf16.mxu0 %v15181_v27  ;;  %v15218_v27 = vld [vmem:[%s20255_s1 + $0x1120] ss:$8 sps:$4 sm:$0xff]  }
 0x274   : > { %8058 = vmatpush1.bf16.msra.mxu0 %v15179_v31  ;;  %v13258_v31 = vcombine.high %v7541_v18, %v7549_v19  ;;  %v15260_v18 = vld [vmem:[%s20255_s1 + $0x1190] ss:$8 sps:$4 sm:$0xff]   ;;  %v15268_v19 = vld [vmem:[%s20255_s1 + $0x11a4] ss:$8 sps:$4 sm:$0xff]  }
 0x275   : > { %8059 = vmatprep.subr.bf16.mxu0 %v15186_v32  ;;  %v15226_v32 = vld [vmem:[%s20255_s1 + $0x1134] ss:$8 sps:$4 sm:$0xff]  }
 0x278   : > { %8060 = vmatpush1.bf16.msra.mxu0 %v15184_v35  ;;  %v13181_v35 = vrot.slane %v13161_v20, 11  ;;  %v15266_v20 = vld [vmem:[%s20255_s1 + $0x11a0] ss:$8 sps:$4 sm:$0xff]  }
 0x279   : > { %8061 = vmatprep.subr.bf16.mxu0 %v15190_v37  ;;  %v7556_v37 = vrot.slane %v13163_v21, 7  ;;  %v15274_v21 = vld [vmem:[%s20255_s1 + $0x11b4] ss:$8 sps:$4 sm:$0xff]  }
 0x27b   : > { %v7557_v45 = vsel %vm16279_vm3, %v13181_v35, %v7556_v37  ;;  %v13146_v35 = vld [vmem:[%s16242_s15 + $0x2a8] sm:$0x88]  ;;  %v13148_v37 = vld [vmem:[%s16242_s15 + $0x2b8] sm:$0x77] }
 0x27c   : > { %8062 = vmatpush1.bf16.msra.mxu0 %v15188_v29  ;;  %v13183_v29 = vrot.slane %v13165_v23, 11  ;;  %v15272_v23 = vld [vmem:[%s20255_s1 + $0x11b0] ss:$8 sps:$4 sm:$0xff]  }
 0x27d   : > { %8063 = vmatprep.subr.bf16.mxu0 %v15195_v30  ;;  %v7564_v30 = vrot.slane %v13167_v24, 7  ;;  %v15280_v24 = vld [vmem:[%s20255_s1 + $0x11c4] ss:$8 sps:$4 sm:$0xff]  }
 0x27f   : > { %v7565_v47 = vsel %vm16279_vm3, %v13183_v29, %v7564_v30  ;;  %v13150_v29 = vld [vmem:[%s16242_s15 + $0x2d8] sm:$0x88]  ;;  %v13152_v30 = vld [vmem:[%s16242_s15 + $0x2e8] sm:$0x77] }
 0x280   : > { %8064 = vmatpush1.bf16.msra.mxu0 %v15193_v48  ;;  %v13138_v48 = vld [vmem:[%s16242_s15 + $0x248] sm:$0x88] }
 0x281   : > { %8065 = vmatprep.subr.bf16.mxu0 %v15202_v49  ;;  %v13140_v49 = vld [vmem:[%s16242_s15 + $0x258] sm:$0x77]  ;;  %v13170_v46 = vrot.slane %v13138_v48, 11  ;;  %v13176_v48 = vrot.slane %v13150_v29, 11 }
 0x282   : > { %v7512_v0 = vrot.slane %v13140_v49, 7  ;;  %v7536_v49 = vrot.slane %v13152_v30, 7 }
 0x284   : > { %8066 = vmatpush1.bf16.msra.mxu0 %v15200_v60  ;;  %v13262_v60 = vcombine.high %v7557_v45, %v7565_v47 }
 0x285   : > { %8108 = vmatprep.subr.bf16.mxu0 %v15208_v22  ;;  %v15238_v22 = vld [vmem:[%s20255_s1 + $0x1154] ss:$8 sps:$4 sm:$0xff]  }
 0x287   : > { %8068 = vmatmul.mubr.bf16.vlgmr.msra.gmra.mrb[0].mxu0 %v13249_v11  ;;  %v18128_v11 = vsel %vm16279_vm3, %v13170_v46, %v7512_v0  ;;  %v13158_v46 = vld [vmem:[%s16242_s15 + $0x338] sm:$0x88]  ;;  %v13160_v0 = vld [vmem:[%s16242_s15 + $0x348] sm:$0x77] }
 0x288   : > { %8109 = vmatpush1.bf16.msra.mxu0 %v15206_v7  ;;  %8077 = vmatprep.mubr.bf16.mxu0 %v13254_v55  ;;  %v18132_v7 = vsel %vm16279_vm3, %v13172_v28, %v7520_v39  ;;  %v13261_v55 = vcombine.low %v7557_v45, %v7565_v47  ;;  %v13174_v45 = vrot.slane %v13146_v35, 11  ;;  %v7528_v47 = vrot.slane %v13148_v37, 7  ;;  %v15302_v39 = vld [vmem:[%s20255_s1 + $0x1200] ss:$8 sps:$4 sm:$0xff]  }
 0x289   : > { %8110 = vmatprep.subr.bf16.mxu0 %v15214_v63  ;;  %v15242_v63 = vld [vmem:[%s20255_s1 + $0x1160] ss:$8 sps:$4 sm:$0xff]   ;;  %v13252_v8 = vcombine.high %v18128_v11, %v18132_v7  ;;  %v13251_v28 = vcombine.low %v18128_v11, %v18132_v7  ;;  %v15308_v11 = vld [vmem:[%s20255_s1 + $0x1210] ss:$8 sps:$4 sm:$0xff]  }
 0x28a   : > { %v2112_v7 = vld [vmem:[%s20256_s2] sm:$0x3] }
 0x28c   : > { %8111 = vmatpush1.bf16.msra.mxu0 %v15212_v42  ;;  %v15254_v42 = vld [vmem:[%s20255_s1 + $0x1180] ss:$8 sps:$4 sm:$0xff]  }
 0x28d   : > { %8112 = vmatprep.subr.bf16.mxu0 %v15220_v44  ;;  %v15262_v44 = vld [vmem:[%s20255_s1 + $0x1194] ss:$8 sps:$4 sm:$0xff]  }
 0x28f   : > { %8078 = vmatmul.mubr.bf16.gmra.mrb[4].mxu0 %v13253_v25  ;;  %v15278_v25 = vld [vmem:[%s20255_s1 + $0x11c0] ss:$8 sps:$4 sm:$0xff]  }
 0x290   : > { %8113 = vmatpush1.bf16.msra.mxu0 %v15218_v27  ;;  %8087 = vmatprep.mubr.bf16.mxu0 %v13258_v31  ;;  %v15286_v27 = vld [vmem:[%s20255_s1 + $0x11d4] ss:$8 sps:$4 sm:$0xff]   ;;  %v15284_v31 = vld [vmem:[%s20255_s1 + $0x11d0] ss:$8 sps:$4 sm:$0xff]  }
 0x291   : > { %8114 = vmatprep.subr.bf16.mxu0 %v15226_v32  ;;  %v15292_v32 = vld [vmem:[%s20255_s1 + $0x11e4] ss:$8 sps:$4 sm:$0xff]  }
 0x294   : > { %8115 = vmatpush1.bf16.msra.mxu0 %v15224_v26  ;;  %v15290_v26 = vld [vmem:[%s20255_s1 + $0x11e0] ss:$8 sps:$4 sm:$0xff]  }
 0x295   : > { %8116 = vmatprep.subr.bf16.mxu0 %v15232_v40  ;;  %v15298_v40 = vld [vmem:[%s20255_s1 + $0x11f4] ss:$8 sps:$4 sm:$0xff]  }
 0x297   : > { %8088 = vmatmul.mubr.bf16.gmra.mrb[8].mxu0 %v13257_v15  ;;  %v7529_v15 = vsel %vm16279_vm3, %v13174_v45, %v7528_v47 }
 0x298   : > { %8117 = vmatpush1.bf16.msra.mxu0 %v15230_v59  ;;  %8097 = vmatprep.mubr.bf16.mxu0 %v13262_v60  ;;  %v7537_v59 = vsel %vm16279_vm3, %v13176_v48, %v7536_v49  ;;  %v13154_v60 = vld [vmem:[%s16242_s15 + $0x308] sm:$0x88]  ;;  %v15320_v49 = vld [vmem:[%s20255_s1 + $0x1230] ss:$8 sps:$4 sm:$0xff]  }
 0x299   : > { %8118 = vmatprep.subr.bf16.mxu0 %v15238_v22  ;;  %v13156_v22 = vld [vmem:[%s16242_s15 + $0x318] sm:$0x77] }
 0x29c   : > { %8119 = vmatpush1.bf16.msra.mxu0 %v15236_v6  ;;  %v13256_v6 = vcombine.high %v7529_v15, %v7537_v59 }
 0x29d   : > { %8120 = vmatprep.subr.bf16.mxu0 %v15244_v3  ;;  %v15310_v3 = vld [vmem:[%s20255_s1 + $0x1214] ss:$8 sps:$4 sm:$0xff]  }
 0x29f   : > { %8098 = vmatmul.mubr.bf16.gmra.mrb[12].mxu0 %v13261_v55  ;;  %v13178_v55 = vrot.slane %v13154_v60, 11 }
 0x2a0   : > { %8121 = vmatpush1.bf16.msra.mxu0 %v15242_v63  ;;  %8140 = vmatprep.mubr.bf16.mxu0 %v13252_v8  ;;  %v7544_v63 = vrot.slane %v13156_v22, 7  ;;  %v13180_v8 = vrot.slane %v13158_v46, 11  ;;  %v13329_v22 = vld [vmem:[%s16242_s15 + $0x250] sm:$0xcc]  ;;  %v13331_v46 = vld [vmem:[%s16242_s15 + $0x260] sm:$0x33] }
 0x2a1   : > { %8122 = vmatprep.subr.bf16.mxu0 %v15250_v9  ;;  %v7552_v9 = vrot.slane %v13160_v0, 7 }
 0x2a4   : > { %8123 = vmatpush1.bf16.msra.mxu0 %v15248_v12  ;;  %v15316_v12 = vld [vmem:[%s20255_s1 + $0x1224] ss:$8 sps:$4 sm:$0xff]  }
 0x2a5   : > { %8124 = vmatprep.subr.bf16.mxu0 %v15256_v16  ;;  %v7545_v16 = vsel %vm16279_vm3, %v13178_v55, %v7544_v63 }
 0x2a8   : > { %8125 = vmatpush1.bf16.msra.mxu0 %v15254_v42  ;;  %v7553_v42 = vsel %vm16279_vm3, %v13180_v8, %v7552_v9 }
 0x2a9   : > { %8126 = vmatprep.subr.bf16.mxu0 %v15262_v44  ;;  %v13162_v44 = vld [vmem:[%s16242_s15 + $0x368] sm:$0x88]  ;;  %v13259_v8 = vcombine.low %v7545_v16, %v7553_v42 }
 0x2aa   : > { %v13182_v35 = vrot.slane %v13162_v44, 11 }
 0x2ac   : > { %8127 = vmatpush1.bf16.msra.mxu0 %v15260_v18  ;;  %v13164_v18 = vld [vmem:[%s16242_s15 + $0x378] sm:$0x77] }
 0x2ad   : > { %8128 = vmatprep.subr.bf16.mxu0 %v15268_v19  ;;  %v13166_v19 = vld [vmem:[%s16242_s15 + $0x398] sm:$0x88]  ;;  %v7560_v37 = vrot.slane %v13164_v18, 7 }
 0x2ae   : > { %v13184_v29 = vrot.slane %v13166_v19, 11  ;;  %v15334_v18 = vld [vmem:[%s20255_s1 + $0x1254] ss:$8 sps:$4 sm:$0xff]   ;;  %v8279_v19 = vrot.slane %v13331_v46, 6 }
 0x2b0   : > { %8129 = vmatpush1.bf16.msra.mxu0 %v15266_v20  ;;  %v13168_v20 = vld [vmem:[%s16242_s15 + $0x3a8] sm:$0x77] }
 0x2b1   : > { %8130 = vmatprep.subr.bf16.mxu0 %v15274_v21  ;;  %v2140_v21 = vld [vmem:[%s20257_s3] sm:$0x3]  ;;  %v7568_v30 = vrot.slane %v13168_v20, 7 }
 0x2b2   : > { %v18252_v45 = vrot.slane %v2140_v21, %v17230_v17 }
 0x2b3   : > { %v18268_v60 = vsel %vm16279_vm3, %v13184_v29, %v7568_v30  ;;  %v15332_v29 = vld [vmem:[%s20255_s1 + $0x1250] ss:$8 sps:$4 sm:$0xff]  }
 0x2b4   : > { %8131 = vmatpush1.bf16.msra.mxu0 %v15272_v23  ;;  %v13255_v23 = vcombine.low %v7529_v15, %v7537_v59  ;;  %v18264_v59 = vsel %vm16279_vm3, %v13182_v35, %v7560_v37 }
 0x2b5   : > { %8132 = vmatprep.subr.bf16.mxu0 %v15280_v24  ;;  %v18237_v24 = vrot.slane %v2112_v7, %v17225_v13 }
 0x2b8   : > { %8133 = vmatpush1.bf16.msra.mxu0 %v15278_v25  ;;  %v18240_v25 = vrot.slane %v2112_v7, %v17230_v17  ;;  %v13264_v7 = vcombine.high %v18264_v59, %v18268_v60 }
 0x2b9   : > { %8134 = vmatprep.subr.bf16.mxu0 %v15286_v27  ;;  %v15314_v27 = vld [vmem:[%s20255_s1 + $0x1220] ss:$8 sps:$4 sm:$0xff]  }
 0x2bc   : > { %8135 = vmatpush1.bf16.msra.mxu0 %v15284_v31  ;;  %v13260_v31 = vcombine.high %v7545_v16, %v7553_v42 }
 0x2bd   : > { %8136 = vmatprep.subr.bf16.mxu0 %v15292_v32  ;;  %v15322_v32 = vld [vmem:[%s20255_s1 + $0x1234] ss:$8 sps:$4 sm:$0xff]  }
 0x2c0   : > { %8137 = vmatpush1.bf16.msra.mxu0 %v15290_v26  ;;  %v18249_v26 = vrot.slane %v2140_v21, %v17225_v13 }
 0x2c1   : > { %8138 = vmatprep.subr.bf16.mxu0 %v15298_v40 }
 0x2c4   : > { %8139 = vmatpush1.bf16.msra.mxu0 %v15296_v56  ;;  %v15328_v56 = vld [vmem:[%s20255_s1 + $0x1244] ss:$8 sps:$4 sm:$0xff]  }
 0x2c5   : > { %8806 = vmatprep.subr.bf16.mxu0 %v15304_v14 }
 0x2c7   : > { %8141 = vmatmul.mubr.bf16.vlgmr.msra.gmra.mrb[0].mxu0 %v13251_v28  ;;  %v2025_v40 = vpop.f32.mrb[8].mxu1 }
 0x2c8   : > { %8807 = vmatpush1.bf16.msra.mxu0 %v15302_v39  ;;  %8150 = vmatprep.mubr.bf16.mxu0 %v13256_v6  ;;  %v2124_v47 = vmul.f32 %v18237_v24, %v2025_v40  ;;  %v2027_v48 = vpop.f32.mrb[9].mxu1  ;;  %v13333_v6 = vld [vmem:[%s16242_s15 + $0x280] sm:$0xcc] }
 0x2c9   : > { %8808 = vmatprep.subr.bf16.mxu0 %v15310_v3  ;;  %v2125_v14 = vmul.f32 %v18240_v25, %v2027_v48  ;;  %v2029_v15 = vpop.f32.mrb[10].mxu1  ;;  %v13335_v3 = vld [vmem:[%s16242_s15 + $0x290] sm:$0x33]  ;;  %v13363_v16 = vrot.slane %v13333_v6, 10  ;;  %v15293_v48 = vld [vmem:[%s20255_s1 + $0x200] ss:$8 sps:$4 sm:$0xff]   ;;  %v13263_v6 = vcombine.low %v18264_v59, %v18268_v60 }
 0x2ca   : > { %v2152_v0 = vadd.f32 %v18249_v26, %v2124_v47  ;;  %v2126_v28 = vmul.f32 %v18237_v24, %v2029_v15  ;;  %v2031_v39 = vpop.f32.mrb[11].mxu1  ;;  %v8287_v42 = vrot.slane %v13335_v3, 6  ;;  %v15346_v59 = vld [vmem:[%s20255_s1 + $0x1274] ss:$8 sps:$4 sm:$0xff]  }
 0x2cb   : > { %v2153_v55 = vadd.f32 %v18252_v45, %v2125_v14  ;;  %v2127_v63 = vmul.f32 %v18240_v25, %v2031_v39 }
 0x2cc   : > { %8809 = vmatpush1.bf16.msra.mxu0 %v15308_v11  ;;  %v2154_v9 = vadd.f32 %v18249_v26, %v2126_v28  ;;  %v15326_v11 = vld [vmem:[%s20255_s1 + $0x1240] ss:$8 sps:$4 sm:$0xff]   ;;  %v2168_v20 = vmax.f32 %v2152_v0, 0.0  ;;  %v18305_v14 = vsel %vm16339_vm5, %v13363_v16, %v8287_v42  ;;  %v15301_v0 = vld [vmem:[%s20255_s1 + $0x214] ss:$8 sps:$4 sm:$0xff]  }
 0x2cd   : > { %8810 = vmatprep.subr.bf16.mxu0 %v15316_v12  ;;  %v13361_v12 = vrot.slane %v13329_v22, 10  ;;  %v2155_v44 = vadd.f32 %v18252_v45, %v2127_v63 }
 0x2ce   : > { %v2170_v21 = vmax.f32 %v2154_v9, 0.0  ;;  %v15299_v9 = vld [vmem:[%s20255_s1 + $0x210] ss:$8 sps:$4 sm:$0xff]  }
 0x2cf   : > { %8151 = vmatmul.mubr.bf16.gmra.mrb[4].mxu0 %v13255_v23  ;;  %v2169_v23 = vmax.f32 %v2153_v55, 0.0  ;;  %v15338_v55 = vld [vmem:[%s20255_s1 + $0x1260] ss:$8 sps:$4 sm:$0xff]  }
 0x2d0   : > { %8811 = vmatpush1.bf16.msra.mxu0 %v15314_v27  ;;  %8160 = vmatprep.mubr.bf16.mxu0 %v13260_v31  ;;  %v2171_v27 = vmax.f32 %v2155_v44, 0.0  ;;  %v2035_v31 = vpop.f32.mrb[12].mxu1 }
 0x2d1   : > { %8812 = vmatprep.subr.bf16.mxu0 %v15322_v32  ;;  %v2200_v32 = vpack.c.bf16 %v2170_v21, %v2168_v20  ;;  %v2128_v35 = vmul.f32 %v18237_v24, %v2035_v31  ;;  %v2037_v37 = vpop.f32.mrb[13].mxu1  ;;  %v15344_v20 = vld [vmem:[%s20255_s1 + $0x1270] ss:$8 sps:$4 sm:$0xff]   ;;  %v15305_v31 = vld [vmem:[%s20255_s1 + $0x220] ss:$8 sps:$4 sm:$0xff]  }
 0x2d2   : > { %v2129_v30 = vmul.f32 %v18240_v25, %v2037_v37  ;;  %v2039_v40 = vpop.f32.mrb[14].mxu1  ;;  %v2201_v47 = vpack.c.bf16 %v2171_v27, %v2169_v23 }
 0x2d3   : > { %v2156_v15 = vadd.f32 %v18249_v26, %v2128_v35  ;;  %v2130_v22 = vmul.f32 %v18237_v24, %v2039_v40  ;;  %v2041_v46 = vpop.f32.mrb[15].mxu1 }
 0x2d4   : > { %8813 = vmatpush1.bf16.msra.mxu0 %v15320_v49  ;;  %v15340_v49 = vld [vmem:[%s20255_s1 + $0x1264] ss:$8 sps:$4 sm:$0xff]   ;;  %v2157_v28 = vadd.f32 %v18252_v45, %v2129_v30  ;;  %v2131_v39 = vmul.f32 %v18240_v25, %v2041_v46  ;;  %2432 = vmatprep.mubr.bf16.mxu1 %v2201_v47  ;;  %v15313_v30 = vld [vmem:[%s20255_s1 + $0x234] ss:$8 sps:$4 sm:$0xff]  }
 0x2d5   : > { %8814 = vmatprep.subr.bf16.mxu0 %v15328_v56  ;;  %v18301_v56 = vsel %vm16339_vm5, %v13361_v12, %v8279_v19  ;;  %v2158_v3 = vadd.f32 %v18249_v26, %v2130_v22  ;;  %2433 = vmatmul.mubr.bf16.vlgmr.msra.gmra.mrb[24].mxu1 %v2200_v32  ;;  %v2172_v60 = vmax.f32 %v2156_v15, 0.0  ;;  %v15352_v32 = vld [vmem:[%s20255_s1 + $0x1284] ss:$8 sps:$4 sm:$0xff]   ;;  %v15311_v22 = vld [vmem:[%s20255_s1 + $0x230] ss:$8 sps:$4 sm:$0xff]  }
 0x2d6   : > { %v13442_v63 = vcombine.high %v18301_v56, %v18305_v14  ;;  %3019 = vmatpush1.bf16.msra.mxu1 %v15293_v48  ;;  %v2173_v12 = vmax.f32 %v2157_v28, 0.0  ;;  %v15358_v46 = vld [vmem:[%s20255_s1 + $0x1294] ss:$8 sps:$4 sm:$0xff]  }
 0x2d7   : > { %8161 = vmatmul.mubr.bf16.gmra.mrb[8].mxu0 %v13259_v8  ;;  %v2159_v8 = vadd.f32 %v18252_v45, %v2131_v39  ;;  %3020 = vmatprep.subr.bf16.mxu1 %v15301_v0  ;;  %v15319_v39 = vld [vmem:[%s20255_s1 + $0x244] ss:$8 sps:$4 sm:$0xff]  }
 0x2d8   : > { %8815 = vmatpush1.bf16.msra.mxu0 %v15326_v11  ;;  %8170 = vmatprep.mubr.bf16.mxu0 %v13264_v7  ;;  %v2174_v11 = vmax.f32 %v2158_v3, 0.0  ;;  %v15307_v7 = vld [vmem:[%s20255_s1 + $0x224] ss:$8 sps:$4 sm:$0xff]  }
 0x2d9   : > { %8816 = vmatprep.subr.bf16.mxu0 %v15334_v18  ;;  %v2175_v44 = vmax.f32 %v2159_v8, 0.0  ;;  %v2045_v18 = vpop.f32.mrb[16].mxu1 }
 0x2da   : > { %v2132_v19 = vmul.f32 %v18237_v24, %v2045_v18  ;;  %v2047_v16 = vpop.f32.mrb[17].mxu1  ;;  %v2202_v42 = vpack.c.bf16 %v2174_v11, %v2172_v60  ;;  %3021 = vmatpush1.bf16.msra.mxu1 %v15299_v9 }
 0x2db   : > { %v2133_v21 = vmul.f32 %v18240_v25, %v2047_v16  ;;  %v2049_v23 = vpop.f32.mrb[18].mxu1  ;;  %v2203_v27 = vpack.c.bf16 %v2175_v44, %v2173_v12  ;;  %3022 = vmatprep.subr.bf16.mxu1 %v15307_v7  ;;  %v15317_v12 = vld [vmem:[%s20255_s1 + $0x240] ss:$8 sps:$4 sm:$0xff]   ;;  %v15364_v44 = vld [vmem:[%s20255_s1 + $0x12a4] ss:$8 sps:$4 sm:$0xff]  }
 0x2dc   : > { %8817 = vmatpush1.bf16.msra.mxu0 %v15332_v29  ;;  %v2160_v35 = vadd.f32 %v18249_v26, %v2132_v19  ;;  %v2134_v37 = vmul.f32 %v18237_v24, %v2049_v23  ;;  %v2051_v29 = vpop.f32.mrb[19].mxu1 }
 0x2dd   : > { %8818 = vmatprep.subr.bf16.mxu0 %v15340_v49  ;;  %v2161_v40 = vadd.f32 %v18252_v45, %v2133_v21  ;;  %v2135_v47 = vmul.f32 %v18240_v25, %v2051_v29  ;;  %2442 = vmatprep.mubr.bf16.mxu1 %v2203_v27  ;;  %v15350_v49 = vld [vmem:[%s20255_s1 + $0x1280] ss:$8 sps:$4 sm:$0xff]  }
 0x2de   : > { %v2162_v48 = vadd.f32 %v18249_v26, %v2134_v37  ;;  %2443 = vmatmul.mubr.bf16.gmra.mrb[28].mxu1 %v2202_v42  ;;  %v2176_v0 = vmax.f32 %v2160_v35, 0.0  ;;  %v15325_v42 = vld [vmem:[%s20255_s1 + $0x254] ss:$8 sps:$4 sm:$0xff]   ;;  %v15362_v27 = vld [vmem:[%s20255_s1 + $0x12a0] ss:$8 sps:$4 sm:$0xff]  }
 0x2df   : > { %8171 = vmatmul.mubr.bf16.gmra.mrb[12].mxu0 %v13263_v6  ;;  %v2163_v15 = vadd.f32 %v18252_v45, %v2135_v47  ;;  %3023 = vmatpush1.bf16.msra.mxu1 %v15305_v31  ;;  %v2177_v6 = vmax.f32 %v2161_v40, 0.0  ;;  %v15323_v31 = vld [vmem:[%s20255_s1 + $0x250] ss:$8 sps:$4 sm:$0xff]   ;;  %v15331_v35 = vld [vmem:[%s20255_s1 + $0x264] ss:$8 sps:$4 sm:$0xff]  }
 0x2e0   : > { %8819 = vmatpush1.bf16.msra.mxu0 %v15338_v55  ;;  %8838 = vmatprep.mubr.bf16.mxu0 %v13442_v63  ;;  %v2178_v28 = vmax.f32 %v2162_v48, 0.0  ;;  %v2055_v55 = vpop.f32.mrb[20].mxu1  ;;  %v15329_v47 = vld [vmem:[%s20255_s1 + $0x260] ss:$8 sps:$4 sm:$0xff]   ;;  %v15376_v48 = vld [vmem:[%s20255_s1 + $0x12c4] ss:$8 sps:$4 sm:$0xff]  }
 0x2e1   : > { %8820 = vmatprep.subr.bf16.mxu0 %v15346_v59  ;;  %3024 = vmatprep.subr.bf16.mxu1 %v15313_v30  ;;  %v2179_v3 = vmax.f32 %v2163_v15, 0.0  ;;  %v2136_v63 = vmul.f32 %v18237_v24, %v2055_v55  ;;  %v2057_v8 = vpop.f32.mrb[21].mxu1  ;;  %v15356_v59 = vld [vmem:[%s20255_s1 + $0x1290] ss:$8 sps:$4 sm:$0xff]   ;;  %v15391_v15 = vld [vmem:[%s16242_s15 + $0x4] ss:$48 sps:$4 sm:$0xff]  }
 0x2e2   : > { %v2204_v9 = vpack.c.bf16 %v2178_v28, %v2176_v0  ;;  %v2137_v60 = vmul.f32 %v18240_v25, %v2057_v8  ;;  %v2059_v11 = vpop.f32.mrb[22].mxu1  ;;  %v15368_v30 = vld [vmem:[%s20255_s1 + $0x12b0] ss:$8 sps:$4 sm:$0xff]   ;;  %v15382_v0 = vld [vmem:[%s20255_s1 + $0x12d4] ss:$8 sps:$4 sm:$0xff]  }
 0x2e3   : > { %3025 = vmatpush1.bf16.msra.mxu1 %v15311_v22  ;;  %v2205_v7 = vpack.c.bf16 %v2179_v3, %v2177_v6  ;;  %v2164_v18 = vadd.f32 %v18249_v26, %v2136_v63  ;;  %v2138_v19 = vmul.f32 %v18237_v24, %v2059_v11  ;;  %v2061_v16 = vpop.f32.mrb[23].mxu1  ;;  %v15374_v22 = vld [vmem:[%s20255_s1 + $0x12c0] ss:$8 sps:$4 sm:$0xff]   ;;  %v15343_v28 = vld [vmem:[%s20255_s1 + $0x284] ss:$8 sps:$4 sm:$0xff]  }
 0x2e4   : > { %8821 = vmatpush1.bf16.msra.mxu0 %v15344_v20  ;;  %3026 = vmatprep.subr.bf16.mxu1 %v15319_v39  ;;  %v2165_v20 = vadd.f32 %v18252_v45, %v2137_v60  ;;  %v2139_v21 = vmul.f32 %v18240_v25, %v2061_v16  ;;  %v15370_v25 = vld [vmem:[%s20255_s1 + $0x12b4] ss:$8 sps:$4 sm:$0xff]   ;;  %v15341_v39 = vld [vmem:[%s20255_s1 + $0x280] ss:$8 sps:$4 sm:$0xff]   ;;  %v15380_v6 = vld [vmem:[%s20255_s1 + $0x12d0] ss:$8 sps:$4 sm:$0xff]  }
 0x2e5   : > { %8822 = vmatprep.subr.bf16.mxu0 %v15352_v32  ;;  %2452 = vmatprep.mubr.bf16.mxu1 %v2205_v7  ;;  %v2166_v23 = vadd.f32 %v18249_v26, %v2138_v19  ;;  %v2180_v32 = vmax.f32 %v2164_v18, 0.0  ;;  %v15349_v3 = vld [vmem:[%s20255_s1 + $0x294] ss:$8 sps:$4 sm:$0xff]   ;;  %v15388_v55 = vld [vmem:[%s20255_s1 + $0x12e4] ss:$8 sps:$4 sm:$0xff]  }
 0x2e6   : > { %2453 = vmatmul.mubr.bf16.gmra.mrb[32].mxu1 %v2204_v9  ;;  %v2167_v24 = vadd.f32 %v18252_v45, %v2139_v21  ;;  %v2181_v37 = vmax.f32 %v2165_v20, 0.0  ;;  %v13337_v63 = vld [vmem:[%s16242_s15 + $0x2b0] sm:$0xcc]  ;;  %v13339_v8 = vld [vmem:[%s16242_s15 + $0x2c0] sm:$0x33] }
 0x2e7   : > { %3027 = vmatpush1.bf16.msra.mxu1 %v15317_v12  ;;  %v2182_v26 = vmax.f32 %v2166_v23, 0.0  ;;  %v13341_v9 = vld [vmem:[%s16242_s15 + $0x2e0] sm:$0xcc]  ;;  %v15347_v60 = vld [vmem:[%s20255_s1 + $0x290] ss:$8 sps:$4 sm:$0xff]   ;;  %v13365_v12 = vrot.slane %v13337_v63, 10 }
 0x2e8   : > { %8823 = vmatpush1.bf16.msra.mxu0 %v15350_v49  ;;  %3028 = vmatprep.subr.bf16.mxu1 %v15325_v42  ;;  %v2183_v45 = vmax.f32 %v2167_v24, 0.0  ;;  %v15337_v49 = vld [vmem:[%s20255_s1 + $0x274] ss:$8 sps:$4 sm:$0xff]   ;;  %v15386_v11 = vld [vmem:[%s20255_s1 + $0x12e0] ss:$8 sps:$4 sm:$0xff]   ;;  %v13367_v18 = vrot.slane %v13341_v9, 10 }
 0x2e9   : > { %8824 = vmatprep.subr.bf16.mxu0 %v15358_v46  ;;  %v2206_v29 = vpack.c.bf16 %v2182_v26, %v2180_v32  ;;  %v15335_v46 = vld [vmem:[%s20255_s1 + $0x270] ss:$8 sps:$4 sm:$0xff]   ;;  %v15397_v7 = vld [vmem:[%s20255_s1 + $0x12f4] ss:$8 sps:$4 sm:$0xff]   ;;  %v15355_v16 = vld [vmem:[%s20255_s1 + $0x2a4] ss:$8 sps:$4 sm:$0xff]  }
 0x2ea   : > { %v2207_v40 = vpack.c.bf16 %v2183_v45, %v2181_v37  ;;  %v15353_v42 = vld [vmem:[%s20255_s1 + $0x2a0] ss:$8 sps:$4 sm:$0xff]   ;;  %v15395_v20 = vld [vmem:[%s20255_s1 + $0x12f0] ss:$8 sps:$4 sm:$0xff]   ;;  %v15361_v21 = vld [vmem:[%s20255_s1 + $0x2b4] ss:$8 sps:$4 sm:$0xff]  }
 0x2eb   : > { %3029 = vmatpush1.bf16.msra.mxu1 %v15323_v31  ;;  %v15403_v23 = vld [vmem:[%s20255_s1 + $0x1304] ss:$8 sps:$4 sm:$0xff]   ;;  %v13345_v31 = vld [vmem:[%s16242_s15 + $0x310] sm:$0xcc]  ;;  %v13351_v26 = vld [vmem:[%s16242_s15 + $0x350] sm:$0x33] }
 0x2ec   : > { %8825 = vmatpush1.bf16.msra.mxu0 %v15356_v59  ;;  %3030 = vmatprep.subr.bf16.mxu1 %v15331_v35  ;;  %v13343_v59 = vld [vmem:[%s16242_s15 + $0x2f0] sm:$0x33]  ;;  %v13349_v32 = vld [vmem:[%s16242_s15 + $0x340] sm:$0xcc]  ;;  %v13441_v35 = vcombine.low %v18301_v56, %v18305_v14  ;;  %v8319_v14 = vrot.slane %v13351_v26, 6 }
 0x2ed   : > { %8826 = vmatprep.subr.bf16.mxu0 %v15364_v44  ;;  %2462 = vmatprep.mubr.bf16.mxu1 %v2207_v40  ;;  %v8295_v44 = vrot.slane %v13339_v8, 6  ;;  %v8303_v19 = vrot.slane %v13343_v59, 6  ;;  %v15359_v37 = vld [vmem:[%s20255_s1 + $0x2b0] ss:$8 sps:$4 sm:$0xff]   ;;  %v15401_v45 = vld [vmem:[%s20255_s1 + $0x1300] ss:$8 sps:$4 sm:$0xff]  }
 0x2ee   : > { %2463 = vmatmul.mubr.bf16.gmra.mrb[36].mxu1 %v2206_v29  ;;  %v13369_v40 = vrot.slane %v13345_v31, 10  ;;  %v13371_v56 = vrot.slane %v13349_v32, 10  ;;  %v15371_v8 = vld [vmem:[%s20255_s1 + $0x2d0] ss:$8 sps:$4 sm:$0xff]   ;;  %v15413_v9 = vld [vmem:[%s20255_s1 + $0x1320] ss:$8 sps:$4 sm:$0xff]  }
 0x2ef   : > { %3031 = vmatpush1.bf16.msra.mxu1 %v15329_v47  ;;  %3050 = vmatprep.mubr.bf16.mxu1 %v15391_v15  ;;  %v8304_v24 = vsel %vm16339_vm5, %v13367_v18, %v8303_v19  ;;  %v15407_v15 = vld [vmem:[%s20255_s1 + $0x1310] ss:$8 sps:$4 sm:$0xff]   ;;  %v15379_v18 = vld [vmem:[%s20255_s1 + $0x2e4] ss:$8 sps:$4 sm:$0xff]   ;;  %v15377_v19 = vld [vmem:[%s20255_s1 + $0x2e0] ss:$8 sps:$4 sm:$0xff]  }
 0x2f0   : > { %8827 = vmatpush1.bf16.msra.mxu0 %v15362_v27  ;;  %3032 = vmatprep.subr.bf16.mxu1 %v15337_v49  ;;  %v8296_v27 = vsel %vm16339_vm5, %v13365_v12, %v8295_v44  ;;  %v15365_v49 = vld [vmem:[%s20255_s1 + $0x2c0] ss:$8 sps:$4 sm:$0xff]   ;;  %v15383_v26 = vld [vmem:[%s20255_s1 + $0x2f0] ss:$8 sps:$4 sm:$0xff]  }
 0x2f1   : > { %8828 = vmatprep.subr.bf16.mxu0 %v15370_v25  ;;  %v13347_v25 = vld [vmem:[%s16242_s15 + $0x320] sm:$0x33]  ;;  %v13446_v29 = vcombine.high %v8296_v27, %v8304_v24  ;;  %v13445_v63 = vcombine.low %v8296_v27, %v8304_v24  ;;  %v13330_v27 = vld [vmem:[%s16242_s15 + $0x258] sm:$0xcc]  ;;  %v13332_v24 = vld [vmem:[%s16242_s15 + $0x268] sm:$0x33] }
 0x2f2   : > { %v8311_v47 = vrot.slane %v13347_v25, 6  ;;  %v13334_v31 = vld [vmem:[%s16242_s15 + $0x288] sm:$0xcc]  ;;  %v13336_v25 = vld [vmem:[%s16242_s15 + $0x298] sm:$0x33] }
 0x2f3   : > { %3033 = vmatpush1.bf16.msra.mxu1 %v15335_v46  ;;  %v15415_v46 = vld [vmem:[%s20255_s1 + $0x1324] ss:$8 sps:$4 sm:$0xff]  }
 0x2f4   : > { %8829 = vmatpush1.bf16.msra.mxu0 %v15368_v30  ;;  %3034 = vmatprep.subr.bf16.mxu1 %v15343_v28  ;;  %v15409_v30 = vld [vmem:[%s20255_s1 + $0x1314] ss:$8 sps:$4 sm:$0xff]   ;;  %v8320_v28 = vsel %vm16339_vm5, %v13371_v56, %v8319_v14  ;;  %v15394_v56 = vld [vmem:[%s20255_s1 + $0x304] ss:$8 sps:$4 sm:$0xff]   ;;  %v15389_v14 = vld [vmem:[%s16242_s15] ss:$48 sps:$4 sm:$0xff]  }
 0x2f5   : > { %8830 = vmatprep.subr.bf16.mxu0 %v15376_v48  ;;  %v15367_v48 = vld [vmem:[%s20255_s1 + $0x2c4] ss:$8 sps:$4 sm:$0xff]  }
 0x2f7   : > { %3035 = vmatpush1.bf16.msra.mxu1 %v15341_v39  ;;  %v13353_v39 = vld [vmem:[%s16242_s15 + $0x370] sm:$0xcc] }
 0x2f8   : > { %8831 = vmatpush1.bf16.msra.mxu0 %v15374_v22  ;;  %3036 = vmatprep.subr.bf16.mxu1 %v15349_v3  ;;  %v15373_v22 = vld [vmem:[%s20255_s1 + $0x2d4] ss:$8 sps:$4 sm:$0xff]   ;;  %v13357_v3 = vld [vmem:[%s16242_s15 + $0x3a0] sm:$0xcc] }
 0x2f9   : > { %8832 = vmatprep.subr.bf16.mxu0 %v15382_v0  ;;  %v8312_v0 = vsel %vm16339_vm5, %v13369_v40, %v8311_v47  ;;  %v13375_v12 = vrot.slane %v13357_v3, 10  ;;  %v13364_v40 = vrot.slane %v13334_v31, 10  ;;  %v8291_v47 = vrot.slane %v13336_v25, 6  ;;  %v15464_v31 = vld [vmem:[%s20255_s1 + $0x13a0] ss:$8 sps:$4 sm:$0xff]  }
 0x2fa   : > { %v13450_v59 = vcombine.high %v8312_v0, %v8320_v28  ;;  %v13449_v32 = vcombine.low %v8312_v0, %v8320_v28  ;;  %v15400_v0 = vld [vmem:[%s20255_s1 + $0x314] ss:$8 sps:$4 sm:$0xff]   ;;  %v15422_v25 = vld [vmem:[%s20255_s1 + $0x350] ss:$8 sps:$4 sm:$0xff]  }
 0x2fb   : > { %3037 = vmatpush1.bf16.msra.mxu1 %v15347_v60  ;;  %v15421_v60 = vld [vmem:[%s20255_s1 + $0x1334] ss:$8 sps:$4 sm:$0xff]  }
 0x2fc   : > { %8833 = vmatpush1.bf16.msra.mxu0 %v15380_v6  ;;  %3038 = vmatprep.subr.bf16.mxu1 %v15355_v16  ;;  %v13355_v6 = vld [vmem:[%s16242_s15 + $0x380] sm:$0x33]  ;;  %v15419_v16 = vld [vmem:[%s20255_s1 + $0x1330] ss:$8 sps:$4 sm:$0xff]  }
 0x2fd   : > { %8834 = vmatprep.subr.bf16.mxu0 %v15388_v55  ;;  %v13359_v55 = vld [vmem:[%s16242_s15 + $0x3b0] sm:$0x33] }
 0x2fe   : > { %v8335_v44 = vrot.slane %v13359_v55, 6  ;;  %v15452_v28 = vld [vmem:[%s16242_s15 + $0x64] ss:$48 sps:$4 sm:$0xff]   ;;  %v15398_v55 = vld [vmem:[%s20255_s1 + $0x310] ss:$8 sps:$4 sm:$0xff]  }
 0x2ff   : > { %3039 = vmatpush1.bf16.msra.mxu1 %v15353_v42  ;;  %v15385_v42 = vld [vmem:[%s20255_s1 + $0x2f4] ss:$8 sps:$4 sm:$0xff]  }
 0x300   : > { %8835 = vmatpush1.bf16.msra.mxu0 %v15386_v11  ;;  %3040 = vmatprep.subr.bf16.mxu1 %v15361_v21  ;;  %v13373_v11 = vrot.slane %v13353_v39, 10 }
 0x301   : > { %8836 = vmatprep.subr.bf16.mxu0 %v15397_v7  ;;  %v8327_v7 = vrot.slane %v13355_v6, 6  ;;  %v15437_v6 = vld [vmem:[%s20255_s1 + $0x1360] ss:$8 sps:$4 sm:$0xff]  }
 0x303   : > { %3041 = vmatpush1.bf16.msra.mxu1 %v15359_v37  ;;  %v8328_v21 = vsel %vm16339_vm5, %v13373_v11, %v8327_v7  ;;  %v15451_v11 = vld [vmem:[%s20255_s1 + $0x1384] ss:$8 sps:$4 sm:$0xff]   ;;  %v15412_v7 = vld [vmem:[%s20255_s1 + $0x334] ss:$8 sps:$4 sm:$0xff]  }
 0x304   : > { %8837 = vmatpush1.bf16.msra.mxu0 %v15395_v20  ;;  %3042 = vmatprep.subr.bf16.mxu1 %v15367_v48  ;;  %v15427_v20 = vld [vmem:[%s20255_s1 + $0x1344] ss:$8 sps:$4 sm:$0xff]   ;;  %v15431_v48 = vld [vmem:[%s20255_s1 + $0x1350] ss:$8 sps:$4 sm:$0xff]  }
 0x305   : > { %8879 = vmatprep.subr.bf16.mxu0 %v15403_v23  ;;  %v8336_v23 = vsel %vm16339_vm5, %v13375_v12, %v8335_v44  ;;  %v15467_v12 = vld [vmem:[%s16242_s15 + $0xc4] ss:$48 sps:$4 sm:$0xff]   ;;  %v15449_v44 = vld [vmem:[%s20255_s1 + $0x1380] ss:$8 sps:$4 sm:$0xff]  }
 0x306   : > { %v13454_v37 = vcombine.high %v8328_v21, %v8336_v23  ;;  %v13453_v39 = vcombine.low %v8328_v21, %v8336_v23  ;;  %v15416_v21 = vld [vmem:[%s20255_s1 + $0x340] ss:$8 sps:$4 sm:$0xff]   ;;  %v15466_v23 = vld [vmem:[%s20255_s1 + $0x13a4] ss:$8 sps:$4 sm:$0xff]  }
 0x307   : > { %8839 = vmatmul.mubr.bf16.vlgmr.msra.gmra.mrb[0].mxu0 %v13441_v35  ;;  %3043 = vmatpush1.bf16.msra.mxu1 %v15365_v49  ;;  %v15425_v35 = vld [vmem:[%s20255_s1 + $0x1340] ss:$8 sps:$4 sm:$0xff]  }
 0x308   : > { %8880 = vmatpush1.bf16.msra.mxu0 %v15401_v45  ;;  %8848 = vmatprep.mubr.bf16.mxu0 %v13446_v29  ;;  %v15433_v45 = vld [vmem:[%s20255_s1 + $0x1354] ss:$8 sps:$4 sm:$0xff]   ;;  %v13362_v29 = vrot.slane %v13330_v27, 10  ;;  %v15392_v49 = vld [vmem:[%s20255_s1 + $0x300] ss:$8 sps:$4 sm:$0xff]  }
 0x309   : > { %8881 = vmatprep.subr.bf16.mxu0 %v15409_v30  ;;  %3044 = vmatprep.subr.bf16.mxu1 %v15373_v22  ;;  %v8283_v30 = vrot.slane %v13332_v24, 6  ;;  %v15424_v27 = vld [vmem:[%s20255_s1 + $0x354] ss:$8 sps:$4 sm:$0xff]  }
 0x30a   : > { %v15482_v24 = vld [vmem:[%s16242_s15 + $0x124] ss:$48 sps:$4 sm:$0xff]  }
 0x30b   : > { %3045 = vmatpush1.bf16.msra.mxu1 %v15371_v8  ;;  %v18559_v22 = vsel %vm16339_vm5, %v13362_v29, %v8283_v30  ;;  %v15406_v8 = vld [vmem:[%s20255_s1 + $0x324] ss:$8 sps:$4 sm:$0xff]   ;;  %v15436_v30 = vld [vmem:[%s20255_s1 + $0x374] ss:$8 sps:$4 sm:$0xff]  }
 0x30c   : > { %8882 = vmatpush1.bf16.msra.mxu0 %v15407_v15  ;;  %3046 = vmatprep.subr.bf16.mxu1 %v15379_v18  ;;  %v15439_v15 = vld [vmem:[%s20255_s1 + $0x1364] ss:$8 sps:$4 sm:$0xff]   ;;  %v15410_v18 = vld [vmem:[%s20255_s1 + $0x330] ss:$8 sps:$4 sm:$0xff]  }
 0x30d   : > { %8883 = vmatprep.subr.bf16.mxu0 %v15415_v46  ;;  %v18563_v46 = vsel %vm16339_vm5, %v13364_v40, %v8291_v47  ;;  %v15481_v29 = vld [vmem:[%s20255_s1 + $0x13c4] ss:$8 sps:$4 sm:$0xff]   ;;  %v15479_v47 = vld [vmem:[%s20255_s1 + $0x13c0] ss:$8 sps:$4 sm:$0xff]  }
 0x30e   : > { %v13444_v3 = vcombine.high %v18559_v22, %v18563_v46  ;;  %v15499_v40 = vld [vmem:[%s16242_s15 + $0xc] ss:$48 sps:$4 sm:$0xff]  }
 0x30f   : > { %8849 = vmatmul.mubr.bf16.gmra.mrb[4].mxu0 %v13445_v63  ;;  %3047 = vmatpush1.bf16.msra.mxu1 %v15377_v19  ;;  %v15445_v63 = vld [vmem:[%s20255_s1 + $0x1374] ss:$8 sps:$4 sm:$0xff]  }
 0x310   : > { %8884 = vmatpush1.bf16.msra.mxu0 %v15413_v9  ;;  %8858 = vmatprep.mubr.bf16.mxu0 %v13450_v59  ;;  %v15443_v9 = vld [vmem:[%s20255_s1 + $0x1370] ss:$8 sps:$4 sm:$0xff]   ;;  %v15459_v19 = vld [vmem:[%s20255_s1 + $0x1394] ss:$8 sps:$4 sm:$0xff]  }
 0x311   : > { %8885 = vmatprep.subr.bf16.mxu0 %v15421_v60  ;;  %3048 = vmatprep.subr.bf16.mxu1 %v15385_v42  ;;  %v15460_v59 = vld [vmem:[%s16242_s15 + $0x60] ss:$48 sps:$4 sm:$0xff]  }
 0x312   : > { %v15404_v60 = vld [vmem:[%s20255_s1 + $0x320] ss:$8 sps:$4 sm:$0xff]   ;;  %v15457_v42 = vld [vmem:[%s20255_s1 + $0x1390] ss:$8 sps:$4 sm:$0xff]  }
 0x313   : > { %3049 = vmatpush1.bf16.msra.mxu1 %v15383_v26  ;;  %v15430_v26 = vld [vmem:[%s20255_s1 + $0x364] ss:$8 sps:$4 sm:$0xff]  }
 0x314   : > { %8886 = vmatpush1.bf16.msra.mxu0 %v15419_v16  ;;  %3091 = vmatprep.subr.bf16.mxu1 %v15394_v56  ;;  %v15418_v16 = vld [vmem:[%s20255_s1 + $0x344] ss:$8 sps:$4 sm:$0xff]   ;;  %v15434_v56 = vld [vmem:[%s20255_s1 + $0x370] ss:$8 sps:$4 sm:$0xff]  }
 0x315   : > { %8887 = vmatprep.subr.bf16.mxu0 %v15427_v20  ;;  %v15475_v20 = vld [vmem:[%s16242_s15 + $0xc0] ss:$48 sps:$4 sm:$0xff]  }
 0x316   : > { %3051 = vmatmul.mubr.bf16.vlgmr.msra.gmra.mrb[40].mxu1 %v15389_v14  ;;  %v15489_v14 = vld [vmem:[%s20255_s1 + $0x13d4] ss:$8 sps:$4 sm:$0xff]  }
 0x317   : > { %8859 = vmatmul.mubr.bf16.gmra.mrb[8].mxu0 %v13449_v32  ;;  %3092 = vmatpush1.bf16.msra.mxu1 %v15392_v49  ;;  %v15474_v32 = vld [vmem:[%s20255_s1 + $0x13b4] ss:$8 sps:$4 sm:$0xff]   ;;  %v15440_v49 = vld [vmem:[%s20255_s1 + $0x380] ss:$8 sps:$4 sm:$0xff]  }
 0x318   : > { %8888 = vmatpush1.bf16.msra.mxu0 %v15425_v35  ;;  %8868 = vmatprep.mubr.bf16.mxu0 %v13454_v37  ;;  %v15472_v35 = vld [vmem:[%s20255_s1 + $0x13b0] ss:$8 sps:$4 sm:$0xff]  }
 0x319   : > { %8889 = vmatprep.subr.bf16.mxu0 %v15433_v45  ;;  %3093 = vmatprep.subr.bf16.mxu1 %v15400_v0  ;;  %v15490_v37 = vld [vmem:[%s16242_s15 + $0x120] ss:$48 sps:$4 sm:$0xff]   ;;  %v15448_v0 = vld [vmem:[%s20255_s1 + $0x394] ss:$8 sps:$4 sm:$0xff]  }
 0x31a   : > { %3060 = vmatprep.mubr.bf16.mxu1 %v15452_v28  ;;  %v15428_v45 = vld [vmem:[%s20255_s1 + $0x360] ss:$8 sps:$4 sm:$0xff]   ;;  %v15496_v28 = vld [vmem:[%s20255_s1 + $0x13e4] ss:$8 sps:$4 sm:$0xff]  }
 0x31b   : > { %3094 = vmatpush1.bf16.msra.mxu1 %v15398_v55  ;;  %v13344_v55 = vld [vmem:[%s16242_s15 + $0x2f8] sm:$0x33] }
 0x31c   : > { %8890 = vmatpush1.bf16.msra.mxu0 %v15431_v48  ;;  %3095 = vmatprep.subr.bf16.mxu1 %v15406_v8  ;;  %v15442_v48 = vld [vmem:[%s20255_s1 + $0x384] ss:$8 sps:$4 sm:$0xff]   ;;  %v15494_v8 = vld [vmem:[%s20255_s1 + $0x13e0] ss:$8 sps:$4 sm:$0xff]  }
 0x31d   : > { %8891 = vmatprep.subr.bf16.mxu0 %v15439_v15  ;;  %v15487_v15 = vld [vmem:[%s20255_s1 + $0x13d0] ss:$8 sps:$4 sm:$0xff]  }
 0x31e   : > { %3061 = vmatmul.mubr.bf16.gmra.mrb[44].mxu1 %v15460_v59 }
 0x31f   : > { %8869 = vmatmul.mubr.bf16.gmra.mrb[12].mxu0 %v13453_v39  ;;  %3096 = vmatpush1.bf16.msra.mxu1 %v15404_v60  ;;  %v13338_v39 = vld [vmem:[%s16242_s15 + $0x2b8] sm:$0xcc] }
 0x320   : > { %8892 = vmatpush1.bf16.msra.mxu0 %v15437_v6  ;;  %8911 = vmatprep.mubr.bf16.mxu0 %v13444_v3  ;;  %v13340_v6 = vld [vmem:[%s16242_s15 + $0x2c8] sm:$0x33]  ;;  %v13342_v3 = vld [vmem:[%s16242_s15 + $0x2e8] sm:$0xcc]  ;;  %v13366_v59 = vrot.slane %v13338_v39, 10 }
 0x321   : > { %8893 = vmatprep.subr.bf16.mxu0 %v15445_v63  ;;  %3097 = vmatprep.subr.bf16.mxu1 %v15412_v7  ;;  %v15446_v63 = vld [vmem:[%s20255_s1 + $0x390] ss:$8 sps:$4 sm:$0xff]   ;;  %v8299_v60 = vrot.slane %v13340_v6, 6  ;;  %v8307_v7 = vrot.slane %v13344_v55, 6  ;;  %v15484_v55 = vld [vmem:[%s20255_s1 + $0x3e0] ss:$8 sps:$4 sm:$0xff]  }
 0x322   : > { %3070 = vmatprep.mubr.bf16.mxu1 %v15467_v12  ;;  %v15456_v12 = vld [vmem:[%s20255_s1 + $0x3a4] ss:$8 sps:$4 sm:$0xff]  }
 0x323   : > { %3098 = vmatpush1.bf16.msra.mxu1 %v15410_v18  ;;  %v15454_v18 = vld [vmem:[%s20255_s1 + $0x3a0] ss:$8 sps:$4 sm:$0xff]  }
 0x324   : > { %8894 = vmatpush1.bf16.msra.mxu0 %v15443_v9  ;;  %3099 = vmatprep.subr.bf16.mxu1 %v15418_v16  ;;  %v15505_v9 = vld [vmem:[%s20255_s1 + $0x13f4] ss:$8 sps:$4 sm:$0xff]   ;;  %v8300_v16 = vsel %vm16339_vm5, %v13366_v59, %v8299_v60 }
 0x325   : > { %8895 = vmatprep.subr.bf16.mxu0 %v15451_v11  ;;  %v13368_v11 = vrot.slane %v13342_v3, 10  ;;  %v15486_v3 = vld [vmem:[%s20255_s1 + $0x3e4] ss:$8 sps:$4 sm:$0xff]  }
 0x326   : > { %3071 = vmatmul.mubr.bf16.gmra.mrb[48].mxu1 %v15475_v20  ;;  %v13346_v20 = vld [vmem:[%s16242_s15 + $0x318] sm:$0xcc] }
 0x327   : > { %3100 = vmatpush1.bf16.msra.mxu1 %v15416_v21  ;;  %3080 = vmatprep.mubr.bf16.mxu1 %v15482_v24  ;;  %v13348_v21 = vld [vmem:[%s16242_s15 + $0x328] sm:$0x33]  ;;  %v13443_v24 = vcombine.low %v18559_v22, %v18563_v46 }
 0x328   : > { %8896 = vmatpush1.bf16.msra.mxu0 %v15449_v44  ;;  %3101 = vmatprep.subr.bf16.mxu1 %v15424_v27  ;;  %v15503_v44 = vld [vmem:[%s20255_s1 + $0x13f0] ss:$8 sps:$4 sm:$0xff]   ;;  %v15471_v22 = vld [vmem:[%s20255_s1 + $0x3c4] ss:$8 sps:$4 sm:$0xff]   ;;  %v15469_v46 = vld [vmem:[%s20255_s1 + $0x3c0] ss:$8 sps:$4 sm:$0xff]  }
 0x329   : > { %8897 = vmatprep.subr.bf16.mxu0 %v15459_v19  ;;  %v15463_v19 = vld [vmem:[%s20255_s1 + $0x3b4] ss:$8 sps:$4 sm:$0xff]  }
 0x32a   : > { %v13352_v27 = vld [vmem:[%s16242_s15 + $0x358] sm:$0x33] }
 0x32b   : > { %3102 = vmatpush1.bf16.msra.mxu1 %v15422_v25  ;;  %v15461_v25 = vld [vmem:[%s20255_s1 + $0x3b0] ss:$8 sps:$4 sm:$0xff]  }
 0x32c   : > { %8898 = vmatpush1.bf16.msra.mxu0 %v15457_v42  ;;  %3103 = vmatprep.subr.bf16.mxu1 %v15430_v26  ;;  %v8308_v42 = vsel %vm16339_vm5, %v13368_v11, %v8307_v7  ;;  %v8315_v26 = vrot.slane %v13348_v21, 6  ;;  %v15491_v11 = vld [vmem:[%s20255_s1 + $0x3f0] ss:$8 sps:$4 sm:$0xff]   ;;  %v15502_v7 = vld [vmem:[%s20255_s1 + $0x404] ss:$8 sps:$4 sm:$0xff]  }
 0x32d   : > { %8899 = vmatprep.subr.bf16.mxu0 %v15466_v23  ;;  %v13350_v23 = vld [vmem:[%s16242_s15 + $0x348] sm:$0xcc] }
 0x32e   : > { %3081 = vmatmul.mubr.bf16.gmra.mrb[52].mxu1 %v15490_v37  ;;  %v8323_v37 = vrot.slane %v13352_v27, 6  ;;  %v15538_v21 = vld [vmem:[%s16242_s15 + $0x68] ss:$48 sps:$4 sm:$0xff]   ;;  %v15542_v27 = vld [vmem:[%s16242_s15 + $0xcc] ss:$48 sps:$4 sm:$0xff]  }
 0x32f   : > { %3104 = vmatpush1.bf16.msra.mxu1 %v15428_v45  ;;  %3123 = vmatprep.mubr.bf16.mxu1 %v15499_v40  ;;  %v15478_v45 = vld [vmem:[%s20255_s1 + $0x3d4] ss:$8 sps:$4 sm:$0xff]  }
 0x330   : > { %8900 = vmatpush1.bf16.msra.mxu0 %v15464_v31  ;;  %3105 = vmatprep.subr.bf16.mxu1 %v15436_v30  ;;  %v13448_v31 = vcombine.high %v8300_v16, %v8308_v42  ;;  %v13354_v40 = vld [vmem:[%s16242_s15 + $0x378] sm:$0xcc] }
 0x331   : > { %8901 = vmatprep.subr.bf16.mxu0 %v15474_v32  ;;  %v13370_v32 = vrot.slane %v13346_v20, 10  ;;  %v15511_v20 = vld [vmem:[%s20255_s1 + $0x424] ss:$8 sps:$4 sm:$0xff]  }
 0x333   : > { %3106 = vmatpush1.bf16.msra.mxu1 %v15434_v56  ;;  %v13358_v56 = vld [vmem:[%s16242_s15 + $0x3a8] sm:$0xcc] }
 0x334   : > { %8902 = vmatpush1.bf16.msra.mxu0 %v15472_v35  ;;  %3107 = vmatprep.subr.bf16.mxu1 %v15442_v48  ;;  %v13372_v35 = vrot.slane %v13350_v23, 10  ;;  %v13447_v48 = vcombine.low %v8300_v16, %v8308_v42  ;;  %v13376_v39 = vrot.slane %v13358_v56, 10  ;;  %v15506_v42 = vld [vmem:[%s20255_s1 + $0x410] ss:$8 sps:$4 sm:$0xff]   ;;  %v15509_v23 = vld [vmem:[%s20255_s1 + $0x420] ss:$8 sps:$4 sm:$0xff]  }
 0x335   : > { %8903 = vmatprep.subr.bf16.mxu0 %v15481_v29  ;;  %v8316_v29 = vsel %vm16339_vm5, %v13370_v32, %v8315_v26  ;;  %v3196_v32 = vld [vmem:[%s16242_s15] sm:$0x88]  ;;  %v3198_v26 = vld [vmem:[%s16242_s15 + $0x10] sm:$0x77] }
 0x336   : > { %v8324_v30 = vsel %vm16339_vm5, %v13372_v35, %v8323_v37  ;;  %v3200_v35 = vld [vmem:[%s16242_s15 + $0x30] sm:$0x88]  ;;  %v3202_v37 = vld [vmem:[%s16242_s15 + $0x40] sm:$0x77] }
 0x337   : > { %3108 = vmatpush1.bf16.msra.mxu1 %v15440_v49  ;;  %v13452_v49 = vcombine.high %v8316_v29, %v8324_v30  ;;  %v13451_v59 = vcombine.low %v8316_v29, %v8324_v30  ;;  %v15520_v29 = vld [vmem:[%s20255_s1 + $0x454] ss:$8 sps:$4 sm:$0xff]   ;;  %v12177_v30 = vrot.slane %v3196_v32, 11  ;;  %v3270_v56 = vrot.slane %v3202_v37, 7  ;;  %v15562_v37 = vld [vmem:[%s20255_s1 + $0x504] ss:$8 sps:$4 sm:$0xff]  }
 0x338   : > { %8904 = vmatpush1.bf16.msra.mxu0 %v15479_v47  ;;  %3109 = vmatprep.subr.bf16.mxu1 %v15448_v0  ;;  %v13356_v47 = vld [vmem:[%s16242_s15 + $0x388] sm:$0x33]  ;;  %v13374_v0 = vrot.slane %v13354_v40, 10  ;;  %v3262_v40 = vrot.slane %v3198_v26, 7 }
 0x339   : > { %8905 = vmatprep.subr.bf16.mxu0 %v15489_v14  ;;  %v13360_v14 = vld [vmem:[%s16242_s15 + $0x3b8] sm:$0x33] }
 0x33a   : > { %v8339_v6 = vrot.slane %v13360_v14, 6  ;;  %v15518_v14 = vld [vmem:[%s20255_s1 + $0x450] ss:$8 sps:$4 sm:$0xff]  }
 0x33b   : > { %3110 = vmatpush1.bf16.msra.mxu1 %v15446_v63 }
 0x33c   : > { %8906 = vmatpush1.bf16.msra.mxu0 %v15487_v15  ;;  %3111 = vmatprep.subr.bf16.mxu1 %v15456_v12  ;;  %v15476_v15 = vld [vmem:[%s20255_s1 + $0x3d0] ss:$8 sps:$4 sm:$0xff]  }
 0x33d   : > { %8907 = vmatprep.subr.bf16.mxu0 %v15496_v28  ;;  %v8331_v28 = vrot.slane %v13356_v47, 6  ;;  %v15497_v12 = vld [vmem:[%s16242_s15 + $0x8] ss:$48 sps:$4 sm:$0xff]   ;;  %v12179_v47 = vrot.slane %v3200_v35, 11 }
 0x33e   : > { %v15557_v35 = vld [vmem:[%s20255_s1 + $0x4f0] ss:$8 sps:$4 sm:$0xff]  }
 0x33f   : > { %3112 = vmatpush1.bf16.msra.mxu1 %v15454_v18  ;;  %v8332_v63 = vsel %vm16339_vm5, %v13374_v0, %v8331_v28  ;;  %v15533_v18 = vld [vmem:[%s16242_s15 + $0x6c] ss:$48 sps:$4 sm:$0xff]   ;;  %v15556_v0 = vld [vmem:[%s16242_s15 + $0x128] ss:$48 sps:$4 sm:$0xff]  }
 0x340   : > { %8908 = vmatpush1.bf16.msra.mxu0 %v15494_v8  ;;  %3113 = vmatprep.subr.bf16.mxu1 %v15463_v19  ;;  %v8340_v8 = vsel %vm16339_vm5, %v13376_v39, %v8339_v6  ;;  %v15508_v19 = vld [vmem:[%s20255_s1 + $0x414] ss:$8 sps:$4 sm:$0xff]   ;;  %v15521_v28 = vld [vmem:[%s20255_s1 + $0x460] ss:$8 sps:$4 sm:$0xff]  }
 0x341   : > { %8909 = vmatprep.subr.bf16.mxu0 %v15505_v9  ;;  %v15493_v9 = vld [vmem:[%s20255_s1 + $0x3f4] ss:$8 sps:$4 sm:$0xff]   ;;  %v13456_v60 = vcombine.high %v8332_v63, %v8340_v8  ;;  %v13455_v16 = vcombine.low %v8332_v63, %v8340_v8  ;;  %v15527_v63 = vld [vmem:[%s20255_s1 + $0x480] ss:$8 sps:$4 sm:$0xff]  }
 0x342   : > { %v15526_v6 = vld [vmem:[%s20255_s1 + $0x474] ss:$8 sps:$4 sm:$0xff]  }
 0x343   : > { %3114 = vmatpush1.bf16.msra.mxu1 %v15461_v25  ;;  %v15517_v25 = vld [vmem:[%s20255_s1 + $0x444] ss:$8 sps:$4 sm:$0xff]   ;;  %v15532_v8 = vld [vmem:[%s20255_s1 + $0x494] ss:$8 sps:$4 sm:$0xff]  }
 0x344   : > { %8910 = vmatpush1.bf16.msra.mxu0 %v15503_v44  ;;  %3115 = vmatprep.subr.bf16.mxu1 %v15471_v22  ;;  %v15500_v44 = vld [vmem:[%s20255_s1 + $0x400] ss:$8 sps:$4 sm:$0xff]  }
 0x345   : > { %v15547_v22 = vld [vmem:[%s16242_s15 + $0xc8] ss:$48 sps:$4 sm:$0xff]  }
 0x347   : > { %8912 = vmatmul.mubr.bf16.vlgmr.msra.gmra.mrb[0].mxu0 %v13443_v24  ;;  %3116 = vmatpush1.bf16.msra.mxu1 %v15469_v46  ;;  %v15514_v24 = vld [vmem:[%s20255_s1 + $0x434] ss:$8 sps:$4 sm:$0xff]   ;;  %v15515_v46 = vld [vmem:[%s20255_s1 + $0x440] ss:$8 sps:$4 sm:$0xff]  }
 0x348   : > { %8921 = vmatprep.mubr.bf16.mxu0 %v13448_v31  ;;  %3117 = vmatprep.subr.bf16.mxu1 %v15478_v45  ;;  %v15512_v31 = vld [vmem:[%s20255_s1 + $0x430] ss:$8 sps:$4 sm:$0xff]   ;;  %v15551_v45 = vld [vmem:[%s16242_s15 + $0x12c] ss:$48 sps:$4 sm:$0xff]  }
 0x34b   : > { %3118 = vmatpush1.bf16.msra.mxu1 %v15476_v15  ;;  %v18802_v15 = vsel %vm16279_vm3, %v12179_v47, %v3270_v56  ;;  %v15560_v56 = vld [vmem:[%s20255_s1 + $0x500] ss:$8 sps:$4 sm:$0xff]  }
 0x34c   : > { %3119 = vmatprep.subr.bf16.mxu1 %v15486_v3  ;;  %v15524_v3 = vld [vmem:[%s20255_s1 + $0x470] ss:$8 sps:$4 sm:$0xff]  }
 0x34f   : > { %8922 = vmatmul.mubr.bf16.gmra.mrb[4].mxu0 %v13447_v48  ;;  %3120 = vmatpush1.bf16.msra.mxu1 %v15484_v55  ;;  %v15523_v48 = vld [vmem:[%s20255_s1 + $0x464] ss:$8 sps:$4 sm:$0xff]  }
 0x350   : > { %8931 = vmatprep.mubr.bf16.mxu0 %v13452_v49  ;;  %3121 = vmatprep.subr.bf16.mxu1 %v15493_v9  ;;  %v18798_v49 = vsel %vm16279_vm3, %v12177_v30, %v3262_v40  ;;  %v15529_v55 = vld [vmem:[%s20255_s1 + $0x484] ss:$8 sps:$4 sm:$0xff]   ;;  %v15530_v9 = vld [vmem:[%s20255_s1 + $0x490] ss:$8 sps:$4 sm:$0xff]  }
 0x351   : > { %v12258_v39 = vcombine.high %v18798_v49, %v18802_v15  ;;  %v3216_v30 = vld [vmem:[%s16242_s15 + $0xf0] sm:$0x88]  ;;  %v3218_v40 = vld [vmem:[%s16242_s15 + $0x100] sm:$0x77]  ;;  %v12257_v47 = vcombine.low %v18798_v49, %v18802_v15 }
 0x352   : > { %v15563_v49 = vld [vmem:[%s20255_s1 + $0x510] ss:$8 sps:$4 sm:$0xff]   ;;  %v15568_v15 = vld [vmem:[%s20255_s1 + $0x524] ss:$8 sps:$4 sm:$0xff]  }
 0x353   : > { %3122 = vmatpush1.bf16.msra.mxu1 %v15491_v11  ;;  %v15541_v11 = vld [vmem:[%s20255_s1 + $0x4b4] ss:$8 sps:$4 sm:$0xff]  }
 0x354   : > { %3789 = vmatprep.subr.bf16.mxu1 %v15502_v7  ;;  %v15539_v7 = vld [vmem:[%s20255_s1 + $0x4b0] ss:$8 sps:$4 sm:$0xff]  }
 0x356   : > { %3124 = vmatmul.mubr.bf16.vlgmr.msra.gmra.mrb[40].mxu1 %v15497_v12  ;;  %v15546_v12 = vld [vmem:[%s20255_s1 + $0x4c4] ss:$8 sps:$4 sm:$0xff]  }
 0x357   : > { %8932 = vmatmul.mubr.bf16.gmra.mrb[8].mxu0 %v13451_v59  ;;  %3790 = vmatpush1.bf16.msra.mxu1 %v15500_v44  ;;  %v15537_v59 = vld [vmem:[%s20255_s1 + $0x4a4] ss:$8 sps:$4 sm:$0xff]   ;;  %v15544_v44 = vld [vmem:[%s20255_s1 + $0x4c0] ss:$8 sps:$4 sm:$0xff]  }
 0x358   : > { %8941 = vmatprep.mubr.bf16.mxu0 %v13456_v60  ;;  %3133 = vmatprep.mubr.bf16.mxu1 %v15533_v18  ;;  %v15535_v60 = vld [vmem:[%s20255_s1 + $0x4a0] ss:$8 sps:$4 sm:$0xff]   ;;  %v15550_v18 = vld [vmem:[%s20255_s1 + $0x4d4] ss:$8 sps:$4 sm:$0xff]  }
 0x359   : > { %3791 = vmatprep.subr.bf16.mxu1 %v15508_v19  ;;  %v15548_v19 = vld [vmem:[%s20255_s1 + $0x4d0] ss:$8 sps:$4 sm:$0xff]  }
 0x35b   : > { %3792 = vmatpush1.bf16.msra.mxu1 %v15506_v42  ;;  %v3204_v42 = vld [vmem:[%s16242_s15 + $0x60] sm:$0x88] }
 0x35c   : > { %3793 = vmatprep.subr.bf16.mxu1 %v15511_v20  ;;  %v3206_v20 = vld [vmem:[%s16242_s15 + $0x70] sm:$0x77] }
 0x35e   : > { %3134 = vmatmul.mubr.bf16.gmra.mrb[44].mxu1 %v15538_v21  ;;  %v3208_v21 = vld [vmem:[%s16242_s15 + $0x90] sm:$0x88] }
 0x35f   : > { %8942 = vmatmul.mubr.bf16.gmra.mrb[12].mxu0 %v13455_v16  ;;  %3794 = vmatpush1.bf16.msra.mxu1 %v15509_v23  ;;  %v15555_v16 = vld [vmem:[%s20255_s1 + $0x4e4] ss:$8 sps:$4 sm:$0xff]   ;;  %v12183_v32 = vrot.slane %v3208_v21, 11 }
 0x360   : > { %3143 = vmatprep.mubr.bf16.mxu1 %v15542_v27  ;;  %3795 = vmatprep.subr.bf16.mxu1 %v15514_v24  ;;  %v3210_v23 = vld [vmem:[%s16242_s15 + $0xa0] sm:$0x77]  ;;  %v15559_v24 = vld [vmem:[%s20255_s1 + $0x4f4] ss:$8 sps:$4 sm:$0xff]  }
 0x361   : > { %v15553_v27 = vld [vmem:[%s20255_s1 + $0x4e0] ss:$8 sps:$4 sm:$0xff]   ;;  %v3286_v26 = vrot.slane %v3210_v23, 7 }
 0x363   : > { %3796 = vmatpush1.bf16.msra.mxu1 %v15512_v31  ;;  %v12181_v31 = vrot.slane %v3204_v42, 11  ;;  %v15569_v42 = vld [vmem:[%s20255_s1 + $0x530] ss:$8 sps:$4 sm:$0xff]  }
 0x364   : > { %3797 = vmatprep.subr.bf16.mxu1 %v15517_v25  ;;  %v3278_v25 = vrot.slane %v3206_v20, 7  ;;  %v15574_v20 = vld [vmem:[%s20255_s1 + $0x544] ss:$8 sps:$4 sm:$0xff]  }
 0x366   : > { %3144 = vmatmul.mubr.bf16.gmra.mrb[48].mxu1 %v15547_v22  ;;  %v3279_v22 = vsel %vm16279_vm3, %v12181_v31, %v3278_v25  ;;  %v3201_v31 = vld [vmem:[%s16242_s15 + $0x38] sm:$0x88]  ;;  %v3203_v25 = vld [vmem:[%s16242_s15 + $0x48] sm:$0x77] }
 0x367   : > { %3798 = vmatpush1.bf16.msra.mxu1 %v15515_v46  ;;  %3153 = vmatprep.mubr.bf16.mxu1 %v15551_v45  ;;  %v3287_v46 = vsel %vm16279_vm3, %v12183_v32, %v3286_v26  ;;  %v3212_v45 = vld [vmem:[%s16242_s15 + $0xc0] sm:$0x88] }
 0x368   : > { %3799 = vmatprep.subr.bf16.mxu1 %v15520_v29  ;;  %v3214_v29 = vld [vmem:[%s16242_s15 + $0xd0] sm:$0x77]  ;;  %v15572_v26 = vld [vmem:[%s20255_s1 + $0x540] ss:$8 sps:$4 sm:$0xff]  }
 0x36b   : > { %3800 = vmatpush1.bf16.msra.mxu1 %v15518_v14  ;;  %v12262_v14 = vcombine.high %v3279_v22, %v3287_v46 }
 0x36c   : > { %3801 = vmatprep.subr.bf16.mxu1 %v15523_v48  ;;  %v15565_v48 = vld [vmem:[%s20255_s1 + $0x514] ss:$8 sps:$4 sm:$0xff]  }
 0x36e   : > { %3154 = vmatmul.mubr.bf16.gmra.mrb[52].mxu1 %v15556_v0  ;;  %v12185_v0 = vrot.slane %v3212_v45, 11  ;;  %v12180_v45 = vrot.slane %v3201_v31, 11 }
 0x36f   : > { %3802 = vmatpush1.bf16.msra.mxu1 %v15521_v28  ;;  %3821 = vmatprep.mubr.bf16.mxu1 %v12258_v39  ;;  %v3294_v28 = vrot.slane %v3214_v29, 7  ;;  %v12187_v39 = vrot.slane %v3216_v30, 11  ;;  %v3274_v29 = vrot.slane %v3203_v25, 7  ;;  %v15575_v30 = vld [vmem:[%s20255_s1 + $0x550] ss:$8 sps:$4 sm:$0xff]  }
 0x370   : > { %3803 = vmatprep.subr.bf16.mxu1 %v15526_v6  ;;  %v3302_v6 = vrot.slane %v3218_v40, 7  ;;  %v18932_v40 = vrot.slane %v17949_v52, %v17225_v13 }
 0x373   : > { %3804 = vmatpush1.bf16.msra.mxu1 %v15524_v3  ;;  %v3295_v3 = vsel %vm16279_vm3, %v12185_v0, %v3294_v28 }
 0x374   : > { %3805 = vmatprep.subr.bf16.mxu1 %v15529_v55  ;;  %v3303_v55 = vsel %vm16279_vm3, %v12187_v39, %v3302_v6 }
 0x375   : > { %v12265_v32 = vcombine.low %v3295_v3, %v3303_v55 }
 0x377   : > { %3806 = vmatpush1.bf16.msra.mxu1 %v15527_v63  ;;  %v3220_v63 = vld [vmem:[%s16242_s15 + $0x120] sm:$0x88] }
 0x378   : > { %3807 = vmatprep.subr.bf16.mxu1 %v15532_v8  ;;  %v3222_v8 = vld [vmem:[%s16242_s15 + $0x130] sm:$0x77] }
 0x37b   : > { %3808 = vmatpush1.bf16.msra.mxu1 %v15530_v9  ;;  %v3224_v9 = vld [vmem:[%s16242_s15 + $0x150] sm:$0x88] }
 0x37c   : > { %3809 = vmatprep.subr.bf16.mxu1 %v15537_v59  ;;  %v3226_v59 = vld [vmem:[%s16242_s15 + $0x160] sm:$0x77] }
 0x37f   : > { %3810 = vmatpush1.bf16.msra.mxu1 %v15535_v60  ;;  %v12261_v60 = vcombine.low %v3279_v22, %v3287_v46 }
 0x380   : > { %3811 = vmatprep.subr.bf16.mxu1 %v15541_v11  ;;  %v15566_v11 = vld [vmem:[%s20255_s1 + $0x520] ss:$8 sps:$4 sm:$0xff]  }
 0x383   : > { %3812 = vmatpush1.bf16.msra.mxu1 %v15539_v7  ;;  %v12266_v7 = vcombine.high %v3295_v3, %v3303_v55 }
 0x384   : > { %3813 = vmatprep.subr.bf16.mxu1 %v15546_v12  ;;  %v15571_v12 = vld [vmem:[%s20255_s1 + $0x534] ss:$8 sps:$4 sm:$0xff]  }
 0x387   : > { %3814 = vmatpush1.bf16.msra.mxu1 %v15544_v44  ;;  %v12189_v44 = vrot.slane %v3220_v63, 11  ;;  %v15583_v63 = vld [vmem:[%s20255_s1 + $0x574] ss:$8 sps:$4 sm:$0xff]  }
 0x388   : > { %3815 = vmatprep.subr.bf16.mxu1 %v15550_v18  ;;  %v3310_v18 = vrot.slane %v3222_v8, 7 }
 0x38a   : > { %v3311_v21 = vsel %vm16279_vm3, %v12189_v44, %v3310_v18  ;;  %v15584_v18 = vld [vmem:[%s20255_s1 + $0x580] ss:$8 sps:$4 sm:$0xff]  }
 0x38b   : > { %3816 = vmatpush1.bf16.msra.mxu1 %v15548_v19  ;;  %v12191_v19 = vrot.slane %v3224_v9, 11  ;;  %v15581_v9 = vld [vmem:[%s20255_s1 + $0x570] ss:$8 sps:$4 sm:$0xff]  }
 0x38c   : > { %3817 = vmatprep.subr.bf16.mxu1 %v15555_v16  ;;  %v3318_v16 = vrot.slane %v3226_v59, 7  ;;  %v15586_v59 = vld [vmem:[%s20255_s1 + $0x584] ss:$8 sps:$4 sm:$0xff]  }
 0x38e   : > { %v3319_v23 = vsel %vm16279_vm3, %v12191_v19, %v3318_v16 }
 0x38f   : > { %3818 = vmatpush1.bf16.msra.mxu1 %v15553_v27  ;;  %v3197_v27 = vld [vmem:[%s16242_s15 + $0x8] sm:$0x88]  ;;  %v12269_v39 = vcombine.low %v3311_v21, %v3319_v23 }
 0x390   : > { %3819 = vmatprep.subr.bf16.mxu1 %v15559_v24  ;;  %v3199_v24 = vld [vmem:[%s16242_s15 + $0x18] sm:$0x77]  ;;  %v12178_v22 = vrot.slane %v3197_v27, 11 }
 0x391   : > { %v3266_v46 = vrot.slane %v3199_v24, 7 }
 0x393   : > { %3820 = vmatpush1.bf16.msra.mxu1 %v15557_v35  ;;  %v12270_v35 = vcombine.high %v3311_v21, %v3319_v23  ;;  %v15587_v21 = vld [vmem:[%s20255_s1 + $0x590] ss:$8 sps:$4 sm:$0xff]   ;;  %v15592_v23 = vld [vmem:[%s20255_s1 + $0x5a4] ss:$8 sps:$4 sm:$0xff]  }
 0x394   : > { %3862 = vmatprep.subr.bf16.mxu1 %v15562_v37  ;;  %v15577_v37 = vld [vmem:[%s20255_s1 + $0x554] ss:$8 sps:$4 sm:$0xff]  }
 0x396   : > { %3822 = vmatmul.mubr.bf16.vlgmr.msra.gmra.mrb[40].mxu1 %v12257_v47  ;;  %v15580_v47 = vld [vmem:[%s20255_s1 + $0x564] ss:$8 sps:$4 sm:$0xff]  }
 0x397   : > { %3863 = vmatpush1.bf16.msra.mxu1 %v15560_v56  ;;  %3831 = vmatprep.mubr.bf16.mxu1 %v12262_v14  ;;  %v18939_v56 = vsel %vm16279_vm3, %v12178_v22, %v3266_v46  ;;  %v18943_v14 = vsel %vm16279_vm3, %v12180_v45, %v3274_v29  ;;  %v15595_v22 = vld [vmem:[%s20255_s1 + $0x5b4] ss:$8 sps:$4 sm:$0xff]   ;;  %v15593_v45 = vld [vmem:[%s20255_s1 + $0x5b0] ss:$8 sps:$4 sm:$0xff]   ;;  %v15598_v29 = vld [vmem:[%s20255_s1 + $0x5c4] ss:$8 sps:$4 sm:$0xff]  }
 0x398   : > { %3864 = vmatprep.subr.bf16.mxu1 %v15565_v48  ;;  %v18947_v48 = vrot.slane %v17954_v36, %v17225_v13  ;;  %v12260_v3 = vcombine.high %v18939_v56, %v18943_v14 }
 0x39b   : > { %3865 = vmatpush1.bf16.msra.mxu1 %v15563_v49 }
 0x39c   : > { %3866 = vmatprep.subr.bf16.mxu1 %v15568_v15  ;;  %v15578_v15 = vld [vmem:[%s20255_s1 + $0x560] ss:$8 sps:$4 sm:$0xff]  }
 0x39e   : > { %3832 = vmatmul.mubr.bf16.gmra.mrb[44].mxu1 %v12261_v60 }
 0x39f   : > { %3867 = vmatpush1.bf16.msra.mxu1 %v15566_v11  ;;  %3841 = vmatprep.mubr.bf16.mxu1 %v12266_v7 }
 0x3a0   : > { %3868 = vmatprep.subr.bf16.mxu1 %v15571_v12 }
 0x3a3   : > { %3869 = vmatpush1.bf16.msra.mxu1 %v15569_v42  ;;  %v15589_v42 = vld [vmem:[%s20255_s1 + $0x594] ss:$8 sps:$4 sm:$0xff]  }
 0x3a4   : > { %3870 = vmatprep.subr.bf16.mxu1 %v15574_v20 }
 0x3a6   : > { %3842 = vmatmul.mubr.bf16.gmra.mrb[48].mxu1 %v12265_v32 }
 0x3a7   : > { %3871 = vmatpush1.bf16.msra.mxu1 %v15572_v26  ;;  %3851 = vmatprep.mubr.bf16.mxu1 %v12270_v35  ;;  %v15590_v26 = vld [vmem:[%s20255_s1 + $0x5a0] ss:$8 sps:$4 sm:$0xff]  }
 0x3a8   : > { %3872 = vmatprep.subr.bf16.mxu1 %v15577_v37  ;;  %v2434_v0 = vpop.f32.mrb[24].mxu1 }
 0x3a9   : > { %v18950_v52 = vadd.f32 %v2434_v0, %v18932_v40  ;;  %v2436_v28 = vpop.f32.mrb[25].mxu1 }
 0x3aa   : > { %v18953_v6 = vadd.f32 %v2436_v28, %v18947_v48  ;;  %v2438_v49 = vpop.f32.mrb[26].mxu1 }
 0x3ab   : > { %3873 = vmatpush1.bf16.msra.mxu1 %v15575_v30  ;;  %v18961_v36 = vadd.f32 %v2438_v49, %v18932_v40  ;;  %v2440_v55 = vpop.f32.mrb[27].mxu1  ;;  %v15596_v49 = vld [vmem:[%s20255_s1 + $0x5c0] ss:$8 sps:$4 sm:$0xff]  }
 0x3ac   : > { %3874 = vmatprep.subr.bf16.mxu1 %v15580_v47  ;;  %v18967_v8 = vadd.f32 %v2440_v55, %v18947_v48  ;;  %v15601_v55 = vld [vmem:[%s20255_s1 + $0x5d4] ss:$8 sps:$4 sm:$0xff]  }
 0x3ae   : > { %3852 = vmatmul.mubr.bf16.gmra.mrb[52].mxu1 %v12269_v39 }
 0x3af   : > { %3875 = vmatpush1.bf16.msra.mxu1 %v15578_v15  ;;  %3894 = vmatprep.mubr.bf16.mxu1 %v12260_v3 }
 0x3b0   : > { %3876 = vmatprep.subr.bf16.mxu1 %v15583_v63 }
 0x3b1   : > { %v2444_v60 = vpop.f32.mrb[28].mxu1 }
 0x3b2   : > { %v18976_v11 = vadd.f32 %v2444_v60, %v18932_v40  ;;  %v2446_v7 = vpop.f32.mrb[29].mxu1  ;;  %v3207_v60 = vld [vmem:[%s16242_s15 + $0x78] sm:$0x77] }
 0x3b3   : > { %v18979_v12 = vadd.f32 %v2446_v7, %v18947_v48  ;;  %3877 = vmatpush1.bf16.msra.mxu1 %v15581_v9  ;;  %v2448_v44 = vpop.f32.mrb[30].mxu1  ;;  %v15599_v9 = vld [vmem:[%s20255_s1 + $0x5d0] ss:$8 sps:$4 sm:$0xff]  }
 0x3b4   : > { %v18985_v19 = vadd.f32 %v2448_v44, %v18932_v40  ;;  %v2450_v16 = vpop.f32.mrb[31].mxu1  ;;  %3878 = vmatprep.subr.bf16.mxu1 %v15586_v59  ;;  %v3205_v59 = vld [vmem:[%s16242_s15 + $0x68] sm:$0x88]  ;;  %v3209_v7 = vld [vmem:[%s16242_s15 + $0x98] sm:$0x88] }
 0x3b5   : > { %v18991_v20 = vadd.f32 %v2450_v16, %v18947_v48  ;;  %v3211_v44 = vld [vmem:[%s16242_s15 + $0xa8] sm:$0x77]  ;;  %v12182_v16 = vrot.slane %v3205_v59, 11 }
 0x3b7   : > { %3879 = vmatpush1.bf16.msra.mxu1 %v15584_v18  ;;  %v15607_v18 = vld [vmem:[%s20255_s1 + $0x5f4] ss:$8 sps:$4 sm:$0xff]  }
 0x3b8   : > { %3880 = vmatprep.subr.bf16.mxu1 %v15589_v42  ;;  %v3282_v42 = vrot.slane %v3207_v60, 7 }
 0x3b9   : > { %v2454_v27 = vpop.f32.mrb[32].mxu1 }
 0x3ba   : > { %v19000_v24 = vadd.f32 %v2454_v27, %v18932_v40  ;;  %v2456_v31 = vpop.f32.mrb[33].mxu1  ;;  %v15605_v27 = vld [vmem:[%s20255_s1 + $0x5f0] ss:$8 sps:$4 sm:$0xff]  }
 0x3bb   : > { %v19003_v25 = vadd.f32 %v2456_v31, %v18947_v48  ;;  %3881 = vmatpush1.bf16.msra.mxu1 %v15587_v21  ;;  %v2458_v32 = vpop.f32.mrb[34].mxu1  ;;  %v12184_v21 = vrot.slane %v3209_v7, 11  ;;  %v15610_v31 = vld [vmem:[%s20255_s1 + $0x604] ss:$8 sps:$4 sm:$0xff]  }
 0x3bc   : > { %v19009_v35 = vadd.f32 %v2458_v32, %v18932_v40  ;;  %v2460_v37 = vpop.f32.mrb[35].mxu1  ;;  %3882 = vmatprep.subr.bf16.mxu1 %v15592_v23  ;;  %v3290_v23 = vrot.slane %v3211_v44, 7  ;;  %v3283_v32 = vsel %vm16279_vm3, %v12182_v16, %v3282_v42  ;;  %v3221_v7 = vld [vmem:[%s16242_s15 + $0x128] sm:$0x88]  ;;  %v3223_v44 = vld [vmem:[%s16242_s15 + $0x138] sm:$0x77] }
 0x3bd   : > { %v19015_v46 = vadd.f32 %v2460_v37, %v18947_v48  ;;  %v3213_v37 = vld [vmem:[%s16242_s15 + $0xc8] sm:$0x88] }
 0x3be   : > { %v15614_v42 = vld [vmem:[%s20255_s1 + $0x620] ss:$8 sps:$4 sm:$0xff]  }
 0x3bf   : > { %3883 = vmatpush1.bf16.msra.mxu1 %v15590_v26  ;;  %v3291_v26 = vsel %vm16279_vm3, %v12184_v21, %v3290_v23  ;;  %v15619_v23 = vld [vmem:[%s20255_s1 + $0x634] ss:$8 sps:$4 sm:$0xff]  }
 0x3c0   : > { %3884 = vmatprep.subr.bf16.mxu1 %v15595_v22  ;;  %v3215_v22 = vld [vmem:[%s16242_s15 + $0xd8] sm:$0x77]  ;;  %v12263_v16 = vcombine.low %v3283_v32, %v3291_v26 }
 0x3c1   : > { %v2464_v30 = vpop.f32.mrb[36].mxu1 }
 0x3c2   : > { %v19024_v47 = vadd.f32 %v2464_v30, %v18932_v40  ;;  %v2466_v0 = vpop.f32.mrb[37].mxu1  ;;  %v12259_v30 = vcombine.low %v18939_v56, %v18943_v14  ;;  %v15611_v56 = vld [vmem:[%s20255_s1 + $0x610] ss:$8 sps:$4 sm:$0xff]   ;;  %v15616_v14 = vld [vmem:[%s20255_s1 + $0x624] ss:$8 sps:$4 sm:$0xff]  }
 0x3c3   : > { %v19027_v28 = vadd.f32 %v2466_v0, %v18947_v48  ;;  %3885 = vmatpush1.bf16.msra.mxu1 %v15593_v45  ;;  %v2468_v39 = vpop.f32.mrb[38].mxu1  ;;  %v3217_v45 = vld [vmem:[%s16242_s15 + $0xf8] sm:$0x88]  ;;  %v15608_v0 = vld [vmem:[%s20255_s1 + $0x600] ss:$8 sps:$4 sm:$0xff]  }
 0x3c4   : > { %v19033_v15 = vadd.f32 %v2468_v39, %v18932_v40  ;;  %v2470_v3 = vpop.f32.mrb[39].mxu1  ;;  %3886 = vmatprep.subr.bf16.mxu1 %v15598_v29  ;;  %v15604_v40 = vld [vmem:[%s20255_s1 + $0x5e4] ss:$8 sps:$4 sm:$0xff]   ;;  %v12264_v39 = vcombine.high %v3283_v32, %v3291_v26  ;;  %v15617_v32 = vld [vmem:[%s20255_s1 + $0x630] ss:$8 sps:$4 sm:$0xff]  }
 0x3c5   : > { %v19039_v63 = vadd.f32 %v2470_v3, %v18947_v48  ;;  %v15602_v48 = vld [vmem:[%s20255_s1 + $0x5e0] ss:$8 sps:$4 sm:$0xff]   ;;  %v12186_v3 = vrot.slane %v3213_v37, 11  ;;  %v15622_v26 = vld [vmem:[%s20255_s1 + $0x644] ss:$8 sps:$4 sm:$0xff]  }
 0x3c6   : > { %v3219_v29 = vld [vmem:[%s16242_s15 + $0x108] sm:$0x77] }
 0x3c7   : > { %3887 = vmatpush1.bf16.msra.mxu1 %v15596_v49  ;;  %v15613_v49 = vld [vmem:[%s20255_s1 + $0x614] ss:$8 sps:$4 sm:$0xff]  }
 0x3c8   : > { %3888 = vmatprep.subr.bf16.mxu1 %v15601_v55  ;;  %v3298_v55 = vrot.slane %v3215_v22, 7 }
 0x3ca   : > { %v3299_v59 = vsel %vm16279_vm3, %v12186_v3, %v3298_v55  ;;  %v15620_v55 = vld [vmem:[%s20255_s1 + $0x640] ss:$8 sps:$4 sm:$0xff]  }
 0x3cb   : > { %3889 = vmatpush1.bf16.msra.mxu1 %v15599_v9  ;;  %v12188_v9 = vrot.slane %v3217_v45, 11 }
 0x3cc   : > { %3890 = vmatprep.subr.bf16.mxu1 %v15604_v40  ;;  %v3306_v40 = vrot.slane %v3219_v29, 7 }
 0x3ce   : > { %v3307_v60 = vsel %vm16279_vm3, %v12188_v9, %v3306_v40  ;;  %v15625_v40 = vld [vmem:[%s20255_s1 + $0x654] ss:$8 sps:$4 sm:$0xff]  }
 0x3cf   : > { %3891 = vmatpush1.bf16.msra.mxu1 %v15602_v48  ;;  %v3225_v48 = vld [vmem:[%s16242_s15 + $0x158] sm:$0x88]  ;;  %v12268_v21 = vcombine.high %v3299_v59, %v3307_v60  ;;  %v12267_v3 = vcombine.low %v3299_v59, %v3307_v60  ;;  %v15628_v60 = vld [vmem:[%s20255_s1 + $0x664] ss:$8 sps:$4 sm:$0xff]  }
 0x3d0   : > { %3892 = vmatprep.subr.bf16.mxu1 %v15607_v18  ;;  %v3227_v18 = vld [vmem:[%s16242_s15 + $0x168] sm:$0x77]  ;;  %v12192_v37 = vrot.slane %v3225_v48, 11  ;;  %v15623_v59 = vld [vmem:[%s20255_s1 + $0x650] ss:$8 sps:$4 sm:$0xff]  }
 0x3d1   : > { %v3322_v22 = vrot.slane %v3227_v18, 7 }
 0x3d3   : > { %3893 = vmatpush1.bf16.msra.mxu1 %v15605_v27  ;;  %v12190_v27 = vrot.slane %v3221_v7, 11  ;;  %v3323_v29 = vsel %vm16279_vm3, %v12192_v37, %v3322_v22  ;;  %v15637_v37 = vld [vmem:[%s20255_s1 + $0x694] ss:$8 sps:$4 sm:$0xff]   ;;  %v15635_v22 = vld [vmem:[%s20255_s1 + $0x690] ss:$8 sps:$4 sm:$0xff]  }
 0x3d4   : > { %4563 = vmatprep.subr.bf16.mxu1 %v15610_v31  ;;  %v3314_v31 = vrot.slane %v3223_v44, 7 }
 0x3d6   : > { %3895 = vmatmul.mubr.bf16.vlgmr.msra.gmra.mrb[40].mxu1 %v12259_v30  ;;  %v3315_v45 = vsel %vm16279_vm3, %v12190_v27, %v3314_v31  ;;  %v3967_v30 = vld [vmem:[%s16242_s15 + $0x10] sm:$0xcc]  ;;  %v15634_v27 = vld [vmem:[%s20255_s1 + $0x684] ss:$8 sps:$4 sm:$0xff]   ;;  %v15632_v31 = vld [vmem:[%s20255_s1 + $0x680] ss:$8 sps:$4 sm:$0xff]  }
 0x3d7   : > { %4564 = vmatpush1.bf16.msra.mxu1 %v15608_v0  ;;  %3904 = vmatprep.mubr.bf16.mxu1 %v12264_v39  ;;  %v3969_v0 = vld [vmem:[%s16242_s15 + $0x20] sm:$0x33]  ;;  %v3971_v39 = vld [vmem:[%s16242_s15 + $0x40] sm:$0xcc]  ;;  %v12272_v9 = vcombine.high %v3315_v45, %v3323_v29  ;;  %v12271_v18 = vcombine.low %v3315_v45, %v3323_v29  ;;  %v15643_v45 = vld [vmem:[%s20255_s1 + $0x6b4] ss:$8 sps:$4 sm:$0xff]  }
 0x3d8   : > { %4565 = vmatprep.subr.bf16.mxu1 %v15613_v49  ;;  %v3973_v49 = vld [vmem:[%s16242_s15 + $0x50] sm:$0x33]  ;;  %v12339_v1 = vrot.slane %v3971_v39, 10 }
 0x3d9   : > { %v4044_v7 = vrot.slane %v3973_v49, 6  ;;  %v15641_v29 = vld [vmem:[%s20255_s1 + $0x6b0] ss:$8 sps:$4 sm:$0xff]   ;;  %v15649_v39 = vld [vmem:[%s20255_s1 + $0x6d4] ss:$8 sps:$4 sm:$0xff]  }
 0x3da   : > { %v15647_v49 = vld [vmem:[%s20255_s1 + $0x6d0] ss:$8 sps:$4 sm:$0xff]  }
 0x3db   : > { %4566 = vmatpush1.bf16.msra.mxu1 %v15611_v56  ;;  %v12337_v56 = vrot.slane %v3967_v30, 10  ;;  %v19131_v48 = vsel %vm16339_vm5, %v12339_v1, %v4044_v7  ;;  %v15646_v30 = vld [vmem:[%s20255_s1 + $0x6c4] ss:$8 sps:$4 sm:$0xff]   ;;  %v15655_v1 = vld [vmem:[%s20255_s1 + $0x6f4] ss:$8 sps:$4 sm:$0xff]  }
 0x3dc   : > { %4567 = vmatprep.subr.bf16.mxu1 %v15616_v14  ;;  %v4036_v14 = vrot.slane %v3969_v0, 6  ;;  %v15644_v0 = vld [vmem:[%s20255_s1 + $0x6c0] ss:$8 sps:$4 sm:$0xff]  }
 0x3de   : > { %3905 = vmatmul.mubr.bf16.gmra.mrb[44].mxu1 %v12263_v16  ;;  %v19127_v44 = vsel %vm16339_vm5, %v12337_v56, %v4036_v14  ;;  %v15626_v16 = vld [vmem:[%s20255_s1 + $0x660] ss:$8 sps:$4 sm:$0xff]   ;;  %v3981_v56 = vld [vmem:[%s16242_s15 + $0xb0] sm:$0x33] }
 0x3df   : > { %4568 = vmatpush1.bf16.msra.mxu1 %v15614_v42  ;;  %3914 = vmatprep.mubr.bf16.mxu1 %v12268_v21  ;;  %v12418_v42 = vcombine.high %v19127_v44, %v19131_v48  ;;  %v15631_v21 = vld [vmem:[%s20255_s1 + $0x674] ss:$8 sps:$4 sm:$0xff]   ;;  %v15650_v14 = vld [vmem:[%s20255_s1 + $0x6e0] ss:$8 sps:$4 sm:$0xff]  }
 0x3e0   : > { %4569 = vmatprep.subr.bf16.mxu1 %v15619_v23  ;;  %v15629_v23 = vld [vmem:[%s20255_s1 + $0x670] ss:$8 sps:$4 sm:$0xff]  }
 0x3e3   : > { %4570 = vmatpush1.bf16.msra.mxu1 %v15617_v32  ;;  %v15640_v32 = vld [vmem:[%s20255_s1 + $0x6a4] ss:$8 sps:$4 sm:$0xff]  }
 0x3e4   : > { %4571 = vmatprep.subr.bf16.mxu1 %v15622_v26  ;;  %v15638_v26 = vld [vmem:[%s20255_s1 + $0x6a0] ss:$8 sps:$4 sm:$0xff]  }
 0x3e6   : > { %3915 = vmatmul.mubr.bf16.gmra.mrb[48].mxu1 %v12267_v3  ;;  %v15652_v3 = vld [vmem:[%s20255_s1 + $0x6e4] ss:$8 sps:$4 sm:$0xff]  }
 0x3e7   : > { %4572 = vmatpush1.bf16.msra.mxu1 %v15620_v55  ;;  %3924 = vmatprep.mubr.bf16.mxu1 %v12272_v9  ;;  %v3975_v55 = vld [vmem:[%s16242_s15 + $0x70] sm:$0xcc]  ;;  %v3977_v9 = vld [vmem:[%s16242_s15 + $0x80] sm:$0x33] }
 0x3e8   : > { %4573 = vmatprep.subr.bf16.mxu1 %v15625_v40  ;;  %v3979_v40 = vld [vmem:[%s16242_s15 + $0xa0] sm:$0xcc]  ;;  %v12341_v7 = vrot.slane %v3975_v55, 10  ;;  %v15659_v55 = vld [vmem:[%s20255_s1 + $0x1410] ss:$8 sps:$4 sm:$0xff]  }
 0x3eb   : > { %4574 = vmatpush1.bf16.msra.mxu1 %v15623_v59  ;;  %v4052_v59 = vrot.slane %v3977_v9, 6 }
 0x3ec   : > { %4575 = vmatprep.subr.bf16.mxu1 %v15628_v60  ;;  %v12343_v60 = vrot.slane %v3979_v40, 10  ;;  %v15664_v40 = vld [vmem:[%s20255_s1 + $0x1424] ss:$8 sps:$4 sm:$0xff]  }
 0x3ee   : > { %3925 = vmatmul.mubr.bf16.gmra.mrb[52].mxu1 %v12271_v18  ;;  %v4060_v18 = vrot.slane %v3981_v56, 6 }
 0x3ef   : > { %4576 = vmatpush1.bf16.msra.mxu1 %v15626_v16  ;;  %4595 = vmatprep.mubr.bf16.mxu1 %v12418_v42  ;;  %v15653_v16 = vld [vmem:[%s20255_s1 + $0x6f0] ss:$8 sps:$4 sm:$0xff]   ;;  %v15658_v42 = vld [vmem:[%s20255_s1 + $0x1404] ss:$8 sps:$4 sm:$0xff]  }
 0x3f0   : > { %4577 = vmatprep.subr.bf16.mxu1 %v15631_v21  ;;  %v4053_v21 = vsel %vm16339_vm5, %v12341_v7, %v4052_v59  ;;  %v3993_v7 = vld [vmem:[%s16242_s15 + $0x140] sm:$0x33]  ;;  %v3995_v59 = vld [vmem:[%s16242_s15 + $0x160] sm:$0xcc] }
 0x3f3   : > { %4578 = vmatpush1.bf16.msra.mxu1 %v15629_v23  ;;  %v4061_v23 = vsel %vm16339_vm5, %v12343_v60, %v4060_v18  ;;  %v3997_v60 = vld [vmem:[%s16242_s15 + $0x170] sm:$0x33] }
 0x3f4   : > { %4579 = vmatprep.subr.bf16.mxu1 %v15634_v27  ;;  %v3983_v27 = vld [vmem:[%s16242_s15 + $0xd0] sm:$0xcc]  ;;  %v12421_v18 = vcombine.low %v4053_v21, %v4061_v23 }
 0x3f7   : > { %4580 = vmatpush1.bf16.msra.mxu1 %v15632_v31  ;;  %v3985_v31 = vld [vmem:[%s16242_s15 + $0xe0] sm:$0x33] }
 0x3f8   : > { %4581 = vmatprep.subr.bf16.mxu1 %v15637_v37  ;;  %v3987_v37 = vld [vmem:[%s16242_s15 + $0x100] sm:$0xcc] }
 0x3fb   : > { %4582 = vmatpush1.bf16.msra.mxu1 %v15635_v22  ;;  %v3989_v22 = vld [vmem:[%s16242_s15 + $0x110] sm:$0x33] }
 0x3fc   : > { %4583 = vmatprep.subr.bf16.mxu1 %v15640_v32  ;;  %v12417_v32 = vcombine.low %v19127_v44, %v19131_v48 }
 0x3ff   : > { %4584 = vmatpush1.bf16.msra.mxu1 %v15638_v26  ;;  %v15656_v26 = vld [vmem:[%s20255_s1 + $0x1400] ss:$8 sps:$4 sm:$0xff]  }
 0x400   : > { %4585 = vmatprep.subr.bf16.mxu1 %v15643_v45  ;;  %v15661_v45 = vld [vmem:[%s20255_s1 + $0x1414] ss:$8 sps:$4 sm:$0xff]  }
 0x403   : > { %4586 = vmatpush1.bf16.msra.mxu1 %v15641_v29  ;;  %v12422_v29 = vcombine.high %v4053_v21, %v4061_v23  ;;  %v15665_v23 = vld [vmem:[%s20255_s1 + $0x1430] ss:$8 sps:$4 sm:$0xff]  }
 0x404   : > { %4587 = vmatprep.subr.bf16.mxu1 %v15646_v30  ;;  %v12345_v30 = vrot.slane %v3983_v27, 10 }
 0x407   : > { %4588 = vmatpush1.bf16.msra.mxu1 %v15644_v0  ;;  %v4068_v0 = vrot.slane %v3985_v31, 6 }
 0x408   : > { %4589 = vmatprep.subr.bf16.mxu1 %v15649_v39  ;;  %v12347_v39 = vrot.slane %v3987_v37, 10  ;;  %v4084_v37 = vrot.slane %v3993_v7, 6 }
 0x409   : > { %v4069_v56 = vsel %vm16339_vm5, %v12345_v30, %v4068_v0  ;;  %v15670_v30 = vld [vmem:[%s20255_s1 + $0x1444] ss:$8 sps:$4 sm:$0xff]  }
 0x40b   : > { %4590 = vmatpush1.bf16.msra.mxu1 %v15647_v49  ;;  %v4076_v49 = vrot.slane %v3989_v22, 6  ;;  %v12351_v22 = vrot.slane %v3995_v59, 10 }
 0x40c   : > { %4591 = vmatprep.subr.bf16.mxu1 %v15652_v3 }
 0x40f   : > { %4592 = vmatpush1.bf16.msra.mxu1 %v15650_v14  ;;  %v4077_v14 = vsel %vm16339_vm5, %v12347_v39, %v4076_v49 }
 0x410   : > { %4593 = vmatprep.subr.bf16.mxu1 %v15655_v1  ;;  %v3991_v1 = vld [vmem:[%s16242_s15 + $0x130] sm:$0xcc]  ;;  %v12426_v27 = vcombine.high %v4069_v56, %v4077_v14  ;;  %v12425_v49 = vcombine.low %v4069_v56, %v4077_v14  ;;  %v15676_v14 = vld [vmem:[%s20255_s1 + $0x1464] ss:$8 sps:$4 sm:$0xff]  }
 0x411   : > { %v12349_v31 = vrot.slane %v3991_v1, 10  ;;  %v15673_v1 = vld [vmem:[%s20255_s1 + $0x1454] ss:$8 sps:$4 sm:$0xff]  }
 0x413   : > { %4594 = vmatpush1.bf16.msra.mxu1 %v15653_v16  ;;  %v15662_v16 = vld [vmem:[%s20255_s1 + $0x1420] ss:$8 sps:$4 sm:$0xff]   ;;  %v4085_v0 = vsel %vm16339_vm5, %v12349_v31, %v4084_v37 }
 0x414   : > { %9813 = vmatprep.subr.bf16.mxu1 %v15658_v42  ;;  %v15667_v42 = vld [vmem:[%s20255_s1 + $0x1434] ss:$8 sps:$4 sm:$0xff]  }
 0x416   : > { %4596 = vmatmul.mubr.bf16.vlgmr.msra.gmra.mrb[40].mxu1 %v12417_v32  ;;  %v4092_v32 = vrot.slane %v3997_v60, 6 }
 0x417   : > { %9814 = vmatpush1.bf16.msra.mxu1 %v15656_v26  ;;  %4605 = vmatprep.mubr.bf16.mxu1 %v12422_v29 }
 0x418   : > { %9815 = vmatprep.subr.bf16.mxu1 %v15661_v45  ;;  %v4093_v39 = vsel %vm16339_vm5, %v12351_v22, %v4092_v32  ;;  %v15677_v22 = vld [vmem:[%s20255_s1 + $0x1470] ss:$8 sps:$4 sm:$0xff]  }
 0x41a   : > { %v19215_v44 = vpop.f32.mrb[0].mxu0 }
 0x41b   : > { %v19217_v48 = vpop.f32.mrb[1].mxu0  ;;  %9816 = vmatpush1.bf16.msra.mxu1 %v15659_v55  ;;  %v15668_v55 = vld [vmem:[%s20255_s1 + $0x1440] ss:$8 sps:$4 sm:$0xff]  }
 0x41c   : > { %v19219_v3 = vpop.f32.mrb[2].mxu0  ;;  %9817 = vmatprep.subr.bf16.mxu1 %v15664_v40  ;;  %v12430_v40 = vcombine.high %v4085_v0, %v4093_v39 }
 0x41d   : > { %v19224_v9 = vpop.f32.mrb[3].mxu0 }
 0x41e   : > { %4606 = vmatmul.mubr.bf16.gmra.mrb[44].mxu1 %v12421_v18  ;;  %v12429_v18 = vcombine.low %v4085_v0, %v4093_v39  ;;  %v15685_v0 = vld [vmem:[%s20255_s1 + $0x1494] ss:$8 sps:$4 sm:$0xff]   ;;  %v15781_v39 = vld [vmem:[%s20258_s4 + $0x104] ss:$8 sps:$4 sm:$0xff]  }
 0x41f   : > { %9818 = vmatpush1.bf16.msra.mxu1 %v15662_v16  ;;  %4615 = vmatprep.mubr.bf16.mxu1 %v12426_v27  ;;  %v15674_v16 = vld [vmem:[%s20255_s1 + $0x1460] ss:$8 sps:$4 sm:$0xff]  }
 0x420   : > { %9819 = vmatprep.subr.bf16.mxu1 %v15667_v42  ;;  %v15679_v42 = vld [vmem:[%s20255_s1 + $0x1474] ss:$8 sps:$4 sm:$0xff]   ;;  %9291 = vmatprep.subr.bf16.mxu0 %v15781_v39  ;;  %v15797_v39 = vld [vmem:[%s20258_s4 + $0x130] ss:$8 sps:$4 sm:$0xff]  }
 0x422   : > { %v19243_v26 = vpop.f32.mrb[4].mxu0 }
 0x423   : > { %v19245_v45 = vpop.f32.mrb[5].mxu0  ;;  %9820 = vmatpush1.bf16.msra.mxu1 %v15665_v23  ;;  %v15682_v23 = vld [vmem:[%s20255_s1 + $0x1484] ss:$8 sps:$4 sm:$0xff]  }
 0x424   : > { %v19247_v21 = vpop.f32.mrb[6].mxu0  ;;  %9821 = vmatprep.subr.bf16.mxu1 %v15670_v30  ;;  %v15680_v30 = vld [vmem:[%s20255_s1 + $0x1480] ss:$8 sps:$4 sm:$0xff]  }
 0x425   : > { %v19252_v29 = vpop.f32.mrb[7].mxu0 }
 0x426   : > { %4616 = vmatmul.mubr.bf16.gmra.mrb[48].mxu1 %v12425_v49  ;;  %v15683_v49 = vld [vmem:[%s20255_s1 + $0x1490] ss:$8 sps:$4 sm:$0xff]  }
 0x427   : > { %9822 = vmatpush1.bf16.msra.mxu1 %v15668_v55  ;;  %4625 = vmatprep.mubr.bf16.mxu1 %v12430_v40  ;;  %v15779_v55 = vld [vmem:[%s20258_s4 + $0x100] ss:$8 sps:$4 sm:$0xff]   ;;  %v15688_v40 = vld [vmem:[%s20255_s1 + $0x14a4] ss:$8 sps:$4 sm:$0xff]  }
 0x428   : > { %9823 = vmatprep.subr.bf16.mxu1 %v15673_v1  ;;  %9292 = vmatpush1.bf16.msra.mxu0 %v15779_v55  ;;  %v15787_v1 = vld [vmem:[%s20258_s4 + $0x114] ss:$8 sps:$4 sm:$0xff]   ;;  %v15805_v55 = vld [vmem:[%s20258_s4 + $0x144] ss:$8 sps:$4 sm:$0xff]  }
 0x429   : > { %9293 = vmatprep.subr.bf16.mxu0 %v15787_v1  ;;  %v15803_v1 = vld [vmem:[%s20258_s4 + $0x140] ss:$8 sps:$4 sm:$0xff]  }
 0x42a   : > { %v19267_v7 = vpop.f32.mrb[8].mxu0 }
 0x42b   : > { %v19269_v59 = vpop.f32.mrb[9].mxu0  ;;  %9824 = vmatpush1.bf16.msra.mxu1 %v15671_v43  ;;  %v15686_v43 = vld [vmem:[%s20255_s1 + $0x14a0] ss:$8 sps:$4 sm:$0xff]  }
 0x42c   : > { %v19271_v60 = vpop.f32.mrb[10].mxu0  ;;  %9825 = vmatprep.subr.bf16.mxu1 %v15676_v14  ;;  %v15785_v14 = vld [vmem:[%s20258_s4 + $0x110] ss:$8 sps:$4 sm:$0xff]  }
 0x42d   : > { %v19276_v56 = vpop.f32.mrb[11].mxu0  ;;  %9294 = vmatpush1.bf16.msra.mxu0 %v15785_v14  ;;  %v15811_v14 = vld [vmem:[%s20258_s4 + $0x154] ss:$8 sps:$4 sm:$0xff]  }
 0x42e   : > { %4626 = vmatmul.mubr.bf16.gmra.mrb[52].mxu1 %v12429_v18  ;;  %v15691_v18 = vld [vmem:[%s20255_s1 + $0x14b4] ss:$8 sps:$4 sm:$0xff]  }
 0x42f   : > { %9826 = vmatpush1.bf16.msra.mxu1 %v15674_v16  ;;  %9845 = vmatprep.mubr.bf16.mxu1 %v16896_v10  ;;  %v15793_v16 = vld [vmem:[%s20258_s4 + $0x124] ss:$8 sps:$4 sm:$0xff]  }
 0x430   : > { %9827 = vmatprep.subr.bf16.mxu1 %v15679_v42  ;;  %v15689_v42 = vld [vmem:[%s20255_s1 + $0x14b0] ss:$8 sps:$4 sm:$0xff]   ;;  %9295 = vmatprep.subr.bf16.mxu0 %v15793_v16 }
 0x431   : > { %v15809_v16 = vld [vmem:[%s20258_s4 + $0x150] ss:$8 sps:$4 sm:$0xff]  }
 0x432   : > { %v19287_v27 = vpop.f32.mrb[12].mxu0 }
 0x433   : > { %v19289_v31 = vpop.f32.mrb[13].mxu0  ;;  %9828 = vmatpush1.bf16.msra.mxu1 %v15677_v22  ;;  %v15791_v22 = vld [vmem:[%s20258_s4 + $0x120] ss:$8 sps:$4 sm:$0xff]  }
 0x434   : > { %v19291_v37 = vpop.f32.mrb[14].mxu0  ;;  %9829 = vmatprep.subr.bf16.mxu1 %v15682_v23  ;;  %v15694_v23 = vld [vmem:[%s20255_s1 + $0x14c4] ss:$8 sps:$4 sm:$0xff]   ;;  %9296 = vmatpush1.bf16.msra.mxu0 %v15791_v22 }
 0x435   : > { %v19296_v32 = vpop.f32.mrb[15].mxu0  ;;  %v15817_v22 = vld [vmem:[%s20258_s4 + $0x164] ss:$8 sps:$4 sm:$0xff]  }
 0x437   : > { %9830 = vmatpush1.bf16.msra.mxu1 %v15680_v30  ;;  %v15799_v30 = vld [vmem:[%s20258_s4 + $0x134] ss:$8 sps:$4 sm:$0xff]  }
 0x438   : > { %9831 = vmatprep.subr.bf16.mxu1 %v15685_v0  ;;  %v15692_v0 = vld [vmem:[%s20255_s1 + $0x14c0] ss:$8 sps:$4 sm:$0xff]   ;;  %9297 = vmatprep.subr.bf16.mxu0 %v15799_v30 }
 0x439   : > { %9298 = vmatpush1.bf16.msra.mxu0 %v15797_v39  ;;  %v15815_v30 = vld [vmem:[%s20258_s4 + $0x160] ss:$8 sps:$4 sm:$0xff]   ;;  %v15823_v39 = vld [vmem:[%s20258_s4 + $0x174] ss:$8 sps:$4 sm:$0xff]  }
 0x43a   : > { %9299 = vmatprep.subr.bf16.mxu0 %v15805_v55  ;;  %v15821_v55 = vld [vmem:[%s20258_s4 + $0x170] ss:$8 sps:$4 sm:$0xff]  }
 0x43b   : > { %9832 = vmatpush1.bf16.msra.mxu1 %v15683_v49  ;;  %v15697_v49 = vld [vmem:[%s20255_s1 + $0x14d4] ss:$8 sps:$4 sm:$0xff]  }
 0x43c   : > { %9833 = vmatprep.subr.bf16.mxu1 %v15688_v40  ;;  %v15695_v40 = vld [vmem:[%s20255_s1 + $0x14d0] ss:$8 sps:$4 sm:$0xff]  }
 0x43d   : > { %9300 = vmatpush1.bf16.msra.mxu0 %v15803_v1  ;;  %v15829_v1 = vld [vmem:[%s20258_s4 + $0x184] ss:$8 sps:$4 sm:$0xff]  }
 0x43e   : > { %9301 = vmatprep.subr.bf16.mxu0 %v15811_v14  ;;  %v15827_v14 = vld [vmem:[%s20258_s4 + $0x180] ss:$8 sps:$4 sm:$0xff]  }
 0x43f   : > { %9834 = vmatpush1.bf16.msra.mxu1 %v15686_v43  ;;  %v15700_v43 = vld [vmem:[%s20255_s1 + $0x14e4] ss:$8 sps:$4 sm:$0xff]  }
 0x440   : > { %9835 = vmatprep.subr.bf16.mxu1 %v15691_v18  ;;  %v15698_v18 = vld [vmem:[%s20255_s1 + $0x14e0] ss:$8 sps:$4 sm:$0xff]  }
 0x441   : > { %9302 = vmatpush1.bf16.msra.mxu0 %v15809_v16  ;;  %v15835_v16 = vld [vmem:[%s20258_s4 + $0x194] ss:$8 sps:$4 sm:$0xff]  }
 0x442   : > { %9303 = vmatprep.subr.bf16.mxu0 %v15817_v22  ;;  %v15833_v22 = vld [vmem:[%s20258_s4 + $0x190] ss:$8 sps:$4 sm:$0xff]  }
 0x443   : > { %9836 = vmatpush1.bf16.msra.mxu1 %v15689_v42  ;;  %v15703_v42 = vld [vmem:[%s20255_s1 + $0x14f4] ss:$8 sps:$4 sm:$0xff]  }
 0x444   : > { %9837 = vmatprep.subr.bf16.mxu1 %v15694_v23  ;;  %v15701_v23 = vld [vmem:[%s20255_s1 + $0x14f0] ss:$8 sps:$4 sm:$0xff]  }
 0x445   : > { %9304 = vmatpush1.bf16.msra.mxu0 %v15815_v30  ;;  %v15841_v30 = vld [vmem:[%s20258_s4 + $0x1a4] ss:$8 sps:$4 sm:$0xff]  }
 0x446   : > { %9305 = vmatprep.subr.bf16.mxu0 %v15823_v39  ;;  %v15839_v39 = vld [vmem:[%s20258_s4 + $0x1a0] ss:$8 sps:$4 sm:$0xff]  }
 0x447   : > { %9838 = vmatpush1.bf16.msra.mxu1 %v15692_v0  ;;  %v15706_v0 = vld [vmem:[%s20255_s1 + $0x1504] ss:$8 sps:$4 sm:$0xff]  }
 0x448   : > { %9839 = vmatprep.subr.bf16.mxu1 %v15697_v49  ;;  %v15704_v49 = vld [vmem:[%s20255_s1 + $0x1500] ss:$8 sps:$4 sm:$0xff]  }
 0x449   : > { %9306 = vmatpush1.bf16.msra.mxu0 %v15821_v55  ;;  %v15847_v55 = vld [vmem:[%s20258_s4 + $0x1b4] ss:$8 sps:$4 sm:$0xff]  }
 0x44a   : > { %9307 = vmatprep.subr.bf16.mxu0 %v15829_v1  ;;  %v15845_v1 = vld [vmem:[%s20258_s4 + $0x1b0] ss:$8 sps:$4 sm:$0xff]  }
 0x44b   : > { %9840 = vmatpush1.bf16.msra.mxu1 %v15695_v40  ;;  %v15709_v40 = vld [vmem:[%s20255_s1 + $0x1514] ss:$8 sps:$4 sm:$0xff]  }
 0x44c   : > { %9841 = vmatprep.subr.bf16.mxu1 %v15700_v43  ;;  %v15707_v43 = vld [vmem:[%s20255_s1 + $0x1510] ss:$8 sps:$4 sm:$0xff]  }
 0x44d   : > { %9308 = vmatpush1.bf16.msra.mxu0 %v15827_v14  ;;  %v15853_v14 = vld [vmem:[%s20258_s4 + $0x1c4] ss:$8 sps:$4 sm:$0xff]  }
 0x44e   : > { %9309 = vmatprep.subr.bf16.mxu0 %v15835_v16  ;;  %v15851_v16 = vld [vmem:[%s20258_s4 + $0x1c0] ss:$8 sps:$4 sm:$0xff]  }
 0x44f   : > { %9842 = vmatpush1.bf16.msra.mxu1 %v15698_v18  ;;  %v15712_v18 = vld [vmem:[%s20255_s1 + $0x1524] ss:$8 sps:$4 sm:$0xff]  }
 0x450   : > { %9843 = vmatprep.subr.bf16.mxu1 %v15703_v42  ;;  %v15710_v42 = vld [vmem:[%s20255_s1 + $0x1520] ss:$8 sps:$4 sm:$0xff]  }
 0x451   : > { %9310 = vmatpush1.bf16.msra.mxu0 %v15833_v22  ;;  %v15859_v22 = vld [vmem:[%s20258_s4 + $0x1d4] ss:$8 sps:$4 sm:$0xff]  }
 0x452   : > { %9311 = vmatprep.subr.bf16.mxu0 %v15841_v30  ;;  %v15857_v30 = vld [vmem:[%s20258_s4 + $0x1d0] ss:$8 sps:$4 sm:$0xff]  }
 0x453   : > { %9844 = vmatpush1.bf16.msra.mxu1 %v15701_v23  ;;  %v15715_v23 = vld [vmem:[%s20255_s1 + $0x1534] ss:$8 sps:$4 sm:$0xff]  }
 0x454   : > { %9886 = vmatprep.subr.bf16.mxu1 %v15706_v0  ;;  %v15713_v0 = vld [vmem:[%s20255_s1 + $0x1530] ss:$8 sps:$4 sm:$0xff]  }
 0x455   : > { %9312 = vmatpush1.bf16.msra.mxu0 %v15839_v39  ;;  %v15865_v39 = vld [vmem:[%s20258_s4 + $0x1e4] ss:$8 sps:$4 sm:$0xff]  }
 0x456   : > { %9846 = vmatmul.mubr.bf16.vlgmr.msra.gmra.mrb[56].mxu1 %v16982_v51  ;;  %9313 = vmatprep.subr.bf16.mxu0 %v15847_v55  ;;  %v15863_v55 = vld [vmem:[%s20258_s4 + $0x1e0] ss:$8 sps:$4 sm:$0xff]  }
 0x457   : > { %9887 = vmatpush1.bf16.msra.mxu1 %v15704_v49  ;;  %9855 = vmatprep.mubr.bf16.mxu1 %v16986_v53  ;;  %v15718_v49 = vld [vmem:[%s20255_s1 + $0x1544] ss:$8 sps:$4 sm:$0xff]  }
 0x458   : > { %9888 = vmatprep.subr.bf16.mxu1 %v15709_v40  ;;  %v15716_v40 = vld [vmem:[%s20255_s1 + $0x1540] ss:$8 sps:$4 sm:$0xff]  }
 0x459   : > { %9314 = vmatpush1.bf16.msra.mxu0 %v15845_v1  ;;  %v15871_v1 = vld [vmem:[%s20258_s4 + $0x1f4] ss:$8 sps:$4 sm:$0xff]  }
 0x45a   : > { %9315 = vmatprep.subr.bf16.mxu0 %v15853_v14  ;;  %v15869_v14 = vld [vmem:[%s20258_s4 + $0x1f0] ss:$8 sps:$4 sm:$0xff]  }
 0x45b   : > { %9889 = vmatpush1.bf16.msra.mxu1 %v15707_v43  ;;  %v15721_v43 = vld [vmem:[%s20255_s1 + $0x1554] ss:$8 sps:$4 sm:$0xff]  }
 0x45c   : > { %9890 = vmatprep.subr.bf16.mxu1 %v15712_v18  ;;  %v15719_v18 = vld [vmem:[%s20255_s1 + $0x1550] ss:$8 sps:$4 sm:$0xff]  }
 0x45d   : > { %9316 = vmatpush1.bf16.msra.mxu0 %v15851_v16  ;;  %v15731_v16 = vld [vmem:[%s20255_s1 + $0x1590] ss:$8 sps:$4 sm:$0xff]  }
 0x45e   : > { %9856 = vmatmul.mubr.bf16.gmra.mrb[60].mxu1 %v17004_v57  ;;  %9317 = vmatprep.subr.bf16.mxu0 %v15859_v22  ;;  %v15734_v22 = vld [vmem:[%s20255_s1 + $0x15a0] ss:$8 sps:$4 sm:$0xff]  }
 0x45f   : > { %9891 = vmatpush1.bf16.msra.mxu1 %v15710_v42  ;;  %9865 = vmatprep.mubr.bf16.mxu1 %v17008_v58  ;;  %v15724_v42 = vld [vmem:[%s20255_s1 + $0x1564] ss:$8 sps:$4 sm:$0xff]  }
 0x460   : > { %9892 = vmatprep.subr.bf16.mxu1 %v15715_v23  ;;  %v15722_v23 = vld [vmem:[%s20255_s1 + $0x1560] ss:$8 sps:$4 sm:$0xff]  }
 0x461   : > { %9318 = vmatpush1.bf16.msra.mxu0 %v15857_v30  ;;  %v15737_v30 = vld [vmem:[%s20255_s1 + $0x15b0] ss:$8 sps:$4 sm:$0xff]  }
 0x462   : > { %9319 = vmatprep.subr.bf16.mxu0 %v15865_v39  ;;  %v15740_v39 = vld [vmem:[%s20255_s1 + $0x15c0] ss:$8 sps:$4 sm:$0xff]  }
 0x463   : > { %9893 = vmatpush1.bf16.msra.mxu1 %v15713_v0  ;;  %v15727_v0 = vld [vmem:[%s20255_s1 + $0x1574] ss:$8 sps:$4 sm:$0xff]  }
 0x464   : > { %9894 = vmatprep.subr.bf16.mxu1 %v15718_v49  ;;  %v15725_v49 = vld [vmem:[%s20255_s1 + $0x1570] ss:$8 sps:$4 sm:$0xff]  }
 0x465   : > { %9320 = vmatpush1.bf16.msra.mxu0 %v15863_v55  ;;  %v15743_v55 = vld [vmem:[%s20255_s1 + $0x15d0] ss:$8 sps:$4 sm:$0xff]  }
 0x466   : > { %9866 = vmatmul.mubr.bf16.gmra.mrb[64].mxu1 %v17026_v61  ;;  %9321 = vmatprep.subr.bf16.mxu0 %v15871_v1  ;;  %v15746_v1 = vld [vmem:[%s20255_s1 + $0x15e0] ss:$8 sps:$4 sm:$0xff]  }
 0x467   : > { %9895 = vmatpush1.bf16.msra.mxu1 %v15716_v40  ;;  %9875 = vmatprep.mubr.bf16.mxu1 %v17030_v62  ;;  %v15730_v40 = vld [vmem:[%s20255_s1 + $0x1584] ss:$8 sps:$4 sm:$0xff]  }
 0x468   : > { %9896 = vmatprep.subr.bf16.mxu1 %v15721_v43  ;;  %v15728_v43 = vld [vmem:[%s20255_s1 + $0x1580] ss:$8 sps:$4 sm:$0xff]  }
 0x469   : > { %9322 = vmatpush1.bf16.msra.mxu0 %v15869_v14  ;;  %v15749_v14 = vld [vmem:[%s20255_s1 + $0x15f0] ss:$8 sps:$4 sm:$0xff]  }
 0x46b   : > { %9897 = vmatpush1.bf16.msra.mxu1 %v15719_v18  ;;  %v15733_v18 = vld [vmem:[%s20255_s1 + $0x1594] ss:$8 sps:$4 sm:$0xff]  }
 0x46c   : > { %9898 = vmatprep.subr.bf16.mxu1 %v15724_v42  ;;  %v15736_v42 = vld [vmem:[%s20255_s1 + $0x15a4] ss:$8 sps:$4 sm:$0xff]  }
 0x46e   : > { %9876 = vmatmul.mubr.bf16.gmra.mrb[68].mxu1 %v17048_v4 }
 0x46f   : > { %9899 = vmatpush1.bf16.msra.mxu1 %v15722_v23  ;;  %9918 = vmatprep.mubr.bf16.mxu1 %v17052_v5  ;;  %v15739_v23 = vld [vmem:[%s20255_s1 + $0x15b4] ss:$8 sps:$4 sm:$0xff]  }
 0x470   : > { %9900 = vmatprep.subr.bf16.mxu1 %v15727_v0  ;;  %v15742_v0 = vld [vmem:[%s20255_s1 + $0x15c4] ss:$8 sps:$4 sm:$0xff]  }
 0x473   : > { %9901 = vmatpush1.bf16.msra.mxu1 %v15725_v49  ;;  %v15745_v49 = vld [vmem:[%s20255_s1 + $0x15d4] ss:$8 sps:$4 sm:$0xff]  }
 0x474   : > { %9902 = vmatprep.subr.bf16.mxu1 %v15730_v40  ;;  %v15748_v40 = vld [vmem:[%s20255_s1 + $0x15e4] ss:$8 sps:$4 sm:$0xff]  }
 0x477   : > { %9903 = vmatpush1.bf16.msra.mxu1 %v15728_v43  ;;  %v15751_v43 = vld [vmem:[%s20255_s1 + $0x15f4] ss:$8 sps:$4 sm:$0xff]  }
 0x478   : > { %9904 = vmatprep.subr.bf16.mxu1 %v15733_v18  ;;  %v15754_v18 = vld [vmem:[%s20255_s1 + $0x1604] ss:$8 sps:$4 sm:$0xff]  }
 0x47b   : > { %9905 = vmatpush1.bf16.msra.mxu1 %v15731_v16  ;;  %v15752_v16 = vld [vmem:[%s20255_s1 + $0x1600] ss:$8 sps:$4 sm:$0xff]  }
 0x47c   : > { %9906 = vmatprep.subr.bf16.mxu1 %v15736_v42  ;;  %v15757_v42 = vld [vmem:[%s20255_s1 + $0x1614] ss:$8 sps:$4 sm:$0xff]  }
 0x47f   : > { %9907 = vmatpush1.bf16.msra.mxu1 %v15734_v22  ;;  %v15755_v22 = vld [vmem:[%s20255_s1 + $0x1610] ss:$8 sps:$4 sm:$0xff]  }
 0x480   : > { %9908 = vmatprep.subr.bf16.mxu1 %v15739_v23  ;;  %v15760_v23 = vld [vmem:[%s20255_s1 + $0x1624] ss:$8 sps:$4 sm:$0xff]  }
 0x483   : > { %9909 = vmatpush1.bf16.msra.mxu1 %v15737_v30  ;;  %v15758_v30 = vld [vmem:[%s20255_s1 + $0x1620] ss:$8 sps:$4 sm:$0xff]  }
 0x484   : > { %9910 = vmatprep.subr.bf16.mxu1 %v15742_v0  ;;  %v15763_v0 = vld [vmem:[%s20255_s1 + $0x1634] ss:$8 sps:$4 sm:$0xff]  }
 0x487   : > { %9911 = vmatpush1.bf16.msra.mxu1 %v15740_v39  ;;  %v15761_v39 = vld [vmem:[%s20255_s1 + $0x1630] ss:$8 sps:$4 sm:$0xff]  }
 0x488   : > { %9912 = vmatprep.subr.bf16.mxu1 %v15745_v49  ;;  %v15766_v49 = vld [vmem:[%s20255_s1 + $0x1644] ss:$8 sps:$4 sm:$0xff]  }
 0x48b   : > { %9913 = vmatpush1.bf16.msra.mxu1 %v15743_v55  ;;  %v15764_v55 = vld [vmem:[%s20255_s1 + $0x1640] ss:$8 sps:$4 sm:$0xff]  }
 0x48c   : > { %9914 = vmatprep.subr.bf16.mxu1 %v15748_v40  ;;  %v15769_v40 = vld [vmem:[%s20255_s1 + $0x1654] ss:$8 sps:$4 sm:$0xff]  }
 0x48f   : > { %9915 = vmatpush1.bf16.msra.mxu1 %v15746_v1  ;;  %v15767_v1 = vld [vmem:[%s20255_s1 + $0x1650] ss:$8 sps:$4 sm:$0xff]  }
 0x490   : > { %9916 = vmatprep.subr.bf16.mxu1 %v15751_v43  ;;  %v15772_v43 = vld [vmem:[%s20255_s1 + $0x1664] ss:$8 sps:$4 sm:$0xff]  }
 0x493   : > { %9917 = vmatpush1.bf16.msra.mxu1 %v15749_v14  ;;  %v15770_v14 = vld [vmem:[%s20255_s1 + $0x1660] ss:$8 sps:$4 sm:$0xff]  }
 0x494   : > { %10820 = vmatprep.subr.bf16.mxu1 %v15754_v18  ;;  %v15775_v18 = vld [vmem:[%s20255_s1 + $0x1674] ss:$8 sps:$4 sm:$0xff]  }
 0x496   : > { %9919 = vmatmul.mubr.bf16.vlgmr.msra.gmra.mrb[56].mxu1 %v17118_v33 }
 0x497   : > { %10821 = vmatpush1.bf16.msra.mxu1 %v15752_v16  ;;  %9928 = vmatprep.mubr.bf16.mxu1 %v17122_v34  ;;  %v15898_v16 = vld [vmem:[%s20258_s4 + $0x204] ss:$8 sps:$4 sm:$0xff]  }
 0x498   : > { %10822 = vmatprep.subr.bf16.mxu1 %v15757_v42  ;;  %v15773_v42 = vld [vmem:[%s20255_s1 + $0x1670] ss:$8 sps:$4 sm:$0xff]   ;;  %10298 = vmatprep.subr.bf16.mxu0 %v15898_v16  ;;  %v15812_v16 = vld [vmem:[%s20255_s1 + $0x16e0] ss:$8 sps:$4 sm:$0xff]  }
 0x49b   : > { %10823 = vmatpush1.bf16.msra.mxu1 %v15755_v22  ;;  %v15778_v22 = vld [vmem:[%s20255_s1 + $0x1684] ss:$8 sps:$4 sm:$0xff]  }
 0x49c   : > { %10824 = vmatprep.subr.bf16.mxu1 %v15760_v23  ;;  %v15776_v23 = vld [vmem:[%s20255_s1 + $0x1680] ss:$8 sps:$4 sm:$0xff]  }
 0x49e   : > { %9929 = vmatmul.mubr.bf16.gmra.mrb[60].mxu1 %v17140_v38 }
 0x49f   : > { %10825 = vmatpush1.bf16.msra.mxu1 %v15758_v30  ;;  %9938 = vmatprep.mubr.bf16.mxu1 %v17144_v41  ;;  %v15784_v30 = vld [vmem:[%s20255_s1 + $0x1694] ss:$8 sps:$4 sm:$0xff]  }
 0x4a0   : > { %10826 = vmatprep.subr.bf16.mxu1 %v15763_v0  ;;  %v15790_v0 = vld [vmem:[%s20255_s1 + $0x16a4] ss:$8 sps:$4 sm:$0xff]  }
 0x4a3   : > { %10827 = vmatpush1.bf16.msra.mxu1 %v15761_v39  ;;  %v15788_v39 = vld [vmem:[%s20255_s1 + $0x16a0] ss:$8 sps:$4 sm:$0xff]  }
 0x4a4   : > { %10828 = vmatprep.subr.bf16.mxu1 %v15766_v49  ;;  %v15796_v49 = vld [vmem:[%s20255_s1 + $0x16b4] ss:$8 sps:$4 sm:$0xff]  }
 0x4a6   : > { %9939 = vmatmul.mubr.bf16.gmra.mrb[64].mxu1 %v17166_v50 }
 0x4a7   : > { %10829 = vmatpush1.bf16.msra.mxu1 %v15764_v55  ;;  %9948 = vmatprep.mubr.bf16.mxu1 %v17170_v54  ;;  %v15794_v55 = vld [vmem:[%s20255_s1 + $0x16b0] ss:$8 sps:$4 sm:$0xff]  }
 0x4a8   : > { %10830 = vmatprep.subr.bf16.mxu1 %v15769_v40  ;;  %v15802_v40 = vld [vmem:[%s20255_s1 + $0x16c4] ss:$8 sps:$4 sm:$0xff]  }
 0x4ab   : > { %10831 = vmatpush1.bf16.msra.mxu1 %v15767_v1  ;;  %v15800_v1 = vld [vmem:[%s20255_s1 + $0x16c0] ss:$8 sps:$4 sm:$0xff]  }
 0x4ac   : > { %10832 = vmatprep.subr.bf16.mxu1 %v15772_v43  ;;  %v15808_v43 = vld [vmem:[%s20255_s1 + $0x16d4] ss:$8 sps:$4 sm:$0xff]  }
 0x4ae   : > { %9949 = vmatmul.mubr.bf16.gmra.mrb[68].mxu1 %v17196_v2 }
 0x4af   : > { %10833 = vmatpush1.bf16.msra.mxu1 %v15770_v14  ;;  %10852 = vmatprep.mubr.bf16.mxu1 %v16896_v10  ;;  %v15782_v10 = vld [vmem:[%s20255_s1 + $0x1690] ss:$8 sps:$4 sm:$0xff]  }
 0x4b0   : > { %10834 = vmatprep.subr.bf16.mxu1 %v15775_v18  ;;  %v15806_v14 = vld [vmem:[%s20255_s1 + $0x16d0] ss:$8 sps:$4 sm:$0xff]   ;;  %v15814_v18 = vld [vmem:[%s20255_s1 + $0x16e4] ss:$8 sps:$4 sm:$0xff]  }
 0x4b3   : > { %10835 = vmatpush1.bf16.msra.mxu1 %v15773_v42  ;;  %v15820_v42 = vld [vmem:[%s20255_s1 + $0x16f4] ss:$8 sps:$4 sm:$0xff]  }
 0x4b4   : > { %10836 = vmatprep.subr.bf16.mxu1 %v15778_v22  ;;  %v15818_v22 = vld [vmem:[%s20255_s1 + $0x16f0] ss:$8 sps:$4 sm:$0xff]  }
 0x4b7   : > { %10837 = vmatpush1.bf16.msra.mxu1 %v15776_v23  ;;  %v15826_v23 = vld [vmem:[%s20255_s1 + $0x1704] ss:$8 sps:$4 sm:$0xff]  }
 0x4b8   : > { %10838 = vmatprep.subr.bf16.mxu1 %v15784_v30  ;;  %v15824_v30 = vld [vmem:[%s20255_s1 + $0x1700] ss:$8 sps:$4 sm:$0xff]  }
 0x4bb   : > { %10839 = vmatpush1.bf16.msra.mxu1 %v15782_v10  ;;  %v15832_v10 = vld [vmem:[%s20255_s1 + $0x1714] ss:$8 sps:$4 sm:$0xff]  }
 0x4bc   : > { %10840 = vmatprep.subr.bf16.mxu1 %v15790_v0  ;;  %v15830_v0 = vld [vmem:[%s20255_s1 + $0x1710] ss:$8 sps:$4 sm:$0xff]  }
 0x4bf   : > { %10841 = vmatpush1.bf16.msra.mxu1 %v15788_v39  ;;  %v15838_v39 = vld [vmem:[%s20255_s1 + $0x1724] ss:$8 sps:$4 sm:$0xff]  }
 0x4c0   : > { %10842 = vmatprep.subr.bf16.mxu1 %v15796_v49  ;;  %v15836_v49 = vld [vmem:[%s20255_s1 + $0x1720] ss:$8 sps:$4 sm:$0xff]  }
 0x4c3   : > { %10843 = vmatpush1.bf16.msra.mxu1 %v15794_v55  ;;  %v15850_v55 = vld [vmem:[%s20255_s1 + $0x1744] ss:$8 sps:$4 sm:$0xff]  }
 0x4c4   : > { %10844 = vmatprep.subr.bf16.mxu1 %v15802_v40  ;;  %v15848_v40 = vld [vmem:[%s20255_s1 + $0x1740] ss:$8 sps:$4 sm:$0xff]  }
 0x4c7   : > { %10845 = vmatpush1.bf16.msra.mxu1 %v15800_v1  ;;  %v13521_v1 = vld [vmem:[%s20256_s2 + $0x2] sm:$0x3] }
 0x4c8   : > { %10846 = vmatprep.subr.bf16.mxu1 %v15808_v43  ;;  %v15854_v43 = vld [vmem:[%s20255_s1 + $0x1750] ss:$8 sps:$4 sm:$0xff]  }
 0x4cb   : > { %10847 = vmatpush1.bf16.msra.mxu1 %v15806_v14  ;;  %v19703_v14 = vrot.slane %v13521_v1, %v17225_v13 }
 0x4cc   : > { %10848 = vmatprep.subr.bf16.mxu1 %v15814_v18  ;;  %v15862_v18 = vld [vmem:[%s20255_s1 + $0x1764] ss:$8 sps:$4 sm:$0xff]  }
 0x4cf   : > { %10849 = vmatpush1.bf16.msra.mxu1 %v15812_v16  ;;  %v19709_v16 = vrot.slane %v13521_v1, %v17230_v17  ;;  %v15866_v1 = vld [vmem:[%s20255_s1 + $0x1770] ss:$8 sps:$4 sm:$0xff]  }
 0x4d0   : > { %10850 = vmatprep.subr.bf16.mxu1 %v15820_v42 }
 0x4d3   : > { %10851 = vmatpush1.bf16.msra.mxu1 %v15818_v22 }
 0x4d4   : > { %10893 = vmatprep.subr.bf16.mxu1 %v15826_v23 }
 0x4d6   : > { %10853 = vmatmul.mubr.bf16.vlgmr.msra.gmra.mrb[72].mxu1 %v16982_v51  ;;  %v15844_v51 = vld [vmem:[%s20255_s1 + $0x1734] ss:$8 sps:$4 sm:$0xff]  }
 0x4d7   : > { %10894 = vmatpush1.bf16.msra.mxu1 %v15824_v30  ;;  %10862 = vmatprep.mubr.bf16.mxu1 %v16986_v53  ;;  %v15842_v53 = vld [vmem:[%s20255_s1 + $0x1730] ss:$8 sps:$4 sm:$0xff]  }
 0x4d8   : > { %10895 = vmatprep.subr.bf16.mxu1 %v15832_v10 }
 0x4db   : > { %10896 = vmatpush1.bf16.msra.mxu1 %v15830_v0  ;;  %v15860_v0 = vld [vmem:[%s20255_s1 + $0x1760] ss:$8 sps:$4 sm:$0xff]  }
 0x4dc   : > { %10897 = vmatprep.subr.bf16.mxu1 %v15838_v39 }
 0x4de   : > { %10863 = vmatmul.mubr.bf16.gmra.mrb[76].mxu1 %v17004_v57  ;;  %v15856_v57 = vld [vmem:[%s20255_s1 + $0x1754] ss:$8 sps:$4 sm:$0xff]  }
 0x4df   : > { %10898 = vmatpush1.bf16.msra.mxu1 %v15836_v49  ;;  %10872 = vmatprep.mubr.bf16.mxu1 %v17008_v58  ;;  %v13522_v58 = vld [vmem:[%s20257_s3 + $0x2] sm:$0x3] }
 0x4e0   : > { %10899 = vmatprep.subr.bf16.mxu1 %v15844_v51  ;;  %v19713_v22 = vrot.slane %v13522_v58, %v17225_v13  ;;  %v19717_v30 = vrot.slane %v13522_v58, %v17230_v17  ;;  %v15868_v51 = vld [vmem:[%s20255_s1 + $0x1774] ss:$8 sps:$4 sm:$0xff]  }
 0x4e3   : > { %10900 = vmatpush1.bf16.msra.mxu1 %v15842_v53 }
 0x4e4   : > { %10901 = vmatprep.subr.bf16.mxu1 %v15850_v55 }
 0x4e6   : > { %10873 = vmatmul.mubr.bf16.gmra.mrb[80].mxu1 %v17026_v61 }
 0x4e7   : > { %10902 = vmatpush1.bf16.msra.mxu1 %v15848_v40  ;;  %10882 = vmatprep.mubr.bf16.mxu1 %v17030_v62 }
 0x4e8   : > { %10903 = vmatprep.subr.bf16.mxu1 %v15856_v57 }
 0x4e9   : > { %v4597_v61 = vpop.f32.mrb[40].mxu1 }
 0x4ea   : > { %v14067_v42 = vadd.f32 %v19215_v44, %v4597_v61  ;;  %v4599_v23 = vpop.f32.mrb[41].mxu1 }
 0x4eb   : > { %v14068_v62 = vadd.f32 %v19217_v48, %v4599_v23  ;;  %v4601_v10 = vpop.f32.mrb[42].mxu1  ;;  %10904 = vmatpush1.bf16.msra.mxu1 %v15854_v43 }
 0x4ec   : > { %v9013_v39 = vmul.f32 %v14067_v42, %v19703_v14  ;;  %v14069_v49 = vadd.f32 %v19219_v3, %v4601_v10  ;;  %v4603_v44 = vpop.f32.mrb[43].mxu1  ;;  %10905 = vmatprep.subr.bf16.mxu1 %v15862_v18 }
 0x4ed   : > { %v9014_v48 = vmul.f32 %v14068_v62, %v19709_v16  ;;  %v14070_v53 = vadd.f32 %v19224_v9, %v4603_v44  ;;  %v15874_v9 = vld [vmem:[%s20255_s1 + $0x1784] ss:$8 sps:$4 sm:$0xff]  }
 0x4ee   : > { %v9042_v55 = vadd.f32 %v19713_v22, %v9013_v39  ;;  %v9015_v40 = vmul.f32 %v14069_v49, %v19703_v14  ;;  %10883 = vmatmul.mubr.bf16.gmra.mrb[84].mxu1 %v17048_v4  ;;  %v15872_v39 = vld [vmem:[%s20255_s1 + $0x1780] ss:$8 sps:$4 sm:$0xff]  }
 0x4ef   : > { %v9043_v57 = vadd.f32 %v19717_v30, %v9014_v48  ;;  %v9016_v3 = vmul.f32 %v14070_v53, %v19709_v16  ;;  %10906 = vmatpush1.bf16.msra.mxu1 %v15860_v0  ;;  %10925 = vmatprep.mubr.bf16.mxu1 %v17052_v5 }
 0x4f0   : > { %v9044_v58 = vadd.f32 %v19713_v22, %v9015_v40  ;;  %10907 = vmatprep.subr.bf16.mxu1 %v15868_v51  ;;  %v9058_v18 = vmax.f32 %v9042_v55, 0.0  ;;  %v15896_v40 = vld [vmem:[%s20258_s4 + $0x200] ss:$8 sps:$4 sm:$0xff]  }
 0x4f1   : > { %v9045_v4 = vadd.f32 %v19717_v30, %v9016_v3  ;;  %v4607_v43 = vpop.f32.mrb[44].mxu1  ;;  %v9059_v62 = vmax.f32 %v9043_v57, 0.0 }
 0x4f2   : > { %v9060_v61 = vmax.f32 %v9044_v58, 0.0  ;;  %v14071_v42 = vadd.f32 %v19243_v26, %v4607_v43  ;;  %v4609_v23 = vpop.f32.mrb[45].mxu1  ;;  %v15877_v26 = vld [vmem:[%s20255_s1 + $0x1794] ss:$8 sps:$4 sm:$0xff]  }
 0x4f3   : > { %v9061_v10 = vmax.f32 %v9045_v4, 0.0  ;;  %v14072_v0 = vadd.f32 %v19245_v45, %v4609_v23  ;;  %v4611_v5 = vpop.f32.mrb[46].mxu1  ;;  %10908 = vmatpush1.bf16.msra.mxu1 %v15866_v1  ;;  %v15880_v4 = vld [vmem:[%s20255_s1 + $0x17a4] ss:$8 sps:$4 sm:$0xff]  }
 0x4f4   : > { %v9090_v49 = vpack.c.bf16 %v9060_v61, %v9058_v18  ;;  %v9017_v44 = vmul.f32 %v14071_v42, %v19703_v14  ;;  %v14073_v51 = vadd.f32 %v19247_v21, %v4611_v5  ;;  %v4613_v48 = vpop.f32.mrb[47].mxu1  ;;  %10909 = vmatprep.subr.bf16.mxu1 %v15874_v9  ;;  %v15901_v21 = vld [vmem:[%s20258_s4 + $0x214] ss:$8 sps:$4 sm:$0xff]   ;;  %v15899_v61 = vld [vmem:[%s20258_s4 + $0x210] ss:$8 sps:$4 sm:$0xff]  }
 0x4f5   : > { %v9018_v53 = vmul.f32 %v14072_v0, %v19709_v16  ;;  %v14074_v45 = vadd.f32 %v19252_v29, %v4613_v48  ;;  %v9091_v55 = vpack.c.bf16 %v9061_v10, %v9059_v62  ;;  %v15875_v29 = vld [vmem:[%s20255_s1 + $0x1790] ss:$8 sps:$4 sm:$0xff]   ;;  %v15904_v0 = vld [vmem:[%s20258_s4 + $0x224] ss:$8 sps:$4 sm:$0xff]  }
 0x4f6   : > { %v9046_v57 = vadd.f32 %v19713_v22, %v9017_v44  ;;  %v9019_v3 = vmul.f32 %v14073_v51, %v19703_v14  ;;  %v15878_v51 = vld [vmem:[%s20255_s1 + $0x17a0] ss:$8 sps:$4 sm:$0xff]  }
 0x4f7   : > { %v9047_v1 = vadd.f32 %v19717_v30, %v9018_v53  ;;  %v9020_v58 = vmul.f32 %v14074_v45, %v19709_v16  ;;  %9323 = vmatprep.mubr.bf16.mxu0 %v9091_v55  ;;  %10910 = vmatpush1.bf16.msra.mxu1 %v15872_v39  ;;  %v15883_v45 = vld [vmem:[%s20255_s1 + $0x17b4] ss:$8 sps:$4 sm:$0xff]  }
 0x4f8   : > { %v9048_v9 = vadd.f32 %v19713_v22, %v9019_v3  ;;  %9324 = vmatmul.mubr.bf16.vlgmr.msra.gmra.mrb[16].mxu0 %v9090_v49  ;;  %10911 = vmatprep.subr.bf16.mxu1 %v15877_v26  ;;  %v9062_v42 = vmax.f32 %v9046_v57, 0.0  ;;  %v15902_v57 = vld [vmem:[%s20258_s4 + $0x220] ss:$8 sps:$4 sm:$0xff]  }
 0x4f9   : > { %v9049_v43 = vadd.f32 %v19717_v30, %v9020_v58  ;;  %v4617_v18 = vpop.f32.mrb[48].mxu1  ;;  %10299 = vmatpush1.bf16.msra.mxu0 %v15896_v40  ;;  %v9063_v5 = vmax.f32 %v9047_v1, 0.0 }
 0x4fa   : > { %v9064_v23 = vmax.f32 %v9048_v9, 0.0  ;;  %v14075_v62 = vadd.f32 %v19267_v7, %v4617_v18  ;;  %v4619_v10 = vpop.f32.mrb[49].mxu1  ;;  %10300 = vmatprep.subr.bf16.mxu0 %v15901_v21  ;;  %v15907_v21 = vld [vmem:[%s20258_s4 + $0x234] ss:$8 sps:$4 sm:$0xff]   ;;  %v15886_v9 = vld [vmem:[%s20255_s1 + $0x17c4] ss:$8 sps:$4 sm:$0xff]  }
 0x4fb   : > { %v9065_v39 = vmax.f32 %v9049_v43, 0.0  ;;  %v14076_v49 = vadd.f32 %v19269_v59, %v4619_v10  ;;  %v4621_v44 = vpop.f32.mrb[50].mxu1  ;;  %10912 = vmatpush1.bf16.msra.mxu1 %v15875_v29  ;;  %v15905_v18 = vld [vmem:[%s20258_s4 + $0x230] ss:$8 sps:$4 sm:$0xff]   ;;  %v15910_v10 = vld [vmem:[%s20258_s4 + $0x244] ss:$8 sps:$4 sm:$0xff]  }
 0x4fc   : > { %v9021_v48 = vmul.f32 %v14075_v62, %v19703_v14  ;;  %v14077_v7 = vadd.f32 %v19271_v60, %v4621_v44  ;;  %v4623_v26 = vpop.f32.mrb[51].mxu1  ;;  %10913 = vmatprep.subr.bf16.mxu1 %v15880_v4  ;;  %v9092_v53 = vpack.c.bf16 %v9064_v23, %v9062_v42  ;;  %v15884_v44 = vld [vmem:[%s20255_s1 + $0x17c0] ss:$8 sps:$4 sm:$0xff]  }
 0x4fd   : > { %v9022_v55 = vmul.f32 %v14076_v49, %v19709_v16  ;;  %v14078_v59 = vadd.f32 %v19276_v56, %v4623_v26  ;;  %v9093_v40 = vpack.c.bf16 %v9065_v39, %v9063_v5  ;;  %10301 = vmatpush1.bf16.msra.mxu0 %v15899_v61  ;;  %v15881_v56 = vld [vmem:[%s20255_s1 + $0x17b0] ss:$8 sps:$4 sm:$0xff]   ;;  %v15889_v26 = vld [vmem:[%s20255_s1 + $0x17d4] ss:$8 sps:$4 sm:$0xff]  }
 0x4fe   : > { %v9050_v3 = vadd.f32 %v19713_v22, %v9021_v48  ;;  %v9023_v60 = vmul.f32 %v14077_v7, %v19703_v14  ;;  %10302 = vmatprep.subr.bf16.mxu0 %v15904_v0 }
 0x4ff   : > { %v9051_v1 = vadd.f32 %v19717_v30, %v9022_v55  ;;  %v9024_v58 = vmul.f32 %v14078_v59, %v19709_v16  ;;  %9333 = vmatprep.mubr.bf16.mxu0 %v9093_v40  ;;  %10914 = vmatpush1.bf16.msra.mxu1 %v15878_v51  ;;  %v15908_v55 = vld [vmem:[%s20258_s4 + $0x240] ss:$8 sps:$4 sm:$0xff]   ;;  %v15913_v40 = vld [vmem:[%s20258_s4 + $0x254] ss:$8 sps:$4 sm:$0xff]  }
 0x500   : > { %v9052_v29 = vadd.f32 %v19713_v22, %v9023_v60  ;;  %9334 = vmatmul.mubr.bf16.gmra.mrb[20].mxu0 %v9092_v53  ;;  %10915 = vmatprep.subr.bf16.mxu1 %v15883_v45  ;;  %v9066_v61 = vmax.f32 %v9050_v3, 0.0 }
 0x501   : > { %v9053_v4 = vadd.f32 %v19717_v30, %v9024_v58  ;;  %v4627_v43 = vpop.f32.mrb[52].mxu1  ;;  %10303 = vmatpush1.bf16.msra.mxu0 %v15902_v57  ;;  %v9067_v0 = vmax.f32 %v9051_v1, 0.0 }
 0x502   : > { %v9068_v42 = vmax.f32 %v9052_v29, 0.0  ;;  %v14079_v23 = vadd.f32 %v19287_v27, %v4627_v43  ;;  %v4629_v62 = vpop.f32.mrb[53].mxu1  ;;  %10304 = vmatprep.subr.bf16.mxu0 %v15907_v21 }
 0x503   : > { %v9069_v5 = vmax.f32 %v9053_v4, 0.0  ;;  %v14080_v39 = vadd.f32 %v19289_v31, %v4629_v62  ;;  %v4631_v49 = vpop.f32.mrb[54].mxu1  ;;  %10916 = vmatpush1.bf16.msra.mxu1 %v15881_v56  ;;  %v15895_v4 = vld [vmem:[%s20255_s1 + $0x17f4] ss:$8 sps:$4 sm:$0xff]   ;;  %v15922_v62 = vld [vmem:[%s20258_s4 + $0x284] ss:$8 sps:$4 sm:$0xff]  }
 0x504   : > { %v9025_v51 = vmul.f32 %v14079_v23, %v19703_v14  ;;  %v14081_v27 = vadd.f32 %v19291_v37, %v4631_v49  ;;  %v4633_v48 = vpop.f32.mrb[55].mxu1  ;;  %10917 = vmatprep.subr.bf16.mxu1 %v15886_v9  ;;  %v9094_v7 = vpack.c.bf16 %v9068_v42, %v9066_v61  ;;  %v15890_v9 = vld [vmem:[%s20255_s1 + $0x17e0] ss:$8 sps:$4 sm:$0xff]   ;;  %v15919_v61 = vld [vmem:[%s20258_s4 + $0x274] ss:$8 sps:$4 sm:$0xff]  }
 0x505   : > { %v9026_v53 = vmul.f32 %v14080_v39, %v19709_v16  ;;  %v14082_v31 = vadd.f32 %v19296_v32, %v4633_v48  ;;  %v9095_v45 = vpack.c.bf16 %v9069_v5, %v9067_v0  ;;  %10305 = vmatpush1.bf16.msra.mxu0 %v15905_v18  ;;  %v15887_v32 = vld [vmem:[%s20255_s1 + $0x17d0] ss:$8 sps:$4 sm:$0xff]   ;;  %v15914_v18 = vld [vmem:[%s20258_s4 + $0x260] ss:$8 sps:$4 sm:$0xff]   ;;  %v15925_v0 = vld [vmem:[%s20258_s4 + $0x294] ss:$8 sps:$4 sm:$0xff]  }
 0x506   : > { %v9054_v59 = vadd.f32 %v19713_v22, %v9025_v51  ;;  %v9027_v37 = vmul.f32 %v14081_v27, %v19703_v14  ;;  %10306 = vmatprep.subr.bf16.mxu0 %v15910_v10  ;;  %v15892_v14 = vld [vmem:[%s20255_s1 + $0x17e4] ss:$8 sps:$4 sm:$0xff]   ;;  %v15893_v42 = vld [vmem:[%s20255_s1 + $0x17f0] ss:$8 sps:$4 sm:$0xff]   ;;  %v15920_v10 = vld [vmem:[%s20258_s4 + $0x280] ss:$8 sps:$4 sm:$0xff]  }
 0x507   : > { %v9055_v57 = vadd.f32 %v19717_v30, %v9026_v53  ;;  %v9028_v3 = vmul.f32 %v14082_v31, %v19709_v16  ;;  %9343 = vmatprep.mubr.bf16.mxu0 %v9095_v45  ;;  %10918 = vmatpush1.bf16.msra.mxu1 %v15884_v44  ;;  %v15911_v16 = vld [vmem:[%s20258_s4 + $0x250] ss:$8 sps:$4 sm:$0xff]   ;;  %v15928_v39 = vld [vmem:[%s20258_s4 + $0x2a4] ss:$8 sps:$4 sm:$0xff]  }
 0x508   : > { %v9056_v60 = vadd.f32 %v19713_v22, %v9027_v37  ;;  %9344 = vmatmul.mubr.bf16.gmra.mrb[24].mxu0 %v9094_v7  ;;  %10919 = vmatprep.subr.bf16.mxu1 %v15889_v26  ;;  %v9070_v1 = vmax.f32 %v9054_v59, 0.0  ;;  %v15916_v22 = vld [vmem:[%s20258_s4 + $0x264] ss:$8 sps:$4 sm:$0xff]   ;;  %v15917_v23 = vld [vmem:[%s20258_s4 + $0x270] ss:$8 sps:$4 sm:$0xff]  }
 0x509   : > { %v9057_v21 = vadd.f32 %v19717_v30, %v9028_v3  ;;  %10307 = vmatpush1.bf16.msra.mxu0 %v15908_v55  ;;  %v9071_v56 = vmax.f32 %v9055_v57, 0.0  ;;  %v15923_v5 = vld [vmem:[%s20258_s4 + $0x290] ss:$8 sps:$4 sm:$0xff]   ;;  %v15934_v44 = vld [vmem:[%s20258_s4 + $0x2c4] ss:$8 sps:$4 sm:$0xff]  }
 0x50a   : > { %v9072_v58 = vmax.f32 %v9056_v60, 0.0  ;;  %10308 = vmatprep.subr.bf16.mxu0 %v15913_v40  ;;  %v15929_v49 = vld [vmem:[%s20258_s4 + $0x2b0] ss:$8 sps:$4 sm:$0xff]   ;;  %v15940_v27 = vld [vmem:[%s20258_s4 + $0x2e4] ss:$8 sps:$4 sm:$0xff]  }
 0x50b   : > { %v9073_v29 = vmax.f32 %v9057_v21, 0.0  ;;  %10920 = vmatpush1.bf16.msra.mxu1 %v15887_v32  ;;  %v15935_v51 = vld [vmem:[%s20258_s4 + $0x2d0] ss:$8 sps:$4 sm:$0xff]   ;;  %v15946_v7 = vld [vmem:[%s20258_s4 + $0x304] ss:$8 sps:$4 sm:$0xff]  }
 0x50c   : > { %10921 = vmatprep.subr.bf16.mxu1 %v15892_v14  ;;  %v9096_v30 = vpack.c.bf16 %v9072_v58, %v9070_v1  ;;  %v15941_v48 = vld [vmem:[%s20258_s4 + $0x2f0] ss:$8 sps:$4 sm:$0xff]   ;;  %v13716_v26 = vld [vmem:[%s20257_s3 + $0x4] sm:$0x3] }
 0x50d   : > { %v9097_v43 = vpack.c.bf16 %v9073_v29, %v9071_v56  ;;  %10309 = vmatpush1.bf16.msra.mxu0 %v15911_v16  ;;  %v19940_v45 = vrot.slane %v13716_v26, %v17225_v13  ;;  %v19943_v59 = vrot.slane %v13716_v26, %v17230_v17 }
 0x50e   : > { %10310 = vmatprep.subr.bf16.mxu0 %v15916_v22 }
 0x50f   : > { %9353 = vmatprep.mubr.bf16.mxu0 %v9097_v43  ;;  %10922 = vmatpush1.bf16.msra.mxu1 %v15890_v9 }
 0x510   : > { %9354 = vmatmul.mubr.bf16.gmra.mrb[28].mxu0 %v9096_v30  ;;  %10923 = vmatprep.subr.bf16.mxu1 %v15895_v4 }
 0x511   : > { %10311 = vmatpush1.bf16.msra.mxu0 %v15914_v18 }
 0x512   : > { %10312 = vmatprep.subr.bf16.mxu0 %v15919_v61 }
 0x513   : > { %10924 = vmatpush1.bf16.msra.mxu1 %v15893_v42 }
 0x515   : > { %10313 = vmatpush1.bf16.msra.mxu0 %v15917_v23 }
 0x516   : > { %10926 = vmatmul.mubr.bf16.vlgmr.msra.gmra.mrb[72].mxu1 %v17118_v33  ;;  %10314 = vmatprep.subr.bf16.mxu0 %v15922_v62  ;;  %v15926_v33 = vld [vmem:[%s20258_s4 + $0x2a0] ss:$8 sps:$4 sm:$0xff]  }
 0x517   : > { %10935 = vmatprep.mubr.bf16.mxu1 %v17122_v34  ;;  %v15931_v34 = vld [vmem:[%s20258_s4 + $0x2b4] ss:$8 sps:$4 sm:$0xff]   ;;  %v15944_v62 = vld [vmem:[%s20258_s4 + $0x300] ss:$8 sps:$4 sm:$0xff]  }
 0x519   : > { %10315 = vmatpush1.bf16.msra.mxu0 %v15920_v10 }
 0x51a   : > { %10316 = vmatprep.subr.bf16.mxu0 %v15925_v0 }
 0x51d   : > { %10317 = vmatpush1.bf16.msra.mxu0 %v15923_v5 }
 0x51e   : > { %10936 = vmatmul.mubr.bf16.gmra.mrb[76].mxu1 %v17140_v38  ;;  %10318 = vmatprep.subr.bf16.mxu0 %v15928_v39  ;;  %v15932_v38 = vld [vmem:[%s20258_s4 + $0x2c0] ss:$8 sps:$4 sm:$0xff]   ;;  %v15949_v39 = vld [vmem:[%s20258_s4 + $0x314] ss:$8 sps:$4 sm:$0xff]  }
 0x51f   : > { %10945 = vmatprep.mubr.bf16.mxu1 %v17144_v41  ;;  %v15937_v41 = vld [vmem:[%s20258_s4 + $0x2d4] ss:$8 sps:$4 sm:$0xff]  }
 0x521   : > { %10319 = vmatpush1.bf16.msra.mxu0 %v15926_v33 }
 0x522   : > { %10320 = vmatprep.subr.bf16.mxu0 %v15931_v34 }
 0x525   : > { %10321 = vmatpush1.bf16.msra.mxu0 %v15929_v49 }
 0x526   : > { %10946 = vmatmul.mubr.bf16.gmra.mrb[80].mxu1 %v17166_v50  ;;  %10322 = vmatprep.subr.bf16.mxu0 %v15934_v44  ;;  %v15938_v50 = vld [vmem:[%s20258_s4 + $0x2e0] ss:$8 sps:$4 sm:$0xff]  }
 0x527   : > { %10955 = vmatprep.mubr.bf16.mxu1 %v17170_v54  ;;  %v15943_v54 = vld [vmem:[%s20258_s4 + $0x2f4] ss:$8 sps:$4 sm:$0xff]  }
 0x529   : > { %10323 = vmatpush1.bf16.msra.mxu0 %v15932_v38  ;;  %v15947_v38 = vld [vmem:[%s20258_s4 + $0x310] ss:$8 sps:$4 sm:$0xff]  }
 0x52a   : > { %10324 = vmatprep.subr.bf16.mxu0 %v15937_v41 }
 0x52d   : > { %10325 = vmatpush1.bf16.msra.mxu0 %v15935_v51 }
 0x52e   : > { %10956 = vmatmul.mubr.bf16.gmra.mrb[84].mxu1 %v17196_v2  ;;  %10326 = vmatprep.subr.bf16.mxu0 %v15940_v27  ;;  %v13715_v2 = vld [vmem:[%s20256_s2 + $0x4] sm:$0x3] }
 0x52f   : > { %v19934_v53 = vrot.slane %v13715_v2, %v17225_v13  ;;  %v19937_v31 = vrot.slane %v13715_v2, %v17230_v17  ;;  %v15952_v27 = vld [vmem:[%s20258_s4 + $0x324] ss:$8 sps:$4 sm:$0xff]  }
 0x531   : > { %10327 = vmatpush1.bf16.msra.mxu0 %v15938_v50 }
 0x532   : > { %10328 = vmatprep.subr.bf16.mxu0 %v15943_v54 }
 0x535   : > { %10329 = vmatpush1.bf16.msra.mxu0 %v15941_v48 }
 0x536   : > { %11305 = vmatprep.subr.bf16.mxu0 %v15946_v7 }
 0x569   : > { %v9920_v55 = vpop.f32.mrb[56].mxu1 }
 0x56a   : > { %v10020_v37 = vmul.f32 %v19934_v53, %v9920_v55  ;;  %v9922_v40 = vpop.f32.mrb[57].mxu1 }
 0x56b   : > { %v10021_v57 = vmul.f32 %v19937_v31, %v9922_v40  ;;  %v9924_v3 = vpop.f32.mrb[58].mxu1 }
 0x56c   : > { %v10049_v32 = vadd.f32 %v19940_v45, %v10020_v37  ;;  %v10022_v60 = vmul.f32 %v19934_v53, %v9924_v3  ;;  %v9926_v14 = vpop.f32.mrb[59].mxu1 }
 0x56d   : > { %v10050_v21 = vadd.f32 %v19943_v59, %v10021_v57  ;;  %v10023_v16 = vmul.f32 %v19937_v31, %v9926_v14  ;;  %v15950_v57 = vld [vmem:[%s20258_s4 + $0x320] ss:$8 sps:$4 sm:$0xff]   ;;  %v15955_v14 = vld [vmem:[%s20258_s4 + $0x334] ss:$8 sps:$4 sm:$0xff]  }
 0x56e   : > { %v10051_v1 = vadd.f32 %v19940_v45, %v10022_v60  ;;  %v10065_v22 = vmax.f32 %v10049_v32, 0.0 }
 0x56f   : > { %v10052_v58 = vadd.f32 %v19943_v59, %v10023_v16  ;;  %v10066_v29 = vmax.f32 %v10050_v21, 0.0 }
 0x570   : > { %v10067_v56 = vmax.f32 %v10051_v1, 0.0 }
 0x571   : > { %v10068_v9 = vmax.f32 %v10052_v58, 0.0  ;;  %v9930_v30 = vpop.f32.mrb[60].mxu1 }
 0x572   : > { %v10097_v4 = vpack.c.bf16 %v10067_v56, %v10065_v22  ;;  %v10024_v43 = vmul.f32 %v19934_v53, %v9930_v30  ;;  %v9932_v18 = vpop.f32.mrb[61].mxu1  ;;  %v15953_v22 = vld [vmem:[%s20258_s4 + $0x330] ss:$8 sps:$4 sm:$0xff]  }
 0x573   : > { %v10025_v61 = vmul.f32 %v19937_v31, %v9932_v18  ;;  %v9934_v42 = vpop.f32.mrb[62].mxu1  ;;  %v10098_v23 = vpack.c.bf16 %v10068_v9, %v10066_v29  ;;  %v15958_v9 = vld [vmem:[%s20258_s4 + $0x344] ss:$8 sps:$4 sm:$0xff]  }
 0x574   : > { %v10053_v10 = vadd.f32 %v19940_v45, %v10024_v43  ;;  %v10026_v0 = vmul.f32 %v19934_v53, %v9934_v42  ;;  %v9936_v5 = vpop.f32.mrb[63].mxu1 }
 0x575   : > { %v10054_v33 = vadd.f32 %v19943_v59, %v10025_v61  ;;  %v10027_v34 = vmul.f32 %v19937_v31, %v9936_v5  ;;  %10330 = vmatprep.mubr.bf16.mxu0 %v10098_v23 }
 0x576   : > { %v10055_v49 = vadd.f32 %v19940_v45, %v10026_v0  ;;  %10331 = vmatmul.mubr.bf16.vlgmr.msra.gmra.mrb[16].mxu0 %v10097_v4  ;;  %v10069_v41 = vmax.f32 %v10053_v10, 0.0  ;;  %v15956_v0 = vld [vmem:[%s20258_s4 + $0x340] ss:$8 sps:$4 sm:$0xff]  }
 0x577   : > { %v10056_v44 = vadd.f32 %v19943_v59, %v10027_v34  ;;  %11306 = vmatpush1.bf16.msra.mxu0 %v15944_v62  ;;  %v10070_v50 = vmax.f32 %v10054_v33, 0.0  ;;  %v15961_v34 = vld [vmem:[%s20258_s4 + $0x354] ss:$8 sps:$4 sm:$0xff]  }
 0x578   : > { %v10071_v51 = vmax.f32 %v10055_v49, 0.0  ;;  %11307 = vmatprep.subr.bf16.mxu0 %v15949_v39 }
 0x579   : > { %v10072_v54 = vmax.f32 %v10056_v44, 0.0  ;;  %v9940_v48 = vpop.f32.mrb[64].mxu1 }
 0x57a   : > { %v10028_v7 = vmul.f32 %v19934_v53, %v9940_v48  ;;  %v9942_v2 = vpop.f32.mrb[65].mxu1  ;;  %v10099_v26 = vpack.c.bf16 %v10071_v51, %v10069_v41 }
 0x57b   : > { %v10029_v55 = vmul.f32 %v19937_v31, %v9942_v2  ;;  %v9944_v37 = vpop.f32.mrb[66].mxu1  ;;  %v10100_v40 = vpack.c.bf16 %v10072_v54, %v10070_v50  ;;  %11308 = vmatpush1.bf16.msra.mxu0 %v15947_v38  ;;  %v15964_v50 = vld [vmem:[%s20258_s4 + $0x364] ss:$8 sps:$4 sm:$0xff]  }
 0x57c   : > { %v10057_v3 = vadd.f32 %v19940_v45, %v10028_v7  ;;  %v10030_v32 = vmul.f32 %v19934_v53, %v9944_v37  ;;  %v9946_v60 = vpop.f32.mrb[67].mxu1  ;;  %11309 = vmatprep.subr.bf16.mxu0 %v15952_v27  ;;  %v15992_v2 = vld [vmem:[%s20265_s11 + $0x40] sm:$0xff]   ;;  %v15965_v37 = vld [vmem:[%s20258_s4 + $0x370] ss:$8 sps:$4 sm:$0xff]  }
 0x57d   : > { %v10058_v21 = vadd.f32 %v19943_v59, %v10029_v55  ;;  %v10031_v16 = vmul.f32 %v19937_v31, %v9946_v60  ;;  %10340 = vmatprep.mubr.bf16.mxu0 %v10100_v40  ;;  %v15994_v55 = vld [vmem:[%s20265_s11 + $0x48] sm:$0xff]   ;;  %13995 = vmatprep.subr.bf16.mxu1 %v15992_v2  ;;  %v15973_v60 = vld [vmem:[%s20258_s4 + $0x394] ss:$8 sps:$4 sm:$0xff]  }
 0x57e   : > { %v10059_v1 = vadd.f32 %v19940_v45, %v10030_v32  ;;  %10341 = vmatmul.mubr.bf16.gmra.mrb[20].mxu0 %v10099_v26  ;;  %v10073_v56 = vmax.f32 %v10057_v3, 0.0  ;;  %v15993_v26 = vld [vmem:[%s20265_s11] sm:$0xff]   ;;  %v15996_v3 = vld [vmem:[%s20265_s11 + $0x50] sm:$0xff]  }
 0x57f   : > { %v10060_v58 = vadd.f32 %v19943_v59, %v10031_v16  ;;  %11310 = vmatpush1.bf16.msra.mxu0 %v15950_v57  ;;  %v10074_v30 = vmax.f32 %v10058_v21, 0.0  ;;  %v15970_v40 = vld [vmem:[%s20258_s4 + $0x384] ss:$8 sps:$4 sm:$0xff]   ;;  %13996 = vmatpush3.bf16.msra.mxu1 %v15993_v26  ;;  %v15968_v32 = vld [vmem:[%s20258_s4 + $0x380] ss:$8 sps:$4 sm:$0xff]   ;;  %v15998_v21 = vld [vmem:[%s20265_s11 + $0x58] sm:$0xff]  }
 0x580   : > { %v10075_v29 = vmax.f32 %v10059_v1, 0.0  ;;  %11311 = vmatprep.subr.bf16.mxu0 %v15955_v14  ;;  %v15995_v57 = vld [vmem:[%s20265_s11 + $0x8] sm:$0xff]   ;;  %13997 = vmatprep.subr.bf16.mxu1 %v15994_v55  ;;  %v15997_v14 = vld [vmem:[%s20265_s11 + $0x10] sm:$0xff]  }
 0x581   : > { %v10076_v4 = vmax.f32 %v10060_v58, 0.0  ;;  %v9950_v43 = vpop.f32.mrb[68].mxu1  ;;  %v15971_v16 = vld [vmem:[%s20258_s4 + $0x390] ss:$8 sps:$4 sm:$0xff]   ;;  %v15976_v1 = vld [vmem:[%s20258_s4 + $0x3a4] ss:$8 sps:$4 sm:$0xff]  }
 0x582   : > { %v10032_v18 = vmul.f32 %v19934_v53, %v9950_v43  ;;  %v9952_v61 = vpop.f32.mrb[69].mxu1  ;;  %v10101_v42 = vpack.c.bf16 %v10075_v29, %v10073_v56  ;;  %v15999_v58 = vld [vmem:[%s20265_s11 + $0x18] sm:$0xff]   ;;  %v15974_v56 = vld [vmem:[%s20258_s4 + $0x3a0] ss:$8 sps:$4 sm:$0xff]  }
 0x583   : > { %v10033_v23 = vmul.f32 %v19937_v31, %v9952_v61  ;;  %v9954_v62 = vpop.f32.mrb[70].mxu1  ;;  %v10102_v10 = vpack.c.bf16 %v10076_v4, %v10074_v30  ;;  %11312 = vmatpush1.bf16.msra.mxu0 %v15953_v22  ;;  %13998 = vmatpush3.bf16.msra.mxu1 %v15995_v57  ;;  %v16000_v22 = vld [vmem:[%s20265_s11 + $0x60] sm:$0xff]   ;;  %v15979_v29 = vld [vmem:[%s20258_s4 + $0x3b4] ss:$8 sps:$4 sm:$0xff]   ;;  %v15977_v30 = vld [vmem:[%s20258_s4 + $0x3b0] ss:$8 sps:$4 sm:$0xff]  }
 0x584   : > { %v10061_v5 = vadd.f32 %v19940_v45, %v10032_v18  ;;  %v10034_v39 = vmul.f32 %v19934_v53, %v9954_v62  ;;  %v9956_v33 = vpop.f32.mrb[71].mxu1  ;;  %11313 = vmatprep.subr.bf16.mxu0 %v15958_v9  ;;  %v15959_v53 = vld [vmem:[%s20258_s4 + $0x350] ss:$8 sps:$4 sm:$0xff]   ;;  %13999 = vmatprep.subr.bf16.mxu1 %v15996_v3  ;;  %v16001_v9 = vld [vmem:[%s20265_s11 + $0x20] sm:$0xff]   ;;  %v15985_v18 = vld [vmem:[%s20258_s4 + $0x3d4] ss:$8 sps:$4 sm:$0xff]  }
 0x585   : > { %v10062_v49 = vadd.f32 %v19943_v59, %v10033_v23  ;;  %v10035_v44 = vmul.f32 %v19937_v31, %v9956_v33  ;;  %10350 = vmatprep.mubr.bf16.mxu0 %v10102_v10  ;;  %v15982_v4 = vld [vmem:[%s20258_s4 + $0x3c4] ss:$8 sps:$4 sm:$0xff]   ;;  %v15980_v43 = vld [vmem:[%s20258_s4 + $0x3c0] ss:$8 sps:$4 sm:$0xff]   ;;  %v15983_v61 = vld [vmem:[%s20258_s4 + $0x3d0] ss:$8 sps:$4 sm:$0xff]  }
 0x586   : > { %v10063_v38 = vadd.f32 %v19940_v45, %v10034_v39  ;;  %10351 = vmatmul.mubr.bf16.gmra.mrb[24].mxu0 %v10101_v42  ;;  %v10077_v51 = vmax.f32 %v10061_v5, 0.0  ;;  %v15962_v45 = vld [vmem:[%s20258_s4 + $0x360] ss:$8 sps:$4 sm:$0xff]   ;;  %v15988_v42 = vld [vmem:[%s20258_s4 + $0x3e4] ss:$8 sps:$4 sm:$0xff]  }
 0x587   : > { %v10064_v41 = vadd.f32 %v19943_v59, %v10035_v44  ;;  %11314 = vmatpush1.bf16.msra.mxu0 %v15956_v0  ;;  %v10078_v54 = vmax.f32 %v10062_v49, 0.0  ;;  %v15967_v59 = vld [vmem:[%s20258_s4 + $0x374] ss:$8 sps:$4 sm:$0xff]   ;;  %14000 = vmatpush3.bf16.msra.mxu1 %v15997_v14  ;;  %v15986_v23 = vld [vmem:[%s20258_s4 + $0x3e0] ss:$8 sps:$4 sm:$0xff]  }
 0x588   : > { %v10079_v27 = vmax.f32 %v10063_v38, 0.0  ;;  %11315 = vmatprep.subr.bf16.mxu0 %v15961_v34  ;;  %14001 = vmatprep.subr.bf16.mxu1 %v15998_v21  ;;  %v15991_v62 = vld [vmem:[%s20258_s4 + $0x3f4] ss:$8 sps:$4 sm:$0xff]   ;;  %v15989_v10 = vld [vmem:[%s20258_s4 + $0x3f0] ss:$8 sps:$4 sm:$0xff]  }
 0x589   : > { %v10080_v31 = vmax.f32 %v10064_v41, 0.0  ;;  %v13909_v0 = vld [vmem:[%s20256_s2 + $0x6] sm:$0x3] }
 0x58a   : > { %v10103_v48 = vpack.c.bf16 %v10079_v27, %v10077_v51  ;;  %v13910_v5 = vld [vmem:[%s20257_s3 + $0x6] sm:$0x3]  ;;  %v20107_v39 = vrot.slane %v13909_v0, %v17225_v13  ;;  %v20110_v33 = vrot.slane %v13909_v0, %v17230_v17 }
 0x58b   : > { %v10104_v7 = vpack.c.bf16 %v10080_v31, %v10078_v54  ;;  %11316 = vmatpush1.bf16.msra.mxu0 %v15959_v53  ;;  %14002 = vmatpush3.bf16.msra.mxu1 %v15999_v58  ;;  %v20113_v34 = vrot.slane %v13910_v5, %v17225_v13  ;;  %v20116_v44 = vrot.slane %v13910_v5, %v17230_v17 }
 0x58c   : > { %11317 = vmatprep.subr.bf16.mxu0 %v15964_v50  ;;  %14003 = vmatprep.subr.bf16.mxu1 %v16000_v22 }
 0x58d   : > { %10360 = vmatprep.mubr.bf16.mxu0 %v10104_v7 }
 0x58e   : > { %10361 = vmatmul.mubr.bf16.gmra.mrb[28].mxu0 %v10103_v48 }
 0x58f   : > { %11318 = vmatpush1.bf16.msra.mxu0 %v15962_v45  ;;  %14004 = vmatpush3.bf16.msra.mxu1 %v16001_v9 }
 0x590   : > { %11319 = vmatprep.subr.bf16.mxu0 %v15967_v59 }
 0x593   : > { %11320 = vmatpush1.bf16.msra.mxu0 %v15965_v37 }
 0x594   : > { %11321 = vmatprep.subr.bf16.mxu0 %v15970_v40 }
 0x597   : > { %11322 = vmatpush1.bf16.msra.mxu0 %v15968_v32 }
 0x598   : > { %11323 = vmatprep.subr.bf16.mxu0 %v15973_v60 }
 0x59b   : > { %11324 = vmatpush1.bf16.msra.mxu0 %v15971_v16 }
 0x59c   : > { %11325 = vmatprep.subr.bf16.mxu0 %v15976_v1 }
 0x59f   : > { %11326 = vmatpush1.bf16.msra.mxu0 %v15974_v56 }
 0x5a0   : > { %11327 = vmatprep.subr.bf16.mxu0 %v15979_v29 }
 0x5a3   : > { %11328 = vmatpush1.bf16.msra.mxu0 %v15977_v30 }
 0x5a4   : > { %11329 = vmatprep.subr.bf16.mxu0 %v15982_v4 }
 0x5a7   : > { %11330 = vmatpush1.bf16.msra.mxu0 %v15980_v43 }
 0x5a8   : > { %11331 = vmatprep.subr.bf16.mxu0 %v15985_v18 }
 0x5ab   : > { %11332 = vmatpush1.bf16.msra.mxu0 %v15983_v61 }
 0x5ac   : > { %11333 = vmatprep.subr.bf16.mxu0 %v15988_v42 }
 0x5af   : > { %11334 = vmatpush1.bf16.msra.mxu0 %v15986_v23 }
 0x5b0   : > { %11335 = vmatprep.subr.bf16.mxu0 %v15991_v62 }
 0x5b3   : > { %11336 = vmatpush1.bf16.msra.mxu0 %v15989_v10 }
 0x5e9   : > { %v10927_v49 = vpop.f32.mrb[72].mxu1 }
 0x5ea   : > { %v11027_v38 = vmul.f32 %v20107_v39, %v10927_v49  ;;  %v10929_v41 = vpop.f32.mrb[73].mxu1 }
 0x5eb   : > { %v11028_v53 = vmul.f32 %v20110_v33, %v10929_v41  ;;  %v10931_v51 = vpop.f32.mrb[74].mxu1 }
 0x5ec   : > { %v11056_v27 = vadd.f32 %v20113_v34, %v11027_v38  ;;  %v11029_v50 = vmul.f32 %v20107_v39, %v10931_v51  ;;  %v10933_v54 = vpop.f32.mrb[75].mxu1 }
 0x5ed   : > { %v11057_v31 = vadd.f32 %v20116_v44, %v11028_v53  ;;  %v11030_v48 = vmul.f32 %v20110_v33, %v10933_v54 }
 0x5ee   : > { %v11058_v7 = vadd.f32 %v20113_v34, %v11029_v50  ;;  %v11072_v59 = vmax.f32 %v11056_v27, 0.0 }
 0x5ef   : > { %v11059_v45 = vadd.f32 %v20116_v44, %v11030_v48  ;;  %v11073_v26 = vmax.f32 %v11057_v31, 0.0 }
 0x5f0   : > { %v11074_v2 = vmax.f32 %v11058_v7, 0.0 }
 0x5f1   : > { %v11075_v55 = vmax.f32 %v11059_v45, 0.0  ;;  %v10937_v37 = vpop.f32.mrb[76].mxu1 }
 0x5f2   : > { %v11104_v40 = vpack.c.bf16 %v11074_v2, %v11072_v59  ;;  %v11031_v57 = vmul.f32 %v20107_v39, %v10937_v37  ;;  %v10939_v3 = vpop.f32.mrb[77].mxu1 }
 0x5f3   : > { %v11032_v32 = vmul.f32 %v20110_v33, %v10939_v3  ;;  %v10941_v60 = vpop.f32.mrb[78].mxu1  ;;  %v11105_v14 = vpack.c.bf16 %v11075_v55, %v11073_v26 }
 0x5f4   : > { %v11060_v21 = vadd.f32 %v20113_v34, %v11031_v57  ;;  %v11033_v16 = vmul.f32 %v20107_v39, %v10941_v60  ;;  %v10943_v1 = vpop.f32.mrb[79].mxu1 }
 0x5f5   : > { %v11061_v58 = vadd.f32 %v20116_v44, %v11032_v32  ;;  %v11034_v22 = vmul.f32 %v20110_v33, %v10943_v1  ;;  %11337 = vmatprep.mubr.bf16.mxu0 %v11105_v14 }
 0x5f6   : > { %v11062_v56 = vadd.f32 %v20113_v34, %v11033_v16  ;;  %11338 = vmatmul.mubr.bf16.vlgmr.msra.gmra.mrb[16].mxu0 %v11104_v40  ;;  %v11076_v9 = vmax.f32 %v11060_v21, 0.0 }
 0x5f7   : > { %v11063_v29 = vadd.f32 %v20116_v44, %v11034_v22  ;;  %v11077_v4 = vmax.f32 %v11061_v58, 0.0 }
 0x5f8   : > { %v11078_v30 = vmax.f32 %v11062_v56, 0.0 }
 0x5f9   : > { %v11079_v43 = vmax.f32 %v11063_v29, 0.0  ;;  %v10947_v18 = vpop.f32.mrb[80].mxu1 }
 0x5fa   : > { %v11035_v61 = vmul.f32 %v20107_v39, %v10947_v18  ;;  %v10949_v42 = vpop.f32.mrb[81].mxu1  ;;  %v11106_v23 = vpack.c.bf16 %v11078_v30, %v11076_v9  ;;  %v16006_v9 = vld [vmem:[%s20265_s11 + $0x78] sm:$0xff]  }
 0x5fb   : > { %v11036_v62 = vmul.f32 %v20110_v33, %v10949_v42  ;;  %v10951_v10 = vpop.f32.mrb[82].mxu1  ;;  %v11107_v0 = vpack.c.bf16 %v11079_v43, %v11077_v4  ;;  %v16007_v30 = vld [vmem:[%s20265_s11 + $0x38] sm:$0xff]   ;;  %v11426_v4 = vld [vmem:[%s20263_s9] sm:$0x3] }
 0x5fc   : > { %v11064_v5 = vadd.f32 %v20113_v34, %v11035_v61  ;;  %v11037_v49 = vmul.f32 %v20107_v39, %v10951_v10  ;;  %v10953_v38 = vpop.f32.mrb[83].mxu1  ;;  %v11454_v43 = vld [vmem:[%s20264_s10] sm:$0x3]  ;;  %v20175_v18 = vrot.slane %v11426_v4, %v17225_v13  ;;  %v20178_v42 = vrot.slane %v11426_v4, %v17230_v17 }
 0x5fd   : > { %v11065_v41 = vadd.f32 %v20116_v44, %v11036_v62  ;;  %v11038_v53 = vmul.f32 %v20110_v33, %v10953_v38  ;;  %11347 = vmatprep.mubr.bf16.mxu0 %v11107_v0  ;;  %v20182_v62 = vrot.slane %v11454_v43, %v17225_v13 }
 0x5fe   : > { %v11066_v51 = vadd.f32 %v20113_v34, %v11037_v49  ;;  %11348 = vmatmul.mubr.bf16.gmra.mrb[20].mxu0 %v11106_v23  ;;  %v11080_v50 = vmax.f32 %v11064_v5, 0.0  ;;  %v20186_v5 = vrot.slane %v11454_v43, %v17230_v17 }
 0x5ff   : > { %v11067_v27 = vadd.f32 %v20116_v44, %v11038_v53  ;;  %v11081_v31 = vmax.f32 %v11065_v41, 0.0 }
 0x600   : > { %v11082_v54 = vmax.f32 %v11066_v51, 0.0 }
 0x601   : > { %v11083_v48 = vmax.f32 %v11067_v27, 0.0  ;;  %v10957_v7 = vpop.f32.mrb[84].mxu1 }
 0x602   : > { %v11039_v45 = vmul.f32 %v20107_v39, %v10957_v7  ;;  %v10959_v59 = vpop.f32.mrb[85].mxu1  ;;  %v11108_v2 = vpack.c.bf16 %v11082_v54, %v11080_v50 }
 0x603   : > { %v11040_v26 = vmul.f32 %v20110_v33, %v10959_v59  ;;  %v10961_v55 = vpop.f32.mrb[86].mxu1  ;;  %v11109_v37 = vpack.c.bf16 %v11083_v48, %v11081_v31 }
 0x604   : > { %v11068_v40 = vadd.f32 %v20113_v34, %v11039_v45  ;;  %v11041_v57 = vmul.f32 %v20107_v39, %v10961_v55  ;;  %v10963_v3 = vpop.f32.mrb[87].mxu1  ;;  %v16002_v39 = vld [vmem:[%s20265_s11 + $0x68] sm:$0xff]  }
 0x605   : > { %v11069_v32 = vadd.f32 %v20116_v44, %v11040_v26  ;;  %v11042_v60 = vmul.f32 %v20110_v33, %v10963_v3  ;;  %11357 = vmatprep.mubr.bf16.mxu0 %v11109_v37  ;;  %v16003_v33 = vld [vmem:[%s20265_s11 + $0x28] sm:$0xff]   ;;  %14005 = vmatprep.subr.bf16.mxu1 %v16002_v39 }
 0x606   : > { %v11070_v14 = vadd.f32 %v20113_v34, %v11041_v57  ;;  %11358 = vmatmul.mubr.bf16.gmra.mrb[24].mxu0 %v11108_v2  ;;  %v11084_v16 = vmax.f32 %v11068_v40, 0.0  ;;  %14006 = vmatpush3.bf16.msra.mxu1 %v16003_v33  ;;  %v16004_v34 = vld [vmem:[%s20265_s11 + $0x70] sm:$0xff]  }
 0x607   : > { %v11071_v21 = vadd.f32 %v20116_v44, %v11042_v60  ;;  %v11085_v58 = vmax.f32 %v11069_v32, 0.0  ;;  %v16005_v44 = vld [vmem:[%s20265_s11 + $0x30] sm:$0xff]   ;;  %14007 = vmatprep.subr.bf16.mxu1 %v16004_v34 }
 0x608   : > { %v11086_v1 = vmax.f32 %v11070_v14, 0.0 }
 0x609   : > { %v11087_v22 = vmax.f32 %v11071_v21, 0.0 }
 0x60a   : > { %v11110_v56 = vpack.c.bf16 %v11086_v1, %v11084_v16  ;;  %14008 = vmatpush3.bf16.msra.mxu1 %v16005_v44 }
 0x60b   : > { %v11111_v29 = vpack.c.bf16 %v11087_v22, %v11085_v58  ;;  %14009 = vmatprep.subr.bf16.mxu1 %v16006_v9 }
 0x60d   : > { %11367 = vmatprep.mubr.bf16.mxu0 %v11111_v29 }
 0x60e   : > { %11368 = vmatmul.mubr.bf16.gmra.mrb[28].mxu0 %v11110_v56  ;;  %14010 = vmatpush3.bf16.msra.mxu1 %v16007_v30 }
 0x6c9   : > { %v11339_v61 = vpop.f32.mrb[16].mxu0 }
 0x6ca   : > { %v14036_v23 = vadd.f32 %v11339_v61, %v18950_v52  ;;  %v11341_v10 = vpop.f32.mrb[17].mxu0 }
 0x6cb   : > { %v14038_v0 = vadd.f32 %v11341_v10, %v18953_v6  ;;  %v11343_v49 = vpop.f32.mrb[18].mxu0 }
 0x6cc   : > { %v11438_v38 = vmul.f32 %v14036_v23, %v20175_v18  ;;  %v14040_v41 = vadd.f32 %v11343_v49, %v18961_v36  ;;  %v11345_v53 = vpop.f32.mrb[19].mxu0 }
 0x6cd   : > { %v11439_v51 = vmul.f32 %v14038_v0, %v20178_v42  ;;  %v14042_v27 = vadd.f32 %v11345_v53, %v18967_v8 }
 0x6ce   : > { %v11466_v52 = vadd.f32 %v20182_v62, %v11438_v38  ;;  %v11440_v13 = vmul.f32 %v14040_v41, %v20175_v18 }
 0x6cf   : > { %v11467_v50 = vadd.f32 %v20186_v5, %v11439_v51  ;;  %v11441_v6 = vmul.f32 %v14042_v27, %v20178_v42 }
 0x6d0   : > { %v11468_v17 = vadd.f32 %v20182_v62, %v11440_v13  ;;  %v11482_v48 = vmax.f32 %v11466_v52, 0.0 }
 0x6d1   : > { %v11469_v54 = vadd.f32 %v20186_v5, %v11441_v6  ;;  %v11349_v31 = vpop.f32.mrb[20].mxu0  ;;  %v11483_v59 = vmax.f32 %v11467_v50, 0.0 }
 0x6d2   : > { %v11484_v36 = vmax.f32 %v11468_v17, 0.0  ;;  %v14044_v7 = vadd.f32 %v11349_v31, %v18976_v11  ;;  %v11351_v45 = vpop.f32.mrb[21].mxu0 }
 0x6d3   : > { %v11485_v8 = vmax.f32 %v11469_v54, 0.0  ;;  %v14046_v2 = vadd.f32 %v11351_v45, %v18979_v12  ;;  %v11353_v26 = vpop.f32.mrb[22].mxu0 }
 0x6d4   : > { %v11498_v55 = vpack.c.bf16 %v11484_v36, %v11482_v48  ;;  %v11442_v37 = vmul.f32 %v14044_v7, %v20175_v18  ;;  %v14048_v40 = vadd.f32 %v11353_v26, %v18985_v19  ;;  %v11355_v57 = vpop.f32.mrb[23].mxu0 }
 0x6d5   : > { %v11443_v3 = vmul.f32 %v14046_v2, %v20178_v42  ;;  %v14050_v32 = vadd.f32 %v11355_v57, %v18991_v20  ;;  %v11499_v60 = vpack.c.bf16 %v11485_v8, %v11483_v59 }
 0x6d6   : > { %v11470_v14 = vadd.f32 %v20182_v62, %v11442_v37  ;;  %v11444_v11 = vmul.f32 %v14048_v40, %v20175_v18 }
 0x6d7   : > { %v11471_v21 = vadd.f32 %v20186_v5, %v11443_v3  ;;  %v11445_v12 = vmul.f32 %v14050_v32, %v20178_v42  ;;  %11673 = vmatprep.mubr.bf16.mxu1 %v11499_v60 }
 0x6d8   : > { %v11472_v16 = vadd.f32 %v20182_v62, %v11444_v11  ;;  %11674 = vmatmul.mubr.bf16.vlgmr.msra.gmra.mrb[88].mxu1 %v11498_v55  ;;  %v11486_v58 = vmax.f32 %v11470_v14, 0.0 }
 0x6d9   : > { %v11473_v19 = vadd.f32 %v20186_v5, %v11445_v12  ;;  %v11359_v1 = vpop.f32.mrb[24].mxu0  ;;  %v11487_v29 = vmax.f32 %v11471_v21, 0.0 }
 0x6da   : > { %v11488_v22 = vmax.f32 %v11472_v16, 0.0  ;;  %v14052_v20 = vadd.f32 %v11359_v1, %v19000_v24  ;;  %v11361_v56 = vpop.f32.mrb[25].mxu0 }
 0x6db   : > { %v11489_v39 = vmax.f32 %v11473_v19, 0.0  ;;  %v14054_v33 = vadd.f32 %v11361_v56, %v19003_v25  ;;  %v11363_v34 = vpop.f32.mrb[26].mxu0 }
 0x6dc   : > { %v11446_v44 = vmul.f32 %v14052_v20, %v20175_v18  ;;  %v14056_v9 = vadd.f32 %v11363_v34, %v19009_v35  ;;  %v11365_v30 = vpop.f32.mrb[27].mxu0  ;;  %v11500_v4 = vpack.c.bf16 %v11488_v22, %v11486_v58 }
 0x6dd   : > { %v11447_v43 = vmul.f32 %v14054_v33, %v20178_v42  ;;  %v14058_v61 = vadd.f32 %v11365_v30, %v19015_v46  ;;  %v11501_v23 = vpack.c.bf16 %v11489_v39, %v11487_v29 }
 0x6de   : > { %v11474_v10 = vadd.f32 %v20182_v62, %v11446_v44  ;;  %v11448_v24 = vmul.f32 %v14056_v9, %v20175_v18 }
 0x6df   : > { %v11475_v0 = vadd.f32 %v20186_v5, %v11447_v43  ;;  %v11449_v25 = vmul.f32 %v14058_v61, %v20178_v42  ;;  %11681 = vmatprep.mubr.bf16.mxu1 %v11501_v23 }
 0x6e0   : > { %v11476_v49 = vadd.f32 %v20182_v62, %v11448_v24  ;;  %11682 = vmatmul.mubr.bf16.gmra.mrb[92].mxu1 %v11500_v4  ;;  %v11490_v41 = vmax.f32 %v11474_v10, 0.0 }
 0x6e1   : > { %v11477_v35 = vadd.f32 %v20186_v5, %v11449_v25  ;;  %v11369_v38 = vpop.f32.mrb[28].mxu0  ;;  %v11491_v27 = vmax.f32 %v11475_v0, 0.0 }
 0x6e2   : > { %v11492_v53 = vmax.f32 %v11476_v49, 0.0  ;;  %v14060_v46 = vadd.f32 %v11369_v38, %v19024_v47  ;;  %v11371_v51 = vpop.f32.mrb[29].mxu0 }
 0x6e3   : > { %v11493_v52 = vmax.f32 %v11477_v35, 0.0  ;;  %v14062_v13 = vadd.f32 %v11371_v51, %v19027_v28  ;;  %v11373_v50 = vpop.f32.mrb[30].mxu0 }
 0x6e4   : > { %v11450_v6 = vmul.f32 %v14060_v46, %v20175_v18  ;;  %v14064_v17 = vadd.f32 %v11373_v50, %v19033_v15  ;;  %v11375_v54 = vpop.f32.mrb[31].mxu0  ;;  %v11502_v31 = vpack.c.bf16 %v11492_v53, %v11490_v41 }
 0x6e5   : > { %v11451_v48 = vmul.f32 %v14062_v13, %v20178_v42  ;;  %v14066_v36 = vadd.f32 %v11375_v54, %v19039_v63  ;;  %v11503_v7 = vpack.c.bf16 %v11493_v52, %v11491_v27 }
 0x6e6   : > { %v11478_v45 = vadd.f32 %v20182_v62, %v11450_v6  ;;  %v11452_v47 = vmul.f32 %v14064_v17, %v20175_v18 }
 0x6e7   : > { %v11479_v59 = vadd.f32 %v20186_v5, %v11451_v48  ;;  %v11453_v28 = vmul.f32 %v14066_v36, %v20178_v42  ;;  %11689 = vmatprep.mubr.bf16.mxu1 %v11503_v7  ;;  %v13975_v42 = vld [vmem:[%s20266_s12] ss:$0 sm:$0xff] }
 0x6e8   : > { %v11480_v8 = vadd.f32 %v20182_v62, %v11452_v47  ;;  %11690 = vmatmul.mubr.bf16.gmra.mrb[96].mxu1 %v11502_v31  ;;  %v11494_v2 = vmax.f32 %v11478_v45, 0.0 }
 0x6e9   : > { %v11481_v15 = vadd.f32 %v20186_v5, %v11453_v28  ;;  %v11495_v55 = vmax.f32 %v11479_v59, 0.0 }
 0x6ea   : > { %v11496_v26 = vmax.f32 %v11480_v8, 0.0 }
 0x6eb   : > { %v11497_v63 = vmax.f32 %v11481_v15, 0.0 }
 0x6ec   : > { %v11504_v37 = vpack.c.bf16 %v11496_v26, %v11494_v2 }
 0x6ed   : > { %v11505_v40 = vpack.c.bf16 %v11497_v63, %v11495_v55 }
 0x6ef   : > { %11697 = vmatprep.mubr.bf16.mxu1 %v11505_v40 }
 0x6f0   : > { %11698 = vmatmul.mubr.bf16.gmra.mrb[100].mxu1 %v11504_v37 }
 0x7ab   : > { %v14011_v18 = vpop.f32.mrb[88].mxu1 }
 0x7ac   : > { %v14012_v57 = vpop.f32.mrb[89].mxu1 }
 0x7ad   : > { %v14013_v3 = vadd.f32 %v14012_v57, %v14011_v18  ;;  %v14014_v62 = vpop.f32.mrb[90].mxu1 }
 0x7ae   : > { %v14015_v5 = vpop.f32.mrb[91].mxu1 }
 0x7af   : > { %v11676_v32 = vadd.f32 %v14013_v3, %v13975_v42  ;;  %v14016_v60 = vadd.f32 %v14015_v5, %v14014_v62 }
 0x7b1   : > { %11706 = vst [vmem:[%s20241_s18] sm:$0xff] %v11676_v32  ;;  %v11679_v14 = vadd.f32 %v14016_v60, %v13975_v42 }
 0x7b3   : > { %11707 = vst [vmem:[%s20241_s18 + $0x8] sm:$0xff] %v11679_v14  ;;  %v14017_v11 = vpop.f32.mrb[92].mxu1 }
 0x7b4   : > { %v14018_v21 = vpop.f32.mrb[93].mxu1 }
 0x7b5   : > { %v14019_v12 = vadd.f32 %v14018_v21, %v14017_v11  ;;  %v14020_v16 = vpop.f32.mrb[94].mxu1 }
 0x7b6   : > { %v14021_v19 = vpop.f32.mrb[95].mxu1 }
 0x7b7   : > { %v11684_v1 = vadd.f32 %v14019_v12, %v13975_v42  ;;  %v14022_v58 = vadd.f32 %v14021_v19, %v14020_v16 }
 0x7b9   : > { %11708 = vst [vmem:[%s20241_s18 + $0x10] sm:$0xff] %v11684_v1  ;;  %v11687_v22 = vadd.f32 %v14022_v58, %v13975_v42 }
 0x7bb   : > { %11709 = vst [vmem:[%s20241_s18 + $0x18] sm:$0xff] %v11687_v22  ;;  %v14023_v20 = vpop.f32.mrb[96].mxu1 }
 0x7bc   : > { %v14024_v56 = vpop.f32.mrb[97].mxu1 }
 0x7bd   : > { %v14025_v29 = vadd.f32 %v14024_v56, %v14023_v20  ;;  %v14026_v39 = vpop.f32.mrb[98].mxu1 }
 0x7be   : > { %v14027_v33 = vpop.f32.mrb[99].mxu1 }
 0x7bf   : > { %v11692_v34 = vadd.f32 %v14025_v29, %v13975_v42  ;;  %v14028_v44 = vadd.f32 %v14027_v33, %v14026_v39 }
 0x7c1   : > { %11710 = vst [vmem:[%s20241_s18 + $0x20] sm:$0xff] %v11692_v34  ;;  %v11695_v9 = vadd.f32 %v14028_v44, %v13975_v42 }
 0x7c3   : > { %11711 = vst [vmem:[%s20241_s18 + $0x28] sm:$0xff] %v11695_v9  ;;  %v14029_v30 = vpop.f32.mrb[100].mxu1 }
 0x7c4   : > { %v14030_v4 = vpop.f32.mrb[101].mxu1 }
 0x7c5   : > { %v14031_v43 = vadd.f32 %v14030_v4, %v14029_v30  ;;  %v14032_v61 = vpop.f32.mrb[102].mxu1 }
 0x7c6   : > { %v14033_v23 = vpop.f32.mrb[103].mxu1 }
 0x7c7   : > { %v11700_v10 = vadd.f32 %v14031_v43, %v13975_v42  ;;  %v14034_v24 = vadd.f32 %v14033_v23, %v14032_v61 }
 0x7c9   : > { %11712 = vst [vmem:[%s20241_s18 + $0x30] sm:$0xff] %v11700_v10  ;;  %v11703_v0 = vadd.f32 %v14034_v24, %v13975_v42 }
 0x7cb   : > { %11713 = vst [vmem:[%s20241_s18 + $0x38] sm:$0xff] %v11703_v0 }
 0x7cc PF: > { %s23_s25 = sadd.s32 1, %s16014_s25  }
 0x7cd   : > { %p20_p4 = scmp.ge.s32.totalorder %s23_s25, 4  }
 0x7cf   :  { %22 = sbr.rel (!%p20_p4) target bundleno = 1 (0x1), region = 124 }

</bundles_post_ra>
